<compile_context>
chip_gen: v6e
topology: v6e:2x2x1
jax: 0.10.0
libtpu: 0.0.40
codegen_flags: <defaults>
</compile_context>

<pallas_src>
import math

import jax
import jax.numpy as jnp
from jax import lax
from jax.experimental import pallas as pl
from jax.experimental.pallas import tpu as pltpu

# ----------------------------- configuration (small, module-consistent) -----------------
BATCH = 2
SEQ_LEN = 16          # L  (power of two assumed by the conv boundary mask)
D_MODEL = 64          # embedding dim (divisible by 8 heads and by 2)
N_LAYER = 2
D_STATE = 8           # SSM state size N
EXPAND = 2
K_CONV = 4            # depthwise conv width
N_HEADS = 8
HEAD_DIM = D_MODEL // N_HEADS

DM = D_MODEL // 2             # per-Mamba d_model (BiRCMamba chunks features in half)
DI = EXPAND * DM              # Mamba d_inner
R = math.ceil(DM / 16)        # dt_rank

S = 2 * BATCH                 # streams per direction: {orig, rc} x batch
SL = S * SEQ_LEN              # stacked rows per direction
SN = S * D_STATE              # (stream, state) rows carried through the scan

_F32 = jnp.float32


def _softplus(x):
    # numerically stable softplus using only exp/log (Mosaic-friendly)
    return jnp.maximum(x, 0.0) + jnp.log(1.0 + jnp.exp(-jnp.abs(x)))


def _rep_spec(arr):
    """Full-array BlockSpec replicated across the grid."""
    nd = arr.ndim
    return pl.BlockSpec(arr.shape, lambda g, _nd=nd: (0,) * _nd)


def _lead_spec(shape):
    """Block = one slab along the leading axis, indexed by the grid position."""
    nd = len(shape)
    return pl.BlockSpec((1,) + tuple(shape[1:]), lambda g, _nd=nd: (g,) + (0,) * (_nd - 1))


# ========================================================================================
# Kernel 1: embedding  (one-hot DNA -> d_model)   out = x @ W + b   (one dot, per feedback)
# ========================================================================================
def _embed_kernel(x_ref, w_ref, b_ref, o_ref):
    o_ref[0] = jnp.dot(x_ref[0], w_ref[...], preferred_element_type=_F32) + b_ref[...]


def embed_forward(x2, w_t, b):
    """x2: (2, BATCH*SEQ_LEN, 4) -- {x, x_rc} stacked; grid over the two sequences."""
    rows = x2.shape[1]
    return pl.pallas_call(
        _embed_kernel,
        out_shape=jax.ShapeDtypeStruct((2, rows, D_MODEL), _F32),
        grid=(2,),
        in_specs=[_lead_spec(x2.shape), _rep_spec(w_t), _rep_spec(b)],
        out_specs=_lead_spec((2, rows, D_MODEL)),
        compiler_params=pltpu.CompilerParams(dimension_semantics=("parallel",)),
    )(x2, w_t, b)


# ========================================================================================
# Kernel 2: fused Mamba block.  grid=(2,) over direction {fwd, rev}; each grid step
#           processes all S = 2*BATCH streams (orig + rc, all batch elements) stacked
#           stream-major along the sublane axis: row r = s*L + l, shape (SL, DM).
# ========================================================================================
def _mamba_kernel(hs_ref, win_ref, wout_ref, convw_ref, convb_ref, wdtc_ref,
                  wxbc_ref, dtb_ref, at_ref, dvec_ref, o_ref,
                  da_scr, db_scr, hseq_scr):
    hs = hs_ref[0]                                                   # (SL, DM)

    # ---- input projection: xz = hs @ W_in  -> x (conv path) and z (gate)
    xz = jnp.dot(hs, win_ref[...], preferred_element_type=_F32)      # (SL, 2*DI)
    x = xz[:, :DI]
    z = xz[:, DI:]

    # ---- depthwise causal conv1d via sublane rolls (XLU) + per-stream boundary mask
    cw = convw_ref[0]                                                # (K, DI)
    row = lax.broadcasted_iota(jnp.int32, (SL, 1), 0)
    pos = jnp.bitwise_and(row, SEQ_LEN - 1)                          # r mod L (L power of 2)
    xc = x * cw[K_CONV - 1:K_CONV, :]                                # shift-0 tap
    for k in range(K_CONV - 1):
        shift = K_CONV - 1 - k                                       # picks x[l - shift]
        xs = pltpu.roll(x, shift, 0)
        xs = jnp.where(pos >= shift, xs, 0.0)                        # causal + stream boundary
        xc = xc + xs * cw[k:k + 1, :]
    xc = xc + convb_ref[0]
    xc = xc * jax.nn.sigmoid(xc)                                     # SiLU

    # ---- dt / B / C projections (dt_rank path pre-folded into one (DI,DI) matmul)
    delta = _softplus(jnp.dot(xc, wdtc_ref[0], preferred_element_type=_F32) + dtb_ref[0])
    du = delta * xc                                                  # delta * u
    bc = jnp.dot(xc, wxbc_ref[0], preferred_element_type=_F32)       # (SL, 2N)
    bm = bc[:, :D_STATE]
    cm = bc[:, D_STATE:]

    # ---- precompute dA = exp(delta*A_n), dB = du*B_n for all (stream, state) pairs,
    #      laid out so the scan reads a (SN, DI) block per time step with one strided load.
    #      scratch row = (s*N + n)*L + l
    a_mat = at_ref[0]                                                # (N, DI)
    for n in range(D_STATE):
        da_n = jnp.exp(delta * a_mat[n:n + 1, :])                    # (SL, DI)
        db_n = du * bm[:, n:n + 1]                                   # (SL, DI)
        for s in range(S):
            base = (s * D_STATE + n) * SEQ_LEN
            da_scr[base:base + SEQ_LEN, :] = da_n[s * SEQ_LEN:(s + 1) * SEQ_LEN, :]
            db_scr[base:base + SEQ_LEN, :] = db_n[s * SEQ_LEN:(s + 1) * SEQ_LEN, :]

    # ---- selective scan: 16 serial steps; carry h for all (stream, state) pairs at once.
    #      h[l] = dA[l] * h[l-1] + dB[l]; full state history stored densely per step
    #      (hseq row = l*SN + s*N + n) for the vectorized C-reduction afterwards.
    def scan_body(l, h):
        da_l = da_scr[pl.ds(l, SN, stride=SEQ_LEN), :]               # (SN, DI)
        db_l = db_scr[pl.ds(l, SN, stride=SEQ_LEN), :]
        h = da_l * h + db_l
        off = pl.multiple_of(l * SN, SN)
        hseq_scr[pl.ds(off, SN), :] = h                              # dense aligned store
        return h

    lax.fori_loop(0, SEQ_LEN, scan_body, jnp.zeros((SN, DI), _F32), unroll=True)

    # ---- y = sum_n C_n * h_n  (vectorized over time; one strided load per (s, n))
    y_parts = []
    for s in range(S):
        y_s = jnp.zeros((SEQ_LEN, DI), _F32)
        for n in range(D_STATE):
            h_sn = hseq_scr[pl.ds(s * D_STATE + n, SEQ_LEN, stride=SN), :]   # (L, DI)
            y_s = y_s + h_sn * cm[s * SEQ_LEN:(s + 1) * SEQ_LEN, n:n + 1]
        y_parts.append(y_s)
    y = jnp.concatenate(y_parts, axis=0)                             # (SL, DI)

    # ---- skip (D), gate with SiLU(z), output projection
    y = y + xc * dvec_ref[0]
    y = y * (z * jax.nn.sigmoid(z))
    yp = jnp.dot(y, wout_ref[...], preferred_element_type=_F32)      # (SL, DM)

    # ---- lane-dense output block: (L, S*DM) = (16, 128), stream s -> lanes [s*DM,(s+1)*DM)
    o_ref[0] = jnp.concatenate(
        [yp[s * SEQ_LEN:(s + 1) * SEQ_LEN, :] for s in range(S)], axis=1)


def mamba_fused_forward(inp, lp):
    """inp: (2, SL, DM) -- direction d=0 holds un-flipped streams, d=1 the L-flipped ones."""
    tied = (lp['win_t'], lp['wout_t'])
    dirp = (lp['convw'], lp['convb'], lp['wdt_comb'], lp['wxbc'], lp['dtb'],
            lp['at_neg'], lp['dvec'])
    return pl.pallas_call(
        _mamba_kernel,
        out_shape=jax.ShapeDtypeStruct((2, SEQ_LEN, S * DM), _F32),
        grid=(2,),
        in_specs=[_lead_spec(inp.shape)]
                 + [_rep_spec(w) for w in tied]
                 + [_lead_spec(w.shape) for w in dirp],
        out_specs=_lead_spec((2, SEQ_LEN, S * DM)),
        scratch_shapes=[
            pltpu.VMEM((SN * SEQ_LEN, DI), _F32),   # dA
            pltpu.VMEM((SN * SEQ_LEN, DI), _F32),   # dB
            pltpu.VMEM((SEQ_LEN * SN, DI), _F32),   # h history
        ],
        compiler_params=pltpu.CompilerParams(dimension_semantics=("parallel",)),
    )(inp, *tied, *dirp)


# ========================================================================================
# Kernel 3: head = LayerNorm -> MultiheadAttention(8 heads) -> fc1 -> ReLU -> fc2
#           (fused QKV matmul, single fused output projection, approx-reciprocal softmax)
# ========================================================================================
def _head_kernel(x_ref, g_ref, be_ref, wqkv_ref, bqkv_ref, wo_ref, bo_ref,
                 w1_ref, b1_ref, w2_ref, b2_ref, o_ref):
    x = x_ref[0]                                                     # (L, D)

    # LayerNorm (eps=1e-5, biased variance)
    mu = jnp.mean(x, axis=-1, keepdims=True)
    xm = x - mu
    var = jnp.mean(xm * xm, axis=-1, keepdims=True)
    xn = xm * lax.rsqrt(var + 1e-5)
    xn = xn * g_ref[...] + be_ref[...]

    # fused QKV projection: one (D, 3D) matmul
    qkv = jnp.dot(xn, wqkv_ref[...], preferred_element_type=_F32) + bqkv_ref[...]
    q = qkv[:, :D_MODEL]
    k = qkv[:, D_MODEL:2 * D_MODEL]
    v = qkv[:, 2 * D_MODEL:]

    scale = 1.0 / (HEAD_DIM ** 0.5)
    dn = (((1,), (1,)), ((), ()))                                    # contract feature dims
    heads = []
    for h in range(N_HEADS):
        lo = h * HEAD_DIM
        qh = q[:, lo:lo + HEAD_DIM]
        kh = k[:, lo:lo + HEAD_DIM]
        vh = v[:, lo:lo + HEAD_DIM]
        sc = lax.dot_general(qh, kh, dn, preferred_element_type=_F32) * scale   # (L, L)
        sc = sc - jnp.max(sc, axis=-1, keepdims=True)
        p = jnp.exp(sc)
        p = p * pl.reciprocal(jnp.sum(p, axis=-1, keepdims=True), approx=True)
        heads.append(jnp.dot(p, vh, preferred_element_type=_F32))    # (L, HEAD_DIM)
    # single fused output projection on the concatenated heads
    attn = jnp.dot(jnp.concatenate(heads, axis=1), wo_ref[...],
                   preferred_element_type=_F32) + bo_ref[...]

    h1 = jnp.dot(attn, w1_ref[...], preferred_element_type=_F32) + b1_ref[...]
    h1 = jnp.maximum(h1, 0.0)                                        # ReLU
    o_ref[0] = jnp.dot(h1, w2_ref[...], preferred_element_type=_F32) + b2_ref[...]


def head_forward(x, hp):
    B = x.shape[0]
    weights = (hp['ln_g'], hp['ln_b'], hp['wqkv_t'], hp['bqkv'], hp['wo_t'], hp['bo'],
               hp['w1_t'], hp['b1'], hp['w2_t'], hp['b2'])
    return pl.pallas_call(
        _head_kernel,
        out_shape=jax.ShapeDtypeStruct((B, SEQ_LEN, D_MODEL), _F32),
        grid=(B,),
        in_specs=[_lead_spec(x.shape)] + [_rep_spec(w) for w in weights],
        out_specs=_lead_spec((B, SEQ_LEN, D_MODEL)),
        compiler_params=pltpu.CompilerParams(dimension_semantics=("parallel",)),
    )(x, *weights)


# ========================================================================================
# Model wiring (plain-JAX glue around the Pallas kernels)
# ========================================================================================
def birc_forward(x, params):
    B = x.shape[0]
    # reverse complement of the one-hot DNA sequence
    x_rc = jnp.flip(x, axis=1)[:, :, jnp.array([1, 0, 3, 2])]

    emb_in = jnp.stack([x.reshape(B * SEQ_LEN, 4), x_rc.reshape(B * SEQ_LEN, 4)], axis=0)
    emb_out = embed_forward(emb_in, params['emb_w_t'], params['emb_b'])     # (2, B*L, D)
    x_embed = emb_out[0].reshape(B, SEQ_LEN, D_MODEL)
    x_rc_embed = emb_out[1].reshape(B, SEQ_LEN, D_MODEL)

    # only the first half of the features feeds the Mamba layers (as in the reference)
    x_orig = x_embed[:, :, :DM]
    x_rc_orig = x_rc_embed[:, :, :DM]

    y_orig = y_rc = None
    for lp in params['layers']:
        streams = jnp.concatenate([x_orig, x_rc_orig], axis=0)               # (S, L, DM)
        streams_rev = jnp.flip(streams, axis=1)
        inp = jnp.stack([streams.reshape(SL, DM), streams_rev.reshape(SL, DM)], axis=0)
        out = mamba_fused_forward(inp, lp)                                   # (2, L, S*DM)
        out = jnp.transpose(out.reshape(2, SEQ_LEN, S, DM), (0, 2, 1, 3))    # (2, S, L, DM)
        comb = out[0] + jnp.flip(out[1], axis=1)   # fwd + flipped-back rev  (BiMamba 'add')
        y_orig, y_rc = comb[:B], comb[B:]
        x_orig, x_rc_orig = y_orig, y_rc

    x_embed_final = jnp.concatenate([y_orig, jnp.flip(y_rc, axis=1)], axis=-1)  # (B, L, D)
    return head_forward(x_embed_final, params['head'])


# ========================================================================================
# Deterministic synthetic parameter initialization
# ========================================================================================
def init_params(key):
    keys = iter(jax.random.split(key, 160))

    def nk():
        return next(keys)

    def w(shape, fan_in):
        return jax.random.normal(nk(), shape, _F32) / jnp.sqrt(jnp.asarray(fan_in, _F32))

    def small_b(shape):
        return 0.01 * jax.random.normal(nk(), shape, _F32)

    params = {'emb_w_t': w((4, D_MODEL), 4.0), 'emb_b': small_b((1, D_MODEL))}

    # Mamba-style SSM parameter initialization (deterministic)
    dt = jnp.exp(jnp.linspace(jnp.log(1e-3), jnp.log(1e-1), DI)).astype(_F32)
    dtb_init = jnp.log(jnp.expm1(dt)).reshape(1, DI)                       # inverse softplus
    at_neg = -jnp.tile(jnp.arange(1, D_STATE + 1, dtype=_F32)[:, None], (1, DI))  # A = -[1..N]

    layers = []
    for _ in range(N_LAYER):
        lp = {'win_t': w((DM, 2 * DI), DM), 'wout_t': w((DI, DM), DI)}     # tied fwd/rev
        per_dir = {k: [] for k in ('convw', 'convb', 'wxbc', 'wdt_comb', 'dtb',
                                   'at_neg', 'dvec')}
        for _d in range(2):                                                # 0 = fwd, 1 = rev
            wx_t = w((DI, R + 2 * D_STATE), DI)
            wdt_t = w((R, DI), R)
            per_dir['convw'].append(w((K_CONV, DI), K_CONV))
            per_dir['convb'].append(small_b((1, DI)))
            per_dir['wxbc'].append(wx_t[:, R:])                            # B/C projection
            per_dir['wdt_comb'].append(jnp.dot(wx_t[:, :R], wdt_t))        # dt_rank folded
            per_dir['dtb'].append(dtb_init)
            per_dir['at_neg'].append(at_neg)
            per_dir['dvec'].append(jnp.ones((1, DI), _F32))
        for kname, vals in per_dir.items():
            lp[kname] = jnp.stack(vals, axis=0)
        layers.append(lp)
    params['layers'] = layers

    wq, bq = w((D_MODEL, D_MODEL), D_MODEL), small_b((1, D_MODEL))
    wk, bk = w((D_MODEL, D_MODEL), D_MODEL), small_b((1, D_MODEL))
    wv, bv = w((D_MODEL, D_MODEL), D_MODEL), small_b((1, D_MODEL))
    params['head'] = {
        'ln_g': jnp.ones((1, D_MODEL), _F32), 'ln_b': jnp.zeros((1, D_MODEL), _F32),
        'wqkv_t': jnp.concatenate([wq, wk, wv], axis=1),
        'bqkv': jnp.concatenate([bq, bk, bv], axis=1),
        'wo_t': w((D_MODEL, D_MODEL), D_MODEL), 'bo': small_b((1, D_MODEL)),
        'w1_t': w((D_MODEL, 2 * D_MODEL), D_MODEL), 'b1': small_b((1, 2 * D_MODEL)),
        'w2_t': w((2 * D_MODEL, D_MODEL), 2 * D_MODEL), 'b2': small_b((1, D_MODEL)),
    }
    return params


if __name__ == "__main__":
    key = jax.random.PRNGKey(0)
    pkey, dkey = jax.random.split(key)
    params = init_params(pkey)

    # deterministic one-hot DNA input (batch, seq_len, 4)
    idx = jax.random.randint(dkey, (BATCH, SEQ_LEN), 0, 4)
    x = jax.nn.one_hot(idx, 4, dtype=_F32)

    out = jax.jit(birc_forward)(x, params)
    out = jax.block_until_ready(out)
    assert out.shape == (BATCH, SEQ_LEN, D_MODEL)
    assert bool(jnp.all(jnp.isfinite(out)))
    print("KERNEL_OK")
</pallas_src>

<mosaic_0001>
module attributes {stable_mosaic.version = 11 : i64} {
  func.func @_embed_kernel(%arg0: i32, %arg1: memref<1x32x4xf32, #tpu.memory_space<vmem>>, %arg2: memref<4x64xf32, #tpu.memory_space<vmem>>, %arg3: memref<1x64xf32, #tpu.memory_space<vmem>>, %arg4: memref<1x32x64xf32, #tpu.memory_space<vmem>>) attributes {dimension_semantics = [#tpu.dimension_semantics<parallel>], iteration_bounds = array<i64: 2>, scalar_prefetch = 0 : i64, scratch_operands = 0 : i64, tpu.core_type = #tpu.core_type<tc>, window_params = [{transform_indices = @transform_0, window_bounds = array<i64: 1, 32, 4>}, {pipeline_mode = #tpu.pipeline_mode<synchronous>, transform_indices = @transform_1, window_bounds = array<i64: 4, 64>}, {pipeline_mode = #tpu.pipeline_mode<synchronous>, transform_indices = @transform_2, window_bounds = array<i64: 1, 64>}, {transform_indices = @transform_3, window_bounds = array<i64: 1, 32, 64>}]} {
    %c0 = arith.constant 0 : index
    %c0_0 = arith.constant 0 : index
    %c0_1 = arith.constant 0 : index
    %0 = vector.load %arg1[%c0, %c0_0, %c0_1] : memref<1x32x4xf32, #tpu.memory_space<vmem>>, vector<1x32x4xf32>
    %1 = vector.shape_cast %0 : vector<1x32x4xf32> to vector<32x4xf32>
    %c0_2 = arith.constant 0 : index
    %c0_3 = arith.constant 0 : index
    %2 = vector.load %arg2[%c0_2, %c0_3] : memref<4x64xf32, #tpu.memory_space<vmem>>, vector<4x64xf32>
    %cst = arith.constant dense<0.000000e+00> : vector<32x64xf32>
    %3 = tpu.matmul %1, %2, %cst {dimension_numbers = #tpu.dot_dimension_numbers<[1], [0], [0], [1], [0, 0, 1, 1], [], []>} : vector<32x4xf32>, vector<4x64xf32>, vector<32x64xf32> -> vector<32x64xf32>
    %c0_4 = arith.constant 0 : index
    %c0_5 = arith.constant 0 : index
    %4 = vector.load %arg3[%c0_4, %c0_5] : memref<1x64xf32, #tpu.memory_space<vmem>>, vector<1x64xf32>
    %5 = vector.broadcast %4 : vector<1x64xf32> to vector<32x64xf32>
    %6 = arith.addf %3, %5 : vector<32x64xf32>
    %c0_6 = arith.constant 0 : index
    %c0_7 = arith.constant 0 : index
    %c0_8 = arith.constant 0 : index
    %7 = vector.load %arg4[%c0_6, %c0_7, %c0_8] : memref<1x32x64xf32, #tpu.memory_space<vmem>>, vector<1x32x64xf32>
    %8 = vector.shape_cast %7 : vector<1x32x64xf32> to vector<32x64xf32>
    %9 = vector.shape_cast %6 : vector<32x64xf32> to vector<1x32x64xf32>
    tpu.vector_store %arg4[%c0_6, %c0_7, %c0_8], %9 {strides = array<i32>} : memref<1x32x64xf32, #tpu.memory_space<vmem>>, vector<1x32x64xf32>,
    return
  }
  func.func @transform_0(%arg0: i32) -> (i32, i32, i32) {
    %c0_i32 = arith.constant 0 : i32
    %c0_i32_0 = arith.constant 0 : i32
    %c0_i32_1 = arith.constant 0 : i32
    return %arg0, %c0_i32, %c0_i32_0 : i32, i32, i32
  }
  func.func @transform_1(%arg0: i32) -> (i32, i32) {
    %c0_i32 = arith.constant 0 : i32
    %c0_i32_0 = arith.constant 0 : i32
    %c0_i32_1 = arith.constant 0 : i32
    return %c0_i32, %c0_i32_0 : i32, i32
  }
  func.func @transform_2(%arg0: i32) -> (i32, i32) {
    %c0_i32 = arith.constant 0 : i32
    %c0_i32_0 = arith.constant 0 : i32
    %c0_i32_1 = arith.constant 0 : i32
    return %c0_i32, %c0_i32_0 : i32, i32
  }
  func.func @transform_3(%arg0: i32) -> (i32, i32, i32) {
    %c0_i32 = arith.constant 0 : i32
    %c0_i32_0 = arith.constant 0 : i32
    %c0_i32_1 = arith.constant 0 : i32
    return %arg0, %c0_i32, %c0_i32_0 : i32, i32, i32
  }
}

module attributes {stable_mosaic.version = 11 : i64} {
  func.func @_head_kernel(%arg0: i32, %arg1: memref<1x16x64xf32, #tpu.memory_space<vmem>>, %arg2: memref<1x64xf32, #tpu.memory_space<vmem>>, %arg3: memref<1x64xf32, #tpu.memory_space<vmem>>, %arg4: memref<64x192xf32, #tpu.memory_space<vmem>>, %arg5: memref<1x192xf32, #tpu.memory_space<vmem>>, %arg6: memref<64x64xf32, #tpu.memory_space<vmem>>, %arg7: memref<1x64xf32, #tpu.memory_space<vmem>>, %arg8: memref<64x128xf32, #tpu.memory_space<vmem>>, %arg9: memref<1x128xf32, #tpu.memory_space<vmem>>, %arg10: memref<128x64xf32, #tpu.memory_space<vmem>>, %arg11: memref<1x64xf32, #tpu.memory_space<vmem>>, %arg12: memref<1x16x64xf32, #tpu.memory_space<vmem>>) attributes {dimension_semantics = [#tpu.dimension_semantics<parallel>], iteration_bounds = array<i64: 2>, scalar_prefetch = 0 : i64, scratch_operands = 0 : i64, tpu.core_type = #tpu.core_type<tc>, window_params = [{transform_indices = @transform_0, window_bounds = array<i64: 1, 16, 64>}, {pipeline_mode = #tpu.pipeline_mode<synchronous>, transform_indices = @transform_1, window_bounds = array<i64: 1, 64>}, {pipeline_mode = #tpu.pipeline_mode<synchronous>, transform_indices = @transform_2, window_bounds = array<i64: 1, 64>}, {pipeline_mode = #tpu.pipeline_mode<synchronous>, transform_indices = @transform_3, window_bounds = array<i64: 64, 192>}, {pipeline_mode = #tpu.pipeline_mode<synchronous>, transform_indices = @transform_4, window_bounds = array<i64: 1, 192>}, {pipeline_mode = #tpu.pipeline_mode<synchronous>, transform_indices = @transform_5, window_bounds = array<i64: 64, 64>}, {pipeline_mode = #tpu.pipeline_mode<synchronous>, transform_indices = @transform_6, window_bounds = array<i64: 1, 64>}, {pipeline_mode = #tpu.pipeline_mode<synchronous>, transform_indices = @transform_7, window_bounds = array<i64: 64, 128>}, {pipeline_mode = #tpu.pipeline_mode<synchronous>, transform_indices = @transform_8, window_bounds = array<i64: 1, 128>}, {pipeline_mode = #tpu.pipeline_mode<synchronous>, transform_indices = @transform_9, window_bounds = array<i64: 128, 64>}, {pipeline_mode = #tpu.pipeline_mode<synchronous>, transform_indices = @transform_10, window_bounds = array<i64: 1, 64>}, {transform_indices = @transform_11, window_bounds = array<i64: 1, 16, 64>}]} {
    %c0 = arith.constant 0 : index
    %c0_0 = arith.constant 0 : index
    %c0_1 = arith.constant 0 : index
    %0 = vector.load %arg1[%c0, %c0_0, %c0_1] : memref<1x16x64xf32, #tpu.memory_space<vmem>>, vector<1x16x64xf32>
    %1 = vector.shape_cast %0 : vector<1x16x64xf32> to vector<16x64xf32>
    %cst = arith.constant dense<0.000000e+00> : vector<16xf32>
    %2 = vector.multi_reduction <add>, %1, %cst [1] : vector<16x64xf32> to vector<16xf32>
    %3 = vector.shape_cast %2 : vector<16xf32> to vector<16x1xf32>
    %cst_2 = arith.constant 6.400000e+01 : f32
    %4 = vector.broadcast %cst_2 : f32 to vector<16x1xf32>
    %5 = arith.divf %3, %4 : vector<16x1xf32>
    %6 = vector.broadcast %5 : vector<16x1xf32> to vector<16x64xf32>
    %7 = arith.subf %1, %6 : vector<16x64xf32>
    %8 = arith.mulf %7, %7 : vector<16x64xf32>
    %cst_3 = arith.constant dense<0.000000e+00> : vector<16xf32>
    %9 = vector.multi_reduction <add>, %8, %cst_3 [1] : vector<16x64xf32> to vector<16xf32>
    %10 = vector.shape_cast %9 : vector<16xf32> to vector<16x1xf32>
    %cst_4 = arith.constant 6.400000e+01 : f32
    %11 = vector.broadcast %cst_4 : f32 to vector<16x1xf32>
    %12 = arith.divf %10, %11 : vector<16x1xf32>
    %cst_5 = arith.constant 9.99999974E-6 : f32
    %13 = vector.broadcast %cst_5 : f32 to vector<16x1xf32>
    %14 = arith.addf %12, %13 : vector<16x1xf32>
    %15 = math.rsqrt %14 : vector<16x1xf32>
    %16 = vector.broadcast %15 : vector<16x1xf32> to vector<16x64xf32>
    %17 = arith.mulf %7, %16 : vector<16x64xf32>
    %c0_6 = arith.constant 0 : index
    %c0_7 = arith.constant 0 : index
    %18 = vector.load %arg2[%c0_6, %c0_7] : memref<1x64xf32, #tpu.memory_space<vmem>>, vector<1x64xf32>
    %19 = vector.broadcast %18 : vector<1x64xf32> to vector<16x64xf32>
    %20 = arith.mulf %17, %19 : vector<16x64xf32>
    %c0_8 = arith.constant 0 : index
    %c0_9 = arith.constant 0 : index
    %21 = vector.load %arg3[%c0_8, %c0_9] : memref<1x64xf32, #tpu.memory_space<vmem>>, vector<1x64xf32>
    %22 = vector.broadcast %21 : vector<1x64xf32> to vector<16x64xf32>
    %23 = arith.addf %20, %22 : vector<16x64xf32>
    %c0_10 = arith.constant 0 : index
    %c0_11 = arith.constant 0 : index
    %24 = vector.load %arg4[%c0_10, %c0_11] : memref<64x192xf32, #tpu.memory_space<vmem>>, vector<64x192xf32>
    %cst_12 = arith.constant dense<0.000000e+00> : vector<16x192xf32>
    %25 = tpu.matmul %23, %24, %cst_12 {dimension_numbers = #tpu.dot_dimension_numbers<[1], [0], [0], [1], [0, 0, 1, 1], [], []>} : vector<16x64xf32>, vector<64x192xf32>, vector<16x192xf32> -> vector<16x192xf32>
    %c0_13 = arith.constant 0 : index
    %c0_14 = arith.constant 0 : index
    %26 = vector.load %arg5[%c0_13, %c0_14] : memref<1x192xf32, #tpu.memory_space<vmem>>, vector<1x192xf32>
    %27 = vector.broadcast %26 : vector<1x192xf32> to vector<16x192xf32>
    %28 = arith.addf %25, %27 : vector<16x192xf32>
    %29 = vector.extract_strided_slice %28 {offsets = [0, 0], sizes = [16, 64], strides = [1, 1]} : vector<16x192xf32> to vector<16x64xf32>
    %30 = vector.extract_strided_slice %28 {offsets = [0, 64], sizes = [16, 64], strides = [1, 1]} : vector<16x192xf32> to vector<16x64xf32>
    %31 = vector.extract_strided_slice %28 {offsets = [0, 128], sizes = [16, 64], strides = [1, 1]} : vector<16x192xf32> to vector<16x64xf32>
    %32 = vector.extract_strided_slice %29 {offsets = [0, 0], sizes = [16, 8], strides = [1, 1]} : vector<16x64xf32> to vector<16x8xf32>
    %33 = vector.extract_strided_slice %30 {offsets = [0, 0], sizes = [16, 8], strides = [1, 1]} : vector<16x64xf32> to vector<16x8xf32>
    %34 = vector.extract_strided_slice %31 {offsets = [0, 0], sizes = [16, 8], strides = [1, 1]} : vector<16x64xf32> to vector<16x8xf32>
    %cst_15 = arith.constant dense<0.000000e+00> : vector<16x16xf32>
    %35 = tpu.matmul %32, %33, %cst_15 {dimension_numbers = #tpu.dot_dimension_numbers<[1], [1], [0], [0], [0, 0, 1, 0], [], []>} : vector<16x8xf32>, vector<16x8xf32>, vector<16x16xf32> -> vector<16x16xf32>
    %cst_16 = arith.constant 0.353553385 : f32
    %36 = vector.broadcast %cst_16 : f32 to vector<16x16xf32>
    %37 = arith.mulf %35, %36 : vector<16x16xf32>
    %cst_17 = arith.constant dense<0xFF800000> : vector<16xf32>
    %38 = vector.multi_reduction <maximumf>, %37, %cst_17 [1] : vector<16x16xf32> to vector<16xf32>
    %39 = vector.shape_cast %38 : vector<16xf32> to vector<16x1xf32>
    %40 = vector.broadcast %39 : vector<16x1xf32> to vector<16x16xf32>
    %41 = arith.subf %37, %40 : vector<16x16xf32>
    %42 = math.exp %41 : vector<16x16xf32>
    %cst_18 = arith.constant dense<0.000000e+00> : vector<16xf32>
    %43 = vector.multi_reduction <add>, %42, %cst_18 [1] : vector<16x16xf32> to vector<16xf32>
    %44 = vector.shape_cast %43 : vector<16xf32> to vector<16x1xf32>
    %45 = tpu.reciprocal %44 {approx = true} : vector<16x1xf32> -> vector<16x1xf32>
    %46 = vector.broadcast %45 : vector<16x1xf32> to vector<16x16xf32>
    %47 = arith.mulf %42, %46 : vector<16x16xf32>
    %cst_19 = arith.constant dense<0.000000e+00> : vector<16x8xf32>
    %48 = tpu.matmul %47, %34, %cst_19 {dimension_numbers = #tpu.dot_dimension_numbers<[1], [0], [0], [1], [0, 0, 1, 1], [], []>} : vector<16x16xf32>, vector<16x8xf32>, vector<16x8xf32> -> vector<16x8xf32>
    %49 = vector.extract_strided_slice %29 {offsets = [0, 8], sizes = [16, 8], strides = [1, 1]} : vector<16x64xf32> to vector<16x8xf32>
    %50 = vector.extract_strided_slice %30 {offsets = [0, 8], sizes = [16, 8], strides = [1, 1]} : vector<16x64xf32> to vector<16x8xf32>
    %51 = vector.extract_strided_slice %31 {offsets = [0, 8], sizes = [16, 8], strides = [1, 1]} : vector<16x64xf32> to vector<16x8xf32>
    %cst_20 = arith.constant dense<0.000000e+00> : vector<16x16xf32>
    %52 = tpu.matmul %49, %50, %cst_20 {dimension_numbers = #tpu.dot_dimension_numbers<[1], [1], [0], [0], [0, 0, 1, 0], [], []>} : vector<16x8xf32>, vector<16x8xf32>, vector<16x16xf32> -> vector<16x16xf32>
    %cst_21 = arith.constant 0.353553385 : f32
    %53 = vector.broadcast %cst_21 : f32 to vector<16x16xf32>
    %54 = arith.mulf %52, %53 : vector<16x16xf32>
    %cst_22 = arith.constant dense<0xFF800000> : vector<16xf32>
    %55 = vector.multi_reduction <maximumf>, %54, %cst_22 [1] : vector<16x16xf32> to vector<16xf32>
    %56 = vector.shape_cast %55 : vector<16xf32> to vector<16x1xf32>
    %57 = vector.broadcast %56 : vector<16x1xf32> to vector<16x16xf32>
    %58 = arith.subf %54, %57 : vector<16x16xf32>
    %59 = math.exp %58 : vector<16x16xf32>
    %cst_23 = arith.constant dense<0.000000e+00> : vector<16xf32>
    %60 = vector.multi_reduction <add>, %59, %cst_23 [1] : vector<16x16xf32> to vector<16xf32>
    %61 = vector.shape_cast %60 : vector<16xf32> to vector<16x1xf32>
    %62 = tpu.reciprocal %61 {approx = true} : vector<16x1xf32> -> vector<16x1xf32>
    %63 = vector.broadcast %62 : vector<16x1xf32> to vector<16x16xf32>
    %64 = arith.mulf %59, %63 : vector<16x16xf32>
    %cst_24 = arith.constant dense<0.000000e+00> : vector<16x8xf32>
    %65 = tpu.matmul %64, %51, %cst_24 {dimension_numbers = #tpu.dot_dimension_numbers<[1], [0], [0], [1], [0, 0, 1, 1], [], []>} : vector<16x16xf32>, vector<16x8xf32>, vector<16x8xf32> -> vector<16x8xf32>
    %66 = vector.extract_strided_slice %29 {offsets = [0, 16], sizes = [16, 8], strides = [1, 1]} : vector<16x64xf32> to vector<16x8xf32>
    %67 = vector.extract_strided_slice %30 {offsets = [0, 16], sizes = [16, 8], strides = [1, 1]} : vector<16x64xf32> to vector<16x8xf32>
    %68 = vector.extract_strided_slice %31 {offsets = [0, 16], sizes = [16, 8], strides = [1, 1]} : vector<16x64xf32> to vector<16x8xf32>
    %cst_25 = arith.constant dense<0.000000e+00> : vector<16x16xf32>
    %69 = tpu.matmul %66, %67, %cst_25 {dimension_numbers = #tpu.dot_dimension_numbers<[1], [1], [0], [0], [0, 0, 1, 0], [], []>} : vector<16x8xf32>, vector<16x8xf32>, vector<16x16xf32> -> vector<16x16xf32>
    %cst_26 = arith.constant 0.353553385 : f32
    %70 = vector.broadcast %cst_26 : f32 to vector<16x16xf32>
    %71 = arith.mulf %69, %70 : vector<16x16xf32>
    %cst_27 = arith.constant dense<0xFF800000> : vector<16xf32>
    %72 = vector.multi_reduction <maximumf>, %71, %cst_27 [1] : vector<16x16xf32> to vector<16xf32>
    %73 = vector.shape_cast %72 : vector<16xf32> to vector<16x1xf32>
    %74 = vector.broadcast %73 : vector<16x1xf32> to vector<16x16xf32>
    %75 = arith.subf %71, %74 : vector<16x16xf32>
    %76 = math.exp %75 : vector<16x16xf32>
    %cst_28 = arith.constant dense<0.000000e+00> : vector<16xf32>
    %77 = vector.multi_reduction <add>, %76, %cst_28 [1] : vector<16x16xf32> to vector<16xf32>
    %78 = vector.shape_cast %77 : vector<16xf32> to vector<16x1xf32>
    %79 = tpu.reciprocal %78 {approx = true} : vector<16x1xf32> -> vector<16x1xf32>
    %80 = vector.broadcast %79 : vector<16x1xf32> to vector<16x16xf32>
    %81 = arith.mulf %76, %80 : vector<16x16xf32>
    %cst_29 = arith.constant dense<0.000000e+00> : vector<16x8xf32>
    %82 = tpu.matmul %81, %68, %cst_29 {dimension_numbers = #tpu.dot_dimension_numbers<[1], [0], [0], [1], [0, 0, 1, 1], [], []>} : vector<16x16xf32>, vector<16x8xf32>, vector<16x8xf32> -> vector<16x8xf32>
    %83 = vector.extract_strided_slice %29 {offsets = [0, 24], sizes = [16, 8], strides = [1, 1]} : vector<16x64xf32> to vector<16x8xf32>
    %84 = vector.extract_strided_slice %30 {offsets = [0, 24], sizes = [16, 8], strides = [1, 1]} : vector<16x64xf32> to vector<16x8xf32>
    %85 = vector.extract_strided_slice %31 {offsets = [0, 24], sizes = [16, 8], strides = [1, 1]} : vector<16x64xf32> to vector<16x8xf32>
    %cst_30 = arith.constant dense<0.000000e+00> : vector<16x16xf32>
    %86 = tpu.matmul %83, %84, %cst_30 {dimension_numbers = #tpu.dot_dimension_numbers<[1], [1], [0], [0], [0, 0, 1, 0], [], []>} : vector<16x8xf32>, vector<16x8xf32>, vector<16x16xf32> -> vector<16x16xf32>
    %cst_31 = arith.constant 0.353553385 : f32
    %87 = vector.broadcast %cst_31 : f32 to vector<16x16xf32>
    %88 = arith.mulf %86, %87 : vector<16x16xf32>
    %cst_32 = arith.constant dense<0xFF800000> : vector<16xf32>
    %89 = vector.multi_reduction <maximumf>, %88, %cst_32 [1] : vector<16x16xf32> to vector<16xf32>
    %90 = vector.shape_cast %89 : vector<16xf32> to vector<16x1xf32>
    %91 = vector.broadcast %90 : vector<16x1xf32> to vector<16x16xf32>
    %92 = arith.subf %88, %91 : vector<16x16xf32>
    %93 = math.exp %92 : vector<16x16xf32>
    %cst_33 = arith.constant dense<0.000000e+00> : vector<16xf32>
    %94 = vector.multi_reduction <add>, %93, %cst_33 [1] : vector<16x16xf32> to vector<16xf32>
    %95 = vector.shape_cast %94 : vector<16xf32> to vector<16x1xf32>
    %96 = tpu.reciprocal %95 {approx = true} : vector<16x1xf32> -> vector<16x1xf32>
    %97 = vector.broadcast %96 : vector<16x1xf32> to vector<16x16xf32>
    %98 = arith.mulf %93, %97 : vector<16x16xf32>
    %cst_34 = arith.constant dense<0.000000e+00> : vector<16x8xf32>
    %99 = tpu.matmul %98, %85, %cst_34 {dimension_numbers = #tpu.dot_dimension_numbers<[1], [0], [0], [1], [0, 0, 1, 1], [], []>} : vector<16x16xf32>, vector<16x8xf32>, vector<16x8xf32> -> vector<16x8xf32>
    %100 = vector.extract_strided_slice %29 {offsets = [0, 32], sizes = [16, 8], strides = [1, 1]} : vector<16x64xf32> to vector<16x8xf32>
    %101 = vector.extract_strided_slice %30 {offsets = [0, 32], sizes = [16, 8], strides = [1, 1]} : vector<16x64xf32> to vector<16x8xf32>
    %102 = vector.extract_strided_slice %31 {offsets = [0, 32], sizes = [16, 8], strides = [1, 1]} : vector<16x64xf32> to vector<16x8xf32>
    %cst_35 = arith.constant dense<0.000000e+00> : vector<16x16xf32>
    %103 = tpu.matmul %100, %101, %cst_35 {dimension_numbers = #tpu.dot_dimension_numbers<[1], [1], [0], [0], [0, 0, 1, 0], [], []>} : vector<16x8xf32>, vector<16x8xf32>, vector<16x16xf32> -> vector<16x16xf32>
    %cst_36 = arith.constant 0.353553385 : f32
    %104 = vector.broadcast %cst_36 : f32 to vector<16x16xf32>
    %105 = arith.mulf %103, %104 : vector<16x16xf32>
    %cst_37 = arith.constant dense<0xFF800000> : vector<16xf32>
    %106 = vector.multi_reduction <maximumf>, %105, %cst_37 [1] : vector<16x16xf32> to vector<16xf32>
    %107 = vector.shape_cast %106 : vector<16xf32> to vector<16x1xf32>
    %108 = vector.broadcast %107 : vector<16x1xf32> to vector<16x16xf32>
    %109 = arith.subf %105, %108 : vector<16x16xf32>
    %110 = math.exp %109 : vector<16x16xf32>
    %cst_38 = arith.constant dense<0.000000e+00> : vector<16xf32>
    %111 = vector.multi_reduction <add>, %110, %cst_38 [1] : vector<16x16xf32> to vector<16xf32>
    %112 = vector.shape_cast %111 : vector<16xf32> to vector<16x1xf32>
    %113 = tpu.reciprocal %112 {approx = true} : vector<16x1xf32> -> vector<16x1xf32>
    %114 = vector.broadcast %113 : vector<16x1xf32> to vector<16x16xf32>
    %115 = arith.mulf %110, %114 : vector<16x16xf32>
    %cst_39 = arith.constant dense<0.000000e+00> : vector<16x8xf32>
    %116 = tpu.matmul %115, %102, %cst_39 {dimension_numbers = #tpu.dot_dimension_numbers<[1], [0], [0], [1], [0, 0, 1, 1], [], []>} : vector<16x16xf32>, vector<16x8xf32>, vector<16x8xf32> -> vector<16x8xf32>
    %117 = vector.extract_strided_slice %29 {offsets = [0, 40], sizes = [16, 8], strides = [1, 1]} : vector<16x64xf32> to vector<16x8xf32>
    %118 = vector.extract_strided_slice %30 {offsets = [0, 40], sizes = [16, 8], strides = [1, 1]} : vector<16x64xf32> to vector<16x8xf32>
    %119 = vector.extract_strided_slice %31 {offsets = [0, 40], sizes = [16, 8], strides = [1, 1]} : vector<16x64xf32> to vector<16x8xf32>
    %cst_40 = arith.constant dense<0.000000e+00> : vector<16x16xf32>
    %120 = tpu.matmul %117, %118, %cst_40 {dimension_numbers = #tpu.dot_dimension_numbers<[1], [1], [0], [0], [0, 0, 1, 0], [], []>} : vector<16x8xf32>, vector<16x8xf32>, vector<16x16xf32> -> vector<16x16xf32>
    %cst_41 = arith.constant 0.353553385 : f32
    %121 = vector.broadcast %cst_41 : f32 to vector<16x16xf32>
    %122 = arith.mulf %120, %121 : vector<16x16xf32>
    %cst_42 = arith.constant dense<0xFF800000> : vector<16xf32>
    %123 = vector.multi_reduction <maximumf>, %122, %cst_42 [1] : vector<16x16xf32> to vector<16xf32>
    %124 = vector.shape_cast %123 : vector<16xf32> to vector<16x1xf32>
    %125 = vector.broadcast %124 : vector<16x1xf32> to vector<16x16xf32>
    %126 = arith.subf %122, %125 : vector<16x16xf32>
    %127 = math.exp %126 : vector<16x16xf32>
    %cst_43 = arith.constant dense<0.000000e+00> : vector<16xf32>
    %128 = vector.multi_reduction <add>, %127, %cst_43 [1] : vector<16x16xf32> to vector<16xf32>
    %129 = vector.shape_cast %128 : vector<16xf32> to vector<16x1xf32>
    %130 = tpu.reciprocal %129 {approx = true} : vector<16x1xf32> -> vector<16x1xf32>
    %131 = vector.broadcast %130 : vector<16x1xf32> to vector<16x16xf32>
    %132 = arith.mulf %127, %131 : vector<16x16xf32>
    %cst_44 = arith.constant dense<0.000000e+00> : vector<16x8xf32>
    %133 = tpu.matmul %132, %119, %cst_44 {dimension_numbers = #tpu.dot_dimension_numbers<[1], [0], [0], [1], [0, 0, 1, 1], [], []>} : vector<16x16xf32>, vector<16x8xf32>, vector<16x8xf32> -> vector<16x8xf32>
    %134 = vector.extract_strided_slice %29 {offsets = [0, 48], sizes = [16, 8], strides = [1, 1]} : vector<16x64xf32> to vector<16x8xf32>
    %135 = vector.extract_strided_slice %30 {offsets = [0, 48], sizes = [16, 8], strides = [1, 1]} : vector<16x64xf32> to vector<16x8xf32>
    %136 = vector.extract_strided_slice %31 {offsets = [0, 48], sizes = [16, 8], strides = [1, 1]} : vector<16x64xf32> to vector<16x8xf32>
    %cst_45 = arith.constant dense<0.000000e+00> : vector<16x16xf32>
    %137 = tpu.matmul %134, %135, %cst_45 {dimension_numbers = #tpu.dot_dimension_numbers<[1], [1], [0], [0], [0, 0, 1, 0], [], []>} : vector<16x8xf32>, vector<16x8xf32>, vector<16x16xf32> -> vector<16x16xf32>
    %cst_46 = arith.constant 0.353553385 : f32
    %138 = vector.broadcast %cst_46 : f32 to vector<16x16xf32>
    %139 = arith.mulf %137, %138 : vector<16x16xf32>
    %cst_47 = arith.constant dense<0xFF800000> : vector<16xf32>
    %140 = vector.multi_reduction <maximumf>, %139, %cst_47 [1] : vector<16x16xf32> to vector<16xf32>
    %141 = vector.shape_cast %140 : vector<16xf32> to vector<16x1xf32>
    %142 = vector.broadcast %141 : vector<16x1xf32> to vector<16x16xf32>
    %143 = arith.subf %139, %142 : vector<16x16xf32>
    %144 = math.exp %143 : vector<16x16xf32>
    %cst_48 = arith.constant dense<0.000000e+00> : vector<16xf32>
    %145 = vector.multi_reduction <add>, %144, %cst_48 [1] : vector<16x16xf32> to vector<16xf32>
    %146 = vector.shape_cast %145 : vector<16xf32> to vector<16x1xf32>
    %147 = tpu.reciprocal %146 {approx = true} : vector<16x1xf32> -> vector<16x1xf32>
    %148 = vector.broadcast %147 : vector<16x1xf32> to vector<16x16xf32>
    %149 = arith.mulf %144, %148 : vector<16x16xf32>
    %cst_49 = arith.constant dense<0.000000e+00> : vector<16x8xf32>
    %150 = tpu.matmul %149, %136, %cst_49 {dimension_numbers = #tpu.dot_dimension_numbers<[1], [0], [0], [1], [0, 0, 1, 1], [], []>} : vector<16x16xf32>, vector<16x8xf32>, vector<16x8xf32> -> vector<16x8xf32>
    %151 = vector.extract_strided_slice %29 {offsets = [0, 56], sizes = [16, 8], strides = [1, 1]} : vector<16x64xf32> to vector<16x8xf32>
    %152 = vector.extract_strided_slice %30 {offsets = [0, 56], sizes = [16, 8], strides = [1, 1]} : vector<16x64xf32> to vector<16x8xf32>
    %153 = vector.extract_strided_slice %31 {offsets = [0, 56], sizes = [16, 8], strides = [1, 1]} : vector<16x64xf32> to vector<16x8xf32>
    %cst_50 = arith.constant dense<0.000000e+00> : vector<16x16xf32>
    %154 = tpu.matmul %151, %152, %cst_50 {dimension_numbers = #tpu.dot_dimension_numbers<[1], [1], [0], [0], [0, 0, 1, 0], [], []>} : vector<16x8xf32>, vector<16x8xf32>, vector<16x16xf32> -> vector<16x16xf32>
    %cst_51 = arith.constant 0.353553385 : f32
    %155 = vector.broadcast %cst_51 : f32 to vector<16x16xf32>
    %156 = arith.mulf %154, %155 : vector<16x16xf32>
    %cst_52 = arith.constant dense<0xFF800000> : vector<16xf32>
    %157 = vector.multi_reduction <maximumf>, %156, %cst_52 [1] : vector<16x16xf32> to vector<16xf32>
    %158 = vector.shape_cast %157 : vector<16xf32> to vector<16x1xf32>
    %159 = vector.broadcast %158 : vector<16x1xf32> to vector<16x16xf32>
    %160 = arith.subf %156, %159 : vector<16x16xf32>
    %161 = math.exp %160 : vector<16x16xf32>
    %cst_53 = arith.constant dense<0.000000e+00> : vector<16xf32>
    %162 = vector.multi_reduction <add>, %161, %cst_53 [1] : vector<16x16xf32> to vector<16xf32>
    %163 = vector.shape_cast %162 : vector<16xf32> to vector<16x1xf32>
    %164 = tpu.reciprocal %163 {approx = true} : vector<16x1xf32> -> vector<16x1xf32>
    %165 = vector.broadcast %164 : vector<16x1xf32> to vector<16x16xf32>
    %166 = arith.mulf %161, %165 : vector<16x16xf32>
    %cst_54 = arith.constant dense<0.000000e+00> : vector<16x8xf32>
    %167 = tpu.matmul %166, %153, %cst_54 {dimension_numbers = #tpu.dot_dimension_numbers<[1], [0], [0], [1], [0, 0, 1, 1], [], []>} : vector<16x16xf32>, vector<16x8xf32>, vector<16x8xf32> -> vector<16x8xf32>
    %168 = tpu.concatenate %48, %65, %82, %99, %116, %133, %150, %167 in 1 : vector<16x8xf32>, vector<16x8xf32>, vector<16x8xf32>, vector<16x8xf32>, vector<16x8xf32>, vector<16x8xf32>, vector<16x8xf32>, vector<16x8xf32> -> vector<16x64xf32>
    %c0_55 = arith.constant 0 : index
    %c0_56 = arith.constant 0 : index
    %169 = vector.load %arg6[%c0_55, %c0_56] : memref<64x64xf32, #tpu.memory_space<vmem>>, vector<64x64xf32>
    %cst_57 = arith.constant dense<0.000000e+00> : vector<16x64xf32>
    %170 = tpu.matmul %168, %169, %cst_57 {dimension_numbers = #tpu.dot_dimension_numbers<[1], [0], [0], [1], [0, 0, 1, 1], [], []>} : vector<16x64xf32>, vector<64x64xf32>, vector<16x64xf32> -> vector<16x64xf32>
    %c0_58 = arith.constant 0 : index
    %c0_59 = arith.constant 0 : index
    %171 = vector.load %arg7[%c0_58, %c0_59] : memref<1x64xf32, #tpu.memory_space<vmem>>, vector<1x64xf32>
    %172 = vector.broadcast %171 : vector<1x64xf32> to vector<16x64xf32>
    %173 = arith.addf %170, %172 : vector<16x64xf32>
    %c0_60 = arith.constant 0 : index
    %c0_61 = arith.constant 0 : index
    %174 = vector.load %arg8[%c0_60, %c0_61] : memref<64x128xf32, #tpu.memory_space<vmem>>, vector<64x128xf32>
    %cst_62 = arith.constant dense<0.000000e+00> : vector<16x128xf32>
    %175 = tpu.matmul %173, %174, %cst_62 {dimension_numbers = #tpu.dot_dimension_numbers<[1], [0], [0], [1], [0, 0, 1, 1], [], []>} : vector<16x64xf32>, vector<64x128xf32>, vector<16x128xf32> -> vector<16x128xf32>
    %c0_63 = arith.constant 0 : index
    %c0_64 = arith.constant 0 : index
    %176 = vector.load %arg9[%c0_63, %c0_64] : memref<1x128xf32, #tpu.memory_space<vmem>>, vector<1x128xf32>
    %177 = vector.broadcast %176 : vector<1x128xf32> to vector<16x128xf32>
    %178 = arith.addf %175, %177 : vector<16x128xf32>
    %cst_65 = arith.constant 0.000000e+00 : f32
    %179 = vector.broadcast %cst_65 : f32 to vector<16x128xf32>
    %180 = arith.maximumf %178, %179 : vector<16x128xf32>
    %c0_66 = arith.constant 0 : index
    %c0_67 = arith.constant 0 : index
    %181 = vector.load %arg10[%c0_66, %c0_67] : memref<128x64xf32, #tpu.memory_space<vmem>>, vector<128x64xf32>
    %cst_68 = arith.constant dense<0.000000e+00> : vector<16x64xf32>
    %182 = tpu.matmul %180, %181, %cst_68 {dimension_numbers = #tpu.dot_dimension_numbers<[1], [0], [0], [1], [0, 0, 1, 1], [], []>} : vector<16x128xf32>, vector<128x64xf32>, vector<16x64xf32> -> vector<16x64xf32>
    %c0_69 = arith.constant 0 : index
    %c0_70 = arith.constant 0 : index
    %183 = vector.load %arg11[%c0_69, %c0_70] : memref<1x64xf32, #tpu.memory_space<vmem>>, vector<1x64xf32>
    %184 = vector.broadcast %183 : vector<1x64xf32> to vector<16x64xf32>
    %185 = arith.addf %182, %184 : vector<16x64xf32>
    %c0_71 = arith.constant 0 : index
    %c0_72 = arith.constant 0 : index
    %c0_73 = arith.constant 0 : index
    %186 = vector.load %arg12[%c0_71, %c0_72, %c0_73] : memref<1x16x64xf32, #tpu.memory_space<vmem>>, vector<1x16x64xf32>
    %187 = vector.shape_cast %186 : vector<1x16x64xf32> to vector<16x64xf32>
    %188 = vector.shape_cast %185 : vector<16x64xf32> to vector<1x16x64xf32>
    tpu.vector_store %arg12[%c0_71, %c0_72, %c0_73], %188 {strides = array<i32>} : memref<1x16x64xf32, #tpu.memory_space<vmem>>, vector<1x16x64xf32>,
    return
  }
  func.func @transform_0(%arg0: i32) -> (i32, i32, i32) {
    %c0_i32 = arith.constant 0 : i32
    %c0_i32_0 = arith.constant 0 : i32
    %c0_i32_1 = arith.constant 0 : i32
    return %arg0, %c0_i32, %c0_i32_0 : i32, i32, i32
  }
  func.func @transform_1(%arg0: i32) -> (i32, i32) {
    %c0_i32 = arith.constant 0 : i32
    %c0_i32_0 = arith.constant 0 : i32
    %c0_i32_1 = arith.constant 0 : i32
    return %c0_i32, %c0_i32_0 : i32, i32
  }
  func.func @transform_2(%arg0: i32) -> (i32, i32) {
    %c0_i32 = arith.constant 0 : i32
    %c0_i32_0 = arith.constant 0 : i32
    %c0_i32_1 = arith.constant 0 : i32
    return %c0_i32, %c0_i32_0 : i32, i32
  }
  func.func @transform_3(%arg0: i32) -> (i32, i32) {
    %c0_i32 = arith.constant 0 : i32
    %c0_i32_0 = arith.constant 0 : i32
    %c0_i32_1 = arith.constant 0 : i32
    return %c0_i32, %c0_i32_0 : i32, i32
  }
  func.func @transform_4(%arg0: i32) -> (i32, i32) {
    %c0_i32 = arith.constant 0 : i32
    %c0_i32_0 = arith.constant 0 : i32
    %c0_i32_1 = arith.constant 0 : i32
    return %c0_i32, %c0_i32_0 : i32, i32
  }
  func.func @transform_5(%arg0: i32) -> (i32, i32) {
    %c0_i32 = arith.constant 0 : i32
    %c0_i32_0 = arith.constant 0 : i32
    %c0_i32_1 = arith.constant 0 : i32
    return %c0_i32, %c0_i32_0 : i32, i32
  }
  func.func @transform_6(%arg0: i32) -> (i32, i32) {
    %c0_i32 = arith.constant 0 : i32
    %c0_i32_0 = arith.constant 0 : i32
    %c0_i32_1 = arith.constant 0 : i32
    return %c0_i32, %c0_i32_0 : i32, i32
  }
  func.func @transform_7(%arg0: i32) -> (i32, i32) {
    %c0_i32 = arith.constant 0 : i32
    %c0_i32_0 = arith.constant 0 : i32
    %c0_i32_1 = arith.constant 0 : i32
    return %c0_i32, %c0_i32_0 : i32, i32
  }
  func.func @transform_8(%arg0: i32) -> (i32, i32) {
    %c0_i32 = arith.constant 0 : i32
    %c0_i32_0 = arith.constant 0 : i32
    %c0_i32_1 = arith.constant 0 : i32
    return %c0_i32, %c0_i32_0 : i32, i32
  }
  func.func @transform_9(%arg0: i32) -> (i32, i32) {
    %c0_i32 = arith.constant 0 : i32
    %c0_i32_0 = arith.constant 0 : i32
    %c0_i32_1 = arith.constant 0 : i32
    return %c0_i32, %c0_i32_0 : i32, i32
  }
  func.func @transform_10(%arg0: i32) -> (i32, i32) {
    %c0_i32 = arith.constant 0 : i32
    %c0_i32_0 = arith.constant 0 : i32
    %c0_i32_1 = arith.constant 0 : i32
    return %c0_i32, %c0_i32_0 : i32, i32
  }
  func.func @transform_11(%arg0: i32) -> (i32, i32, i32) {
    %c0_i32 = arith.constant 0 : i32
    %c0_i32_0 = arith.constant 0 : i32
    %c0_i32_1 = arith.constant 0 : i32
    return %arg0, %c0_i32, %c0_i32_0 : i32, i32, i32
  }
}

module attributes {stable_mosaic.version = 11 : i64} {
  func.func @_mamba_kernel(%arg0: i32, %arg1: memref<1x64x32xf32, #tpu.memory_space<vmem>>, %arg2: memref<32x128xf32, #tpu.memory_space<vmem>>, %arg3: memref<64x32xf32, #tpu.memory_space<vmem>>, %arg4: memref<1x4x64xf32, #tpu.memory_space<vmem>>, %arg5: memref<1x1x64xf32, #tpu.memory_space<vmem>>, %arg6: memref<1x64x64xf32, #tpu.memory_space<vmem>>, %arg7: memref<1x64x16xf32, #tpu.memory_space<vmem>>, %arg8: memref<1x1x64xf32, #tpu.memory_space<vmem>>, %arg9: memref<1x8x64xf32, #tpu.memory_space<vmem>>, %arg10: memref<1x1x64xf32, #tpu.memory_space<vmem>>, %arg11: memref<1x16x128xf32, #tpu.memory_space<vmem>>, %arg12: memref<512x64xf32, #tpu.memory_space<vmem>>, %arg13: memref<512x64xf32, #tpu.memory_space<vmem>>, %arg14: memref<512x64xf32, #tpu.memory_space<vmem>>) attributes {dimension_semantics = [#tpu.dimension_semantics<parallel>], iteration_bounds = array<i64: 2>, scalar_prefetch = 0 : i64, scratch_operands = 3 : i64, tpu.core_type = #tpu.core_type<tc>, window_params = [{transform_indices = @transform_0, window_bounds = array<i64: 1, 64, 32>}, {pipeline_mode = #tpu.pipeline_mode<synchronous>, transform_indices = @transform_1, window_bounds = array<i64: 32, 128>}, {pipeline_mode = #tpu.pipeline_mode<synchronous>, transform_indices = @transform_2, window_bounds = array<i64: 64, 32>}, {transform_indices = @transform_3, window_bounds = array<i64: 1, 4, 64>}, {transform_indices = @transform_4, window_bounds = array<i64: 1, 1, 64>}, {transform_indices = @transform_5, window_bounds = array<i64: 1, 64, 64>}, {transform_indices = @transform_6, window_bounds = array<i64: 1, 64, 16>}, {transform_indices = @transform_7, window_bounds = array<i64: 1, 1, 64>}, {transform_indices = @transform_8, window_bounds = array<i64: 1, 8, 64>}, {transform_indices = @transform_9, window_bounds = array<i64: 1, 1, 64>}, {transform_indices = @transform_10, window_bounds = array<i64: 1, 16, 128>}]} {
    %c0 = arith.constant 0 : index
    %c0_0 = arith.constant 0 : index
    %c0_1 = arith.constant 0 : index
    %0 = vector.load %arg1[%c0, %c0_0, %c0_1] : memref<1x64x32xf32, #tpu.memory_space<vmem>>, vector<1x64x32xf32>
    %1 = vector.shape_cast %0 : vector<1x64x32xf32> to vector<64x32xf32>
    %c0_2 = arith.constant 0 : index
    %c0_3 = arith.constant 0 : index
    %2 = vector.load %arg2[%c0_2, %c0_3] : memref<32x128xf32, #tpu.memory_space<vmem>>, vector<32x128xf32>
    %cst = arith.constant dense<0.000000e+00> : vector<64x128xf32>
    %3 = tpu.matmul %1, %2, %cst {dimension_numbers = #tpu.dot_dimension_numbers<[1], [0], [0], [1], [0, 0, 1, 1], [], []>} : vector<64x32xf32>, vector<32x128xf32>, vector<64x128xf32> -> vector<64x128xf32>
    %4 = vector.extract_strided_slice %3 {offsets = [0, 0], sizes = [64, 64], strides = [1, 1]} : vector<64x128xf32> to vector<64x64xf32>
    %5 = vector.extract_strided_slice %3 {offsets = [0, 64], sizes = [64, 64], strides = [1, 1]} : vector<64x128xf32> to vector<64x64xf32>
    %c0_4 = arith.constant 0 : index
    %c0_5 = arith.constant 0 : index
    %c0_6 = arith.constant 0 : index
    %6 = vector.load %arg4[%c0_4, %c0_5, %c0_6] : memref<1x4x64xf32, #tpu.memory_space<vmem>>, vector<1x4x64xf32>
    %7 = vector.shape_cast %6 : vector<1x4x64xf32> to vector<4x64xf32>
    %8 = tpu.iota {dimensions = array<i32: 0>} : vector<64x1xi32>
    %c15_i32 = arith.constant 15 : i32
    %9 = vector.broadcast %c15_i32 : i32 to vector<64x1xi32>
    %10 = arith.andi %8, %9 : vector<64x1xi32>
    %11 = vector.extract_strided_slice %7 {offsets = [3, 0], sizes = [1, 64], strides = [1, 1]} : vector<4x64xf32> to vector<1x64xf32>
    %12 = vector.broadcast %11 : vector<1x64xf32> to vector<64x64xf32>
    %13 = arith.mulf %4, %12 : vector<64x64xf32>
    %c3_i32 = arith.constant 3 : i32
    %14 = tpu.dynamic_rotate %4 by %c3_i32 dim 0 : vector<64x64xf32>, i32 -> vector<64x64xf32>
    %c3_i32_7 = arith.constant 3 : i32
    %15 = vector.broadcast %c3_i32_7 : i32 to vector<64x1xi32>
    %16 = arith.cmpi sge, %10, %15 : vector<64x1xi32>
    %cst_8 = arith.constant 0.000000e+00 : f32
    %17 = vector.shape_cast %16 : vector<64x1xi1> to vector<64x1xi1>
    %18 = vector.broadcast %17 : vector<64x1xi1> to vector<64x64xi1>
    %19 = vector.broadcast %cst_8 : f32 to vector<64x64xf32>
    %20 = arith.select %18, %14, %19 : vector<64x64xi1>, vector<64x64xf32>
    %21 = vector.extract_strided_slice %7 {offsets = [0, 0], sizes = [1, 64], strides = [1, 1]} : vector<4x64xf32> to vector<1x64xf32>
    %22 = vector.broadcast %21 : vector<1x64xf32> to vector<64x64xf32>
    %23 = arith.mulf %20, %22 : vector<64x64xf32>
    %24 = arith.addf %13, %23 : vector<64x64xf32>
    %c2_i32 = arith.constant 2 : i32
    %25 = tpu.dynamic_rotate %4 by %c2_i32 dim 0 : vector<64x64xf32>, i32 -> vector<64x64xf32>
    %c2_i32_9 = arith.constant 2 : i32
    %26 = vector.broadcast %c2_i32_9 : i32 to vector<64x1xi32>
    %27 = arith.cmpi sge, %10, %26 : vector<64x1xi32>
    %cst_10 = arith.constant 0.000000e+00 : f32
    %28 = vector.shape_cast %27 : vector<64x1xi1> to vector<64x1xi1>
    %29 = vector.broadcast %28 : vector<64x1xi1> to vector<64x64xi1>
    %30 = vector.broadcast %cst_10 : f32 to vector<64x64xf32>
    %31 = arith.select %29, %25, %30 : vector<64x64xi1>, vector<64x64xf32>
    %32 = vector.extract_strided_slice %7 {offsets = [1, 0], sizes = [1, 64], strides = [1, 1]} : vector<4x64xf32> to vector<1x64xf32>
    %33 = vector.broadcast %32 : vector<1x64xf32> to vector<64x64xf32>
    %34 = arith.mulf %31, %33 : vector<64x64xf32>
    %35 = arith.addf %24, %34 : vector<64x64xf32>
    %c1_i32 = arith.constant 1 : i32
    %36 = tpu.dynamic_rotate %4 by %c1_i32 dim 0 : vector<64x64xf32>, i32 -> vector<64x64xf32>
    %c1_i32_11 = arith.constant 1 : i32
    %37 = vector.broadcast %c1_i32_11 : i32 to vector<64x1xi32>
    %38 = arith.cmpi sge, %10, %37 : vector<64x1xi32>
    %cst_12 = arith.constant 0.000000e+00 : f32
    %39 = vector.shape_cast %38 : vector<64x1xi1> to vector<64x1xi1>
    %40 = vector.broadcast %39 : vector<64x1xi1> to vector<64x64xi1>
    %41 = vector.broadcast %cst_12 : f32 to vector<64x64xf32>
    %42 = arith.select %40, %36, %41 : vector<64x64xi1>, vector<64x64xf32>
    %43 = vector.extract_strided_slice %7 {offsets = [2, 0], sizes = [1, 64], strides = [1, 1]} : vector<4x64xf32> to vector<1x64xf32>
    %44 = vector.broadcast %43 : vector<1x64xf32> to vector<64x64xf32>
    %45 = arith.mulf %42, %44 : vector<64x64xf32>
    %46 = arith.addf %35, %45 : vector<64x64xf32>
    %c0_13 = arith.constant 0 : index
    %c0_14 = arith.constant 0 : index
    %c0_15 = arith.constant 0 : index
    %47 = vector.load %arg5[%c0_13, %c0_14, %c0_15] : memref<1x1x64xf32, #tpu.memory_space<vmem>>, vector<1x1x64xf32>
    %48 = vector.shape_cast %47 : vector<1x1x64xf32> to vector<1x64xf32>
    %49 = vector.broadcast %48 : vector<1x64xf32> to vector<64x64xf32>
    %50 = arith.addf %46, %49 : vector<64x64xf32>
    %51 = arith.negf %50 : vector<64x64xf32>
    %52 = math.exp %51 : vector<64x64xf32>
    %cst_16 = arith.constant 1.000000e+00 : f32
    %53 = vector.broadcast %cst_16 : f32 to vector<64x64xf32>
    %54 = arith.addf %53, %52 : vector<64x64xf32>
    %55 = arith.divf %53, %54 : vector<64x64xf32>
    %56 = arith.mulf %50, %55 : vector<64x64xf32>
    %c0_17 = arith.constant 0 : index
    %c0_18 = arith.constant 0 : index
    %c0_19 = arith.constant 0 : index
    %57 = vector.load %arg6[%c0_17, %c0_18, %c0_19] : memref<1x64x64xf32, #tpu.memory_space<vmem>>, vector<1x64x64xf32>
    %58 = vector.shape_cast %57 : vector<1x64x64xf32> to vector<64x64xf32>
    %cst_20 = arith.constant dense<0.000000e+00> : vector<64x64xf32>
    %59 = tpu.matmul %56, %58, %cst_20 {dimension_numbers = #tpu.dot_dimension_numbers<[1], [0], [0], [1], [0, 0, 1, 1], [], []>} : vector<64x64xf32>, vector<64x64xf32>, vector<64x64xf32> -> vector<64x64xf32>
    %c0_21 = arith.constant 0 : index
    %c0_22 = arith.constant 0 : index
    %c0_23 = arith.constant 0 : index
    %60 = vector.load %arg8[%c0_21, %c0_22, %c0_23] : memref<1x1x64xf32, #tpu.memory_space<vmem>>, vector<1x1x64xf32>
    %61 = vector.shape_cast %60 : vector<1x1x64xf32> to vector<1x64xf32>
    %62 = vector.broadcast %61 : vector<1x64xf32> to vector<64x64xf32>
    %63 = arith.addf %59, %62 : vector<64x64xf32>
    %cst_24 = arith.constant 0.000000e+00 : f32
    %64 = vector.broadcast %cst_24 : f32 to vector<64x64xf32>
    %65 = arith.maximumf %63, %64 : vector<64x64xf32>
    %66 = math.absf %63 : vector<64x64xf32>
    %cst_25 = arith.constant 0.000000e+00 : f32
    %67 = vector.broadcast %cst_25 : f32 to vector<64x64xf32>
    %68 = arith.subf %67, %66 : vector<64x64xf32>
    %69 = math.exp %68 : vector<64x64xf32>
    %cst_26 = arith.constant 1.000000e+00 : f32
    %70 = vector.broadcast %cst_26 : f32 to vector<64x64xf32>
    %71 = arith.addf %70, %69 : vector<64x64xf32>
    %72 = math.log %71 : vector<64x64xf32>
    %73 = arith.addf %65, %72 : vector<64x64xf32>
    %74 = arith.mulf %73, %56 : vector<64x64xf32>
    %c0_27 = arith.constant 0 : index
    %c0_28 = arith.constant 0 : index
    %c0_29 = arith.constant 0 : index
    %75 = vector.load %arg7[%c0_27, %c0_28, %c0_29] : memref<1x64x16xf32, #tpu.memory_space<vmem>>, vector<1x64x16xf32>
    %76 = vector.shape_cast %75 : vector<1x64x16xf32> to vector<64x16xf32>
    %cst_30 = arith.constant dense<0.000000e+00> : vector<64x16xf32>
    %77 = tpu.matmul %56, %76, %cst_30 {dimension_numbers = #tpu.dot_dimension_numbers<[1], [0], [0], [1], [0, 0, 1, 1], [], []>} : vector<64x64xf32>, vector<64x16xf32>, vector<64x16xf32> -> vector<64x16xf32>
    %78 = vector.extract_strided_slice %77 {offsets = [0, 0], sizes = [64, 8], strides = [1, 1]} : vector<64x16xf32> to vector<64x8xf32>
    %79 = vector.extract_strided_slice %77 {offsets = [0, 8], sizes = [64, 8], strides = [1, 1]} : vector<64x16xf32> to vector<64x8xf32>
    %c0_31 = arith.constant 0 : index
    %c0_32 = arith.constant 0 : index
    %c0_33 = arith.constant 0 : index
    %80 = vector.load %arg9[%c0_31, %c0_32, %c0_33] : memref<1x8x64xf32, #tpu.memory_space<vmem>>, vector<1x8x64xf32>
    %81 = vector.shape_cast %80 : vector<1x8x64xf32> to vector<8x64xf32>
    %82 = vector.extract_strided_slice %81 {offsets = [0, 0], sizes = [1, 64], strides = [1, 1]} : vector<8x64xf32> to vector<1x64xf32>
    %83 = vector.broadcast %82 : vector<1x64xf32> to vector<64x64xf32>
    %84 = arith.mulf %73, %83 : vector<64x64xf32>
    %85 = math.exp %84 : vector<64x64xf32>
    %86 = vector.extract_strided_slice %78 {offsets = [0, 0], sizes = [64, 1], strides = [1, 1]} : vector<64x8xf32> to vector<64x1xf32>
    %87 = vector.broadcast %86 : vector<64x1xf32> to vector<64x64xf32>
    %88 = arith.mulf %74, %87 : vector<64x64xf32>
    %89 = vector.extract_strided_slice %85 {offsets = [0, 0], sizes = [16, 64], strides = [1, 1]} : vector<64x64xf32> to vector<16x64xf32>
    %c0_34 = arith.constant 0 : index
    %c0_35 = arith.constant 0 : index
    %90 = vector.load %arg12[%c0_34, %c0_35] : memref<512x64xf32, #tpu.memory_space<vmem>>, vector<16x64xf32>
    tpu.vector_store %arg12[%c0_34, %c0_35], %89 {strides = array<i32>} : memref<512x64xf32, #tpu.memory_space<vmem>>, vector<16x64xf32>,
    %91 = vector.extract_strided_slice %88 {offsets = [0, 0], sizes = [16, 64], strides = [1, 1]} : vector<64x64xf32> to vector<16x64xf32>
    %c0_36 = arith.constant 0 : index
    %c0_37 = arith.constant 0 : index
    %92 = vector.load %arg13[%c0_36, %c0_37] : memref<512x64xf32, #tpu.memory_space<vmem>>, vector<16x64xf32>
    tpu.vector_store %arg13[%c0_36, %c0_37], %91 {strides = array<i32>} : memref<512x64xf32, #tpu.memory_space<vmem>>, vector<16x64xf32>,
    %93 = vector.extract_strided_slice %85 {offsets = [16, 0], sizes = [16, 64], strides = [1, 1]} : vector<64x64xf32> to vector<16x64xf32>
    %c128 = arith.constant 128 : index
    %c0_38 = arith.constant 0 : index
    %94 = vector.load %arg12[%c128, %c0_38] : memref<512x64xf32, #tpu.memory_space<vmem>>, vector<16x64xf32>
    tpu.vector_store %arg12[%c128, %c0_38], %93 {strides = array<i32>} : memref<512x64xf32, #tpu.memory_space<vmem>>, vector<16x64xf32>,
    %95 = vector.extract_strided_slice %88 {offsets = [16, 0], sizes = [16, 64], strides = [1, 1]} : vector<64x64xf32> to vector<16x64xf32>
    %c128_39 = arith.constant 128 : index
    %c0_40 = arith.constant 0 : index
    %96 = vector.load %arg13[%c128_39, %c0_40] : memref<512x64xf32, #tpu.memory_space<vmem>>, vector<16x64xf32>
    tpu.vector_store %arg13[%c128_39, %c0_40], %95 {strides = array<i32>} : memref<512x64xf32, #tpu.memory_space<vmem>>, vector<16x64xf32>,
    %97 = vector.extract_strided_slice %85 {offsets = [32, 0], sizes = [16, 64], strides = [1, 1]} : vector<64x64xf32> to vector<16x64xf32>
    %c256 = arith.constant 256 : index
    %c0_41 = arith.constant 0 : index
    %98 = vector.load %arg12[%c256, %c0_41] : memref<512x64xf32, #tpu.memory_space<vmem>>, vector<16x64xf32>
    tpu.vector_store %arg12[%c256, %c0_41], %97 {strides = array<i32>} : memref<512x64xf32, #tpu.memory_space<vmem>>, vector<16x64xf32>,
    %99 = vector.extract_strided_slice %88 {offsets = [32, 0], sizes = [16, 64], strides = [1, 1]} : vector<64x64xf32> to vector<16x64xf32>
    %c256_42 = arith.constant 256 : index
    %c0_43 = arith.constant 0 : index
    %100 = vector.load %arg13[%c256_42, %c0_43] : memref<512x64xf32, #tpu.memory_space<vmem>>, vector<16x64xf32>
    tpu.vector_store %arg13[%c256_42, %c0_43], %99 {strides = array<i32>} : memref<512x64xf32, #tpu.memory_space<vmem>>, vector<16x64xf32>,
    %101 = vector.extract_strided_slice %85 {offsets = [48, 0], sizes = [16, 64], strides = [1, 1]} : vector<64x64xf32> to vector<16x64xf32>
    %c384 = arith.constant 384 : index
    %c0_44 = arith.constant 0 : index
    %102 = vector.load %arg12[%c384, %c0_44] : memref<512x64xf32, #tpu.memory_space<vmem>>, vector<16x64xf32>
    tpu.vector_store %arg12[%c384, %c0_44], %101 {strides = array<i32>} : memref<512x64xf32, #tpu.memory_space<vmem>>, vector<16x64xf32>,
    %103 = vector.extract_strided_slice %88 {offsets = [48, 0], sizes = [16, 64], strides = [1, 1]} : vector<64x64xf32> to vector<16x64xf32>
    %c384_45 = arith.constant 384 : index
    %c0_46 = arith.constant 0 : index
    %104 = vector.load %arg13[%c384_45, %c0_46] : memref<512x64xf32, #tpu.memory_space<vmem>>, vector<16x64xf32>
    tpu.vector_store %arg13[%c384_45, %c0_46], %103 {strides = array<i32>} : memref<512x64xf32, #tpu.memory_space<vmem>>, vector<16x64xf32>,
    %105 = vector.extract_strided_slice %81 {offsets = [1, 0], sizes = [1, 64], strides = [1, 1]} : vector<8x64xf32> to vector<1x64xf32>
    %106 = vector.broadcast %105 : vector<1x64xf32> to vector<64x64xf32>
    %107 = arith.mulf %73, %106 : vector<64x64xf32>
    %108 = math.exp %107 : vector<64x64xf32>
    %109 = vector.extract_strided_slice %78 {offsets = [0, 1], sizes = [64, 1], strides = [1, 1]} : vector<64x8xf32> to vector<64x1xf32>
    %110 = vector.broadcast %109 : vector<64x1xf32> to vector<64x64xf32>
    %111 = arith.mulf %74, %110 : vector<64x64xf32>
    %112 = vector.extract_strided_slice %108 {offsets = [0, 0], sizes = [16, 64], strides = [1, 1]} : vector<64x64xf32> to vector<16x64xf32>
    %c16 = arith.constant 16 : index
    %c0_47 = arith.constant 0 : index
    %113 = vector.load %arg12[%c16, %c0_47] : memref<512x64xf32, #tpu.memory_space<vmem>>, vector<16x64xf32>
    tpu.vector_store %arg12[%c16, %c0_47], %112 {strides = array<i32>} : memref<512x64xf32, #tpu.memory_space<vmem>>, vector<16x64xf32>,
    %114 = vector.extract_strided_slice %111 {offsets = [0, 0], sizes = [16, 64], strides = [1, 1]} : vector<64x64xf32> to vector<16x64xf32>
    %c16_48 = arith.constant 16 : index
    %c0_49 = arith.constant 0 : index
    %115 = vector.load %arg13[%c16_48, %c0_49] : memref<512x64xf32, #tpu.memory_space<vmem>>, vector<16x64xf32>
    tpu.vector_store %arg13[%c16_48, %c0_49], %114 {strides = array<i32>} : memref<512x64xf32, #tpu.memory_space<vmem>>, vector<16x64xf32>,
    %116 = vector.extract_strided_slice %108 {offsets = [16, 0], sizes = [16, 64], strides = [1, 1]} : vector<64x64xf32> to vector<16x64xf32>
    %c144 = arith.constant 144 : index
    %c0_50 = arith.constant 0 : index
    %117 = vector.load %arg12[%c144, %c0_50] : memref<512x64xf32, #tpu.memory_space<vmem>>, vector<16x64xf32>
    tpu.vector_store %arg12[%c144, %c0_50], %116 {strides = array<i32>} : memref<512x64xf32, #tpu.memory_space<vmem>>, vector<16x64xf32>,
    %118 = vector.extract_strided_slice %111 {offsets = [16, 0], sizes = [16, 64], strides = [1, 1]} : vector<64x64xf32> to vector<16x64xf32>
    %c144_51 = arith.constant 144 : index
    %c0_52 = arith.constant 0 : index
    %119 = vector.load %arg13[%c144_51, %c0_52] : memref<512x64xf32, #tpu.memory_space<vmem>>, vector<16x64xf32>
    tpu.vector_store %arg13[%c144_51, %c0_52], %118 {strides = array<i32>} : memref<512x64xf32, #tpu.memory_space<vmem>>, vector<16x64xf32>,
    %120 = vector.extract_strided_slice %108 {offsets = [32, 0], sizes = [16, 64], strides = [1, 1]} : vector<64x64xf32> to vector<16x64xf32>
    %c272 = arith.constant 272 : index
    %c0_53 = arith.constant 0 : index
    %121 = vector.load %arg12[%c272, %c0_53] : memref<512x64xf32, #tpu.memory_space<vmem>>, vector<16x64xf32>
    tpu.vector_store %arg12[%c272, %c0_53], %120 {strides = array<i32>} : memref<512x64xf32, #tpu.memory_space<vmem>>, vector<16x64xf32>,
    %122 = vector.extract_strided_slice %111 {offsets = [32, 0], sizes = [16, 64], strides = [1, 1]} : vector<64x64xf32> to vector<16x64xf32>
    %c272_54 = arith.constant 272 : index
    %c0_55 = arith.constant 0 : index
    %123 = vector.load %arg13[%c272_54, %c0_55] : memref<512x64xf32, #tpu.memory_space<vmem>>, vector<16x64xf32>
    tpu.vector_store %arg13[%c272_54, %c0_55], %122 {strides = array<i32>} : memref<512x64xf32, #tpu.memory_space<vmem>>, vector<16x64xf32>,
    %124 = vector.extract_strided_slice %108 {offsets = [48, 0], sizes = [16, 64], strides = [1, 1]} : vector<64x64xf32> to vector<16x64xf32>
    %c400 = arith.constant 400 : index
    %c0_56 = arith.constant 0 : index
    %125 = vector.load %arg12[%c400, %c0_56] : memref<512x64xf32, #tpu.memory_space<vmem>>, vector<16x64xf32>
    tpu.vector_store %arg12[%c400, %c0_56], %124 {strides = array<i32>} : memref<512x64xf32, #tpu.memory_space<vmem>>, vector<16x64xf32>,
    %126 = vector.extract_strided_slice %111 {offsets = [48, 0], sizes = [16, 64], strides = [1, 1]} : vector<64x64xf32> to vector<16x64xf32>
    %c400_57 = arith.constant 400 : index
    %c0_58 = arith.constant 0 : index
    %127 = vector.load %arg13[%c400_57, %c0_58] : memref<512x64xf32, #tpu.memory_space<vmem>>, vector<16x64xf32>
    tpu.vector_store %arg13[%c400_57, %c0_58], %126 {strides = array<i32>} : memref<512x64xf32, #tpu.memory_space<vmem>>, vector<16x64xf32>,
    %128 = vector.extract_strided_slice %81 {offsets = [2, 0], sizes = [1, 64], strides = [1, 1]} : vector<8x64xf32> to vector<1x64xf32>
    %129 = vector.broadcast %128 : vector<1x64xf32> to vector<64x64xf32>
    %130 = arith.mulf %73, %129 : vector<64x64xf32>
    %131 = math.exp %130 : vector<64x64xf32>
    %132 = vector.extract_strided_slice %78 {offsets = [0, 2], sizes = [64, 1], strides = [1, 1]} : vector<64x8xf32> to vector<64x1xf32>
    %133 = vector.broadcast %132 : vector<64x1xf32> to vector<64x64xf32>
    %134 = arith.mulf %74, %133 : vector<64x64xf32>
    %135 = vector.extract_strided_slice %131 {offsets = [0, 0], sizes = [16, 64], strides = [1, 1]} : vector<64x64xf32> to vector<16x64xf32>
    %c32 = arith.constant 32 : index
    %c0_59 = arith.constant 0 : index
    %136 = vector.load %arg12[%c32, %c0_59] : memref<512x64xf32, #tpu.memory_space<vmem>>, vector<16x64xf32>
    tpu.vector_store %arg12[%c32, %c0_59], %135 {strides = array<i32>} : memref<512x64xf32, #tpu.memory_space<vmem>>, vector<16x64xf32>,
    %137 = vector.extract_strided_slice %134 {offsets = [0, 0], sizes = [16, 64], strides = [1, 1]} : vector<64x64xf32> to vector<16x64xf32>
    %c32_60 = arith.constant 32 : index
    %c0_61 = arith.constant 0 : index
    %138 = vector.load %arg13[%c32_60, %c0_61] : memref<512x64xf32, #tpu.memory_space<vmem>>, vector<16x64xf32>
    tpu.vector_store %arg13[%c32_60, %c0_61], %137 {strides = array<i32>} : memref<512x64xf32, #tpu.memory_space<vmem>>, vector<16x64xf32>,
    %139 = vector.extract_strided_slice %131 {offsets = [16, 0], sizes = [16, 64], strides = [1, 1]} : vector<64x64xf32> to vector<16x64xf32>
    %c160 = arith.constant 160 : index
    %c0_62 = arith.constant 0 : index
    %140 = vector.load %arg12[%c160, %c0_62] : memref<512x64xf32, #tpu.memory_space<vmem>>, vector<16x64xf32>
    tpu.vector_store %arg12[%c160, %c0_62], %139 {strides = array<i32>} : memref<512x64xf32, #tpu.memory_space<vmem>>, vector<16x64xf32>,
    %141 = vector.extract_strided_slice %134 {offsets = [16, 0], sizes = [16, 64], strides = [1, 1]} : vector<64x64xf32> to vector<16x64xf32>
    %c160_63 = arith.constant 160 : index
    %c0_64 = arith.constant 0 : index
    %142 = vector.load %arg13[%c160_63, %c0_64] : memref<512x64xf32, #tpu.memory_space<vmem>>, vector<16x64xf32>
    tpu.vector_store %arg13[%c160_63, %c0_64], %141 {strides = array<i32>} : memref<512x64xf32, #tpu.memory_space<vmem>>, vector<16x64xf32>,
    %143 = vector.extract_strided_slice %131 {offsets = [32, 0], sizes = [16, 64], strides = [1, 1]} : vector<64x64xf32> to vector<16x64xf32>
    %c288 = arith.constant 288 : index
    %c0_65 = arith.constant 0 : index
    %144 = vector.load %arg12[%c288, %c0_65] : memref<512x64xf32, #tpu.memory_space<vmem>>, vector<16x64xf32>
    tpu.vector_store %arg12[%c288, %c0_65], %143 {strides = array<i32>} : memref<512x64xf32, #tpu.memory_space<vmem>>, vector<16x64xf32>,
    %145 = vector.extract_strided_slice %134 {offsets = [32, 0], sizes = [16, 64], strides = [1, 1]} : vector<64x64xf32> to vector<16x64xf32>
    %c288_66 = arith.constant 288 : index
    %c0_67 = arith.constant 0 : index
    %146 = vector.load %arg13[%c288_66, %c0_67] : memref<512x64xf32, #tpu.memory_space<vmem>>, vector<16x64xf32>
    tpu.vector_store %arg13[%c288_66, %c0_67], %145 {strides = array<i32>} : memref<512x64xf32, #tpu.memory_space<vmem>>, vector<16x64xf32>,
    %147 = vector.extract_strided_slice %131 {offsets = [48, 0], sizes = [16, 64], strides = [1, 1]} : vector<64x64xf32> to vector<16x64xf32>
    %c416 = arith.constant 416 : index
    %c0_68 = arith.constant 0 : index
    %148 = vector.load %arg12[%c416, %c0_68] : memref<512x64xf32, #tpu.memory_space<vmem>>, vector<16x64xf32>
    tpu.vector_store %arg12[%c416, %c0_68], %147 {strides = array<i32>} : memref<512x64xf32, #tpu.memory_space<vmem>>, vector<16x64xf32>,
    %149 = vector.extract_strided_slice %134 {offsets = [48, 0], sizes = [16, 64], strides = [1, 1]} : vector<64x64xf32> to vector<16x64xf32>
    %c416_69 = arith.constant 416 : index
    %c0_70 = arith.constant 0 : index
    %150 = vector.load %arg13[%c416_69, %c0_70] : memref<512x64xf32, #tpu.memory_space<vmem>>, vector<16x64xf32>
    tpu.vector_store %arg13[%c416_69, %c0_70], %149 {strides = array<i32>} : memref<512x64xf32, #tpu.memory_space<vmem>>, vector<16x64xf32>,
    %151 = vector.extract_strided_slice %81 {offsets = [3, 0], sizes = [1, 64], strides = [1, 1]} : vector<8x64xf32> to vector<1x64xf32>
    %152 = vector.broadcast %151 : vector<1x64xf32> to vector<64x64xf32>
    %153 = arith.mulf %73, %152 : vector<64x64xf32>
    %154 = math.exp %153 : vector<64x64xf32>
    %155 = vector.extract_strided_slice %78 {offsets = [0, 3], sizes = [64, 1], strides = [1, 1]} : vector<64x8xf32> to vector<64x1xf32>
    %156 = vector.broadcast %155 : vector<64x1xf32> to vector<64x64xf32>
    %157 = arith.mulf %74, %156 : vector<64x64xf32>
    %158 = vector.extract_strided_slice %154 {offsets = [0, 0], sizes = [16, 64], strides = [1, 1]} : vector<64x64xf32> to vector<16x64xf32>
    %c48 = arith.constant 48 : index
    %c0_71 = arith.constant 0 : index
    %159 = vector.load %arg12[%c48, %c0_71] : memref<512x64xf32, #tpu.memory_space<vmem>>, vector<16x64xf32>
    tpu.vector_store %arg12[%c48, %c0_71], %158 {strides = array<i32>} : memref<512x64xf32, #tpu.memory_space<vmem>>, vector<16x64xf32>,
    %160 = vector.extract_strided_slice %157 {offsets = [0, 0], sizes = [16, 64], strides = [1, 1]} : vector<64x64xf32> to vector<16x64xf32>
    %c48_72 = arith.constant 48 : index
    %c0_73 = arith.constant 0 : index
    %161 = vector.load %arg13[%c48_72, %c0_73] : memref<512x64xf32, #tpu.memory_space<vmem>>, vector<16x64xf32>
    tpu.vector_store %arg13[%c48_72, %c0_73], %160 {strides = array<i32>} : memref<512x64xf32, #tpu.memory_space<vmem>>, vector<16x64xf32>,
    %162 = vector.extract_strided_slice %154 {offsets = [16, 0], sizes = [16, 64], strides = [1, 1]} : vector<64x64xf32> to vector<16x64xf32>
    %c176 = arith.constant 176 : index
    %c0_74 = arith.constant 0 : index
    %163 = vector.load %arg12[%c176, %c0_74] : memref<512x64xf32, #tpu.memory_space<vmem>>, vector<16x64xf32>
    tpu.vector_store %arg12[%c176, %c0_74], %162 {strides = array<i32>} : memref<512x64xf32, #tpu.memory_space<vmem>>, vector<16x64xf32>,
    %164 = vector.extract_strided_slice %157 {offsets = [16, 0], sizes = [16, 64], strides = [1, 1]} : vector<64x64xf32> to vector<16x64xf32>
    %c176_75 = arith.constant 176 : index
    %c0_76 = arith.constant 0 : index
    %165 = vector.load %arg13[%c176_75, %c0_76] : memref<512x64xf32, #tpu.memory_space<vmem>>, vector<16x64xf32>
    tpu.vector_store %arg13[%c176_75, %c0_76], %164 {strides = array<i32>} : memref<512x64xf32, #tpu.memory_space<vmem>>, vector<16x64xf32>,
    %166 = vector.extract_strided_slice %154 {offsets = [32, 0], sizes = [16, 64], strides = [1, 1]} : vector<64x64xf32> to vector<16x64xf32>
    %c304 = arith.constant 304 : index
    %c0_77 = arith.constant 0 : index
    %167 = vector.load %arg12[%c304, %c0_77] : memref<512x64xf32, #tpu.memory_space<vmem>>, vector<16x64xf32>
    tpu.vector_store %arg12[%c304, %c0_77], %166 {strides = array<i32>} : memref<512x64xf32, #tpu.memory_space<vmem>>, vector<16x64xf32>,
    %168 = vector.extract_strided_slice %157 {offsets = [32, 0], sizes = [16, 64], strides = [1, 1]} : vector<64x64xf32> to vector<16x64xf32>
    %c304_78 = arith.constant 304 : index
    %c0_79 = arith.constant 0 : index
    %169 = vector.load %arg13[%c304_78, %c0_79] : memref<512x64xf32, #tpu.memory_space<vmem>>, vector<16x64xf32>
    tpu.vector_store %arg13[%c304_78, %c0_79], %168 {strides = array<i32>} : memref<512x64xf32, #tpu.memory_space<vmem>>, vector<16x64xf32>,
    %170 = vector.extract_strided_slice %154 {offsets = [48, 0], sizes = [16, 64], strides = [1, 1]} : vector<64x64xf32> to vector<16x64xf32>
    %c432 = arith.constant 432 : index
    %c0_80 = arith.constant 0 : index
    %171 = vector.load %arg12[%c432, %c0_80] : memref<512x64xf32, #tpu.memory_space<vmem>>, vector<16x64xf32>
    tpu.vector_store %arg12[%c432, %c0_80], %170 {strides = array<i32>} : memref<512x64xf32, #tpu.memory_space<vmem>>, vector<16x64xf32>,
    %172 = vector.extract_strided_slice %157 {offsets = [48, 0], sizes = [16, 64], strides = [1, 1]} : vector<64x64xf32> to vector<16x64xf32>
    %c432_81 = arith.constant 432 : index
    %c0_82 = arith.constant 0 : index
    %173 = vector.load %arg13[%c432_81, %c0_82] : memref<512x64xf32, #tpu.memory_space<vmem>>, vector<16x64xf32>
    tpu.vector_store %arg13[%c432_81, %c0_82], %172 {strides = array<i32>} : memref<512x64xf32, #tpu.memory_space<vmem>>, vector<16x64xf32>,
    %174 = vector.extract_strided_slice %81 {offsets = [4, 0], sizes = [1, 64], strides = [1, 1]} : vector<8x64xf32> to vector<1x64xf32>
    %175 = vector.broadcast %174 : vector<1x64xf32> to vector<64x64xf32>
    %176 = arith.mulf %73, %175 : vector<64x64xf32>
    %177 = math.exp %176 : vector<64x64xf32>
    %178 = vector.extract_strided_slice %78 {offsets = [0, 4], sizes = [64, 1], strides = [1, 1]} : vector<64x8xf32> to vector<64x1xf32>
    %179 = vector.broadcast %178 : vector<64x1xf32> to vector<64x64xf32>
    %180 = arith.mulf %74, %179 : vector<64x64xf32>
    %181 = vector.extract_strided_slice %177 {offsets = [0, 0], sizes = [16, 64], strides = [1, 1]} : vector<64x64xf32> to vector<16x64xf32>
    %c64 = arith.constant 64 : index
    %c0_83 = arith.constant 0 : index
    %182 = vector.load %arg12[%c64, %c0_83] : memref<512x64xf32, #tpu.memory_space<vmem>>, vector<16x64xf32>
    tpu.vector_store %arg12[%c64, %c0_83], %181 {strides = array<i32>} : memref<512x64xf32, #tpu.memory_space<vmem>>, vector<16x64xf32>,
    %183 = vector.extract_strided_slice %180 {offsets = [0, 0], sizes = [16, 64], strides = [1, 1]} : vector<64x64xf32> to vector<16x64xf32>
    %c64_84 = arith.constant 64 : index
    %c0_85 = arith.constant 0 : index
    %184 = vector.load %arg13[%c64_84, %c0_85] : memref<512x64xf32, #tpu.memory_space<vmem>>, vector<16x64xf32>
    tpu.vector_store %arg13[%c64_84, %c0_85], %183 {strides = array<i32>} : memref<512x64xf32, #tpu.memory_space<vmem>>, vector<16x64xf32>,
    %185 = vector.extract_strided_slice %177 {offsets = [16, 0], sizes = [16, 64], strides = [1, 1]} : vector<64x64xf32> to vector<16x64xf32>
    %c192 = arith.constant 192 : index
    %c0_86 = arith.constant 0 : index
    %186 = vector.load %arg12[%c192, %c0_86] : memref<512x64xf32, #tpu.memory_space<vmem>>, vector<16x64xf32>
    tpu.vector_store %arg12[%c192, %c0_86], %185 {strides = array<i32>} : memref<512x64xf32, #tpu.memory_space<vmem>>, vector<16x64xf32>,
    %187 = vector.extract_strided_slice %180 {offsets = [16, 0], sizes = [16, 64], strides = [1, 1]} : vector<64x64xf32> to vector<16x64xf32>
    %c192_87 = arith.constant 192 : index
    %c0_88 = arith.constant 0 : index
    %188 = vector.load %arg13[%c192_87, %c0_88] : memref<512x64xf32, #tpu.memory_space<vmem>>, vector<16x64xf32>
    tpu.vector_store %arg13[%c192_87, %c0_88], %187 {strides = array<i32>} : memref<512x64xf32, #tpu.memory_space<vmem>>, vector<16x64xf32>,
    %189 = vector.extract_strided_slice %177 {offsets = [32, 0], sizes = [16, 64], strides = [1, 1]} : vector<64x64xf32> to vector<16x64xf32>
    %c320 = arith.constant 320 : index
    %c0_89 = arith.constant 0 : index
    %190 = vector.load %arg12[%c320, %c0_89] : memref<512x64xf32, #tpu.memory_space<vmem>>, vector<16x64xf32>
    tpu.vector_store %arg12[%c320, %c0_89], %189 {strides = array<i32>} : memref<512x64xf32, #tpu.memory_space<vmem>>, vector<16x64xf32>,
    %191 = vector.extract_strided_slice %180 {offsets = [32, 0], sizes = [16, 64], strides = [1, 1]} : vector<64x64xf32> to vector<16x64xf32>
    %c320_90 = arith.constant 320 : index
    %c0_91 = arith.constant 0 : index
    %192 = vector.load %arg13[%c320_90, %c0_91] : memref<512x64xf32, #tpu.memory_space<vmem>>, vector<16x64xf32>
    tpu.vector_store %arg13[%c320_90, %c0_91], %191 {strides = array<i32>} : memref<512x64xf32, #tpu.memory_space<vmem>>, vector<16x64xf32>,
    %193 = vector.extract_strided_slice %177 {offsets = [48, 0], sizes = [16, 64], strides = [1, 1]} : vector<64x64xf32> to vector<16x64xf32>
    %c448 = arith.constant 448 : index
    %c0_92 = arith.constant 0 : index
    %194 = vector.load %arg12[%c448, %c0_92] : memref<512x64xf32, #tpu.memory_space<vmem>>, vector<16x64xf32>
    tpu.vector_store %arg12[%c448, %c0_92], %193 {strides = array<i32>} : memref<512x64xf32, #tpu.memory_space<vmem>>, vector<16x64xf32>,
    %195 = vector.extract_strided_slice %180 {offsets = [48, 0], sizes = [16, 64], strides = [1, 1]} : vector<64x64xf32> to vector<16x64xf32>
    %c448_93 = arith.constant 448 : index
    %c0_94 = arith.constant 0 : index
    %196 = vector.load %arg13[%c448_93, %c0_94] : memref<512x64xf32, #tpu.memory_space<vmem>>, vector<16x64xf32>
    tpu.vector_store %arg13[%c448_93, %c0_94], %195 {strides = array<i32>} : memref<512x64xf32, #tpu.memory_space<vmem>>, vector<16x64xf32>,
    %197 = vector.extract_strided_slice %81 {offsets = [5, 0], sizes = [1, 64], strides = [1, 1]} : vector<8x64xf32> to vector<1x64xf32>
    %198 = vector.broadcast %197 : vector<1x64xf32> to vector<64x64xf32>
    %199 = arith.mulf %73, %198 : vector<64x64xf32>
    %200 = math.exp %199 : vector<64x64xf32>
    %201 = vector.extract_strided_slice %78 {offsets = [0, 5], sizes = [64, 1], strides = [1, 1]} : vector<64x8xf32> to vector<64x1xf32>
    %202 = vector.broadcast %201 : vector<64x1xf32> to vector<64x64xf32>
    %203 = arith.mulf %74, %202 : vector<64x64xf32>
    %204 = vector.extract_strided_slice %200 {offsets = [0, 0], sizes = [16, 64], strides = [1, 1]} : vector<64x64xf32> to vector<16x64xf32>
    %c80 = arith.constant 80 : index
    %c0_95 = arith.constant 0 : index
    %205 = vector.load %arg12[%c80, %c0_95] : memref<512x64xf32, #tpu.memory_space<vmem>>, vector<16x64xf32>
    tpu.vector_store %arg12[%c80, %c0_95], %204 {strides = array<i32>} : memref<512x64xf32, #tpu.memory_space<vmem>>, vector<16x64xf32>,
    %206 = vector.extract_strided_slice %203 {offsets = [0, 0], sizes = [16, 64], strides = [1, 1]} : vector<64x64xf32> to vector<16x64xf32>
    %c80_96 = arith.constant 80 : index
    %c0_97 = arith.constant 0 : index
    %207 = vector.load %arg13[%c80_96, %c0_97] : memref<512x64xf32, #tpu.memory_space<vmem>>, vector<16x64xf32>
    tpu.vector_store %arg13[%c80_96, %c0_97], %206 {strides = array<i32>} : memref<512x64xf32, #tpu.memory_space<vmem>>, vector<16x64xf32>,
    %208 = vector.extract_strided_slice %200 {offsets = [16, 0], sizes = [16, 64], strides = [1, 1]} : vector<64x64xf32> to vector<16x64xf32>
    %c208 = arith.constant 208 : index
    %c0_98 = arith.constant 0 : index
    %209 = vector.load %arg12[%c208, %c0_98] : memref<512x64xf32, #tpu.memory_space<vmem>>, vector<16x64xf32>
    tpu.vector_store %arg12[%c208, %c0_98], %208 {strides = array<i32>} : memref<512x64xf32, #tpu.memory_space<vmem>>, vector<16x64xf32>,
    %210 = vector.extract_strided_slice %203 {offsets = [16, 0], sizes = [16, 64], strides = [1, 1]} : vector<64x64xf32> to vector<16x64xf32>
    %c208_99 = arith.constant 208 : index
    %c0_100 = arith.constant 0 : index
    %211 = vector.load %arg13[%c208_99, %c0_100] : memref<512x64xf32, #tpu.memory_space<vmem>>, vector<16x64xf32>
    tpu.vector_store %arg13[%c208_99, %c0_100], %210 {strides = array<i32>} : memref<512x64xf32, #tpu.memory_space<vmem>>, vector<16x64xf32>,
    %212 = vector.extract_strided_slice %200 {offsets = [32, 0], sizes = [16, 64], strides = [1, 1]} : vector<64x64xf32> to vector<16x64xf32>
    %c336 = arith.constant 336 : index
    %c0_101 = arith.constant 0 : index
    %213 = vector.load %arg12[%c336, %c0_101] : memref<512x64xf32, #tpu.memory_space<vmem>>, vector<16x64xf32>
    tpu.vector_store %arg12[%c336, %c0_101], %212 {strides = array<i32>} : memref<512x64xf32, #tpu.memory_space<vmem>>, vector<16x64xf32>,
    %214 = vector.extract_strided_slice %203 {offsets = [32, 0], sizes = [16, 64], strides = [1, 1]} : vector<64x64xf32> to vector<16x64xf32>
    %c336_102 = arith.constant 336 : index
    %c0_103 = arith.constant 0 : index
    %215 = vector.load %arg13[%c336_102, %c0_103] : memref<512x64xf32, #tpu.memory_space<vmem>>, vector<16x64xf32>
    tpu.vector_store %arg13[%c336_102, %c0_103], %214 {strides = array<i32>} : memref<512x64xf32, #tpu.memory_space<vmem>>, vector<16x64xf32>,
    %216 = vector.extract_strided_slice %200 {offsets = [48, 0], sizes = [16, 64], strides = [1, 1]} : vector<64x64xf32> to vector<16x64xf32>
    %c464 = arith.constant 464 : index
    %c0_104 = arith.constant 0 : index
    %217 = vector.load %arg12[%c464, %c0_104] : memref<512x64xf32, #tpu.memory_space<vmem>>, vector<16x64xf32>
    tpu.vector_store %arg12[%c464, %c0_104], %216 {strides = array<i32>} : memref<512x64xf32, #tpu.memory_space<vmem>>, vector<16x64xf32>,
    %218 = vector.extract_strided_slice %203 {offsets = [48, 0], sizes = [16, 64], strides = [1, 1]} : vector<64x64xf32> to vector<16x64xf32>
    %c464_105 = arith.constant 464 : index
    %c0_106 = arith.constant 0 : index
    %219 = vector.load %arg13[%c464_105, %c0_106] : memref<512x64xf32, #tpu.memory_space<vmem>>, vector<16x64xf32>
    tpu.vector_store %arg13[%c464_105, %c0_106], %218 {strides = array<i32>} : memref<512x64xf32, #tpu.memory_space<vmem>>, vector<16x64xf32>,
    %220 = vector.extract_strided_slice %81 {offsets = [6, 0], sizes = [1, 64], strides = [1, 1]} : vector<8x64xf32> to vector<1x64xf32>
    %221 = vector.broadcast %220 : vector<1x64xf32> to vector<64x64xf32>
    %222 = arith.mulf %73, %221 : vector<64x64xf32>
    %223 = math.exp %222 : vector<64x64xf32>
    %224 = vector.extract_strided_slice %78 {offsets = [0, 6], sizes = [64, 1], strides = [1, 1]} : vector<64x8xf32> to vector<64x1xf32>
    %225 = vector.broadcast %224 : vector<64x1xf32> to vector<64x64xf32>
    %226 = arith.mulf %74, %225 : vector<64x64xf32>
    %227 = vector.extract_strided_slice %223 {offsets = [0, 0], sizes = [16, 64], strides = [1, 1]} : vector<64x64xf32> to vector<16x64xf32>
    %c96 = arith.constant 96 : index
    %c0_107 = arith.constant 0 : index
    %228 = vector.load %arg12[%c96, %c0_107] : memref<512x64xf32, #tpu.memory_space<vmem>>, vector<16x64xf32>
    tpu.vector_store %arg12[%c96, %c0_107], %227 {strides = array<i32>} : memref<512x64xf32, #tpu.memory_space<vmem>>, vector<16x64xf32>,
    %229 = vector.extract_strided_slice %226 {offsets = [0, 0], sizes = [16, 64], strides = [1, 1]} : vector<64x64xf32> to vector<16x64xf32>
    %c96_108 = arith.constant 96 : index
    %c0_109 = arith.constant 0 : index
    %230 = vector.load %arg13[%c96_108, %c0_109] : memref<512x64xf32, #tpu.memory_space<vmem>>, vector<16x64xf32>
    tpu.vector_store %arg13[%c96_108, %c0_109], %229 {strides = array<i32>} : memref<512x64xf32, #tpu.memory_space<vmem>>, vector<16x64xf32>,
    %231 = vector.extract_strided_slice %223 {offsets = [16, 0], sizes = [16, 64], strides = [1, 1]} : vector<64x64xf32> to vector<16x64xf32>
    %c224 = arith.constant 224 : index
    %c0_110 = arith.constant 0 : index
    %232 = vector.load %arg12[%c224, %c0_110] : memref<512x64xf32, #tpu.memory_space<vmem>>, vector<16x64xf32>
    tpu.vector_store %arg12[%c224, %c0_110], %231 {strides = array<i32>} : memref<512x64xf32, #tpu.memory_space<vmem>>, vector<16x64xf32>,
    %233 = vector.extract_strided_slice %226 {offsets = [16, 0], sizes = [16, 64], strides = [1, 1]} : vector<64x64xf32> to vector<16x64xf32>
    %c224_111 = arith.constant 224 : index
    %c0_112 = arith.constant 0 : index
    %234 = vector.load %arg13[%c224_111, %c0_112] : memref<512x64xf32, #tpu.memory_space<vmem>>, vector<16x64xf32>
    tpu.vector_store %arg13[%c224_111, %c0_112], %233 {strides = array<i32>} : memref<512x64xf32, #tpu.memory_space<vmem>>, vector<16x64xf32>,
    %235 = vector.extract_strided_slice %223 {offsets = [32, 0], sizes = [16, 64], strides = [1, 1]} : vector<64x64xf32> to vector<16x64xf32>
    %c352 = arith.constant 352 : index
    %c0_113 = arith.constant 0 : index
    %236 = vector.load %arg12[%c352, %c0_113] : memref<512x64xf32, #tpu.memory_space<vmem>>, vector<16x64xf32>
    tpu.vector_store %arg12[%c352, %c0_113], %235 {strides = array<i32>} : memref<512x64xf32, #tpu.memory_space<vmem>>, vector<16x64xf32>,
    %237 = vector.extract_strided_slice %226 {offsets = [32, 0], sizes = [16, 64], strides = [1, 1]} : vector<64x64xf32> to vector<16x64xf32>
    %c352_114 = arith.constant 352 : index
    %c0_115 = arith.constant 0 : index
    %238 = vector.load %arg13[%c352_114, %c0_115] : memref<512x64xf32, #tpu.memory_space<vmem>>, vector<16x64xf32>
    tpu.vector_store %arg13[%c352_114, %c0_115], %237 {strides = array<i32>} : memref<512x64xf32, #tpu.memory_space<vmem>>, vector<16x64xf32>,
    %239 = vector.extract_strided_slice %223 {offsets = [48, 0], sizes = [16, 64], strides = [1, 1]} : vector<64x64xf32> to vector<16x64xf32>
    %c480 = arith.constant 480 : index
    %c0_116 = arith.constant 0 : index
    %240 = vector.load %arg12[%c480, %c0_116] : memref<512x64xf32, #tpu.memory_space<vmem>>, vector<16x64xf32>
    tpu.vector_store %arg12[%c480, %c0_116], %239 {strides = array<i32>} : memref<512x64xf32, #tpu.memory_space<vmem>>, vector<16x64xf32>,
    %241 = vector.extract_strided_slice %226 {offsets = [48, 0], sizes = [16, 64], strides = [1, 1]} : vector<64x64xf32> to vector<16x64xf32>
    %c480_117 = arith.constant 480 : index
    %c0_118 = arith.constant 0 : index
    %242 = vector.load %arg13[%c480_117, %c0_118] : memref<512x64xf32, #tpu.memory_space<vmem>>, vector<16x64xf32>
    tpu.vector_store %arg13[%c480_117, %c0_118], %241 {strides = array<i32>} : memref<512x64xf32, #tpu.memory_space<vmem>>, vector<16x64xf32>,
    %243 = vector.extract_strided_slice %81 {offsets = [7, 0], sizes = [1, 64], strides = [1, 1]} : vector<8x64xf32> to vector<1x64xf32>
    %244 = vector.broadcast %243 : vector<1x64xf32> to vector<64x64xf32>
    %245 = arith.mulf %73, %244 : vector<64x64xf32>
    %246 = math.exp %245 : vector<64x64xf32>
    %247 = vector.extract_strided_slice %78 {offsets = [0, 7], sizes = [64, 1], strides = [1, 1]} : vector<64x8xf32> to vector<64x1xf32>
    %248 = vector.broadcast %247 : vector<64x1xf32> to vector<64x64xf32>
    %249 = arith.mulf %74, %248 : vector<64x64xf32>
    %250 = vector.extract_strided_slice %246 {offsets = [0, 0], sizes = [16, 64], strides = [1, 1]} : vector<64x64xf32> to vector<16x64xf32>
    %c112 = arith.constant 112 : index
    %c0_119 = arith.constant 0 : index
    %251 = vector.load %arg12[%c112, %c0_119] : memref<512x64xf32, #tpu.memory_space<vmem>>, vector<16x64xf32>
    tpu.vector_store %arg12[%c112, %c0_119], %250 {strides = array<i32>} : memref<512x64xf32, #tpu.memory_space<vmem>>, vector<16x64xf32>,
    %252 = vector.extract_strided_slice %249 {offsets = [0, 0], sizes = [16, 64], strides = [1, 1]} : vector<64x64xf32> to vector<16x64xf32>
    %c112_120 = arith.constant 112 : index
    %c0_121 = arith.constant 0 : index
    %253 = vector.load %arg13[%c112_120, %c0_121] : memref<512x64xf32, #tpu.memory_space<vmem>>, vector<16x64xf32>
    tpu.vector_store %arg13[%c112_120, %c0_121], %252 {strides = array<i32>} : memref<512x64xf32, #tpu.memory_space<vmem>>, vector<16x64xf32>,
    %254 = vector.extract_strided_slice %246 {offsets = [16, 0], sizes = [16, 64], strides = [1, 1]} : vector<64x64xf32> to vector<16x64xf32>
    %c240 = arith.constant 240 : index
    %c0_122 = arith.constant 0 : index
    %255 = vector.load %arg12[%c240, %c0_122] : memref<512x64xf32, #tpu.memory_space<vmem>>, vector<16x64xf32>
    tpu.vector_store %arg12[%c240, %c0_122], %254 {strides = array<i32>} : memref<512x64xf32, #tpu.memory_space<vmem>>, vector<16x64xf32>,
    %256 = vector.extract_strided_slice %249 {offsets = [16, 0], sizes = [16, 64], strides = [1, 1]} : vector<64x64xf32> to vector<16x64xf32>
    %c240_123 = arith.constant 240 : index
    %c0_124 = arith.constant 0 : index
    %257 = vector.load %arg13[%c240_123, %c0_124] : memref<512x64xf32, #tpu.memory_space<vmem>>, vector<16x64xf32>
    tpu.vector_store %arg13[%c240_123, %c0_124], %256 {strides = array<i32>} : memref<512x64xf32, #tpu.memory_space<vmem>>, vector<16x64xf32>,
    %258 = vector.extract_strided_slice %246 {offsets = [32, 0], sizes = [16, 64], strides = [1, 1]} : vector<64x64xf32> to vector<16x64xf32>
    %c368 = arith.constant 368 : index
    %c0_125 = arith.constant 0 : index
    %259 = vector.load %arg12[%c368, %c0_125] : memref<512x64xf32, #tpu.memory_space<vmem>>, vector<16x64xf32>
    tpu.vector_store %arg12[%c368, %c0_125], %258 {strides = array<i32>} : memref<512x64xf32, #tpu.memory_space<vmem>>, vector<16x64xf32>,
    %260 = vector.extract_strided_slice %249 {offsets = [32, 0], sizes = [16, 64], strides = [1, 1]} : vector<64x64xf32> to vector<16x64xf32>
    %c368_126 = arith.constant 368 : index
    %c0_127 = arith.constant 0 : index
    %261 = vector.load %arg13[%c368_126, %c0_127] : memref<512x64xf32, #tpu.memory_space<vmem>>, vector<16x64xf32>
    tpu.vector_store %arg13[%c368_126, %c0_127], %260 {strides = array<i32>} : memref<512x64xf32, #tpu.memory_space<vmem>>, vector<16x64xf32>,
    %262 = vector.extract_strided_slice %246 {offsets = [48, 0], sizes = [16, 64], strides = [1, 1]} : vector<64x64xf32> to vector<16x64xf32>
    %c496 = arith.constant 496 : index
    %c0_128 = arith.constant 0 : index
    %263 = vector.load %arg12[%c496, %c0_128] : memref<512x64xf32, #tpu.memory_space<vmem>>, vector<16x64xf32>
    tpu.vector_store %arg12[%c496, %c0_128], %262 {strides = array<i32>} : memref<512x64xf32, #tpu.memory_space<vmem>>, vector<16x64xf32>,
    %264 = vector.extract_strided_slice %249 {offsets = [48, 0], sizes = [16, 64], strides = [1, 1]} : vector<64x64xf32> to vector<16x64xf32>
    %c496_129 = arith.constant 496 : index
    %c0_130 = arith.constant 0 : index
    %265 = vector.load %arg13[%c496_129, %c0_130] : memref<512x64xf32, #tpu.memory_space<vmem>>, vector<16x64xf32>
    tpu.vector_store %arg13[%c496_129, %c0_130], %264 {strides = array<i32>} : memref<512x64xf32, #tpu.memory_space<vmem>>, vector<16x64xf32>,
    %cst_131 = arith.constant 0.000000e+00 : f32
    %266 = vector.broadcast %cst_131 : f32 to vector<32x64xf32>
    %c0_i32 = arith.constant 0 : i32
    %267 = arith.index_cast %c0_i32 : i32 to index
    %c0_132 = arith.constant 0 : index
    %268 = tpu.strided_load %arg12[%267, %c0_132] {strides = array<i32: 16, 1>} : memref<512x64xf32, #tpu.memory_space<vmem>>, vector<32x64xf32>
    %269 = arith.index_cast %c0_i32 : i32 to index
    %c0_133 = arith.constant 0 : index
    %270 = tpu.strided_load %arg13[%269, %c0_133] {strides = array<i32: 16, 1>} : memref<512x64xf32, #tpu.memory_space<vmem>>, vector<32x64xf32>
    %271 = arith.mulf %268, %266 : vector<32x64xf32>
    %272 = arith.addf %271, %270 : vector<32x64xf32>
    %c32_i32 = arith.constant 32 : i32
    %273 = arith.muli %c0_i32, %c32_i32 : i32
    %274 = tpu.assume_multiple %273, 32 : i32
    %275 = arith.index_cast %274 : i32 to index
    %c0_134 = arith.constant 0 : index
    %276 = vector.load %arg14[%275, %c0_134] : memref<512x64xf32, #tpu.memory_space<vmem>>, vector<32x64xf32>
    tpu.vector_store %arg14[%275, %c0_134], %272 {strides = array<i32>} : memref<512x64xf32, #tpu.memory_space<vmem>>, vector<32x64xf32>,
    %c1_i32_135 = arith.constant 1 : i32
    %277 = arith.index_cast %c1_i32_135 : i32 to index
    %c0_136 = arith.constant 0 : index
    %278 = tpu.strided_load %arg12[%277, %c0_136] {strides = array<i32: 16, 1>} : memref<512x64xf32, #tpu.memory_space<vmem>>, vector<32x64xf32>
    %279 = arith.index_cast %c1_i32_135 : i32 to index
    %c0_137 = arith.constant 0 : index
    %280 = tpu.strided_load %arg13[%279, %c0_137] {strides = array<i32: 16, 1>} : memref<512x64xf32, #tpu.memory_space<vmem>>, vector<32x64xf32>
    %281 = arith.mulf %278, %272 : vector<32x64xf32>
    %282 = arith.addf %281, %280 : vector<32x64xf32>
    %c32_i32_138 = arith.constant 32 : i32
    %283 = arith.muli %c1_i32_135, %c32_i32_138 : i32
    %284 = tpu.assume_multiple %283, 32 : i32
    %285 = arith.index_cast %284 : i32 to index
    %c0_139 = arith.constant 0 : index
    %286 = vector.load %arg14[%285, %c0_139] : memref<512x64xf32, #tpu.memory_space<vmem>>, vector<32x64xf32>
    tpu.vector_store %arg14[%285, %c0_139], %282 {strides = array<i32>} : memref<512x64xf32, #tpu.memory_space<vmem>>, vector<32x64xf32>,
    %c2_i32_140 = arith.constant 2 : i32
    %287 = arith.index_cast %c2_i32_140 : i32 to index
    %c0_141 = arith.constant 0 : index
    %288 = tpu.strided_load %arg12[%287, %c0_141] {strides = array<i32: 16, 1>} : memref<512x64xf32, #tpu.memory_space<vmem>>, vector<32x64xf32>
    %289 = arith.index_cast %c2_i32_140 : i32 to index
    %c0_142 = arith.constant 0 : index
    %290 = tpu.strided_load %arg13[%289, %c0_142] {strides = array<i32: 16, 1>} : memref<512x64xf32, #tpu.memory_space<vmem>>, vector<32x64xf32>
    %291 = arith.mulf %288, %282 : vector<32x64xf32>
    %292 = arith.addf %291, %290 : vector<32x64xf32>
    %c32_i32_143 = arith.constant 32 : i32
    %293 = arith.muli %c2_i32_140, %c32_i32_143 : i32
    %294 = tpu.assume_multiple %293, 32 : i32
    %295 = arith.index_cast %294 : i32 to index
    %c0_144 = arith.constant 0 : index
    %296 = vector.load %arg14[%295, %c0_144] : memref<512x64xf32, #tpu.memory_space<vmem>>, vector<32x64xf32>
    tpu.vector_store %arg14[%295, %c0_144], %292 {strides = array<i32>} : memref<512x64xf32, #tpu.memory_space<vmem>>, vector<32x64xf32>,
    %c3_i32_145 = arith.constant 3 : i32
    %297 = arith.index_cast %c3_i32_145 : i32 to index
    %c0_146 = arith.constant 0 : index
    %298 = tpu.strided_load %arg12[%297, %c0_146] {strides = array<i32: 16, 1>} : memref<512x64xf32, #tpu.memory_space<vmem>>, vector<32x64xf32>
    %299 = arith.index_cast %c3_i32_145 : i32 to index
    %c0_147 = arith.constant 0 : index
    %300 = tpu.strided_load %arg13[%299, %c0_147] {strides = array<i32: 16, 1>} : memref<512x64xf32, #tpu.memory_space<vmem>>, vector<32x64xf32>
    %301 = arith.mulf %298, %292 : vector<32x64xf32>
    %302 = arith.addf %301, %300 : vector<32x64xf32>
    %c32_i32_148 = arith.constant 32 : i32
    %303 = arith.muli %c3_i32_145, %c32_i32_148 : i32
    %304 = tpu.assume_multiple %303, 32 : i32
    %305 = arith.index_cast %304 : i32 to index
    %c0_149 = arith.constant 0 : index
    %306 = vector.load %arg14[%305, %c0_149] : memref<512x64xf32, #tpu.memory_space<vmem>>, vector<32x64xf32>
    tpu.vector_store %arg14[%305, %c0_149], %302 {strides = array<i32>} : memref<512x64xf32, #tpu.memory_space<vmem>>, vector<32x64xf32>,
    %c4_i32 = arith.constant 4 : i32
    %307 = arith.index_cast %c4_i32 : i32 to index
    %c0_150 = arith.constant 0 : index
    %308 = tpu.strided_load %arg12[%307, %c0_150] {strides = array<i32: 16, 1>} : memref<512x64xf32, #tpu.memory_space<vmem>>, vector<32x64xf32>
    %309 = arith.index_cast %c4_i32 : i32 to index
    %c0_151 = arith.constant 0 : index
    %310 = tpu.strided_load %arg13[%309, %c0_151] {strides = array<i32: 16, 1>} : memref<512x64xf32, #tpu.memory_space<vmem>>, vector<32x64xf32>
    %311 = arith.mulf %308, %302 : vector<32x64xf32>
    %312 = arith.addf %311, %310 : vector<32x64xf32>
    %c32_i32_152 = arith.constant 32 : i32
    %313 = arith.muli %c4_i32, %c32_i32_152 : i32
    %314 = tpu.assume_multiple %313, 32 : i32
    %315 = arith.index_cast %314 : i32 to index
    %c0_153 = arith.constant 0 : index
    %316 = vector.load %arg14[%315, %c0_153] : memref<512x64xf32, #tpu.memory_space<vmem>>, vector<32x64xf32>
    tpu.vector_store %arg14[%315, %c0_153], %312 {strides = array<i32>} : memref<512x64xf32, #tpu.memory_space<vmem>>, vector<32x64xf32>,
    %c5_i32 = arith.constant 5 : i32
    %317 = arith.index_cast %c5_i32 : i32 to index
    %c0_154 = arith.constant 0 : index
    %318 = tpu.strided_load %arg12[%317, %c0_154] {strides = array<i32: 16, 1>} : memref<512x64xf32, #tpu.memory_space<vmem>>, vector<32x64xf32>
    %319 = arith.index_cast %c5_i32 : i32 to index
    %c0_155 = arith.constant 0 : index
    %320 = tpu.strided_load %arg13[%319, %c0_155] {strides = array<i32: 16, 1>} : memref<512x64xf32, #tpu.memory_space<vmem>>, vector<32x64xf32>
    %321 = arith.mulf %318, %312 : vector<32x64xf32>
    %322 = arith.addf %321, %320 : vector<32x64xf32>
    %c32_i32_156 = arith.constant 32 : i32
    %323 = arith.muli %c5_i32, %c32_i32_156 : i32
    %324 = tpu.assume_multiple %323, 32 : i32
    %325 = arith.index_cast %324 : i32 to index
    %c0_157 = arith.constant 0 : index
    %326 = vector.load %arg14[%325, %c0_157] : memref<512x64xf32, #tpu.memory_space<vmem>>, vector<32x64xf32>
    tpu.vector_store %arg14[%325, %c0_157], %322 {strides = array<i32>} : memref<512x64xf32, #tpu.memory_space<vmem>>, vector<32x64xf32>,
    %c6_i32 = arith.constant 6 : i32
    %327 = arith.index_cast %c6_i32 : i32 to index
    %c0_158 = arith.constant 0 : index
    %328 = tpu.strided_load %arg12[%327, %c0_158] {strides = array<i32: 16, 1>} : memref<512x64xf32, #tpu.memory_space<vmem>>, vector<32x64xf32>
    %329 = arith.index_cast %c6_i32 : i32 to index
    %c0_159 = arith.constant 0 : index
    %330 = tpu.strided_load %arg13[%329, %c0_159] {strides = array<i32: 16, 1>} : memref<512x64xf32, #tpu.memory_space<vmem>>, vector<32x64xf32>
    %331 = arith.mulf %328, %322 : vector<32x64xf32>
    %332 = arith.addf %331, %330 : vector<32x64xf32>
    %c32_i32_160 = arith.constant 32 : i32
    %333 = arith.muli %c6_i32, %c32_i32_160 : i32
    %334 = tpu.assume_multiple %333, 32 : i32
    %335 = arith.index_cast %334 : i32 to index
    %c0_161 = arith.constant 0 : index
    %336 = vector.load %arg14[%335, %c0_161] : memref<512x64xf32, #tpu.memory_space<vmem>>, vector<32x64xf32>
    tpu.vector_store %arg14[%335, %c0_161], %332 {strides = array<i32>} : memref<512x64xf32, #tpu.memory_space<vmem>>, vector<32x64xf32>,
    %c7_i32 = arith.constant 7 : i32
    %337 = arith.index_cast %c7_i32 : i32 to index
    %c0_162 = arith.constant 0 : index
    %338 = tpu.strided_load %arg12[%337, %c0_162] {strides = array<i32: 16, 1>} : memref<512x64xf32, #tpu.memory_space<vmem>>, vector<32x64xf32>
    %339 = arith.index_cast %c7_i32 : i32 to index
    %c0_163 = arith.constant 0 : index
    %340 = tpu.strided_load %arg13[%339, %c0_163] {strides = array<i32: 16, 1>} : memref<512x64xf32, #tpu.memory_space<vmem>>, vector<32x64xf32>
    %341 = arith.mulf %338, %332 : vector<32x64xf32>
    %342 = arith.addf %341, %340 : vector<32x64xf32>
    %c32_i32_164 = arith.constant 32 : i32
    %343 = arith.muli %c7_i32, %c32_i32_164 : i32
    %344 = tpu.assume_multiple %343, 32 : i32
    %345 = arith.index_cast %344 : i32 to index
    %c0_165 = arith.constant 0 : index
    %346 = vector.load %arg14[%345, %c0_165] : memref<512x64xf32, #tpu.memory_space<vmem>>, vector<32x64xf32>
    tpu.vector_store %arg14[%345, %c0_165], %342 {strides = array<i32>} : memref<512x64xf32, #tpu.memory_space<vmem>>, vector<32x64xf32>,
    %c8_i32 = arith.constant 8 : i32
    %347 = arith.index_cast %c8_i32 : i32 to index
    %c0_166 = arith.constant 0 : index
    %348 = tpu.strided_load %arg12[%347, %c0_166] {strides = array<i32: 16, 1>} : memref<512x64xf32, #tpu.memory_space<vmem>>, vector<32x64xf32>
    %349 = arith.index_cast %c8_i32 : i32 to index
    %c0_167 = arith.constant 0 : index
    %350 = tpu.strided_load %arg13[%349, %c0_167] {strides = array<i32: 16, 1>} : memref<512x64xf32, #tpu.memory_space<vmem>>, vector<32x64xf32>
    %351 = arith.mulf %348, %342 : vector<32x64xf32>
    %352 = arith.addf %351, %350 : vector<32x64xf32>
    %c32_i32_168 = arith.constant 32 : i32
    %353 = arith.muli %c8_i32, %c32_i32_168 : i32
    %354 = tpu.assume_multiple %353, 32 : i32
    %355 = arith.index_cast %354 : i32 to index
    %c0_169 = arith.constant 0 : index
    %356 = vector.load %arg14[%355, %c0_169] : memref<512x64xf32, #tpu.memory_space<vmem>>, vector<32x64xf32>
    tpu.vector_store %arg14[%355, %c0_169], %352 {strides = array<i32>} : memref<512x64xf32, #tpu.memory_space<vmem>>, vector<32x64xf32>,
    %c9_i32 = arith.constant 9 : i32
    %357 = arith.index_cast %c9_i32 : i32 to index
    %c0_170 = arith.constant 0 : index
    %358 = tpu.strided_load %arg12[%357, %c0_170] {strides = array<i32: 16, 1>} : memref<512x64xf32, #tpu.memory_space<vmem>>, vector<32x64xf32>
    %359 = arith.index_cast %c9_i32 : i32 to index
    %c0_171 = arith.constant 0 : index
    %360 = tpu.strided_load %arg13[%359, %c0_171] {strides = array<i32: 16, 1>} : memref<512x64xf32, #tpu.memory_space<vmem>>, vector<32x64xf32>
    %361 = arith.mulf %358, %352 : vector<32x64xf32>
    %362 = arith.addf %361, %360 : vector<32x64xf32>
    %c32_i32_172 = arith.constant 32 : i32
    %363 = arith.muli %c9_i32, %c32_i32_172 : i32
    %364 = tpu.assume_multiple %363, 32 : i32
    %365 = arith.index_cast %364 : i32 to index
    %c0_173 = arith.constant 0 : index
    %366 = vector.load %arg14[%365, %c0_173] : memref<512x64xf32, #tpu.memory_space<vmem>>, vector<32x64xf32>
    tpu.vector_store %arg14[%365, %c0_173], %362 {strides = array<i32>} : memref<512x64xf32, #tpu.memory_space<vmem>>, vector<32x64xf32>,
    %c10_i32 = arith.constant 10 : i32
    %367 = arith.index_cast %c10_i32 : i32 to index
    %c0_174 = arith.constant 0 : index
    %368 = tpu.strided_load %arg12[%367, %c0_174] {strides = array<i32: 16, 1>} : memref<512x64xf32, #tpu.memory_space<vmem>>, vector<32x64xf32>
    %369 = arith.index_cast %c10_i32 : i32 to index
    %c0_175 = arith.constant 0 : index
    %370 = tpu.strided_load %arg13[%369, %c0_175] {strides = array<i32: 16, 1>} : memref<512x64xf32, #tpu.memory_space<vmem>>, vector<32x64xf32>
    %371 = arith.mulf %368, %362 : vector<32x64xf32>
    %372 = arith.addf %371, %370 : vector<32x64xf32>
    %c32_i32_176 = arith.constant 32 : i32
    %373 = arith.muli %c10_i32, %c32_i32_176 : i32
    %374 = tpu.assume_multiple %373, 32 : i32
    %375 = arith.index_cast %374 : i32 to index
    %c0_177 = arith.constant 0 : index
    %376 = vector.load %arg14[%375, %c0_177] : memref<512x64xf32, #tpu.memory_space<vmem>>, vector<32x64xf32>
    tpu.vector_store %arg14[%375, %c0_177], %372 {strides = array<i32>} : memref<512x64xf32, #tpu.memory_space<vmem>>, vector<32x64xf32>,
    %c11_i32 = arith.constant 11 : i32
    %377 = arith.index_cast %c11_i32 : i32 to index
    %c0_178 = arith.constant 0 : index
    %378 = tpu.strided_load %arg12[%377, %c0_178] {strides = array<i32: 16, 1>} : memref<512x64xf32, #tpu.memory_space<vmem>>, vector<32x64xf32>
    %379 = arith.index_cast %c11_i32 : i32 to index
    %c0_179 = arith.constant 0 : index
    %380 = tpu.strided_load %arg13[%379, %c0_179] {strides = array<i32: 16, 1>} : memref<512x64xf32, #tpu.memory_space<vmem>>, vector<32x64xf32>
    %381 = arith.mulf %378, %372 : vector<32x64xf32>
    %382 = arith.addf %381, %380 : vector<32x64xf32>
    %c32_i32_180 = arith.constant 32 : i32
    %383 = arith.muli %c11_i32, %c32_i32_180 : i32
    %384 = tpu.assume_multiple %383, 32 : i32
    %385 = arith.index_cast %384 : i32 to index
    %c0_181 = arith.constant 0 : index
    %386 = vector.load %arg14[%385, %c0_181] : memref<512x64xf32, #tpu.memory_space<vmem>>, vector<32x64xf32>
    tpu.vector_store %arg14[%385, %c0_181], %382 {strides = array<i32>} : memref<512x64xf32, #tpu.memory_space<vmem>>, vector<32x64xf32>,
    %c12_i32 = arith.constant 12 : i32
    %387 = arith.index_cast %c12_i32 : i32 to index
    %c0_182 = arith.constant 0 : index
    %388 = tpu.strided_load %arg12[%387, %c0_182] {strides = array<i32: 16, 1>} : memref<512x64xf32, #tpu.memory_space<vmem>>, vector<32x64xf32>
    %389 = arith.index_cast %c12_i32 : i32 to index
    %c0_183 = arith.constant 0 : index
    %390 = tpu.strided_load %arg13[%389, %c0_183] {strides = array<i32: 16, 1>} : memref<512x64xf32, #tpu.memory_space<vmem>>, vector<32x64xf32>
    %391 = arith.mulf %388, %382 : vector<32x64xf32>
    %392 = arith.addf %391, %390 : vector<32x64xf32>
    %c32_i32_184 = arith.constant 32 : i32
    %393 = arith.muli %c12_i32, %c32_i32_184 : i32
    %394 = tpu.assume_multiple %393, 32 : i32
    %395 = arith.index_cast %394 : i32 to index
    %c0_185 = arith.constant 0 : index
    %396 = vector.load %arg14[%395, %c0_185] : memref<512x64xf32, #tpu.memory_space<vmem>>, vector<32x64xf32>
    tpu.vector_store %arg14[%395, %c0_185], %392 {strides = array<i32>} : memref<512x64xf32, #tpu.memory_space<vmem>>, vector<32x64xf32>,
    %c13_i32 = arith.constant 13 : i32
    %397 = arith.index_cast %c13_i32 : i32 to index
    %c0_186 = arith.constant 0 : index
    %398 = tpu.strided_load %arg12[%397, %c0_186] {strides = array<i32: 16, 1>} : memref<512x64xf32, #tpu.memory_space<vmem>>, vector<32x64xf32>
    %399 = arith.index_cast %c13_i32 : i32 to index
    %c0_187 = arith.constant 0 : index
    %400 = tpu.strided_load %arg13[%399, %c0_187] {strides = array<i32: 16, 1>} : memref<512x64xf32, #tpu.memory_space<vmem>>, vector<32x64xf32>
    %401 = arith.mulf %398, %392 : vector<32x64xf32>
    %402 = arith.addf %401, %400 : vector<32x64xf32>
    %c32_i32_188 = arith.constant 32 : i32
    %403 = arith.muli %c13_i32, %c32_i32_188 : i32
    %404 = tpu.assume_multiple %403, 32 : i32
    %405 = arith.index_cast %404 : i32 to index
    %c0_189 = arith.constant 0 : index
    %406 = vector.load %arg14[%405, %c0_189] : memref<512x64xf32, #tpu.memory_space<vmem>>, vector<32x64xf32>
    tpu.vector_store %arg14[%405, %c0_189], %402 {strides = array<i32>} : memref<512x64xf32, #tpu.memory_space<vmem>>, vector<32x64xf32>,
    %c14_i32 = arith.constant 14 : i32
    %407 = arith.index_cast %c14_i32 : i32 to index
    %c0_190 = arith.constant 0 : index
    %408 = tpu.strided_load %arg12[%407, %c0_190] {strides = array<i32: 16, 1>} : memref<512x64xf32, #tpu.memory_space<vmem>>, vector<32x64xf32>
    %409 = arith.index_cast %c14_i32 : i32 to index
    %c0_191 = arith.constant 0 : index
    %410 = tpu.strided_load %arg13[%409, %c0_191] {strides = array<i32: 16, 1>} : memref<512x64xf32, #tpu.memory_space<vmem>>, vector<32x64xf32>
    %411 = arith.mulf %408, %402 : vector<32x64xf32>
    %412 = arith.addf %411, %410 : vector<32x64xf32>
    %c32_i32_192 = arith.constant 32 : i32
    %413 = arith.muli %c14_i32, %c32_i32_192 : i32
    %414 = tpu.assume_multiple %413, 32 : i32
    %415 = arith.index_cast %414 : i32 to index
    %c0_193 = arith.constant 0 : index
    %416 = vector.load %arg14[%415, %c0_193] : memref<512x64xf32, #tpu.memory_space<vmem>>, vector<32x64xf32>
    tpu.vector_store %arg14[%415, %c0_193], %412 {strides = array<i32>} : memref<512x64xf32, #tpu.memory_space<vmem>>, vector<32x64xf32>,
    %c15_i32_194 = arith.constant 15 : i32
    %417 = arith.index_cast %c15_i32_194 : i32 to index
    %c0_195 = arith.constant 0 : index
    %418 = tpu.strided_load %arg12[%417, %c0_195] {strides = array<i32: 16, 1>} : memref<512x64xf32, #tpu.memory_space<vmem>>, vector<32x64xf32>
    %419 = arith.index_cast %c15_i32_194 : i32 to index
    %c0_196 = arith.constant 0 : index
    %420 = tpu.strided_load %arg13[%419, %c0_196] {strides = array<i32: 16, 1>} : memref<512x64xf32, #tpu.memory_space<vmem>>, vector<32x64xf32>
    %421 = arith.mulf %418, %412 : vector<32x64xf32>
    %422 = arith.addf %421, %420 : vector<32x64xf32>
    %c32_i32_197 = arith.constant 32 : i32
    %423 = arith.muli %c15_i32_194, %c32_i32_197 : i32
    %424 = tpu.assume_multiple %423, 32 : i32
    %425 = arith.index_cast %424 : i32 to index
    %c0_198 = arith.constant 0 : index
    %426 = vector.load %arg14[%425, %c0_198] : memref<512x64xf32, #tpu.memory_space<vmem>>, vector<32x64xf32>
    tpu.vector_store %arg14[%425, %c0_198], %422 {strides = array<i32>} : memref<512x64xf32, #tpu.memory_space<vmem>>, vector<32x64xf32>,
    %c16_i32 = arith.constant 16 : i32
    %cst_199 = arith.constant 0.000000e+00 : f32
    %427 = vector.broadcast %cst_199 : f32 to vector<16x64xf32>
    %c0_200 = arith.constant 0 : index
    %c0_201 = arith.constant 0 : index
    %428 = tpu.strided_load %arg14[%c0_200, %c0_201] {strides = array<i32: 32, 1>} : memref<512x64xf32, #tpu.memory_space<vmem>>, vector<16x64xf32>
    %429 = vector.extract_strided_slice %79 {offsets = [0, 0], sizes = [16, 1], strides = [1, 1]} : vector<64x8xf32> to vector<16x1xf32>
    %430 = vector.broadcast %429 : vector<16x1xf32> to vector<16x64xf32>
    %431 = arith.mulf %428, %430 : vector<16x64xf32>
    %432 = arith.addf %427, %431 : vector<16x64xf32>
    %c1 = arith.constant 1 : index
    %c0_202 = arith.constant 0 : index
    %433 = tpu.strided_load %arg14[%c1, %c0_202] {strides = array<i32: 32, 1>} : memref<512x64xf32, #tpu.memory_space<vmem>>, vector<16x64xf32>
    %434 = vector.extract_strided_slice %79 {offsets = [0, 1], sizes = [16, 1], strides = [1, 1]} : vector<64x8xf32> to vector<16x1xf32>
    %435 = vector.broadcast %434 : vector<16x1xf32> to vector<16x64xf32>
    %436 = arith.mulf %433, %435 : vector<16x64xf32>
    %437 = arith.addf %432, %436 : vector<16x64xf32>
    %c2 = arith.constant 2 : index
    %c0_203 = arith.constant 0 : index
    %438 = tpu.strided_load %arg14[%c2, %c0_203] {strides = array<i32: 32, 1>} : memref<512x64xf32, #tpu.memory_space<vmem>>, vector<16x64xf32>
    %439 = vector.extract_strided_slice %79 {offsets = [0, 2], sizes = [16, 1], strides = [1, 1]} : vector<64x8xf32> to vector<16x1xf32>
    %440 = vector.broadcast %439 : vector<16x1xf32> to vector<16x64xf32>
    %441 = arith.mulf %438, %440 : vector<16x64xf32>
    %442 = arith.addf %437, %441 : vector<16x64xf32>
    %c3 = arith.constant 3 : index
    %c0_204 = arith.constant 0 : index
    %443 = tpu.strided_load %arg14[%c3, %c0_204] {strides = array<i32: 32, 1>} : memref<512x64xf32, #tpu.memory_space<vmem>>, vector<16x64xf32>
    %444 = vector.extract_strided_slice %79 {offsets = [0, 3], sizes = [16, 1], strides = [1, 1]} : vector<64x8xf32> to vector<16x1xf32>
    %445 = vector.broadcast %444 : vector<16x1xf32> to vector<16x64xf32>
    %446 = arith.mulf %443, %445 : vector<16x64xf32>
    %447 = arith.addf %442, %446 : vector<16x64xf32>
    %c4 = arith.constant 4 : index
    %c0_205 = arith.constant 0 : index
    %448 = tpu.strided_load %arg14[%c4, %c0_205] {strides = array<i32: 32, 1>} : memref<512x64xf32, #tpu.memory_space<vmem>>, vector<16x64xf32>
    %449 = vector.extract_strided_slice %79 {offsets = [0, 4], sizes = [16, 1], strides = [1, 1]} : vector<64x8xf32> to vector<16x1xf32>
    %450 = vector.broadcast %449 : vector<16x1xf32> to vector<16x64xf32>
    %451 = arith.mulf %448, %450 : vector<16x64xf32>
    %452 = arith.addf %447, %451 : vector<16x64xf32>
    %c5 = arith.constant 5 : index
    %c0_206 = arith.constant 0 : index
    %453 = tpu.strided_load %arg14[%c5, %c0_206] {strides = array<i32: 32, 1>} : memref<512x64xf32, #tpu.memory_space<vmem>>, vector<16x64xf32>
    %454 = vector.extract_strided_slice %79 {offsets = [0, 5], sizes = [16, 1], strides = [1, 1]} : vector<64x8xf32> to vector<16x1xf32>
    %455 = vector.broadcast %454 : vector<16x1xf32> to vector<16x64xf32>
    %456 = arith.mulf %453, %455 : vector<16x64xf32>
    %457 = arith.addf %452, %456 : vector<16x64xf32>
    %c6 = arith.constant 6 : index
    %c0_207 = arith.constant 0 : index
    %458 = tpu.strided_load %arg14[%c6, %c0_207] {strides = array<i32: 32, 1>} : memref<512x64xf32, #tpu.memory_space<vmem>>, vector<16x64xf32>
    %459 = vector.extract_strided_slice %79 {offsets = [0, 6], sizes = [16, 1], strides = [1, 1]} : vector<64x8xf32> to vector<16x1xf32>
    %460 = vector.broadcast %459 : vector<16x1xf32> to vector<16x64xf32>
    %461 = arith.mulf %458, %460 : vector<16x64xf32>
    %462 = arith.addf %457, %461 : vector<16x64xf32>
    %c7 = arith.constant 7 : index
    %c0_208 = arith.constant 0 : index
    %463 = tpu.strided_load %arg14[%c7, %c0_208] {strides = array<i32: 32, 1>} : memref<512x64xf32, #tpu.memory_space<vmem>>, vector<16x64xf32>
    %464 = vector.extract_strided_slice %79 {offsets = [0, 7], sizes = [16, 1], strides = [1, 1]} : vector<64x8xf32> to vector<16x1xf32>
    %465 = vector.broadcast %464 : vector<16x1xf32> to vector<16x64xf32>
    %466 = arith.mulf %463, %465 : vector<16x64xf32>
    %467 = arith.addf %462, %466 : vector<16x64xf32>
    %cst_209 = arith.constant 0.000000e+00 : f32
    %468 = vector.broadcast %cst_209 : f32 to vector<16x64xf32>
    %c8 = arith.constant 8 : index
    %c0_210 = arith.constant 0 : index
    %469 = tpu.strided_load %arg14[%c8, %c0_210] {strides = array<i32: 32, 1>} : memref<512x64xf32, #tpu.memory_space<vmem>>, vector<16x64xf32>
    %470 = vector.extract_strided_slice %79 {offsets = [16, 0], sizes = [16, 1], strides = [1, 1]} : vector<64x8xf32> to vector<16x1xf32>
    %471 = vector.broadcast %470 : vector<16x1xf32> to vector<16x64xf32>
    %472 = arith.mulf %469, %471 : vector<16x64xf32>
    %473 = arith.addf %468, %472 : vector<16x64xf32>
    %c9 = arith.constant 9 : index
    %c0_211 = arith.constant 0 : index
    %474 = tpu.strided_load %arg14[%c9, %c0_211] {strides = array<i32: 32, 1>} : memref<512x64xf32, #tpu.memory_space<vmem>>, vector<16x64xf32>
    %475 = vector.extract_strided_slice %79 {offsets = [16, 1], sizes = [16, 1], strides = [1, 1]} : vector<64x8xf32> to vector<16x1xf32>
    %476 = vector.broadcast %475 : vector<16x1xf32> to vector<16x64xf32>
    %477 = arith.mulf %474, %476 : vector<16x64xf32>
    %478 = arith.addf %473, %477 : vector<16x64xf32>
    %c10 = arith.constant 10 : index
    %c0_212 = arith.constant 0 : index
    %479 = tpu.strided_load %arg14[%c10, %c0_212] {strides = array<i32: 32, 1>} : memref<512x64xf32, #tpu.memory_space<vmem>>, vector<16x64xf32>
    %480 = vector.extract_strided_slice %79 {offsets = [16, 2], sizes = [16, 1], strides = [1, 1]} : vector<64x8xf32> to vector<16x1xf32>
    %481 = vector.broadcast %480 : vector<16x1xf32> to vector<16x64xf32>
    %482 = arith.mulf %479, %481 : vector<16x64xf32>
    %483 = arith.addf %478, %482 : vector<16x64xf32>
    %c11 = arith.constant 11 : index
    %c0_213 = arith.constant 0 : index
    %484 = tpu.strided_load %arg14[%c11, %c0_213] {strides = array<i32: 32, 1>} : memref<512x64xf32, #tpu.memory_space<vmem>>, vector<16x64xf32>
    %485 = vector.extract_strided_slice %79 {offsets = [16, 3], sizes = [16, 1], strides = [1, 1]} : vector<64x8xf32> to vector<16x1xf32>
    %486 = vector.broadcast %485 : vector<16x1xf32> to vector<16x64xf32>
    %487 = arith.mulf %484, %486 : vector<16x64xf32>
    %488 = arith.addf %483, %487 : vector<16x64xf32>
    %c12 = arith.constant 12 : index
    %c0_214 = arith.constant 0 : index
    %489 = tpu.strided_load %arg14[%c12, %c0_214] {strides = array<i32: 32, 1>} : memref<512x64xf32, #tpu.memory_space<vmem>>, vector<16x64xf32>
    %490 = vector.extract_strided_slice %79 {offsets = [16, 4], sizes = [16, 1], strides = [1, 1]} : vector<64x8xf32> to vector<16x1xf32>
    %491 = vector.broadcast %490 : vector<16x1xf32> to vector<16x64xf32>
    %492 = arith.mulf %489, %491 : vector<16x64xf32>
    %493 = arith.addf %488, %492 : vector<16x64xf32>
    %c13 = arith.constant 13 : index
    %c0_215 = arith.constant 0 : index
    %494 = tpu.strided_load %arg14[%c13, %c0_215] {strides = array<i32: 32, 1>} : memref<512x64xf32, #tpu.memory_space<vmem>>, vector<16x64xf32>
    %495 = vector.extract_strided_slice %79 {offsets = [16, 5], sizes = [16, 1], strides = [1, 1]} : vector<64x8xf32> to vector<16x1xf32>
    %496 = vector.broadcast %495 : vector<16x1xf32> to vector<16x64xf32>
    %497 = arith.mulf %494, %496 : vector<16x64xf32>
    %498 = arith.addf %493, %497 : vector<16x64xf32>
    %c14 = arith.constant 14 : index
    %c0_216 = arith.constant 0 : index
    %499 = tpu.strided_load %arg14[%c14, %c0_216] {strides = array<i32: 32, 1>} : memref<512x64xf32, #tpu.memory_space<vmem>>, vector<16x64xf32>
    %500 = vector.extract_strided_slice %79 {offsets = [16, 6], sizes = [16, 1], strides = [1, 1]} : vector<64x8xf32> to vector<16x1xf32>
    %501 = vector.broadcast %500 : vector<16x1xf32> to vector<16x64xf32>
    %502 = arith.mulf %499, %501 : vector<16x64xf32>
    %503 = arith.addf %498, %502 : vector<16x64xf32>
    %c15 = arith.constant 15 : index
    %c0_217 = arith.constant 0 : index
    %504 = tpu.strided_load %arg14[%c15, %c0_217] {strides = array<i32: 32, 1>} : memref<512x64xf32, #tpu.memory_space<vmem>>, vector<16x64xf32>
    %505 = vector.extract_strided_slice %79 {offsets = [16, 7], sizes = [16, 1], strides = [1, 1]} : vector<64x8xf32> to vector<16x1xf32>
    %506 = vector.broadcast %505 : vector<16x1xf32> to vector<16x64xf32>
    %507 = arith.mulf %504, %506 : vector<16x64xf32>
    %508 = arith.addf %503, %507 : vector<16x64xf32>
    %cst_218 = arith.constant 0.000000e+00 : f32
    %509 = vector.broadcast %cst_218 : f32 to vector<16x64xf32>
    %c16_219 = arith.constant 16 : index
    %c0_220 = arith.constant 0 : index
    %510 = tpu.strided_load %arg14[%c16_219, %c0_220] {strides = array<i32: 32, 1>} : memref<512x64xf32, #tpu.memory_space<vmem>>, vector<16x64xf32>
    %511 = vector.extract_strided_slice %79 {offsets = [32, 0], sizes = [16, 1], strides = [1, 1]} : vector<64x8xf32> to vector<16x1xf32>
    %512 = vector.broadcast %511 : vector<16x1xf32> to vector<16x64xf32>
    %513 = arith.mulf %510, %512 : vector<16x64xf32>
    %514 = arith.addf %509, %513 : vector<16x64xf32>
    %c17 = arith.constant 17 : index
    %c0_221 = arith.constant 0 : index
    %515 = tpu.strided_load %arg14[%c17, %c0_221] {strides = array<i32: 32, 1>} : memref<512x64xf32, #tpu.memory_space<vmem>>, vector<16x64xf32>
    %516 = vector.extract_strided_slice %79 {offsets = [32, 1], sizes = [16, 1], strides = [1, 1]} : vector<64x8xf32> to vector<16x1xf32>
    %517 = vector.broadcast %516 : vector<16x1xf32> to vector<16x64xf32>
    %518 = arith.mulf %515, %517 : vector<16x64xf32>
    %519 = arith.addf %514, %518 : vector<16x64xf32>
    %c18 = arith.constant 18 : index
    %c0_222 = arith.constant 0 : index
    %520 = tpu.strided_load %arg14[%c18, %c0_222] {strides = array<i32: 32, 1>} : memref<512x64xf32, #tpu.memory_space<vmem>>, vector<16x64xf32>
    %521 = vector.extract_strided_slice %79 {offsets = [32, 2], sizes = [16, 1], strides = [1, 1]} : vector<64x8xf32> to vector<16x1xf32>
    %522 = vector.broadcast %521 : vector<16x1xf32> to vector<16x64xf32>
    %523 = arith.mulf %520, %522 : vector<16x64xf32>
    %524 = arith.addf %519, %523 : vector<16x64xf32>
    %c19 = arith.constant 19 : index
    %c0_223 = arith.constant 0 : index
    %525 = tpu.strided_load %arg14[%c19, %c0_223] {strides = array<i32: 32, 1>} : memref<512x64xf32, #tpu.memory_space<vmem>>, vector<16x64xf32>
    %526 = vector.extract_strided_slice %79 {offsets = [32, 3], sizes = [16, 1], strides = [1, 1]} : vector<64x8xf32> to vector<16x1xf32>
    %527 = vector.broadcast %526 : vector<16x1xf32> to vector<16x64xf32>
    %528 = arith.mulf %525, %527 : vector<16x64xf32>
    %529 = arith.addf %524, %528 : vector<16x64xf32>
    %c20 = arith.constant 20 : index
    %c0_224 = arith.constant 0 : index
    %530 = tpu.strided_load %arg14[%c20, %c0_224] {strides = array<i32: 32, 1>} : memref<512x64xf32, #tpu.memory_space<vmem>>, vector<16x64xf32>
    %531 = vector.extract_strided_slice %79 {offsets = [32, 4], sizes = [16, 1], strides = [1, 1]} : vector<64x8xf32> to vector<16x1xf32>
    %532 = vector.broadcast %531 : vector<16x1xf32> to vector<16x64xf32>
    %533 = arith.mulf %530, %532 : vector<16x64xf32>
    %534 = arith.addf %529, %533 : vector<16x64xf32>
    %c21 = arith.constant 21 : index
    %c0_225 = arith.constant 0 : index
    %535 = tpu.strided_load %arg14[%c21, %c0_225] {strides = array<i32: 32, 1>} : memref<512x64xf32, #tpu.memory_space<vmem>>, vector<16x64xf32>
    %536 = vector.extract_strided_slice %79 {offsets = [32, 5], sizes = [16, 1], strides = [1, 1]} : vector<64x8xf32> to vector<16x1xf32>
    %537 = vector.broadcast %536 : vector<16x1xf32> to vector<16x64xf32>
    %538 = arith.mulf %535, %537 : vector<16x64xf32>
    %539 = arith.addf %534, %538 : vector<16x64xf32>
    %c22 = arith.constant 22 : index
    %c0_226 = arith.constant 0 : index
    %540 = tpu.strided_load %arg14[%c22, %c0_226] {strides = array<i32: 32, 1>} : memref<512x64xf32, #tpu.memory_space<vmem>>, vector<16x64xf32>
    %541 = vector.extract_strided_slice %79 {offsets = [32, 6], sizes = [16, 1], strides = [1, 1]} : vector<64x8xf32> to vector<16x1xf32>
    %542 = vector.broadcast %541 : vector<16x1xf32> to vector<16x64xf32>
    %543 = arith.mulf %540, %542 : vector<16x64xf32>
    %544 = arith.addf %539, %543 : vector<16x64xf32>
    %c23 = arith.constant 23 : index
    %c0_227 = arith.constant 0 : index
    %545 = tpu.strided_load %arg14[%c23, %c0_227] {strides = array<i32: 32, 1>} : memref<512x64xf32, #tpu.memory_space<vmem>>, vector<16x64xf32>
    %546 = vector.extract_strided_slice %79 {offsets = [32, 7], sizes = [16, 1], strides = [1, 1]} : vector<64x8xf32> to vector<16x1xf32>
    %547 = vector.broadcast %546 : vector<16x1xf32> to vector<16x64xf32>
    %548 = arith.mulf %545, %547 : vector<16x64xf32>
    %549 = arith.addf %544, %548 : vector<16x64xf32>
    %cst_228 = arith.constant 0.000000e+00 : f32
    %550 = vector.broadcast %cst_228 : f32 to vector<16x64xf32>
    %c24 = arith.constant 24 : index
    %c0_229 = arith.constant 0 : index
    %551 = tpu.strided_load %arg14[%c24, %c0_229] {strides = array<i32: 32, 1>} : memref<512x64xf32, #tpu.memory_space<vmem>>, vector<16x64xf32>
    %552 = vector.extract_strided_slice %79 {offsets = [48, 0], sizes = [16, 1], strides = [1, 1]} : vector<64x8xf32> to vector<16x1xf32>
    %553 = vector.broadcast %552 : vector<16x1xf32> to vector<16x64xf32>
    %554 = arith.mulf %551, %553 : vector<16x64xf32>
    %555 = arith.addf %550, %554 : vector<16x64xf32>
    %c25 = arith.constant 25 : index
    %c0_230 = arith.constant 0 : index
    %556 = tpu.strided_load %arg14[%c25, %c0_230] {strides = array<i32: 32, 1>} : memref<512x64xf32, #tpu.memory_space<vmem>>, vector<16x64xf32>
    %557 = vector.extract_strided_slice %79 {offsets = [48, 1], sizes = [16, 1], strides = [1, 1]} : vector<64x8xf32> to vector<16x1xf32>
    %558 = vector.broadcast %557 : vector<16x1xf32> to vector<16x64xf32>
    %559 = arith.mulf %556, %558 : vector<16x64xf32>
    %560 = arith.addf %555, %559 : vector<16x64xf32>
    %c26 = arith.constant 26 : index
    %c0_231 = arith.constant 0 : index
    %561 = tpu.strided_load %arg14[%c26, %c0_231] {strides = array<i32: 32, 1>} : memref<512x64xf32, #tpu.memory_space<vmem>>, vector<16x64xf32>
    %562 = vector.extract_strided_slice %79 {offsets = [48, 2], sizes = [16, 1], strides = [1, 1]} : vector<64x8xf32> to vector<16x1xf32>
    %563 = vector.broadcast %562 : vector<16x1xf32> to vector<16x64xf32>
    %564 = arith.mulf %561, %563 : vector<16x64xf32>
    %565 = arith.addf %560, %564 : vector<16x64xf32>
    %c27 = arith.constant 27 : index
    %c0_232 = arith.constant 0 : index
    %566 = tpu.strided_load %arg14[%c27, %c0_232] {strides = array<i32: 32, 1>} : memref<512x64xf32, #tpu.memory_space<vmem>>, vector<16x64xf32>
    %567 = vector.extract_strided_slice %79 {offsets = [48, 3], sizes = [16, 1], strides = [1, 1]} : vector<64x8xf32> to vector<16x1xf32>
    %568 = vector.broadcast %567 : vector<16x1xf32> to vector<16x64xf32>
    %569 = arith.mulf %566, %568 : vector<16x64xf32>
    %570 = arith.addf %565, %569 : vector<16x64xf32>
    %c28 = arith.constant 28 : index
    %c0_233 = arith.constant 0 : index
    %571 = tpu.strided_load %arg14[%c28, %c0_233] {strides = array<i32: 32, 1>} : memref<512x64xf32, #tpu.memory_space<vmem>>, vector<16x64xf32>
    %572 = vector.extract_strided_slice %79 {offsets = [48, 4], sizes = [16, 1], strides = [1, 1]} : vector<64x8xf32> to vector<16x1xf32>
    %573 = vector.broadcast %572 : vector<16x1xf32> to vector<16x64xf32>
    %574 = arith.mulf %571, %573 : vector<16x64xf32>
    %575 = arith.addf %570, %574 : vector<16x64xf32>
    %c29 = arith.constant 29 : index
    %c0_234 = arith.constant 0 : index
    %576 = tpu.strided_load %arg14[%c29, %c0_234] {strides = array<i32: 32, 1>} : memref<512x64xf32, #tpu.memory_space<vmem>>, vector<16x64xf32>
    %577 = vector.extract_strided_slice %79 {offsets = [48, 5], sizes = [16, 1], strides = [1, 1]} : vector<64x8xf32> to vector<16x1xf32>
    %578 = vector.broadcast %577 : vector<16x1xf32> to vector<16x64xf32>
    %579 = arith.mulf %576, %578 : vector<16x64xf32>
    %580 = arith.addf %575, %579 : vector<16x64xf32>
    %c30 = arith.constant 30 : index
    %c0_235 = arith.constant 0 : index
    %581 = tpu.strided_load %arg14[%c30, %c0_235] {strides = array<i32: 32, 1>} : memref<512x64xf32, #tpu.memory_space<vmem>>, vector<16x64xf32>
    %582 = vector.extract_strided_slice %79 {offsets = [48, 6], sizes = [16, 1], strides = [1, 1]} : vector<64x8xf32> to vector<16x1xf32>
    %583 = vector.broadcast %582 : vector<16x1xf32> to vector<16x64xf32>
    %584 = arith.mulf %581, %583 : vector<16x64xf32>
    %585 = arith.addf %580, %584 : vector<16x64xf32>
    %c31 = arith.constant 31 : index
    %c0_236 = arith.constant 0 : index
    %586 = tpu.strided_load %arg14[%c31, %c0_236] {strides = array<i32: 32, 1>} : memref<512x64xf32, #tpu.memory_space<vmem>>, vector<16x64xf32>
    %587 = vector.extract_strided_slice %79 {offsets = [48, 7], sizes = [16, 1], strides = [1, 1]} : vector<64x8xf32> to vector<16x1xf32>
    %588 = vector.broadcast %587 : vector<16x1xf32> to vector<16x64xf32>
    %589 = arith.mulf %586, %588 : vector<16x64xf32>
    %590 = arith.addf %585, %589 : vector<16x64xf32>
    %591 = tpu.concatenate %467, %508, %549, %590 in 0 : vector<16x64xf32>, vector<16x64xf32>, vector<16x64xf32>, vector<16x64xf32> -> vector<64x64xf32>
    %c0_237 = arith.constant 0 : index
    %c0_238 = arith.constant 0 : index
    %c0_239 = arith.constant 0 : index
    %592 = vector.load %arg10[%c0_237, %c0_238, %c0_239] : memref<1x1x64xf32, #tpu.memory_space<vmem>>, vector<1x1x64xf32>
    %593 = vector.shape_cast %592 : vector<1x1x64xf32> to vector<1x64xf32>
    %594 = vector.broadcast %593 : vector<1x64xf32> to vector<64x64xf32>
    %595 = arith.mulf %56, %594 : vector<64x64xf32>
    %596 = arith.addf %591, %595 : vector<64x64xf32>
    %597 = arith.negf %5 : vector<64x64xf32>
    %598 = math.exp %597 : vector<64x64xf32>
    %cst_240 = arith.constant 1.000000e+00 : f32
    %599 = vector.broadcast %cst_240 : f32 to vector<64x64xf32>
    %600 = arith.addf %599, %598 : vector<64x64xf32>
    %601 = arith.divf %599, %600 : vector<64x64xf32>
    %602 = arith.mulf %5, %601 : vector<64x64xf32>
    %603 = arith.mulf %596, %602 : vector<64x64xf32>
    %c0_241 = arith.constant 0 : index
    %c0_242 = arith.constant 0 : index
    %604 = vector.load %arg3[%c0_241, %c0_242] : memref<64x32xf32, #tpu.memory_space<vmem>>, vector<64x32xf32>
    %cst_243 = arith.constant dense<0.000000e+00> : vector<64x32xf32>
    %605 = tpu.matmul %603, %604, %cst_243 {dimension_numbers = #tpu.dot_dimension_numbers<[1], [0], [0], [1], [0, 0, 1, 1], [], []>} : vector<64x64xf32>, vector<64x32xf32>, vector<64x32xf32> -> vector<64x32xf32>
    %606 = vector.extract_strided_slice %605 {offsets = [0, 0], sizes = [16, 32], strides = [1, 1]} : vector<64x32xf32> to vector<16x32xf32>
    %607 = vector.extract_strided_slice %605 {offsets = [16, 0], sizes = [16, 32], strides = [1, 1]} : vector<64x32xf32> to vector<16x32xf32>
    %608 = vector.extract_strided_slice %605 {offsets = [32, 0], sizes = [16, 32], strides = [1, 1]} : vector<64x32xf32> to vector<16x32xf32>
    %609 = vector.extract_strided_slice %605 {offsets = [48, 0], sizes = [16, 32], strides = [1, 1]} : vector<64x32xf32> to vector<16x32xf32>
    %610 = tpu.concatenate %606, %607, %608, %609 in 1 : vector<16x32xf32>, vector<16x32xf32>, vector<16x32xf32>, vector<16x32xf32> -> vector<16x128xf32>
    %c0_244 = arith.constant 0 : index
    %c0_245 = arith.constant 0 : index
    %c0_246 = arith.constant 0 : index
    %611 = vector.load %arg11[%c0_244, %c0_245, %c0_246] : memref<1x16x128xf32, #tpu.memory_space<vmem>>, vector<1x16x128xf32>
    %612 = vector.shape_cast %611 : vector<1x16x128xf32> to vector<16x128xf32>
    %613 = vector.shape_cast %610 : vector<16x128xf32> to vector<1x16x128xf32>
    tpu.vector_store %arg11[%c0_244, %c0_245, %c0_246], %613 {strides = array<i32>} : memref<1x16x128xf32, #tpu.memory_space<vmem>>, vector<1x16x128xf32>,
    return
  }
  func.func @transform_0(%arg0: i32) -> (i32, i32, i32) {
    %c0_i32 = arith.constant 0 : i32
    %c0_i32_0 = arith.constant 0 : i32
    %c0_i32_1 = arith.constant 0 : i32
    return %arg0, %c0_i32, %c0_i32_0 : i32, i32, i32
  }
  func.func @transform_1(%arg0: i32) -> (i32, i32) {
    %c0_i32 = arith.constant 0 : i32
    %c0_i32_0 = arith.constant 0 : i32
    %c0_i32_1 = arith.constant 0 : i32
    return %c0_i32, %c0_i32_0 : i32, i32
  }
  func.func @transform_2(%arg0: i32) -> (i32, i32) {
    %c0_i32 = arith.constant 0 : i32
    %c0_i32_0 = arith.constant 0 : i32
    %c0_i32_1 = arith.constant 0 : i32
    return %c0_i32, %c0_i32_0 : i32, i32
  }
  func.func @transform_3(%arg0: i32) -> (i32, i32, i32) {
    %c0_i32 = arith.constant 0 : i32
    %c0_i32_0 = arith.constant 0 : i32
    %c0_i32_1 = arith.constant 0 : i32
    return %arg0, %c0_i32, %c0_i32_0 : i32, i32, i32
  }
  func.func @transform_4(%arg0: i32) -> (i32, i32, i32) {
    %c0_i32 = arith.constant 0 : i32
    %c0_i32_0 = arith.constant 0 : i32
    %c0_i32_1 = arith.constant 0 : i32
    return %arg0, %c0_i32, %c0_i32_0 : i32, i32, i32
  }
  func.func @transform_5(%arg0: i32) -> (i32, i32, i32) {
    %c0_i32 = arith.constant 0 : i32
    %c0_i32_0 = arith.constant 0 : i32
    %c0_i32_1 = arith.constant 0 : i32
    return %arg0, %c0_i32, %c0_i32_0 : i32, i32, i32
  }
  func.func @transform_6(%arg0: i32) -> (i32, i32, i32) {
    %c0_i32 = arith.constant 0 : i32
    %c0_i32_0 = arith.constant 0 : i32
    %c0_i32_1 = arith.constant 0 : i32
    return %arg0, %c0_i32, %c0_i32_0 : i32, i32, i32
  }
  func.func @transform_7(%arg0: i32) -> (i32, i32, i32) {
    %c0_i32 = arith.constant 0 : i32
    %c0_i32_0 = arith.constant 0 : i32
    %c0_i32_1 = arith.constant 0 : i32
    return %arg0, %c0_i32, %c0_i32_0 : i32, i32, i32
  }
  func.func @transform_8(%arg0: i32) -> (i32, i32, i32) {
    %c0_i32 = arith.constant 0 : i32
    %c0_i32_0 = arith.constant 0 : i32
    %c0_i32_1 = arith.constant 0 : i32
    return %arg0, %c0_i32, %c0_i32_0 : i32, i32, i32
  }
  func.func @transform_9(%arg0: i32) -> (i32, i32, i32) {
    %c0_i32 = arith.constant 0 : i32
    %c0_i32_0 = arith.constant 0 : i32
    %c0_i32_1 = arith.constant 0 : i32
    return %arg0, %c0_i32, %c0_i32_0 : i32, i32, i32
  }
  func.func @transform_10(%arg0: i32) -> (i32, i32, i32) {
    %c0_i32 = arith.constant 0 : i32
    %c0_i32_0 = arith.constant 0 : i32
    %c0_i32_1 = arith.constant 0 : i32
    return %arg0, %c0_i32, %c0_i32_0 : i32, i32, i32
  }
}

</mosaic_0001>

<bundles_post_ra>
// kernel: birc_forward.4
= control target key start
LH: loop header
LB: loop body
LE: loop exit
PB: predicated region body
PF: predicated region fallthrough
CT: control target
= control target key end

     0   :  { %s415_s12 = smov 0   ;;  %s438_s0 = inlined_call_operand.vmem [shape: f32[2,32,4], index: 0, kind: input, shape index: {}]   ;;  %s439_s1 = inlined_call_operand.vmem [shape: f32[4,64], index: 1, kind: input, shape index: {}]   ;;  %s440_s2 = inlined_call_operand.vmem [shape: f32[1,64], index: 2, kind: input, shape index: {}]   ;;  %s441_s3 = inlined_call_operand.vmem [shape: f32[2,32,64], index: 3, kind: output, shape index: {}]  }
   0x1 LB: > { %s345_s13 = sadd.s32 4294967295, %s393_s12   ;;  %p349_p0 = scmp.ge.s32.totalorder %s393_s12, 1  ;;  %s393_s12 = sphi %s415_s12, %s13_s12  }
   0x2   : > { %p137_p1 = scmp.lt.s32.totalorder %s393_s12, 3 }
   0x4   : > { %p138_p2 = pnand %p349_p0, %p137_p1 }
   0x5   : > { %p161_p3 = scmp.lt.s32.totalorder (!%p138_p2), %s345_s13, 1 }
   0x6   : > { %141 = sbr.rel (%p138_p2) target bundleno = 214 (0xd6), region = 32 }
   0xb   : > { %v175_v0 = vld [vmem:[%s439_s1] sm:$0xf]  ;;  %vm196_vm0 = vcmask 1043456   ;;  %s443_s13 = smov (!%p161_p3, %s345_s13), 1  ;;  %vm183_vm1 = vcmask 31744   ;;  %vm285_vm2 = vcmask 523264  }
   0xc   : > { %369 = vmatprep.subr.msk.mxu0 %vm196_vm0, %v175_v0  ;;  %377 = vmatprep.subr.msk.mxu1 %vm196_vm0, %v175_v0  ;;  %s362_s16 = sshll.u32 %s443_s13, 5  ;;  %v354_v5 = vld [vmem:[%s440_s2] ss:$0 sm:$0xff] }
   0xd   : > { %370 = vmatpush3.msk.msra.mxu0 %vm196_vm0, %v175_v0  ;;  %378 = vmatpush3.msk.msra.mxu1 %vm196_vm0, %v175_v0  ;;  %s165_s19 = scalar_lea.vmem %s438_s0, %s362_s16  ;;  %s170_s24 = scalar_lea.vmem %s441_s3, %s362_s16 }
   0xe   : > { %v171_v1 = vld [vmem:[%s165_s19] sm:$0xff]  ;;  %v173_v2 = vld [vmem:[%s165_s19 + $0x10] sm:$0xff]  ;;  %v172_v3 = vld [vmem:[%s165_s19 + $0x8] sm:$0xff] }
   0xf   : > { %371 = vmatprep.mubr.msk.f32.mxu0 %vm183_vm1, %v171_v1  ;;  %374 = vmatprep.mubr.msk.f32.mxu1 %vm183_vm1, %v173_v2  ;;  %v174_v4 = vld [vmem:[%s165_s19 + $0x18] sm:$0xff] }
  0x10   : > { %372 = vmatmul.mubr.msk.f32.vlgmr.msra.gmra.mxu0 %vm183_vm1, %v172_v3  ;;  %375 = vmatmul.mubr.msk.f32.vlgmr.msra.gmra.mxu1 %vm183_vm1, %v174_v4 }
  0xd0   : > { %v373_v6 = vpop.f32.mrf.mxu0  ;;  %v376_v7 = vpop.f32.mrf.mxu1 }
  0xd1   : > { %v272_v8 = vadd.f32 %v373_v6, %v354_v5  ;;  %v282_v9 = vadd.f32 %v376_v7, %v354_v5 }
  0xd2   : > { %v266_v10 = vpop.f32.mrf.mxu0  ;;  %v276_v11 = vpop.f32.mrf.mxu1 }
  0xd3   : > { %287 = vst.msk [vmem:[%s170_s24 + $0x8] sm:$0xff] %vm285_vm2, %v272_v8  ;;  %289 = vst.msk [vmem:[%s170_s24 + $0x18] sm:$0xff] %vm285_vm2, %v282_v9  ;;  %v267_v12 = vadd.f32 %v354_v5, %v266_v10  ;;  %v277_v13 = vadd.f32 %v354_v5, %v276_v11 }
  0xd5   : > { %286 = vst.msk [vmem:[%s170_s24] sm:$0xff] %vm285_vm2, %v267_v12  ;;  %288 = vst.msk [vmem:[%s170_s24 + $0x10] sm:$0xff] %vm285_vm2, %v277_v13 }
  0xd6 PF: > { %s13_s12 = sadd.s32 1, %s393_s12  }
  0xd7   : > { %p10_p4 = scmp.ge.s32.totalorder %s13_s12, 4  }
  0xd9   :  { %12 = sbr.rel (!%p10_p4) target bundleno = 1 (0x1), region = 62 }

// kernel: birc_forward.7
= control target key start
LH: loop header
LB: loop body
LE: loop exit
PB: predicated region body
PF: predicated region fallthrough
CT: control target
= control target key end

     0   :  { %s3752_s0 = inlined_call_operand.vmem [shape: f32[2,16,64], index: 0, kind: input, shape index: {}]   ;;  %s3753_s1 = inlined_call_operand.vmem [shape: f32[1,64], index: 1, kind: input, shape index: {}]   ;;  %s3754_s2 = inlined_call_operand.vmem [shape: f32[1,64], index: 2, kind: input, shape index: {}]   ;;  %s3755_s3 = inlined_call_operand.vmem [shape: f32[64,192], index: 3, kind: input, shape index: {}]   ;;  %s3756_s4 = inlined_call_operand.vmem [shape: f32[1,192], index: 4, kind: input, shape index: {}]   ;;  %s3757_s5 = inlined_call_operand.vmem [shape: f32[64,64], index: 5, kind: input, shape index: {}]   ;;  %s3758_s6 = inlined_call_operand.vmem [shape: f32[1,64], index: 6, kind: input, shape index: {}]   ;;  %s3759_s7 = inlined_call_operand.vmem [shape: f32[64,128], index: 7, kind: input, shape index: {}]   ;;  %s3760_s8 = inlined_call_operand.vmem [shape: f32[1,128], index: 8, kind: input, shape index: {}]   ;;  %s3761_s9 = inlined_call_operand.vmem [shape: f32[128,64], index: 9, kind: input, shape index: {}]   ;;  %s3762_s10 = inlined_call_operand.vmem [shape: f32[1,64], index: 10, kind: input, shape index: {}]   ;;  %s3763_s11 = inlined_call_operand.hbm [shape: f32[2,16,64], index: 11, kind: output, shape index: {}]  }
   0x1   :  { %3765 = sst [smem:[#allocation5_spill]] %s3752_s0 }
   0x2   :  { %16 = vsyncpa [#allocation3], 0 }
   0x3   :  { %18 = vsyncpa [#allocation3 + $0x1], 0  ;;  %s3225_s17 = smov 0   ;;  %s3227_s18 = smov 0  }
   0x4   :  { %s3229_s19 = smov 0   ;;  %s3231_s20 = smov 0  }
   0x5 LB: > { %s3246_s21 = sadd.s32 4294967295, %s3145_s20   ;;  %s2601_s22 = sadd.s32 4294967294, %s3145_s20   ;;  %s3145_s20 = sphi %s3231_s20, %s3773_s20   ;;  %s3141_s19 = sphi %s3229_s19, %s3772_s19   ;;  %s3137_s18 = sphi %s3227_s18, %s3771_s18   ;;  %s3133_s17 = sphi %s3225_s17, %s3770_s17  }
   0x6   : > { %s3250_s23 = sadd.s32 1, %s3145_s20   ;;  %s267_s24 = sadd.s32 1, %s3141_s19 }
   0x7   : > { %s264_s25 = ssub.s32 %s3145_s20, %s3250_s23  ;;  %p277_p0 = scmp.ne.s32.totalorder %s3141_s19, %s3137_s18 }
   0x8   : > { %p265_p1 = scmp.eq.s32.totalorder %s264_s25, 0  ;;  %p278_p2 = scmp.eq.s32.totalorder %s3246_s21, 1 }
   0x9   : > { %p283_p3 = scmp.ne.s32.totalorder %s3137_s18, %s3133_s17  ;;  %p284_p4 = scmp.eq.s32.totalorder %s2601_s22, 1 }
   0xa   : > { %s3261_s26 = scalar_select %p265_p1, %s3141_s19, %s267_s24  }
   0xb   : > { %p3263_p5 = por %p278_p2, %p277_p0  ;;  %p3267_p6 = por %p284_p4, %p283_p3 }
   0xc   : > { %p2604_p7 = scmp.ge.s32.totalorder %s3145_s20, 1  ;;  %p340_p8 = scmp.lt.s32.totalorder %s3145_s20, 3 }
   0xe   : > { %p341_p9 = pnand %p2604_p7, %p340_p8 }
   0xf   : > { %p380_p10 = scmp.lt.s32.totalorder (!%p341_p9), %s3246_s21, 1  ;;  %s3768_s0 = sld [smem:[#allocation5_spill]] (!%p341_p9) }
  0x10   : > { %344 = sbr.rel (%p341_p9) target bundleno = 5216 (0x1460), region = 64  ;;  %s3148_s13 = smov (!%p341_p9), 64  }
  0x11   : > { %s3150_s15 = smov (!%p341_p9), 120   ;;  %s3151_s16 = smov (!%p341_p9), 48  }
  0x12   : > { %s3152_s22 = smov (!%p341_p9), 112   ;;  %s3153_s24 = smov (!%p341_p9), 40  }
  0x13   : > { %s3154_s25 = smov (!%p341_p9), 104   ;;  %s3157_s12 = smov (!%p341_p9), 24  }
  0x15   : > { %s381_s29 = scalar_select %p380_p10, %s3246_s21, 1  ;;  %vm387_vm0 = vcmask 523264   ;;  %v448_v14 = vld [vmem:[%s3755_s3 + $0x78] sm:$0xff]  ;;  %v447_v15 = vld [vmem:[%s3755_s3 + $0x70] sm:$0xff]  ;;  %v446_v16 = vld [vmem:[%s3755_s3 + $0x68] sm:$0xff]  ;;  %v3147_v19 = vmov 0.0   ;;  %v451_v47 = vlaneseq }
  0x16   : > { %483 = vmatprep.subr.mxu0 %v448_v14  ;;  %v445_v17 = vld [vmem:[%s3755_s3 + $0x60] sm:$0xff]  ;;  %v444_v18 = vld [vmem:[%s3755_s3 + $0x58] sm:$0xff]  ;;  %531 = vmatprep.mubr.f32.mxu0 %v3147_v19  ;;  %v443_v20 = vld [vmem:[%s3755_s3 + $0x50] sm:$0xff]  ;;  %vm550_vm1 = vcmask 64512   ;;  %vm636_vm2 = vcmask 130048   ;;  %vm2216_vm3 = vcmask 195584  }
  0x17   : > { %s2672_s30 = sshll.u32 %s381_s29, 4  ;;  %484 = vmatpush1.msra.mxu0 %v447_v15  ;;  %v442_v21 = vld [vmem:[%s3755_s3 + $0x48] sm:$0xff]  ;;  %v441_v22 = vld [vmem:[%s3755_s3 + $0x40] sm:$0xff]  ;;  %v440_v23 = vld [vmem:[%s3755_s3 + $0x38] sm:$0xff]  ;;  %v452_v48 = vshrl.u32 %v451_v47, 7  ;;  %s3155_s29 = smov 32  }
  0x18   : > { %s384_s14 = scalar_lea.vmem %s3768_s0, %s2672_s30  ;;  %485 = vmatprep.subr.mxu0 %v446_v16  ;;  %v439_v24 = vld [vmem:[%s3755_s3 + $0x30] sm:$0xff]  ;;  %v438_v25 = vld [vmem:[%s3755_s3 + $0x28] sm:$0xff]  ;;  %v437_v26 = vld [vmem:[%s3755_s3 + $0x20] sm:$0xff]  ;;  %s3156_s30 = smov 96   ;;  %vm2219_vm4 = vcmask 261120   ;;  %vm2222_vm5 = vcmask 326656  }
  0x19   : > { %v385_v0 = vld [vmem:[%s384_s14] sm:$0xff]  ;;  %v386_v1 = vld [vmem:[%s384_s14 + $0x8] sm:$0xff]  ;;  %486 = vmatpush1.msra.mxu0 %v445_v17  ;;  %v436_v27 = vld [vmem:[%s3755_s3 + $0x18] sm:$0xff]  ;;  %v453_v49 = vsub.s32 0, %v452_v48  ;;  %v457_v57 = vsub.s32 1, %v452_v48  ;;  %s3149_s14 = smov 56  }
  0x1a   : > { %v388_v2 = vsel %vm387_vm0, %v385_v0, 0.0  ;;  %v391_v3 = vsel %vm387_vm0, %v386_v1, 0.0  ;;  %487 = vmatprep.subr.mxu0 %v444_v18  ;;  %v435_v28 = vld [vmem:[%s3755_s3 + $0x10] sm:$0xff]  ;;  %v434_v29 = vld [vmem:[%s3755_s3 + $0x8] sm:$0xff]  ;;  %v433_v30 = vld [vmem:[%s3755_s3] sm:$0xff]  ;;  %vm2225_vm6 = vcmask 392192  }
  0x1b   : > { %389 = vadd.xlane.f32.xlu0 %v388_v2  ;;  %488 = vmatpush1.msra.mxu0 %v443_v20  ;;  %v2608_v38 = vld [vmem:[%s3753_s1] ss:$0 sm:$0xff]  ;;  %vm2228_vm7 = vcmask 457728  }
  0x1c   : > { %489 = vmatprep.subr.mxu0 %v442_v21  ;;  %v2609_v40 = vld [vmem:[%s3754_s2] ss:$0 sm:$0xff] }
  0x1d   : > { %490 = vmatpush1.msra.mxu0 %v441_v22  ;;  %v449_v50 = vld [vmem:[%s3756_s4] sm:$0x3] }
  0x1e   : > { %491 = vmatprep.subr.mxu0 %v440_v23  ;;  %v454_v51 = vrot.slane %v449_v50, %v453_v49  ;;  %v458_v61 = vrot.slane %v449_v50, %v457_v57 }
  0x1f   : > { %392 = vadd.xlane.f32.xlu0 %v391_v3  ;;  %492 = vmatpush1.msra.mxu0 %v439_v24 }
  0x20   : > { %493 = vmatprep.subr.mxu0 %v438_v25 }
  0x21   : > { %494 = vmatpush1.msra.mxu0 %v437_v26 }
  0x22   : > { %495 = vmatprep.subr.mxu0 %v436_v27 }
  0x23   : > { %496 = vmatpush1.msra.mxu0 %v435_v28 }
  0x24   : > { %497 = vmatprep.subr.mxu0 %v434_v29 }
  0x25   : > { %498 = vmatpush1.msra.mxu0 %v433_v30 }
  0xa4   : > { %v390_v4 = vpop.xlane.xlu0 %389 }
  0xa5   : > { %v395_v5 = vmul.f32 0.015625, %v390_v4 }
  0xa7   : > { %v397_v6 = vsub.f32 %v385_v0, %v395_v5 }
  0xa8   : > { %v393_v7 = vpop.xlane.xlu0 %392 }
  0xa9   : > { %v396_v8 = vmul.f32 0.015625, %v393_v7  ;;  %v399_v9 = vmul.f32 %v397_v6, %v397_v6 }
  0xab   : > { %v398_v10 = vsub.f32 %v386_v1, %v396_v8  ;;  %v401_v11 = vsel %vm387_vm0, %v399_v9, 0.0 }
  0xac   : > { %402 = vadd.xlane.f32.xlu1 %v401_v11 }
  0xad   : > { %v400_v12 = vmul.f32 %v398_v10, %v398_v10 }
  0xaf   : > { %v404_v13 = vsel %vm387_vm0, %v400_v12, 0.0 }
  0xb0   : > { %405 = vadd.xlane.f32.xlu1 %v404_v13 }
 0x135   : > { %v403_v31 = vpop.xlane.xlu1 %402 }
 0x136   : > { %v407_v32 = vmul.f32 0.015625, %v403_v31 }
 0x138   : > { %v409_v33 = vadd.f32 1e-05, %v407_v32 }
 0x139   : > { %v406_v34 = vpop.xlane.xlu1 %405 }
 0x13a   : > { %3017 = vrsqrt.f32 %v409_v33  ;;  %v408_v35 = vmul.f32 0.015625, %v406_v34 }
 0x13c   : > { %v410_v36 = vadd.f32 1e-05, %v408_v35 }
 0x13e   : > { %3019 = vrsqrt.f32 %v410_v36 }
 0x147   : > { %v3018_v37 = vpop.eup %3017 }
 0x148   : > { %v413_v39 = vmul.f32 %v3018_v37, %v397_v6 }
 0x14a   : > { %v422_v41 = vmul.f32 %v2608_v38, %v413_v39 }
 0x14b   : > { %v3020_v42 = vpop.eup %3019 }
 0x14c   : > { %v431_v43 = vadd.f32 %v2609_v40, %v422_v41  ;;  %v414_v44 = vmul.f32 %v3020_v42, %v398_v10 }
 0x14e   : > { %2610 = vmatmul.mubr.msk.f32.vlgmr.msra.gmra.mxu0 %vm387_vm0, %v431_v43  ;;  %v423_v45 = vmul.f32 %v2608_v38, %v414_v44 }
 0x14f   : > { %537 = vmatprep.mubr.f32.mxu0 %v3147_v19 }
 0x150   : > { %v432_v46 = vadd.f32 %v2609_v40, %v423_v45 }
 0x152   : > { %2611 = vmatmul.mubr.msk.f32.gmra.mxu0 %vm387_vm0, %v432_v46 }
 0x20e   : > { %v533_v52 = vpop.f32.mrf.mxu0 }
 0x20f   : > { %v3341_v53 = vadd.f32 %v533_v52, %v454_v51 }
 0x210   : > { %v535_v54 = vpop.f32.mrf.mxu0 }
 0x211   : > { %2780 = vmatprep.mubr.msk.f32.mxu1 %vm550_vm1, %v3341_v53  ;;  %546 = vrot.lane.b32.xlu1 %v3341_v53, %s3148_s13  ;;  %v3356_v63 = vadd.f32 %v535_v54, %v458_v61 }
 0x212   : > { %v539_v55 = vpop.f32.mrf.mxu0 }
 0x213   : > { %v3346_v56 = vadd.f32 %v539_v55, %v454_v51 }
 0x214   : > { %v541_v59 = vpop.f32.mrf.mxu0 }
 0x215   : > { %548 = vrot.lane.b32.xlu0 %v3346_v56, %s3148_s13  ;;  %v3352_v62 = vadd.f32 %v541_v59, %v458_v61  ;;  %s3158_s13 = smov 88  }
 0x283   : > { %v547_v60 = vpop.permute.xlu1 %546 }
 0x287   : > { %v549_v58 = vpop.permute.xlu0 %548 }
 0x288   : > { %2776 = vmatprep.subr.msk.mxu1 %vm550_vm1, %v549_v58 }
 0x289   : > { %2777 = vmatpush3.xpose.msk.msra.mxu1 %vm550_vm1, %v549_v58 }
 0x28a   : > { %2778 = vmatprep.subr.msk.mxu1 %vm550_vm1, %v547_v60 }
 0x28d   : > { %2779 = vmatpush3.xpose.msk.msra.mxu1 %vm550_vm1, %v547_v60 }
 0x28e   : > { %2783 = vmatprep.subr.mxu1 %v3352_v62 }
 0x290   : > { %2781 = vmatmul.mubr.msk.f32.vlgmr.msra.gmra.mxu1 %vm550_vm1, %v3346_v56 }
 0x291   : > { %2784 = vmatpush3.msra.mxu1 %v3352_v62 }
 0x292   : > { %2785 = vmatprep.subr.mxu1 %v3356_v63 }
 0x293   : > { %2786 = vmatpush3.msra.mxu1 %v3356_v63 }
 0x350   : > { %v2782_v0 = vpop.f32.mrf.mxu1 }
 0x351   : > { %v635_v1 = vmul.f32 0.35355338, %v2782_v0 }
 0x352   : > { %v625_v2 = vpop.f32.mrf.mxu1 }
 0x353   : > { %v634_v3 = vmul.f32 0.35355338, %v625_v2  ;;  %v640_v4 = vsel %vm636_vm2, %v635_v1, -inf }
 0x354   : > { %641 = vmax.xlane.f32.xlu0 %v640_v4 }
 0x355   : > { %v637_v5 = vsel %vm636_vm2, %v634_v3, -inf }
 0x356   : > { %638 = vmax.xlane.f32.xlu1 %v637_v5 }
 0x3dd   : > { %v642_v6 = vpop.xlane.xlu0 %641 }
 0x3de   : > { %v644_v7 = vsub.f32 %v635_v1, %v642_v6 }
 0x3df   : > { %v639_v8 = vpop.xlane.xlu1 %638 }
 0x3e0   : > { %v647_v9 = vmul.f32 1.442695, %v644_v7  ;;  %v643_v10 = vsub.f32 %v634_v3, %v639_v8 }
 0x3e2   : > { %3021 = vpow2.f32 %v647_v9  ;;  %v645_v11 = vmul.f32 1.442695, %v643_v10 }
 0x3e4   : > { %3023 = vpow2.f32 %v645_v11 }
 0x3ef   : > { %v3022_v12 = vpop.eup %3021 }
 0x3f0   : > { %v652_v13 = vsel %vm636_vm2, %v3022_v12, 0.0 }
 0x3f1   : > { %v3024_v14 = vpop.eup %3023  ;;  %653 = vadd.xlane.f32.xlu1 %v652_v13 }
 0x3f2   : > { %v649_v15 = vsel %vm636_vm2, %v3024_v14, 0.0 }
 0x3f3   : > { %650 = vadd.xlane.f32.xlu0 %v649_v15 }
 0x402   : > { %744 = vrot.lane.b32.xlu1 %v3341_v53, %s3149_s14 }
 0x406   : > { %740 = vrot.lane.b32.xlu1 %v3341_v53, %s3150_s15 }
 0x409   : > { %746 = vrot.lane.b32.xlu0 %v3346_v56, %s3149_s14 }
 0x40a   : > { %950 = vrot.lane.b32.xlu1 %v3346_v56, %s3151_s16 }
 0x40d   : > { %742 = vrot.lane.b32.xlu0 %v3346_v56, %s3150_s15 }
 0x40e   : > { %948 = vrot.lane.b32.xlu1 %v3341_v53, %s3151_s16 }
 0x411   : > { %944 = vrot.lane.b32.xlu0 %v3341_v53, %s3152_s22 }
 0x412   : > { %946 = vrot.lane.b32.xlu1 %v3346_v56, %s3152_s22 }
 0x47a   : > { %v654_v16 = vpop.xlane.xlu1 %653 }
 0x47b   : > { %3025 = vrcp.f32 %v654_v16 }
 0x47c   : > { %v651_v17 = vpop.xlane.xlu0 %650 }
 0x47d   : > { %3027 = vrcp.f32 %v651_v17 }
 0x47e   : > { %v745_v19 = vpop.permute.xlu1 %744 }
 0x480   : > { %v747_v18 = vpop.permute.xlu0 %746 }
 0x481   : > { %2790 = vmatprep.subr.msk.mxu1 %vm550_vm1, %v747_v18 }
 0x482   : > { %v741_v22 = vpop.permute.xlu1 %740 }
 0x484   : > { %v743_v25 = vpop.permute.xlu0 %742 }
 0x486   : > { %v951_v26 = vpop.permute.xlu1 %950 }
 0x488   : > { %v3026_v20 = vpop.eup %3025  ;;  %v945_v27 = vpop.permute.xlu0 %944 }
 0x489   : > { %v658_v24 = vmul.f32 %v3026_v20, %v3022_v12 }
 0x48a   : > { %v3028_v21 = vpop.eup %3027  ;;  %v949_v28 = vpop.permute.xlu1 %948 }
 0x48b   : > { %v657_v23 = vmul.f32 %v3028_v21, %v3024_v14 }
 0x48d   : > { %2787 = vmatprep.mubr.msk.f32.mxu1 %vm636_vm2, %v657_v23 }
 0x48e   : > { %2788 = vmatmul.mubr.msk.f32.vlgmr.msra.gmra.mxu1 %vm636_vm2, %v658_v24  ;;  %v947_v29 = vpop.permute.xlu1 %946 }
 0x48f   : > { %2791 = vmatpush3.xpose.msk.msra.mxu1 %vm550_vm1, %v747_v18  ;;  %2794 = vmatprep.mubr.msk.f32.mxu1 %vm550_vm1, %v741_v22 }
 0x490   : > { %2792 = vmatprep.subr.msk.mxu1 %vm550_vm1, %v745_v19 }
 0x493   : > { %2793 = vmatpush3.xpose.msk.msra.mxu1 %vm550_vm1, %v745_v19 }
 0x494   : > { %2804 = vmatprep.subr.msk.mxu1 %vm550_vm1, %v951_v26 }
 0x496   : > { %2795 = vmatmul.mubr.msk.f32.vlgmr.msra.gmra.mxu1 %vm550_vm1, %v743_v25 }
 0x497   : > { %2805 = vmatpush3.xpose.msk.msra.mxu1 %vm550_vm1, %v951_v26  ;;  %2808 = vmatprep.mubr.msk.f32.mxu1 %vm550_vm1, %v945_v27 }
 0x498   : > { %2806 = vmatprep.subr.msk.mxu1 %vm550_vm1, %v949_v28 }
 0x49b   : > { %2807 = vmatpush3.xpose.msk.msra.mxu1 %vm550_vm1, %v949_v28 }
 0x49e   : > { %2809 = vmatmul.mubr.msk.f32.vlgmr.msra.gmra.mxu1 %vm550_vm1, %v947_v29 }
 0x54e   : > { %v3397_v30 = vpop.f32.mrf.mxu1 }
 0x550   : > { %v3399_v31 = vpop.f32.mrf.mxu1 }
 0x556   : > { %v2796_v32 = vpop.f32.mrf.mxu1 }
 0x557   : > { %v832_v33 = vmul.f32 0.35355338, %v2796_v32 }
 0x558   : > { %v822_v34 = vpop.f32.mrf.mxu1 }
 0x559   : > { %v831_v35 = vmul.f32 0.35355338, %v822_v34  ;;  %v836_v36 = vsel %vm636_vm2, %v832_v33, -inf }
 0x55a   : > { %837 = vmax.xlane.f32.xlu1 %v836_v36 }
 0x55b   : > { %v833_v37 = vsel %vm636_vm2, %v831_v35, -inf }
 0x55c   : > { %834 = vmax.xlane.f32.xlu0 %v833_v37 }
 0x55e   : > { %v2810_v38 = vpop.f32.mrf.mxu1 }
 0x55f   : > { %v1036_v41 = vmul.f32 0.35355338, %v2810_v38 }
 0x560   : > { %v1026_v39 = vpop.f32.mrf.mxu1 }
 0x561   : > { %v1035_v40 = vmul.f32 0.35355338, %v1026_v39  ;;  %v1040_v43 = vsel %vm636_vm2, %v1036_v41, -inf }
 0x563   : > { %v1037_v42 = vsel %vm636_vm2, %v1035_v40, -inf }
 0x564   : > { %1038 = vmax.xlane.f32.xlu0 %v1037_v42 }
 0x568   : > { %1041 = vmax.xlane.f32.xlu0 %v1040_v43 }
 0x56b   : > { %857 = vrot.lane.b32.xlu1 %v3356_v63, %s3150_s15 }
 0x56f   : > { %1061 = vrot.lane.b32.xlu1 %v3352_v62, %s3152_s22 }
 0x573   : > { %1059 = vrot.lane.b32.xlu1 %v3356_v63, %s3152_s22  ;;  %s3160_s22 = smov 80  }
 0x57e   : > { %859 = vrot.lane.b32.xlu0 %v3352_v62, %s3150_s15  ;;  %s3159_s15 = smov 16  }
 0x5e3   : > { %v838_v44 = vpop.xlane.xlu1 %837 }
 0x5e4   : > { %v840_v45 = vsub.f32 %v832_v33, %v838_v44 }
 0x5e5   : > { %v835_v46 = vpop.xlane.xlu0 %834 }
 0x5e6   : > { %v843_v47 = vmul.f32 1.442695, %v840_v45  ;;  %v839_v48 = vsub.f32 %v831_v35, %v835_v46 }
 0x5e7   : > { %v858_v57 = vpop.permute.xlu1 %857 }
 0x5e8   : > { %3029 = vpow2.f32 %v843_v47  ;;  %v841_v49 = vmul.f32 1.442695, %v839_v48 }
 0x5ea   : > { %3031 = vpow2.f32 %v841_v49 }
 0x5eb   : > { %v1062_v2 = vpop.permute.xlu1 %1061 }
 0x5ed   : > { %v1039_v50 = vpop.xlane.xlu0 %1038 }
 0x5ee   : > { %v1043_v51 = vsub.f32 %v1035_v40, %v1039_v50 }
 0x5ef   : > { %v1060_v7 = vpop.permute.xlu1 %1059 }
 0x5f0   : > { %v1045_v52 = vmul.f32 1.442695, %v1043_v51 }
 0x5f1   : > { %v1042_v54 = vpop.xlane.xlu0 %1041 }
 0x5f2   : > { %3033 = vpow2.f32 %v1045_v52  ;;  %v1044_v55 = vsub.f32 %v1036_v41, %v1042_v54 }
 0x5f4   : > { %v1047_v58 = vmul.f32 1.442695, %v1044_v55 }
 0x5f5   : > { %v3030_v59 = vpop.eup %3029  ;;  %v860_v60 = vpop.permute.xlu0 %859 }
 0x5f6   : > { %3035 = vpow2.f32 %v1047_v58  ;;  %2797 = vmatprep.subr.mxu0 %v860_v60  ;;  %v848_v61 = vsel %vm636_vm2, %v3030_v59, 0.0 }
 0x5f7   : > { %v3032_v0 = vpop.eup %3031  ;;  %2798 = vmatpush3.msra.mxu0 %v860_v60  ;;  %849 = vadd.xlane.f32.xlu1 %v848_v61 }
 0x5f8   : > { %2799 = vmatprep.subr.mxu0 %v858_v57  ;;  %v845_v1 = vsel %vm636_vm2, %v3032_v0, 0.0 }
 0x5f9   : > { %846 = vadd.xlane.f32.xlu0 %v845_v1  ;;  %2800 = vmatpush3.msra.mxu0 %v858_v57 }
 0x5fa   : > { %2811 = vmatprep.subr.mxu0 %v1062_v2 }
 0x5ff   : > { %v3034_v3 = vpop.eup %3033 }
 0x600   : > { %v1049_v4 = vsel %vm636_vm2, %v3034_v3, 0.0 }
 0x601   : > { %1050 = vadd.xlane.f32.xlu0 %v1049_v4 }
 0x603   : > { %v3036_v5 = vpop.eup %3035 }
 0x604   : > { %v1052_v6 = vsel %vm636_vm2, %v3036_v5, 0.0 }
 0x605   : > { %1053 = vadd.xlane.f32.xlu1 %v1052_v6 }
 0x616   : > { %1150 = vrot.lane.b32.xlu1 %v3341_v53, %s3153_s24 }
 0x617   : > { %1152 = vrot.lane.b32.xlu0 %v3346_v56, %s3153_s24 }
 0x61a   : > { %1148 = vrot.lane.b32.xlu1 %v3346_v56, %s3154_s25 }
 0x61b   : > { %1146 = vrot.lane.b32.xlu0 %v3341_v53, %s3154_s25 }
 0x680   : > { %v850_v8 = vpop.xlane.xlu1 %849 }
 0x681   : > { %3037 = vrcp.f32 %v850_v8 }
 0x682   : > { %v847_v9 = vpop.xlane.xlu0 %846 }
 0x683   : > { %3039 = vrcp.f32 %v847_v9 }
 0x68a   : > { %v1051_v10 = vpop.xlane.xlu0 %1050 }
 0x68b   : > { %3041 = vrcp.f32 %v1051_v10 }
 0x68e   : > { %v1054_v11 = vpop.xlane.xlu1 %1053  ;;  %v3038_v12 = vpop.eup %3037 }
 0x68f   : > { %3043 = vrcp.f32 %v1054_v11  ;;  %v854_v15 = vmul.f32 %v3038_v12, %v3030_v59  ;;  %v1153_v16 = vpop.permute.xlu0 %1152 }
 0x690   : > { %v3040_v13 = vpop.eup %3039 }
 0x691   : > { %v853_v14 = vmul.f32 %v3040_v13, %v3032_v0 }
 0x692   : > { %v1151_v22 = vpop.permute.xlu1 %1150 }
 0x693   : > { %2801 = vmatprep.mubr.msk.f32.mxu0 %vm636_vm2, %v853_v14  ;;  %v1147_v21 = vpop.permute.xlu0 %1146 }
 0x694   : > { %2802 = vmatmul.mubr.msk.f32.vlgmr.msra.gmra.mxu0 %vm636_vm2, %v854_v15 }
 0x695   : > { %2812 = vmatpush3.msra.mxu0 %v1062_v2 }
 0x696   : > { %2813 = vmatprep.subr.mxu0 %v1060_v7  ;;  %v1149_v23 = vpop.permute.xlu1 %1148 }
 0x697   : > { %2814 = vmatpush3.msra.mxu0 %v1060_v7 }
 0x698   : > { %v3042_v17 = vpop.eup %3041  ;;  %2818 = vmatprep.subr.msk.mxu0 %vm550_vm1, %v1153_v16 }
 0x699   : > { %v1057_v18 = vmul.f32 %v3042_v17, %v3034_v3 }
 0x69b   : > { %2815 = vmatprep.mubr.msk.f32.mxu0 %vm636_vm2, %v1057_v18 }
 0x69c   : > { %v3044_v19 = vpop.eup %3043 }
 0x69d   : > { %v1058_v20 = vmul.f32 %v3044_v19, %v3036_v5 }
 0x69f   : > { %2816 = vmatmul.mubr.msk.f32.vlgmr.msra.gmra.mxu0 %vm636_vm2, %v1058_v20 }
 0x6a0   : > { %2819 = vmatpush3.xpose.msk.msra.mxu0 %vm550_vm1, %v1153_v16  ;;  %2822 = vmatprep.mubr.msk.f32.mxu0 %vm550_vm1, %v1147_v21 }
 0x6a1   : > { %2820 = vmatprep.subr.msk.mxu0 %vm550_vm1, %v1151_v22 }
 0x6a4   : > { %2821 = vmatpush3.xpose.msk.msra.mxu0 %vm550_vm1, %v1151_v22 }
 0x6a7   : > { %2823 = vmatmul.mubr.msk.f32.vlgmr.msra.gmra.mxu0 %vm550_vm1, %v1149_v23 }
 0x754   : > { %v3435_v24 = vpop.f32.mrf.mxu0 }
 0x756   : > { %v3437_v25 = vpop.f32.mrf.mxu0 }
 0x75f   : > { %v3439_v26 = vpop.f32.mrf.mxu0 }
 0x761   : > { %v3441_v27 = vpop.f32.mrf.mxu0 }
 0x767   : > { %v2824_v28 = vpop.f32.mrf.mxu0 }
 0x768   : > { %v1238_v29 = vmul.f32 0.35355338, %v2824_v28 }
 0x769   : > { %v1228_v32 = vpop.f32.mrf.mxu0 }
 0x76a   : > { %v1237_v33 = vmul.f32 0.35355338, %v1228_v32  ;;  %v1242_v34 = vsel %vm636_vm2, %v1238_v29, -inf }
 0x76b   : > { %1243 = vmax.xlane.f32.xlu1 %v1242_v34 }
 0x76c   : > { %v1239_v35 = vsel %vm636_vm2, %v1237_v33, -inf }
 0x76d   : > { %1240 = vmax.xlane.f32.xlu0 %v1239_v35 }
 0x77c   : > { %1261 = vrot.lane.b32.xlu1 %v3356_v63, %s3154_s25 }
 0x780   : > { %1354 = vrot.lane.b32.xlu1 %v3346_v56, %s3155_s29 }
 0x784   : > { %1352 = vrot.lane.b32.xlu1 %v3341_v53, %s3155_s29 }
 0x788   : > { %1350 = vrot.lane.b32.xlu1 %v3346_v56, %s3156_s30 }
 0x7f4   : > { %v1244_v36 = vpop.xlane.xlu1 %1243 }
 0x7f5   : > { %v1246_v37 = vsub.f32 %v1238_v29, %v1244_v36 }
 0x7f6   : > { %v1241_v38 = vpop.xlane.xlu0 %1240 }
 0x7f7   : > { %v1249_v39 = vmul.f32 1.442695, %v1246_v37  ;;  %v1245_v40 = vsub.f32 %v1237_v33, %v1241_v38 }
 0x7f8   : > { %v1262_v48 = vpop.permute.xlu1 %1261 }
 0x7f9   : > { %3045 = vpow2.f32 %v1249_v39  ;;  %v1247_v41 = vmul.f32 1.442695, %v1245_v40 }
 0x7fb   : > { %3047 = vpow2.f32 %v1247_v41 }
 0x7fc   : > { %v1355_v50 = vpop.permute.xlu1 %1354 }
 0x800   : > { %v1353_v58 = vpop.permute.xlu1 %1352 }
 0x804   : > { %v1351_v59 = vpop.permute.xlu1 %1350 }
 0x806   : > { %v3046_v42 = vpop.eup %3045 }
 0x807   : > { %v1254_v43 = vsel %vm636_vm2, %v3046_v42, 0.0 }
 0x808   : > { %v3048_v44 = vpop.eup %3047  ;;  %1255 = vadd.xlane.f32.xlu0 %v1254_v43 }
 0x809   : > { %v1251_v45 = vsel %vm636_vm2, %v3048_v44, 0.0 }
 0x80c   : > { %1252 = vadd.xlane.f32.xlu0 %v1251_v45 }
 0x822   : > { %1263 = vrot.lane.b32.xlu0 %v3352_v62, %s3154_s25  ;;  %s3764_s25 = smov 8  }
 0x826   : > { %1348 = vrot.lane.b32.xlu0 %v3341_v53, %s3156_s30 }
 0x891   : > { %v1256_v46 = vpop.xlane.xlu0 %1255 }
 0x892   : > { %3049 = vrcp.f32 %v1256_v46 }
 0x895   : > { %v1253_v47 = vpop.xlane.xlu0 %1252 }
 0x896   : > { %3051 = vrcp.f32 %v1253_v47 }
 0x899   : > { %v1264_v49 = vpop.permute.xlu0 %1263 }
 0x89a   : > { %2825 = vmatprep.subr.mxu1 %v1264_v49 }
 0x89b   : > { %2826 = vmatpush3.msra.mxu1 %v1264_v49 }
 0x89c   : > { %2827 = vmatprep.subr.mxu1 %v1262_v48 }
 0x89d   : > { %2828 = vmatpush3.msra.mxu1 %v1262_v48  ;;  %v1349_v57 = vpop.permute.xlu0 %1348 }
 0x89e   : > { %2832 = vmatprep.subr.msk.mxu1 %vm550_vm1, %v1355_v50 }
 0x89f   : > { %v3050_v51 = vpop.eup %3049 }
 0x8a0   : > { %v1260_v55 = vmul.f32 %v3050_v51, %v3046_v42 }
 0x8a3   : > { %v3052_v52 = vpop.eup %3051 }
 0x8a4   : > { %v1259_v54 = vmul.f32 %v3052_v52, %v3048_v44 }
 0x8a6   : > { %2829 = vmatprep.mubr.msk.f32.mxu1 %vm636_vm2, %v1259_v54 }
 0x8a7   : > { %2830 = vmatmul.mubr.msk.f32.vlgmr.msra.gmra.mxu1 %vm636_vm2, %v1260_v55 }
 0x8a8   : > { %2833 = vmatpush3.xpose.msk.msra.mxu1 %vm550_vm1, %v1355_v50  ;;  %2836 = vmatprep.mubr.msk.f32.mxu1 %vm550_vm1, %v1349_v57 }
 0x8a9   : > { %2834 = vmatprep.subr.msk.mxu1 %vm550_vm1, %v1353_v58 }
 0x8ac   : > { %2835 = vmatpush3.xpose.msk.msra.mxu1 %vm550_vm1, %v1353_v58 }
 0x8af   : > { %2837 = vmatmul.mubr.msk.f32.vlgmr.msra.gmra.mxu1 %vm550_vm1, %v1351_v59 }
 0x967   : > { %v3467_v60 = vpop.f32.mrf.mxu1 }
 0x969   : > { %v3469_v61 = vpop.f32.mrf.mxu1 }
 0x96f   : > { %v2838_v0 = vpop.f32.mrf.mxu1 }
 0x970   : > { %v1440_v1 = vmul.f32 0.35355338, %v2838_v0 }
 0x971   : > { %v1430_v2 = vpop.f32.mrf.mxu1 }
 0x972   : > { %v1439_v3 = vmul.f32 0.35355338, %v1430_v2  ;;  %v1444_v4 = vsel %vm636_vm2, %v1440_v1, -inf }
 0x973   : > { %1445 = vmax.xlane.f32.xlu1 %v1444_v4 }
 0x974   : > { %v1441_v5 = vsel %vm636_vm2, %v1439_v3, -inf }
 0x975   : > { %1442 = vmax.xlane.f32.xlu0 %v1441_v5 }
 0x984   : > { %1463 = vrot.lane.b32.xlu1 %v3356_v63, %s3156_s30 }
 0x988   : > { %1556 = vrot.lane.b32.xlu1 %v3346_v56, %s3157_s12 }
 0x98c   : > { %1554 = vrot.lane.b32.xlu1 %v3341_v53, %s3157_s12 }
 0x990   : > { %1552 = vrot.lane.b32.xlu1 %v3346_v56, %s3158_s13 }
 0x9fc   : > { %v1446_v6 = vpop.xlane.xlu1 %1445 }
 0x9fd   : > { %v1448_v7 = vsub.f32 %v1440_v1, %v1446_v6 }
 0x9fe   : > { %v1443_v8 = vpop.xlane.xlu0 %1442 }
 0x9ff   : > { %v1451_v9 = vmul.f32 1.442695, %v1448_v7  ;;  %v1447_v10 = vsub.f32 %v1439_v3, %v1443_v8 }
 0xa00   : > { %v1464_v18 = vpop.permute.xlu1 %1463 }
 0xa01   : > { %3053 = vpow2.f32 %v1451_v9  ;;  %v1449_v11 = vmul.f32 1.442695, %v1447_v10 }
 0xa03   : > { %3055 = vpow2.f32 %v1449_v11 }
 0xa04   : > { %v1557_v20 = vpop.permute.xlu1 %1556 }
 0xa08   : > { %v1555_v32 = vpop.permute.xlu1 %1554 }
 0xa0c   : > { %v1553_v33 = vpop.permute.xlu1 %1552 }
 0xa0e   : > { %v3054_v12 = vpop.eup %3053 }
 0xa0f   : > { %v1456_v13 = vsel %vm636_vm2, %v3054_v12, 0.0 }
 0xa10   : > { %v3056_v14 = vpop.eup %3055  ;;  %1457 = vadd.xlane.f32.xlu0 %v1456_v13 }
 0xa11   : > { %v1453_v15 = vsel %vm636_vm2, %v3056_v14, 0.0 }
 0xa14   : > { %1454 = vadd.xlane.f32.xlu0 %v1453_v15 }
 0xa2a   : > { %1465 = vrot.lane.b32.xlu0 %v3352_v62, %s3156_s30  ;;  %s3162_s30 = smov 72  }
 0xa2e   : > { %1550 = vrot.lane.b32.xlu0 %v3341_v53, %s3158_s13 }
 0xa99   : > { %v1458_v16 = vpop.xlane.xlu0 %1457 }
 0xa9a   : > { %3057 = vrcp.f32 %v1458_v16 }
 0xa9d   : > { %v1455_v17 = vpop.xlane.xlu0 %1454 }
 0xa9e   : > { %3059 = vrcp.f32 %v1455_v17 }
 0xaa1   : > { %v1466_v19 = vpop.permute.xlu0 %1465 }
 0xaa2   : > { %2839 = vmatprep.subr.mxu0 %v1466_v19 }
 0xaa3   : > { %2840 = vmatpush3.msra.mxu0 %v1466_v19 }
 0xaa4   : > { %2841 = vmatprep.subr.mxu0 %v1464_v18 }
 0xaa5   : > { %2842 = vmatpush3.msra.mxu0 %v1464_v18  ;;  %v1551_v29 = vpop.permute.xlu0 %1550 }
 0xaa6   : > { %2846 = vmatprep.subr.msk.mxu0 %vm550_vm1, %v1557_v20 }
 0xaa7   : > { %v3058_v21 = vpop.eup %3057 }
 0xaa8   : > { %v1462_v28 = vmul.f32 %v3058_v21, %v3054_v12 }
 0xaab   : > { %v3060_v22 = vpop.eup %3059 }
 0xaac   : > { %v1461_v23 = vmul.f32 %v3060_v22, %v3056_v14 }
 0xaae   : > { %2843 = vmatprep.mubr.msk.f32.mxu0 %vm636_vm2, %v1461_v23 }
 0xaaf   : > { %2844 = vmatmul.mubr.msk.f32.vlgmr.msra.gmra.mxu0 %vm636_vm2, %v1462_v28 }
 0xab0   : > { %2847 = vmatpush3.xpose.msk.msra.mxu0 %vm550_vm1, %v1557_v20  ;;  %2850 = vmatprep.mubr.msk.f32.mxu0 %vm550_vm1, %v1551_v29 }
 0xab1   : > { %2848 = vmatprep.subr.msk.mxu0 %vm550_vm1, %v1555_v32 }
 0xab4   : > { %2849 = vmatpush3.xpose.msk.msra.mxu0 %vm550_vm1, %v1555_v32 }
 0xab7   : > { %2851 = vmatmul.mubr.msk.f32.vlgmr.msra.gmra.mxu0 %vm550_vm1, %v1553_v33 }
 0xb6f   : > { %v3495_v34 = vpop.f32.mrf.mxu0 }
 0xb71   : > { %v3497_v35 = vpop.f32.mrf.mxu0 }
 0xb77   : > { %v2852_v36 = vpop.f32.mrf.mxu0 }
 0xb78   : > { %v1642_v37 = vmul.f32 0.35355338, %v2852_v36 }
 0xb79   : > { %v1632_v38 = vpop.f32.mrf.mxu0 }
 0xb7a   : > { %v1641_v39 = vmul.f32 0.35355338, %v1632_v38  ;;  %v1646_v40 = vsel %vm636_vm2, %v1642_v37, -inf }
 0xb7b   : > { %1647 = vmax.xlane.f32.xlu1 %v1646_v40 }
 0xb7c   : > { %v1643_v41 = vsel %vm636_vm2, %v1641_v39, -inf }
 0xb7d   : > { %1644 = vmax.xlane.f32.xlu0 %v1643_v41 }
 0xb8c   : > { %1665 = vrot.lane.b32.xlu1 %v3356_v63, %s3158_s13 }
 0xb90   : > { %1758 = vrot.lane.b32.xlu1 %v3346_v56, %s3159_s15 }
 0xb94   : > { %1756 = vrot.lane.b32.xlu1 %v3341_v53, %s3159_s15 }
 0xb98   : > { %1754 = vrot.lane.b32.xlu1 %v3346_v56, %s3160_s22 }
 0xc04   : > { %v1648_v42 = vpop.xlane.xlu1 %1647 }
 0xc05   : > { %v1650_v43 = vsub.f32 %v1642_v37, %v1648_v42 }
 0xc06   : > { %v1645_v44 = vpop.xlane.xlu0 %1644 }
 0xc07   : > { %v1653_v45 = vmul.f32 1.442695, %v1650_v43  ;;  %v1649_v46 = vsub.f32 %v1641_v39, %v1645_v44 }
 0xc08   : > { %v1666_v55 = vpop.permute.xlu1 %1665 }
 0xc09   : > { %3061 = vpow2.f32 %v1653_v45  ;;  %v1651_v47 = vmul.f32 1.442695, %v1649_v46 }
 0xc0b   : > { %3063 = vpow2.f32 %v1651_v47 }
 0xc0c   : > { %v1759_v58 = vpop.permute.xlu1 %1758 }
 0xc10   : > { %v1757_v4 = vpop.permute.xlu1 %1756 }
 0xc14   : > { %v1755_v5 = vpop.permute.xlu1 %1754 }
 0xc16   : > { %v3062_v48 = vpop.eup %3061 }
 0xc17   : > { %v1658_v49 = vsel %vm636_vm2, %v3062_v48, 0.0 }
 0xc18   : > { %v3064_v50 = vpop.eup %3063  ;;  %1659 = vadd.xlane.f32.xlu0 %v1658_v49 }
 0xc19   : > { %v1655_v51 = vsel %vm636_vm2, %v3064_v50, 0.0 }
 0xc1c   : > { %1656 = vadd.xlane.f32.xlu0 %v1655_v51 }
 0xc32   : > { %1667 = vrot.lane.b32.xlu0 %v3352_v62, %s3158_s13 }
 0xc36   : > { %1752 = vrot.lane.b32.xlu0 %v3341_v53, %s3160_s22 }
 0xca1   : > { %v1660_v52 = vpop.xlane.xlu0 %1659 }
 0xca2   : > { %3065 = vrcp.f32 %v1660_v52 }
 0xca5   : > { %v1657_v54 = vpop.xlane.xlu0 %1656 }
 0xca6   : > { %3067 = vrcp.f32 %v1657_v54 }
 0xca9   : > { %v1668_v57 = vpop.permute.xlu0 %1667 }
 0xcaa   : > { %2853 = vmatprep.subr.mxu1 %v1668_v57 }
 0xcab   : > { %2854 = vmatpush3.msra.mxu1 %v1668_v57 }
 0xcac   : > { %2855 = vmatprep.subr.mxu1 %v1666_v55 }
 0xcad   : > { %2856 = vmatpush3.msra.mxu1 %v1666_v55  ;;  %v1753_v3 = vpop.permute.xlu0 %1752 }
 0xcae   : > { %2860 = vmatprep.subr.msk.mxu1 %vm550_vm1, %v1759_v58 }
 0xcaf   : > { %v3066_v59 = vpop.eup %3065 }
 0xcb0   : > { %v1664_v2 = vmul.f32 %v3066_v59, %v3062_v48 }
 0xcb3   : > { %v3068_v0 = vpop.eup %3067 }
 0xcb4   : > { %v1663_v1 = vmul.f32 %v3068_v0, %v3064_v50 }
 0xcb6   : > { %2857 = vmatprep.mubr.msk.f32.mxu1 %vm636_vm2, %v1663_v1  ;;  %v2237_v1 = vld [vmem:[%s3757_s5 + $0x30] sm:$0xff] }
 0xcb7   : > { %2858 = vmatmul.mubr.msk.f32.vlgmr.msra.gmra.mxu1 %vm636_vm2, %v1664_v2  ;;  %v2236_v2 = vld [vmem:[%s3757_s5 + $0x28] sm:$0xff] }
 0xcb8   : > { %2861 = vmatpush3.xpose.msk.msra.mxu1 %vm550_vm1, %v1759_v58  ;;  %2864 = vmatprep.mubr.msk.f32.mxu1 %vm550_vm1, %v1753_v3  ;;  %v2235_v3 = vld [vmem:[%s3757_s5 + $0x20] sm:$0xff] }
 0xcb9   : > { %2862 = vmatprep.subr.msk.mxu1 %vm550_vm1, %v1757_v4 }
 0xcbc   : > { %2863 = vmatpush3.xpose.msk.msra.mxu1 %vm550_vm1, %v1757_v4  ;;  %v2234_v4 = vld [vmem:[%s3757_s5 + $0x18] sm:$0xff] }
 0xcbf   : > { %2865 = vmatmul.mubr.msk.f32.vlgmr.msra.gmra.mxu1 %vm550_vm1, %v1755_v5  ;;  %v2233_v5 = vld [vmem:[%s3757_s5 + $0x10] sm:$0xff] }
 0xd77   : > { %v3523_v6 = vpop.f32.mrf.mxu1 }
 0xd79   : > { %v3525_v7 = vpop.f32.mrf.mxu1 }
 0xd7f   : > { %v2866_v8 = vpop.f32.mrf.mxu1 }
 0xd80   : > { %v1844_v9 = vmul.f32 0.35355338, %v2866_v8  ;;  %v2334_v8 = vld [vmem:[%s3759_s7 + $0x38] sm:$0xff] }
 0xd81   : > { %v1834_v10 = vpop.f32.mrf.mxu1 }
 0xd82   : > { %v1843_v11 = vmul.f32 0.35355338, %v1834_v10  ;;  %v1848_v12 = vsel %vm636_vm2, %v1844_v9, -inf }
 0xd83   : > { %1849 = vmax.xlane.f32.xlu1 %v1848_v12 }
 0xd84   : > { %v1845_v13 = vsel %vm636_vm2, %v1843_v11, -inf }
 0xd85   : > { %1846 = vmax.xlane.f32.xlu0 %v1845_v13 }
 0xd94   : > { %1867 = vrot.lane.b32.xlu1 %v3356_v63, %s3160_s22 }
 0xd98   : > { %1960 = vrot.lane.b32.xlu1 %v3346_v56, %s3764_s25 }
 0xd9c   : > { %1958 = vrot.lane.b32.xlu1 %v3341_v53, %s3764_s25 }
 0xda0   : > { %1956 = vrot.lane.b32.xlu1 %v3346_v56, %s3162_s30 }
 0xe0c   : > { %v1850_v14 = vpop.xlane.xlu1 %1849 }
 0xe0d   : > { %v1852_v15 = vsub.f32 %v1844_v9, %v1850_v14 }
 0xe0e   : > { %v1847_v16 = vpop.xlane.xlu0 %1846 }
 0xe0f   : > { %v1855_v17 = vmul.f32 1.442695, %v1852_v15  ;;  %v1851_v18 = vsub.f32 %v1843_v11, %v1847_v16 }
 0xe10   : > { %v1868_v29 = vpop.permute.xlu1 %1867 }
 0xe11   : > { %3069 = vpow2.f32 %v1855_v17  ;;  %v1853_v19 = vmul.f32 1.442695, %v1851_v18 }
 0xe13   : > { %3071 = vpow2.f32 %v1853_v19 }
 0xe14   : > { %v1961_v33 = vpop.permute.xlu1 %1960 }
 0xe18   : > { %v1959_v40 = vpop.permute.xlu1 %1958 }
 0xe1c   : > { %v1957_v41 = vpop.permute.xlu1 %1956 }
 0xe1e   : > { %v3070_v20 = vpop.eup %3069 }
 0xe1f   : > { %v1860_v21 = vsel %vm636_vm2, %v3070_v20, 0.0 }
 0xe20   : > { %v3072_v22 = vpop.eup %3071  ;;  %1861 = vadd.xlane.f32.xlu0 %v1860_v21 }
 0xe21   : > { %v1857_v23 = vsel %vm636_vm2, %v3072_v22, 0.0 }
 0xe24   : > { %1858 = vadd.xlane.f32.xlu0 %v1857_v23 }
 0xe3a   : > { %1869 = vrot.lane.b32.xlu0 %v3352_v62, %s3160_s22  ;;  %s377_s22 = sand.u32 1, %s3137_s18  }
 0xe3e   : > { %1954 = vrot.lane.b32.xlu0 %v3341_v53, %s3162_s30 }
 0xea9   : > { %v1862_v56 = vpop.xlane.xlu0 %1861 }
 0xeaa   : > { %3073 = vrcp.f32 %v1862_v56 }
 0xead   : > { %v1859_v28 = vpop.xlane.xlu0 %1858 }
 0xeae   : > { %3075 = vrcp.f32 %v1859_v28 }
 0xeb1   : > { %v1870_v32 = vpop.permute.xlu0 %1869 }
 0xeb2   : > { %2867 = vmatprep.subr.mxu0 %v1870_v32 }
 0xeb3   : > { %2868 = vmatpush3.msra.mxu0 %v1870_v32 }
 0xeb4   : > { %2869 = vmatprep.subr.mxu0 %v1868_v29 }
 0xeb5   : > { %2870 = vmatpush3.msra.mxu0 %v1868_v29  ;;  %v1955_v53 = vpop.permute.xlu0 %1954 }
 0xeb6   : > { %2874 = vmatprep.subr.msk.mxu0 %vm550_vm1, %v1961_v33 }
 0xeb7   : > { %v3074_v36 = vpop.eup %3073 }
 0xeb8   : > { %v1866_v39 = vmul.f32 %v3074_v36, %v3070_v20 }
 0xebb   : > { %v3076_v37 = vpop.eup %3075 }
 0xebc   : > { %v1865_v38 = vmul.f32 %v3076_v37, %v3072_v22 }
 0xebe   : > { %2871 = vmatprep.mubr.msk.f32.mxu0 %vm636_vm2, %v1865_v38 }
 0xebf   : > { %2872 = vmatmul.mubr.msk.f32.vlgmr.msra.gmra.mxu0 %vm636_vm2, %v1866_v39 }
 0xec0   : > { %2875 = vmatpush3.xpose.msk.msra.mxu0 %vm550_vm1, %v1961_v33  ;;  %2878 = vmatprep.mubr.msk.f32.mxu0 %vm550_vm1, %v1955_v53 }
 0xec1   : > { %2876 = vmatprep.subr.msk.mxu0 %vm550_vm1, %v1959_v40 }
 0xec4   : > { %2877 = vmatpush3.xpose.msk.msra.mxu0 %vm550_vm1, %v1959_v40 }
 0xec7   : > { %2879 = vmatmul.mubr.msk.f32.vlgmr.msra.gmra.mxu0 %vm550_vm1, %v1957_v41 }
 0xf7f   : > { %v2873_v42 = vpop.f32.mrf.mxu0 }
 0xf81   : > { %v1945_v43 = vpop.f32.mrf.mxu0 }
 0xf87   : > { %v2880_v44 = vpop.f32.mrf.mxu0 }
 0xf88   : > { %v2046_v45 = vmul.f32 0.35355338, %v2880_v44  ;;  %v2332_v44 = vld [vmem:[%s3759_s7 + $0x28] sm:$0xff] }
 0xf89   : > { %v2036_v46 = vpop.f32.mrf.mxu0 }
 0xf8a   : > { %v2045_v47 = vmul.f32 0.35355338, %v2036_v46  ;;  %v2050_v48 = vsel %vm636_vm2, %v2046_v45, -inf  ;;  %v2330_v46 = vld [vmem:[%s3759_s7 + $0x18] sm:$0xff] }
 0xf8b   : > { %2051 = vmax.xlane.f32.xlu1 %v2050_v48  ;;  %v2328_v48 = vld [vmem:[%s3759_s7 + $0x8] sm:$0xff] }
 0xf8c   : > { %v2047_v49 = vsel %vm636_vm2, %v2045_v47, -inf }
 0xf8d   : > { %2048 = vmax.xlane.f32.xlu0 %v2047_v49  ;;  %v2327_v49 = vld [vmem:[%s3759_s7] sm:$0xff] }
 0xf9c   : > { %2069 = vrot.lane.b32.xlu1 %v3356_v63, %s3162_s30 }
 0xfa0   : > { %2158 = vrot.lane.b32.xlu1 %v3437_v25, %s3764_s25 }
 0xfa4   : > { %2160 = vrot.lane.b32.xlu1 %v3435_v24, %s3764_s25 }
 0xfa8   : > { %2168 = vrot.lane.b32.xlu1 %v3439_v26, %s3159_s15 }
 0xfac   : > { %2176 = vrot.lane.b32.xlu1 %v3467_v60, %s3157_s12 }
 0xfb0   : > { %2184 = vrot.lane.b32.xlu1 %v3495_v34, %s3155_s29 }
 0xfb4   : > { %2192 = vrot.lane.b32.xlu1 %v3523_v6, %s3153_s24  ;;  %v2232_v6 = vld [vmem:[%s3757_s5 + $0x8] sm:$0xff] }
 0xfb8   : > { %2200 = vrot.lane.b32.xlu1 %v2873_v42, %s3151_s16 }
0x1014   : > { %v2052_v63 = vpop.xlane.xlu1 %2051 }
0x1015   : > { %v2054_v50 = vsub.f32 %v2046_v45, %v2052_v63  ;;  %v2331_v45 = vld [vmem:[%s3759_s7 + $0x20] sm:$0xff]  ;;  %v2440_v63 = vld [vmem:[%s3761_s9 + $0x78] sm:$0xff] }
0x1016   : > { %v2049_v25 = vpop.xlane.xlu0 %2048 }
0x1017   : > { %v2057_v51 = vmul.f32 1.442695, %v2054_v50  ;;  %v2053_v52 = vsub.f32 %v2045_v47, %v2049_v25  ;;  %v2329_v47 = vld [vmem:[%s3759_s7 + $0x10] sm:$0xff]  ;;  %v2438_v25 = vld [vmem:[%s3761_s9 + $0x68] sm:$0xff] }
0x1018   : > { %v2439_v50 = vld [vmem:[%s3761_s9 + $0x70] sm:$0xff] }
0x1019   : > { %3077 = vpow2.f32 %v2057_v51  ;;  %v2055_v24 = vmul.f32 1.442695, %v2053_v52  ;;  %v2437_v51 = vld [vmem:[%s3761_s9 + $0x60] sm:$0xff]  ;;  %v2436_v52 = vld [vmem:[%s3761_s9 + $0x58] sm:$0xff] }
0x101b   : > { %3079 = vpow2.f32 %v2055_v24  ;;  %v2435_v24 = vld [vmem:[%s3761_s9 + $0x50] sm:$0xff] }
0x1026   : > { %v3078_v26 = vpop.eup %3077 }
0x1027   : > { %v2062_v54 = vsel %vm636_vm2, %v3078_v26, 0.0 }
0x1028   : > { %v3080_v60 = vpop.eup %3079  ;;  %2063 = vadd.xlane.f32.xlu0 %v2062_v54  ;;  %v2433_v54 = vld [vmem:[%s3761_s9 + $0x40] sm:$0xff] }
0x1029   : > { %v2059_v34 = vsel %vm636_vm2, %v3080_v60, 0.0 }
0x102c   : > { %2060 = vadd.xlane.f32.xlu0 %v2059_v34  ;;  %v2431_v34 = vld [vmem:[%s3761_s9 + $0x30] sm:$0xff] }
0x1042   : > { %2071 = vrot.lane.b32.xlu0 %v3352_v62, %s3162_s30  ;;  %v2070_v62 = vpop.permute.xlu1 %2069  ;;  %s2605_s30 = sshll.u32 %s377_s22, 4 }
0x1046   : > { %2166 = vrot.lane.b32.xlu0 %v3441_v27, %s3159_s15  ;;  %v2159_v11 = vpop.permute.xlu1 %2158 }
0x1047   : > { %v2212_v21 = vsel %vm550_vm1, %v3399_v31, %v2159_v11 }
0x104a   : > { %2174 = vrot.lane.b32.xlu0 %v3469_v61, %s3157_s12  ;;  %v2161_v12 = vpop.permute.xlu1 %2160  ;;  %s2673_s12 = sshll.u32 %s3246_s21, 8 }
0x104b   : > { %v2213_v23 = vsel %vm550_vm1, %v3397_v30, %v2161_v12 }
0x104e   : > { %2182 = vrot.lane.b32.xlu0 %v3497_v35, %s3155_s29  ;;  %v2238_v35 = vld [vmem:[%s3757_s5 + $0x38] sm:$0xff]  ;;  %v2169_v13 = vpop.permute.xlu1 %2168 }
0x104f   : > { %2888 = vmatprep.subr.mxu0 %v2238_v35  ;;  %v2215_v29 = vsel %vm636_vm2, %v2213_v23, %v2169_v13 }
0x1050   : > { %2889 = vmatpush3.msra.mxu0 %v2238_v35  ;;  %v2427_v35 = vld [vmem:[%s3761_s9 + $0x10] sm:$0xff] }
0x1051   : > { %2890 = vmatprep.subr.mxu0 %v2237_v1 }
0x1052   : > { %2190 = vrot.lane.b32.xlu0 %v3525_v7, %s3153_s24  ;;  %2891 = vmatpush3.msra.mxu0 %v2237_v1  ;;  %v2231_v7 = vld [vmem:[%s3757_s5] sm:$0xff]  ;;  %v2177_v15 = vpop.permute.xlu1 %2176  ;;  %v2426_v1 = vld [vmem:[%s3761_s9 + $0x8] sm:$0xff]  ;;  %s3708_s24 = scalar_lea.hbm %s3763_s11, %s2673_s12 }
0x1053   : > { %2892 = vmatprep.subr.mxu0 %v2236_v2  ;;  %v2218_v33 = vsel %vm2216_vm3, %v2215_v29, %v2177_v15 }
0x1054   : > { %2893 = vmatpush3.msra.mxu0 %v2236_v2  ;;  %v2425_v2 = vld [vmem:[%s3761_s9] sm:$0xff] }
0x1055   : > { %2894 = vmatprep.subr.mxu0 %v2235_v3 }
0x1056   : > { %2198 = vrot.lane.b32.xlu0 %v1945_v43, %s3151_s16  ;;  %2895 = vmatpush3.msra.mxu0 %v2235_v3  ;;  %v2185_v17 = vpop.permute.xlu1 %2184  ;;  %v2333_v43 = vld [vmem:[%s3759_s7 + $0x30] sm:$0xff]  ;;  %v2663_v3 = vld [vmem:[%s3760_s8] ss:$0 sm:$0xff]  ;;  %s3163_s16 = smov [#allocation2]  }
0x1057   : > { %2896 = vmatprep.subr.mxu0 %v2234_v4  ;;  %v2221_v37 = vsel %vm2219_vm4, %v2218_v33, %v2185_v17  ;;  %s3089_s25 = sshll.u32 %s3163_s16, 4  ;;  %s3090_s25 = int_to_ptr.vmem [resolvable:$false] %s3089_s25 }
0x1058   : > { %2897 = vmatpush3.msra.mxu0 %v2234_v4  ;;  %s3091_s0 = scalar_lea.vmem %s3090_s25, 512 }
0x1059   : > { %2898 = vmatprep.subr.mxu0 %v2233_v5 }
0x105a   : > { %2899 = vmatpush3.msra.mxu0 %v2233_v5  ;;  %v2193_v19 = vpop.permute.xlu1 %2192 }
0x105b   : > { %2900 = vmatprep.subr.mxu0 %v2232_v6  ;;  %v2224_v39 = vsel %vm2222_vm5, %v2221_v37, %v2193_v19 }
0x105c   : > { %2901 = vmatpush3.msra.mxu0 %v2232_v6 }
0x105d   : > { %2902 = vmatprep.subr.mxu0 %v2231_v7 }
0x105e   : > { %2903 = vmatpush3.msra.mxu0 %v2231_v7  ;;  %v2201_v22 = vpop.permute.xlu1 %2200 }
0x105f   : > { %2907 = vmatprep.subr.mxu0 %v2334_v8  ;;  %v2227_v41 = vsel %vm2225_vm6, %v2224_v39, %v2201_v22 }
0x10b1   : > { %v2064_v55 = vpop.xlane.xlu0 %2063 }
0x10b2   : > { %3081 = vrcp.f32 %v2064_v55  ;;  %v2430_v55 = vld [vmem:[%s3761_s9 + $0x28] sm:$0xff] }
0x10b5   : > { %v2061_v57 = vpop.xlane.xlu0 %2060 }
0x10b6   : > { %3083 = vrcp.f32 %v2061_v57  ;;  %v2429_v57 = vld [vmem:[%s3761_s9 + $0x20] sm:$0xff] }
0x10b9   : > { %v2072_v58 = vpop.permute.xlu0 %2071 }
0x10ba   : > { %2881 = vmatprep.subr.mxu1 %v2072_v58 }
0x10bb   : > { %2882 = vmatpush3.msra.mxu1 %v2072_v58 }
0x10bc   : > { %2883 = vmatprep.subr.mxu1 %v2070_v62 }
0x10bd   : > { %2884 = vmatpush3.msra.mxu1 %v2070_v62  ;;  %v2167_v14 = vpop.permute.xlu0 %2166  ;;  %v2660_v62 = vld [vmem:[%s3758_s6] ss:$0 sm:$0xff] }
0x10be   : > { %v2214_v56 = vsel %vm636_vm2, %v2212_v21, %v2167_v14  ;;  %2926 = vmatprep.subr.mxu1 %v2440_v63 }
0x10bf   : > { %v3082_v27 = vpop.eup %3081 }
0x10c0   : > { %v2068_v0 = vmul.f32 %v3082_v27, %v3078_v26  ;;  %v2434_v26 = vld [vmem:[%s3761_s9 + $0x48] sm:$0xff] }
0x10c1   : > { %v2175_v16 = vpop.permute.xlu0 %2174 }
0x10c2   : > { %v2217_v32 = vsel %vm2216_vm3, %v2214_v56, %v2175_v16 }
0x10c3   : > { %v3084_v61 = vpop.eup %3083 }
0x10c4   : > { %v2067_v59 = vmul.f32 %v3084_v61, %v3080_v60  ;;  %v2432_v60 = vld [vmem:[%s3761_s9 + $0x38] sm:$0xff] }
0x10c5   : > { %v2183_v18 = vpop.permute.xlu0 %2182 }
0x10c6   : > { %2885 = vmatprep.mubr.msk.f32.mxu1 %vm636_vm2, %v2067_v59  ;;  %v2220_v36 = vsel %vm2219_vm4, %v2217_v32, %v2183_v18 }
0x10c7   : > { %2886 = vmatmul.mubr.msk.f32.vlgmr.msra.gmra.mxu1 %vm636_vm2, %v2068_v0  ;;  %v2428_v0 = vld [vmem:[%s3761_s9 + $0x18] sm:$0xff] }
0x10c8   : > { %2927 = vmatpush3.msra.mxu1 %v2440_v63 }
0x10c9   : > { %v2191_v20 = vpop.permute.xlu0 %2190  ;;  %2928 = vmatprep.subr.mxu1 %v2439_v50 }
0x10ca   : > { %v2223_v38 = vsel %vm2222_vm5, %v2220_v36, %v2191_v20  ;;  %2929 = vmatpush3.msra.mxu1 %v2439_v50 }
0x10cb   : > { %2930 = vmatprep.subr.mxu1 %v2438_v25 }
0x10cc   : > { %2931 = vmatpush3.msra.mxu1 %v2438_v25 }
0x10cd   : > { %v2199_v28 = vpop.permute.xlu0 %2198  ;;  %2932 = vmatprep.subr.mxu1 %v2437_v51 }
0x10ce   : > { %v2226_v53 = vsel %vm2225_vm6, %v2223_v38, %v2199_v28  ;;  %2933 = vmatpush3.msra.mxu1 %v2437_v51 }
0x10cf   : > { %2934 = vmatprep.subr.mxu1 %v2436_v52 }
0x10d0   : > { %2935 = vmatpush3.msra.mxu1 %v2436_v52 }
0x10d1   : > { %2936 = vmatprep.subr.mxu1 %v2435_v24 }
0x10d2   : > { %2937 = vmatpush3.msra.mxu1 %v2435_v24 }
0x10d3   : > { %2938 = vmatprep.subr.mxu1 %v2434_v26 }
0x10d4   : > { %2939 = vmatpush3.msra.mxu1 %v2434_v26 }
0x10d5   : > { %2940 = vmatprep.subr.mxu1 %v2433_v54 }
0x10d6   : > { %2941 = vmatpush3.msra.mxu1 %v2433_v54 }
0x10d7   : > { %2942 = vmatprep.subr.mxu1 %v2432_v60 }
0x10d8   : > { %2943 = vmatpush3.msra.mxu1 %v2432_v60 }
0x10d9   : > { %2944 = vmatprep.subr.mxu1 %v2431_v34 }
0x10da   : > { %2945 = vmatpush3.msra.mxu1 %v2431_v34 }
0x10db   : > { %2946 = vmatprep.subr.mxu1 %v2430_v55 }
0x10dc   : > { %2947 = vmatpush3.msra.mxu1 %v2430_v55 }
0x10dd   : > { %2948 = vmatprep.subr.mxu1 %v2429_v57 }
0x10de   : > { %2949 = vmatpush3.msra.mxu1 %v2429_v57 }
0x10df   : > { %2950 = vmatprep.subr.mxu1 %v2428_v0 }
0x10e0   : > { %2951 = vmatpush3.msra.mxu1 %v2428_v0 }
0x10e1   : > { %2952 = vmatprep.subr.mxu1 %v2427_v35 }
0x10e2   : > { %2953 = vmatpush3.msra.mxu1 %v2427_v35 }
0x10e3   : > { %2954 = vmatprep.subr.mxu1 %v2426_v1 }
0x10e4   : > { %2955 = vmatpush3.msra.mxu1 %v2426_v1 }
0x10e5   : > { %2956 = vmatprep.subr.mxu1 %v2425_v2 }
0x10e6   : > { %2957 = vmatpush3.msra.mxu1 %v2425_v2 }
0x1187   : > { %v2887_v9 = vpop.f32.mrf.mxu1 }
0x1188   : > { %2208 = vrot.lane.b32.xlu1 %v2887_v9, %s3149_s14 }
0x1189   : > { %v2147_v10 = vpop.f32.mrf.mxu1 }
0x118a   : > { %2206 = vrot.lane.b32.xlu0 %v2147_v10, %s3149_s14  ;;  %v2666_v10 = vld [vmem:[%s3762_s10] ss:$0 sm:$0xff]  ;;  %s379_s14 = scalar_lea.vmem [#allocation2], %s2605_s30  ;;  %s3711_s30 = scalar_lea.sflag [#allocation3], %s377_s22 }
0x118b   : > { %s2539_s29 = sshll.u32 %s379_s14, 4  ;;  %s3702_s29 = int_to_ptr.vmem [resolvable:$true] %s2539_s29 }
0x118c   : > { %s3085_s21 = scalar_lea.vmem %s3702_s29, 256  ;;  %p3092_p0 = scmp.lt.s32.totalorder %s3702_s29, %s3090_s25 }
0x118d   : > { %p3086_p11 = scmp.ne.s32.totalorder %s3702_s29, %s3085_s21  ;;  %p3093_p1 = scmp.lt.s32.totalorder %s3091_s0, %s3085_s21 }
0x118f   : > { %p3087_p12 = pnand %p3086_p11, %p3263_p5  ;;  %p3094_p2 = por %p3093_p1, %p3092_p0 }
0x1191   : > { %p3088_p13 = pneg %p3087_p12 }
0x1193   : > { %p3095_p3 = pnand %p3094_p2, %p3088_p13 }
0x11fa   : > { %v2209_v31 = vpop.permute.xlu1 %2208 }
0x11fb   : > { %v2230_v42 = vsel %vm2228_vm7, %v2227_v41, %v2209_v31 }
0x11fc   : > { %v2207_v40 = vpop.permute.xlu0 %2206 }
0x11fd   : > { %v2229_v30 = vsel %vm2228_vm7, %v2226_v53, %v2207_v40 }
0x11fe   : > { %2904 = vmatprep.mubr.msk.f32.mxu0 %vm387_vm0, %v2229_v30 }
0x11ff   : > { %2905 = vmatmul.mubr.msk.f32.vlgmr.msra.gmra.mxu0 %vm387_vm0, %v2230_v42 }
0x1200   : > { %2908 = vmatpush3.msra.mxu0 %v2334_v8 }
0x1201   : > { %2909 = vmatprep.subr.mxu0 %v2333_v43 }
0x1202   : > { %2910 = vmatpush3.msra.mxu0 %v2333_v43 }
0x1203   : > { %2911 = vmatprep.subr.mxu0 %v2332_v44 }
0x1204   : > { %2912 = vmatpush3.msra.mxu0 %v2332_v44 }
0x1205   : > { %2913 = vmatprep.subr.mxu0 %v2331_v45 }
0x1206   : > { %2914 = vmatpush3.msra.mxu0 %v2331_v45 }
0x1207   : > { %2915 = vmatprep.subr.mxu0 %v2330_v46 }
0x1208   : > { %2916 = vmatpush3.msra.mxu0 %v2330_v46 }
0x1209   : > { %2917 = vmatprep.subr.mxu0 %v2329_v47 }
0x120a   : > { %2918 = vmatpush3.msra.mxu0 %v2329_v47 }
0x120b   : > { %2919 = vmatprep.subr.mxu0 %v2328_v48 }
0x120c   : > { %2920 = vmatpush3.msra.mxu0 %v2328_v48 }
0x120d   : > { %2921 = vmatprep.subr.mxu0 %v2327_v49 }
0x120e   : > { %2922 = vmatpush3.msra.mxu0 %v2327_v49 }
0x12bf   : > { %v2906_v58 = vpop.f32.mrf.mxu0 }
0x12c0   : > { %v2324_v59 = vadd.f32 %v2906_v58, %v2660_v62 }
0x12c1   : > { %v2318_v27 = vpop.f32.mrf.mxu0 }
0x12c2   : > { %v2319_v61 = vadd.f32 %v2660_v62, %v2318_v27 }
0x12c4   : > { %2923 = vmatprep.mubr.msk.f32.mxu0 %vm387_vm0, %v2319_v61 }
0x12c5   : > { %2924 = vmatmul.mubr.msk.f32.vlgmr.msra.gmra.mxu0 %vm387_vm0, %v2324_v59 }
0x1385   : > { %v2925_v4 = vpop.f32.mrf.mxu0 }
0x1386   : > { %v2420_v5 = vadd.f32 %v2925_v4, %v2663_v3 }
0x1387   : > { %v2414_v6 = vpop.f32.mrf.mxu0 }
0x1388   : > { %v2415_v7 = vadd.f32 %v2663_v3, %v2414_v6  ;;  %v2424_v9 = vmax.f32 %v2420_v5, 0.0 }
0x138a   : > { %v2423_v8 = vmax.f32 %v2415_v7, 0.0 }
0x138c   : > { %2958 = vmatprep.mubr.f32.mxu1 %v2423_v8 }
0x138d   : > { %2959 = vmatmul.mubr.f32.vlgmr.msra.gmra.mxu1 %v2424_v9 }
0x144d   : > { %v2960_v11 = vpop.f32.mrf.mxu1 }
0x144e   : > { %v2520_v12 = vadd.f32 %v2960_v11, %v2666_v10 }
0x144f   : > { %v2514_v13 = vpop.f32.mrf.mxu1 }
0x1450   : > { %2524 = vst.msk [vmem:[%s379_s14 + $0x8] sm:$0xff] %vm387_vm0, %v2520_v12  ;;  %v2515_v14 = vadd.f32 %v2666_v10, %v2514_v13 }
0x1452   : > { %2523 = vst.msk [vmem:[%s379_s14] sm:$0xff] %vm387_vm0, %v2515_v14 }
0x1453   : > { %3098 = shalt.err (!%p3095_p3)
}
0x1454   : > { %s3099_s22 = scalar_lea.hbm %s3708_s24, 256  ;;  %s3103_s13 = scalar_lea.hbm %s3763_s11, 512 }
0x1455   : > { %p3100_p4 = scmp.ne.s32.totalorder %s3708_s24, %s3099_s22  ;;  %p3104_p9 = scmp.lt.s32.totalorder %s3708_s24, %s3763_s11 }
0x1456   : > { %p3105_p10 = scmp.lt.s32.totalorder %s3103_s13, %s3099_s22 }
0x1457   : > { %p3101_p7 = pnand %p3100_p4, %p3263_p5 }
0x1458   : > { %p3106_p11 = por %p3105_p10, %p3104_p9 }
0x1459   : > { %p3102_p8 = pneg %p3101_p7 }
0x145b   : > { %p3107_p12 = pnand %p3106_p11, %p3102_p8 }
0x145d   : > { %3110 = shalt.err (!%p3107_p12)
}
0x145e   : > { %s3164_s0 = smov 128   ;;  %s3769_s25 = smov 8  }
0x145f   : > { %2961 = dma.vmem_to_hbm [thread:$0]  (%p3263_p5), %s3702_s29, 256, %s3708_s24, %s3711_s30, %s3164_s0, %s3164_s0, %s3769_s25  }
0x1460 PF: > { %p2967_p13 = scmp.ge.s32.totalorder %s3145_s20, 2  ;;  %s2554_s21 = sand.u32 1, %s3133_s17  }
0x1461   : > { %s2555_s22 = scalar_lea.sflag [#allocation3], %s2554_s21 }
0x1462   : > { %p2964_p0 = pnand %p2967_p13, %p3267_p6 }
0x1464   : > { %p2965_p1 = pneg %p2964_p0 }
0x1466   : > { %3128 = dma.done.wait (%p2965_p1), %s2555_s22, 256  }
0x1467   : > { %3130 = vsyncadd (%p2965_p1), %s2555_s22, 4294967040  ;;  %p21_p2 = scmp.ge.s32.totalorder %s3250_s23, 4   ;;  %s3770_s17 = smov %s3137_s18 }
0x1468   : > { %s3771_s18 = smov %s3141_s19  ;;  %s3772_s19 = smov %s3261_s26 }
0x1469   : > { %s3773_s20 = smov %s3250_s23  ;;  %23 = sbr.rel (!%p21_p2) target bundleno = 5 (0x5), region = 99 }
0x146e   :  { %2560 = vsyncpa [#allocation3], 1 }
0x146f   :  { %2562 = vsyncpa [#allocation3 + $0x1], 1 }

// kernel: birc_forward.5
= control target key start
LH: loop header
LB: loop body
LE: loop exit
PB: predicated region body
PF: predicated region fallthrough
CT: control target
= control target key end

     0   :  { %s5703_s13 = smov 0   ;;  %s8039_s0 = inlined_call_operand.vmem [shape: f32[2,64,32], index: 0, kind: input, shape index: {}]   ;;  %s8040_s1 = inlined_call_operand.vmem [shape: f32[32,128], index: 1, kind: input, shape index: {}]   ;;  %s8041_s2 = inlined_call_operand.vmem [shape: f32[64,32], index: 2, kind: input, shape index: {}]   ;;  %s8042_s3 = inlined_call_operand.vmem [shape: f32[2,4,64], index: 3, kind: input, shape index: {}]   ;;  %s8043_s4 = inlined_call_operand.vmem [shape: f32[2,1,64], index: 4, kind: input, shape index: {}]   ;;  %s8044_s5 = inlined_call_operand.vmem [shape: f32[2,64,64], index: 5, kind: input, shape index: {}]   ;;  %s8045_s6 = inlined_call_operand.vmem [shape: f32[2,64,16], index: 6, kind: input, shape index: {}]   ;;  %s8046_s7 = inlined_call_operand.vmem [shape: f32[2,1,64], index: 7, kind: input, shape index: {}]   ;;  %s8047_s8 = inlined_call_operand.vmem [shape: f32[2,8,64], index: 8, kind: input, shape index: {}]   ;;  %s8048_s9 = inlined_call_operand.vmem [shape: f32[2,1,64], index: 9, kind: input, shape index: {}]   ;;  %s8049_s10 = inlined_call_operand.vmem [shape: f32[2,16,128], index: 10, kind: output, shape index: {}]  }
   0x1 LB: > { %s5000_s14 = sadd.s32 4294967295, %s5627_s13   ;;  %p5004_p0 = scmp.ge.s32.totalorder %s5627_s13, 1  ;;  %s5627_s13 = sphi %s5703_s13, %s20_s13  }
   0x2   : > { %p374_p1 = scmp.lt.s32.totalorder %s5627_s13, 3 }
   0x4   : > { %p375_p2 = pnand %p5004_p0, %p374_p1 }
   0x6   : > { %378 = sbr.rel (%p375_p2) target bundleno = 1514 (0x5ea), region = 60 }
   0xb   : > { %v487_v0 = vld [vmem:[%s8040_s1 + $0x18] sm:$0xff]  ;;  %v486_v1 = vld [vmem:[%s8040_s1 + $0x10] sm:$0xff]  ;;  %p439_p3 = scmp.lt.s32.totalorder %s5000_s14, 1  ;;  %v485_v2 = vld [vmem:[%s8040_s1 + $0x8] sm:$0xff]  ;;  %vm488_vm0 = vcmask 261120   ;;  %v8064_v28 = vmov 1   ;;  %v619_v30 = vlaneseq }
   0xc   : > { %5132 = vmatprep.subr.mxu0 %v487_v0  ;;  %v484_v3 = vld [vmem:[%s8040_s1] sm:$0xff]  ;;  %5280 = vset.pattern.permute.xlu1 %v8064_v28  ;;  %v5630_v29 = vmov 0  }
   0xd   : > { %5133 = vmatpush3.msra.mxu0 %v487_v0  ;;  %s8282_s14 = smov (!%p439_p3, %s5000_s14), 1  ;;  %5279 = vset.pattern.permute.xlu0 %v5630_v29  ;;  %v5766_v31 = vshrl.u32 %v619_v30, 7 }
   0xe   : > { %5134 = vmatprep.subr.mxu0 %v486_v1  ;;  %s5068_s23 = sshll.u32 %s8282_s14, 6  ;;  %s5007_s15 = sshll.u32 %s8282_s14, 2 }
   0xf   : > { %5135 = vmatpush3.msra.mxu0 %v486_v1  ;;  %s443_s26 = scalar_lea.vmem %s8039_s0, %s5068_s23  ;;  %s5740_s29 = scalar_lea.vmem %s8045_s6, %s5068_s23  ;;  %v622_v33 = vadd.s32 16, %v5766_v31  ;;  %v624_v35 = vadd.s32 32, %v5766_v31  ;;  %v638_v36 = vsub.s32 3, %v5766_v31  ;;  %v699_v37 = vsub.s32 0, %v5766_v31 }
  0x10   : > { %5136 = vmatprep.subr.mxu0 %v485_v2  ;;  %v476_v4 = vld [vmem:[%s443_s26] sm:$0xff]  ;;  %v477_v5 = vld [vmem:[%s443_s26 + $0x8] sm:$0xff]  ;;  %v478_v6 = vld [vmem:[%s443_s26 + $0x10] sm:$0xff]  ;;  %s5745_s12 = scalar_lea.vmem %s8044_s5, %s5068_s23  ;;  %s447_s18 = scalar_lea.vmem %s8042_s3, %s5007_s15  ;;  %v626_v41 = vadd.s32 48, %v5766_v31  ;;  %vm656_vm1 = vcmp.lt.s32.totalorder %v5766_v31, 3  ;;  %v768_v43 = vsub.s32 1, %v5766_v31 }
  0x11   : > { %5137 = vmatpush3.msra.mxu0 %v485_v2  ;;  %5140 = vmatprep.mubr.msk.f32.mxu0 %vm488_vm0, %v476_v4  ;;  %v479_v7 = vld [vmem:[%s443_s26 + $0x18] sm:$0xff]  ;;  %v480_v8 = vld [vmem:[%s443_s26 + $0x20] sm:$0xff]  ;;  %v481_v9 = vld [vmem:[%s443_s26 + $0x28] sm:$0xff]  ;;  %v5784_v42 = vand.u32 15, %v622_v33  ;;  %v5790_v46 = vand.u32 15, %v624_v35  ;;  %v5793_v47 = vand.u32 15, %v5766_v31  ;;  %s450_s21 = scalar_lea.vmem %s8043_s4, %s8282_s14  ;;  %s463_s24 = scalar_lea.vmem %s8046_s7, %s8282_s14 }
  0x12   : > { %5138 = vmatprep.subr.mxu0 %v484_v3  ;;  %v482_v10 = vld [vmem:[%s443_s26 + $0x30] sm:$0xff]  ;;  %v483_v11 = vld [vmem:[%s443_s26 + $0x38] sm:$0xff]  ;;  %v1156_v16 = vld [vmem:[%s5740_s29 + $0x28] sm:$0xff]  ;;  %v837_v48 = vsub.s32 2, %v5766_v31  ;;  %v5811_v54 = vand.u32 15, %v626_v41  ;;  %vm725_vm2 = vcmp.lt.s32.totalorder %v5766_v31, 2 }
  0x13   : > { %5139 = vmatpush3.msra.mxu0 %v484_v3  ;;  %v1158_v12 = vld [vmem:[%s5740_s29 + $0x38] sm:$0xff]  ;;  %v1157_v14 = vld [vmem:[%s5740_s29 + $0x30] sm:$0xff]  ;;  %v931_v17 = vld [vmem:[%s5745_s12 + $0x28] sm:$0xff]  ;;  %vm667_vm3 = vcmp.ge.s32.totalorder %v5784_v42, 3  ;;  %vm669_vm4 = vcmp.ge.s32.totalorder %v5790_v46, 3  ;;  %vm665_vm5 = vcmp.ge.s32.totalorder %v5793_v47, 3 }
  0x14   : > { %5141 = vmatmul.mubr.msk.f32.vlgmr.msra.gmra.mxu0 %vm488_vm0, %v477_v5  ;;  %v933_v13 = vld [vmem:[%s5745_s12 + $0x38] sm:$0xff]  ;;  %5180 = vmatprep.subr.mxu0 %v1158_v12  ;;  %v932_v15 = vld [vmem:[%s5745_s12 + $0x30] sm:$0xff]  ;;  %v1155_v18 = vld [vmem:[%s5740_s29 + $0x20] sm:$0xff]  ;;  %vm734_vm6 = vcmp.ge.s32.totalorder %v5793_v47, 2  ;;  %vm671_vm7 = vcmp.ge.s32.totalorder %v5811_v54, 3  ;;  %vm794_vm8 = vcmp.lt.s32.totalorder %v5766_v31, 1 }
  0x15   : > { %5143 = vmatprep.mubr.msk.f32.mxu0 %vm488_vm0, %v478_v6  ;;  %5152 = vmatprep.subr.mxu1 %v933_v13  ;;  %v930_v19 = vld [vmem:[%s5745_s12 + $0x20] sm:$0xff]  ;;  %v1154_v20 = vld [vmem:[%s5740_s29 + $0x18] sm:$0xff]  ;;  %v1153_v22 = vld [vmem:[%s5740_s29 + $0x10] sm:$0xff]  ;;  %vm803_vm9 = vcmp.ge.s32.totalorder %v5793_v47, 1  ;;  %vm736_vm10 = vcmp.ge.s32.totalorder %v5784_v42, 2  ;;  %vm805_vm11 = vcmp.ge.s32.totalorder %v5784_v42, 1 }
  0x16   : > { %5181 = vmatpush3.msra.mxu0 %v1158_v12  ;;  %5153 = vmatpush3.msra.mxu1 %v933_v13  ;;  %v929_v21 = vld [vmem:[%s5745_s12 + $0x18] sm:$0xff]  ;;  %v928_v23 = vld [vmem:[%s5745_s12 + $0x10] sm:$0xff]  ;;  %v1152_v24 = vld [vmem:[%s5740_s29 + $0x8] sm:$0xff]  ;;  %vm738_vm12 = vcmp.ge.s32.totalorder %v5790_v46, 2  ;;  %vm807_vm13 = vcmp.ge.s32.totalorder %v5790_v46, 1  ;;  %vm740_vm14 = vcmp.ge.s32.totalorder %v5811_v54, 2 }
  0x17   : > { %5182 = vmatprep.subr.mxu0 %v1157_v14  ;;  %5154 = vmatprep.subr.mxu1 %v932_v15  ;;  %v927_v25 = vld [vmem:[%s5745_s12 + $0x8] sm:$0xff]  ;;  %v1151_v26 = vld [vmem:[%s5740_s29] sm:$0xff]  ;;  %vm809_vm15 = vcmp.ge.s32.totalorder %v5811_v54, 1  ;;  %s5012_s25 = sshll.u32 %s8282_s14, 3  ;;  %s5645_s29 = smov 64  }
  0x18   : > { %5144 = vmatmul.mubr.msk.f32.gmra.mxu0 %vm488_vm0, %v479_v7  ;;  %5155 = vmatpush3.msra.mxu1 %v932_v15  ;;  %v926_v27 = vld [vmem:[%s5745_s12] sm:$0xff]  ;;  %s467_s28 = scalar_lea.vmem %s8047_s8, %s5012_s25  ;;  %s7783_s12 = scalar_lea.vmem %s8048_s9, %s8282_s14 }
  0x19   : > { %5146 = vmatprep.mubr.msk.f32.mxu0 %vm488_vm0, %v480_v8  ;;  %5183 = vmatpush3.msra.mxu0 %v1157_v14  ;;  %v618_v38 = vld [vmem:[%s447_s18] sm:$0xf]  ;;  %s5647_s15 = smov 96   ;;  %s5071_s16 = sshll.u32 %s8282_s14, 4 }
  0x1a   : > { %5184 = vmatprep.subr.mxu0 %v1156_v16  ;;  %5156 = vmatprep.subr.mxu1 %v931_v17  ;;  %v5798_v49 = vrot.slane %v618_v38, %v638_v36  ;;  %v5802_v50 = vrot.slane %v618_v38, %v699_v37  ;;  %v5822_v57 = vrot.slane %v618_v38, %v768_v43  ;;  %s475_s19 = scalar_lea.vmem %s8049_s10, %s5071_s16 }
  0x1b   : > { %5185 = vmatpush3.msra.mxu0 %v1156_v16  ;;  %5157 = vmatpush3.msra.mxu1 %v931_v17  ;;  %v5826_v58 = vrot.slane %v618_v38, %v837_v48 }
  0x1c   : > { %5147 = vmatmul.mubr.msk.f32.gmra.mxu0 %vm488_vm0, %v481_v9  ;;  %5186 = vmatprep.subr.mxu0 %v1155_v18 }
  0x1d   : > { %5149 = vmatprep.mubr.msk.f32.mxu0 %vm488_vm0, %v482_v10  ;;  %5158 = vmatprep.subr.mxu1 %v930_v19 }
  0x1e   : > { %5187 = vmatpush3.msra.mxu0 %v1155_v18  ;;  %5159 = vmatpush3.msra.mxu1 %v930_v19 }
  0x1f   : > { %5188 = vmatprep.subr.mxu0 %v1154_v20  ;;  %5160 = vmatprep.subr.mxu1 %v929_v21 }
  0x20   : > { %5150 = vmatmul.mubr.msk.f32.gmra.mxu0 %vm488_vm0, %v483_v11  ;;  %5161 = vmatpush3.msra.mxu1 %v929_v21 }
  0x21   : > { %5189 = vmatpush3.msra.mxu0 %v1154_v20  ;;  %5162 = vmatprep.subr.mxu1 %v928_v23 }
  0x22   : > { %5190 = vmatprep.subr.mxu0 %v1153_v22  ;;  %5163 = vmatpush3.msra.mxu1 %v928_v23 }
  0x23   : > { %5191 = vmatpush3.msra.mxu0 %v1153_v22  ;;  %5164 = vmatprep.subr.mxu1 %v927_v25 }
  0x24   : > { %5192 = vmatprep.subr.mxu0 %v1152_v24  ;;  %5165 = vmatpush3.msra.mxu1 %v927_v25 }
  0x25   : > { %5193 = vmatpush3.msra.mxu0 %v1152_v24  ;;  %5166 = vmatprep.subr.mxu1 %v926_v27 }
  0x26   : > { %5194 = vmatprep.subr.mxu0 %v1151_v26  ;;  %5167 = vmatpush3.msra.mxu1 %v926_v27 }
  0x27   : > { %5195 = vmatpush3.msra.mxu0 %v1151_v26 }
  0xd4   : > { %v5768_v32 = vpop.f32.mrf.mxu0 }
  0xd5   : > { %8116 = vst [vmem:[#allocation5_spill] sm:$0xff] %v5768_v32  ;;  %v649_v44 = vrot.slane %v5768_v32, 5  ;;  %v641_v59 = vmul.f32 %v5768_v32, %v5798_v49  ;;  %v718_v60 = vrot.slane %v5768_v32, 6  ;;  %v787_v63 = vrot.slane %v5768_v32, 7 }
  0xd6   : > { %v5774_v34 = vpop.f32.mrf.mxu0 }
  0xd7   : > { %8117 = vst [vmem:[#allocation6_spill] sm:$0xff] %v5774_v34  ;;  %v648_v39 = vrot.slane %v5774_v34, 5  ;;  %v717_v55 = vrot.slane %v5774_v34, 6  ;;  %v640_v4 = vmul.f32 %v5798_v49, %v5774_v34  ;;  %v786_v6 = vrot.slane %v5774_v34, 7 }
  0xd8   : > { %v5780_v40 = vpop.f32.mrf.mxu0 }
  0xd9   : > { %v663_v52 = vsel %vm656_vm1, %v648_v39, %v649_v44  ;;  %v651_v0 = vrot.slane %v5780_v40, 5  ;;  %v732_v5 = vsel %vm725_vm2, %v717_v55, %v718_v60  ;;  %v5849_v7 = vmul.f32 %v5780_v40, %v5798_v49 }
  0xda   : > { %v5788_v45 = vpop.f32.mrf.mxu0  ;;  %v702_v61 = vmul.f32 %v5802_v50, %v663_v52  ;;  %v720_v8 = vrot.slane %v5780_v40, 6  ;;  %v789_v13 = vrot.slane %v5780_v40, 7  ;;  %v771_v20 = vmul.f32 %v5822_v57, %v732_v5 }
  0xdb   : > { %v650_v51 = vrot.slane %v5788_v45, 5  ;;  %v719_v1 = vrot.slane %v5788_v45, 6  ;;  %v642_v14 = vmul.f32 %v5798_v49, %v5788_v45  ;;  %v788_v15 = vrot.slane %v5788_v45, 7 }
  0xdc   : > { %v5809_v53 = vpop.f32.mrf.mxu0  ;;  %v710_v16 = vadd.f32 %v702_v61, %v641_v59 }
  0xdd   : > { %v662_v62 = vsel %vm656_vm1, %v649_v44, %v650_v51  ;;  %v661_v9 = vsel %vm656_vm1, %v650_v51, %v651_v0  ;;  %v730_v17 = vsel %vm725_vm2, %v719_v1, %v720_v8  ;;  %v731_v25 = vsel %vm725_vm2, %v718_v60, %v719_v1 }
  0xde   : > { %v5816_v56 = vpop.f32.mrf.mxu0  ;;  %v691_v10 = vsel %vm667_vm3, %v662_v62, 0.0  ;;  %v704_v22 = vmul.f32 %v5802_v50, %v661_v9  ;;  %v653_v26 = vrot.slane %v5809_v53, 5  ;;  %v5889_v33 = vmul.f32 %v5809_v53, %v5798_v49 }
  0xdf   : > { %v652_v2 = vrot.slane %v5816_v56, 5  ;;  %v703_v21 = vmul.f32 %v5802_v50, %v691_v10  ;;  %v721_v35 = vrot.slane %v5816_v56, 6  ;;  %v722_v41 = vrot.slane %v5809_v53, 6 }
  0xe0   : > { %v5839_v3 = vpop.f32.mrf.mxu0  ;;  %v791_v60 = vrot.slane %v5809_v53, 7  ;;  %v644_v61 = vmul.f32 %v5798_v49, %v5816_v56  ;;  %v790_v62 = vrot.slane %v5816_v56, 7  ;;  %v760_v47 = vsel %vm736_vm10, %v731_v25, 0.0 }
  0xe1   : > { %8118 = vst [vmem:[#allocation7_spill] sm:$0xff] %v5839_v3  ;;  %v660_v11 = vsel %vm656_vm1, %v651_v0, %v652_v2  ;;  %v655_v18 = vrot.slane %v5839_v3, 5  ;;  %v724_v19 = vrot.slane %v5839_v3, 6  ;;  %v793_v30 = vrot.slane %v5839_v3, 7 }
  0xe2   : > { %v5859_v12 = vpop.f32.mrf.mxu0  ;;  %v693_v23 = vsel %vm669_vm4, %v660_v11, 0.0  ;;  %v659_v44 = vsel %vm656_vm1, %v652_v2, %v653_v26  ;;  %v711_v59 = vadd.f32 %v703_v21, %v642_v14  ;;  %v728_v9 = vsel %vm725_vm2, %v721_v35, %v722_v41 }
  0xe3   : > { %v654_v24 = vrot.slane %v5859_v12, 5  ;;  %v664_v27 = vsel %vm656_vm1, %v655_v18, %v648_v39  ;;  %v733_v39 = vsel %vm725_vm2, %v724_v19, %v717_v55  ;;  %v705_v51 = vmul.f32 %v5802_v50, %v693_v23 }
  0xe4   : > { %v689_v38 = vsel %vm665_vm5, %v664_v27, 0.0  ;;  %v5910_v55 = vmul.f32 %v5839_v3, %v5798_v49  ;;  %v758_v1 = vsel %vm734_vm6, %v733_v39, 0.0  ;;  %v802_v2 = vsel %vm794_vm8, %v793_v30, %v786_v6 }
  0xe5   : > { %v658_v52 = vsel %vm656_vm1, %v653_v26, %v654_v24  ;;  %v701_v0 = vmul.f32 %v5802_v50, %v689_v38  ;;  %v706_v5 = vmul.f32 %v5802_v50, %v659_v44  ;;  %v729_v10 = vsel %vm725_vm2, %v720_v8, %v721_v35 }
  0xe6   : > { %v695_v11 = vsel %vm671_vm7, %v658_v52, 0.0  ;;  %v713_v14 = vadd.f32 %v705_v51, %v644_v61  ;;  %v646_v21 = vmul.f32 %v5798_v49, %v5859_v12  ;;  %v770_v26 = vmul.f32 %v5822_v57, %v758_v1  ;;  %v5946_v51 = vld [vmem:[%s450_s21] ss:$0 sm:$0xff] }
  0xe7   : > { %v709_v23 = vadd.f32 %v701_v0, %v640_v4  ;;  %v657_v27 = vsel %vm656_vm1, %v654_v24, %v655_v18  ;;  %v827_v8 = vsel %vm803_vm9, %v802_v2, 0.0  ;;  %v779_v35 = vadd.f32 %v771_v20, %v710_v16 }
  0xe8   : > { %v801_v38 = vsel %vm794_vm8, %v786_v6, %v787_v63  ;;  %v707_v49 = vmul.f32 %v5802_v50, %v695_v11  ;;  %v839_v4 = vmul.f32 %v5826_v58, %v827_v8  ;;  %v800_v6 = vsel %vm794_vm8, %v787_v63, %v788_v15 }
  0xe9   : > { %v778_v39 = vadd.f32 %v770_v26, %v709_v23  ;;  %v840_v44 = vmul.f32 %v5826_v58, %v801_v38  ;;  %v712_v16 = vadd.f32 %v704_v22, %v5849_v7  ;;  %v773_v18 = vmul.f32 %v5822_v57, %v730_v17 }
  0xea   : > { %v723_v20 = vrot.slane %v5859_v12, 6  ;;  %v772_v61 = vmul.f32 %v5822_v57, %v760_v47  ;;  %v829_v25 = vsel %vm805_vm11, %v800_v6, 0.0  ;;  %v799_v63 = vsel %vm794_vm8, %v788_v15, %v789_v13 }
  0xeb   : > { %v847_v24 = vadd.f32 %v839_v4, %v778_v39  ;;  %v848_v52 = vadd.f32 %v840_v44, %v779_v35  ;;  %v781_v0 = vadd.f32 %v773_v18, %v712_v16  ;;  %v762_v7 = vsel %vm738_vm12, %v729_v10, 0.0 }
  0xec   : > { %v708_v17 = vmul.f32 %v5802_v50, %v657_v27  ;;  %v792_v22 = vrot.slane %v5859_v12, 7  ;;  %v780_v2 = vadd.f32 %v772_v61, %v711_v59  ;;  %v841_v11 = vmul.f32 %v5826_v58, %v829_v25 }
  0xed   : > { %v5974_v1 = vadd.f32 %v5946_v51, %v847_v24  ;;  %v5977_v42 = vadd.f32 %v5946_v51, %v848_v52  ;;  %v842_v23 = vmul.f32 %v5826_v58, %v799_v63  ;;  %v774_v15 = vmul.f32 %v5822_v57, %v762_v7 }
  0xee   : > { %v715_v26 = vadd.f32 %v707_v49, %v646_v21  ;;  %v798_v27 = vsel %vm794_vm8, %v789_v13, %v790_v62  ;;  %v727_v59 = vsel %vm725_vm2, %v722_v41, %v723_v20  ;;  %v849_v8 = vadd.f32 %v841_v11, %v780_v2 }
  0xef   : > { %v5024_v10 = vmul.f32 -1.442695, %v5974_v1  ;;  %v5025_v50 = vmul.f32 -1.442695, %v5977_v42  ;;  %v850_v35 = vadd.f32 %v842_v23, %v781_v0  ;;  %v782_v38 = vadd.f32 %v774_v15, %v713_v14 }
  0xf0   : > { %v831_v21 = vsel %vm807_vm13, %v798_v27, 0.0  ;;  %v714_v49 = vadd.f32 %v706_v5, %v5889_v33  ;;  %v775_v39 = vmul.f32 %v5822_v57, %v728_v9  ;;  %v726_v4 = vsel %vm725_vm2, %v723_v20, %v724_v19 }
  0xf1   : > { %5396 = vpow2.f32 %v5024_v10  ;;  %v6001_v13 = vadd.f32 %v5946_v51, %v849_v8  ;;  %v6004_v41 = vadd.f32 %v5946_v51, %v850_v35  ;;  %v843_v14 = vmul.f32 %v5826_v58, %v831_v21 }
  0xf2   : > { %5398 = vpow2.f32 %v5025_v50  ;;  %v783_v46 = vadd.f32 %v775_v39, %v714_v49  ;;  %v797_v33 = vsel %vm794_vm8, %v790_v62, %v791_v60  ;;  %v764_v19 = vsel %vm740_vm14, %v727_v59, 0.0 }
  0xf3   : > { %v5026_v5 = vmul.f32 -1.442695, %v6001_v13  ;;  %v5027_v9 = vmul.f32 -1.442695, %v6004_v41  ;;  %v851_v44 = vadd.f32 %v843_v14, %v782_v38  ;;  %v844_v47 = vmul.f32 %v5826_v58, %v797_v33 }
  0xf4   : > { %v776_v6 = vmul.f32 %v5822_v57, %v764_v19  ;;  %v796_v16 = vsel %vm794_vm8, %v791_v60, %v792_v22  ;;  %v716_v18 = vadd.f32 %v708_v17, %v5910_v55  ;;  %v777_v25 = vmul.f32 %v5822_v57, %v726_v4 }
  0xf5   : > { %5400 = vpow2.f32 %v5026_v5  ;;  %v6025_v62 = vadd.f32 %v5946_v51, %v851_v44  ;;  %v852_v20 = vadd.f32 %v844_v47, %v783_v46  ;;  %v833_v24 = vsel %vm809_vm15, %v796_v16, 0.0 }
  0xf6   : > { %v784_v52 = vadd.f32 %v776_v6, %v715_v26  ;;  %v845_v61 = vmul.f32 %v5826_v58, %v833_v24  ;;  %5402 = vpow2.f32 %v5027_v9  ;;  %v795_v55 = vsel %vm794_vm8, %v792_v22, %v793_v30 }
  0xf7   : > { %v5028_v0 = vmul.f32 -1.442695, %v6025_v62  ;;  %v867_v60 = vadd.f32 %v5946_v51, %v852_v20  ;;  %v785_v7 = vadd.f32 %v777_v25, %v716_v18  ;;  %v846_v54 = vmul.f32 %v5826_v58, %v795_v55  ;;  %v5032_v20 = vld [vmem:[%s463_s24] ss:$0 sm:$0xff] }
  0xf8   : > { %v853_v63 = vadd.f32 %v845_v61, %v784_v52  ;;  %vm941_vm1 = vcmask 523264   ;;  %vm4865_vm2 = vcmask 785408  }
  0xf9   : > { %5404 = vpow2.f32 %v5028_v0  ;;  %v5029_v17 = vmul.f32 -1.442695, %v867_v60  ;;  %v854_v11 = vadd.f32 %v846_v54, %v785_v7  ;;  %v8062_v54 = vmov 3  }
  0xfa   : > { %v868_v2 = vadd.f32 %v5946_v51, %v853_v63 }
  0xfb   : > { %5406 = vpow2.f32 %v5029_v17  ;;  %v869_v23 = vadd.f32 %v5946_v51, %v854_v11  ;;  %v5632_v17 = vmov 2  }
  0xfc   : > { %v5030_v57 = vmul.f32 -1.442695, %v868_v2 }
  0xfd   : > { %v5031_v10 = vmul.f32 -1.442695, %v869_v23 }
  0xfe   : > { %v5397_v15 = vpop.eup %5396  ;;  %5408 = vpow2.f32 %v5030_v57 }
  0xff   : > { %v894_v26 = vadd.f32 1.0, %v5397_v15  ;;  %v5399_v50 = vpop.eup %5398 }
 0x100   : > { %v895_v30 = vadd.f32 1.0, %v5399_v50 }
 0x101   : > { %5410 = vrcp.f32 %v894_v26 }
 0x102   : > { %5412 = vpow2.f32 %v5031_v10  ;;  %v5401_v22 = vpop.eup %5400 }
 0x103   : > { %5414 = vrcp.f32 %v895_v30  ;;  %v896_v58 = vadd.f32 1.0, %v5401_v22  ;;  %v5403_v27 = vpop.eup %5402 }
 0x104   : > { %v897_v59 = vadd.f32 1.0, %v5403_v27 }
 0x105   : > { %5416 = vrcp.f32 %v896_v58 }
 0x106   : > { %v5405_v8 = vpop.eup %5404  ;;  %5418 = vrcp.f32 %v897_v59 }
 0x107   : > { %v898_v35 = vadd.f32 1.0, %v5405_v8 }
 0x108   : > { %v5407_v38 = vpop.eup %5406 }
 0x109   : > { %5420 = vrcp.f32 %v898_v35  ;;  %v899_v51 = vadd.f32 1.0, %v5407_v38 }
 0x10b   : > { %v5409_v21 = vpop.eup %5408  ;;  %5422 = vrcp.f32 %v899_v51 }
 0x10c   : > { %v900_v49 = vadd.f32 1.0, %v5409_v21 }
 0x10e   : > { %v5411_v39 = vpop.eup %5410  ;;  %5424 = vrcp.f32 %v900_v49 }
 0x10f   : > { %v5413_v4 = vpop.eup %5412  ;;  %v6041_v14 = vmul.f32 %v5411_v39, %v5974_v1 }
 0x110   : > { %v5415_v46 = vpop.eup %5414  ;;  %v901_v33 = vadd.f32 1.0, %v5413_v4 }
 0x111   : > { %8119 = vst [vmem:[#allocation8_spill] sm:$0xff] %v6041_v14  ;;  %5168 = vmatprep.mubr.msk.f32.mxu1 %vm941_vm1, %v6041_v14  ;;  %5196 = vmatprep.mubr.msk.f32.mxu0 %vm941_vm1, %v6041_v14  ;;  %v6048_v19 = vmul.f32 %v5415_v46, %v5977_v42  ;;  %v8052_v46 = vmov 5  }
 0x112   : > { %5426 = vrcp.f32 %v901_v33  ;;  %v5417_v5 = vpop.eup %5416 }
 0x113   : > { %8120 = vst [vmem:[#allocation9_spill] sm:$0xff] %v6048_v19  ;;  %5169 = vmatmul.mubr.msk.f32.vlgmr.msra.gmra.mxu1 %vm941_vm1, %v6048_v19  ;;  %5197 = vmatmul.mubr.msk.f32.vlgmr.msra.gmra.mxu0 %vm941_vm1, %v6048_v19  ;;  %v6055_v1 = vmul.f32 %v5417_v5, %v6001_v13  ;;  %v5419_v9 = vpop.eup %5418 }
 0x114   : > { %v6062_v42 = vmul.f32 %v5419_v9, %v6004_v41 }
 0x115   : > { %8121 = vst [vmem:[#allocation10_spill] sm:$0xff] %v6055_v1  ;;  %5171 = vmatprep.mubr.msk.f32.mxu1 %vm941_vm1, %v6055_v1  ;;  %5199 = vmatprep.mubr.msk.f32.mxu0 %vm941_vm1, %v6055_v1 }
 0x116   : > { %8122 = vst [vmem:[#allocation11_spill] sm:$0xff] %v6062_v42  ;;  %v5421_v44 = vpop.eup %5420 }
 0x117   : > { %5172 = vmatmul.mubr.msk.f32.gmra.mxu1 %vm941_vm1, %v6062_v42  ;;  %5200 = vmatmul.mubr.msk.f32.gmra.mxu0 %vm941_vm1, %v6062_v42  ;;  %v6069_v13 = vmul.f32 %v5421_v44, %v6025_v62 }
 0x118   : > { %v5423_v47 = vpop.eup %5422 }
 0x119   : > { %8123 = vst [vmem:[#allocation12_spill] sm:$0xff] %v6069_v13  ;;  %5174 = vmatprep.mubr.msk.f32.mxu1 %vm941_vm1, %v6069_v13  ;;  %5202 = vmatprep.mubr.msk.f32.mxu0 %vm941_vm1, %v6069_v13  ;;  %v6075_v41 = vmul.f32 %v5423_v47, %v867_v60 }
 0x11b   : > { %8124 = vst [vmem:[#allocation13_spill] sm:$0xff] %v6075_v41  ;;  %v5425_v6 = vpop.eup %5424  ;;  %5175 = vmatmul.mubr.msk.f32.gmra.mxu1 %vm941_vm1, %v6075_v41  ;;  %5203 = vmatmul.mubr.msk.f32.gmra.mxu0 %vm941_vm1, %v6075_v41 }
 0x11c   : > { %v6081_v16 = vmul.f32 %v5425_v6, %v868_v2 }
 0x11e   : > { %8125 = vst [vmem:[#allocation14_spill] sm:$0xff] %v6081_v16  ;;  %5177 = vmatprep.mubr.msk.f32.mxu1 %vm941_vm1, %v6081_v16  ;;  %5205 = vmatprep.mubr.msk.f32.mxu0 %vm941_vm1, %v6081_v16 }
 0x11f   : > { %v5427_v18 = vpop.eup %5426 }
 0x120   : > { %v6087_v62 = vmul.f32 %v5427_v18, %v869_v23 }
 0x122   : > { %8126 = vst [vmem:[#allocation15_spill] sm:$0xff] %v6087_v62  ;;  %5178 = vmatmul.mubr.msk.f32.gmra.mxu1 %vm941_vm1, %v6087_v62  ;;  %5206 = vmatmul.mubr.msk.f32.gmra.mxu0 %vm941_vm1, %v6087_v62 }
 0x1d3   : > { %v5170_v24 = vpop.f32.mrf.mxu1  ;;  %v6097_v52 = vpop.f32.mrf.mxu0 }
 0x1d4   : > { %v6099_v61 = vadd.f32 %v5170_v24, %v5032_v20  ;;  %1390 = vperm.xlu1 %5280, %v6097_v52   ;;  %1300 = vperm.xlu0 %5279, %v6097_v52  }
 0x1d5   : > { %v1032_v25 = vpop.f32.mrf.mxu1  ;;  %v6116_v30 = vpop.f32.mrf.mxu0 }
 0x1d6   : > { %v1080_v0 = vand.u32 2147483647, %v6099_v61  ;;  %v6104_v60 = vadd.f32 %v5032_v20, %v1032_v25  ;;  %8127 = vst [vmem:[#allocation16_spill] sm:$0xff] %v6116_v30 }
 0x1d7   : > { %v5173_v7 = vpop.f32.mrf.mxu1 }
 0x1d8   : > { %v1088_v55 = vsub.f32 0.0, %v1080_v0  ;;  %v1079_v63 = vand.u32 2147483647, %v6104_v60  ;;  %5282 = vset.pattern.permute.xlu1 %v8062_v54  ;;  %5281 = vset.pattern.permute.xlu0 %v5632_v17  ;;  %v6109_v2 = vadd.f32 %v5173_v7, %v5032_v20  ;;  %v8068_v0 = vmov 6  }
 0x1d9   : > { %1558 = vperm.xlu1 %5282, %v6097_v52   ;;  %1474 = vperm.xlu0 %5281, %v6097_v52   ;;  %v1042_v23 = vpop.f32.mrf.mxu1 }
 0x1da   : > { %v1097_v11 = vmul.f32 1.442695, %v1088_v55  ;;  %v1087_v57 = vsub.f32 0.0, %v1079_v63  ;;  %v1082_v15 = vand.u32 2147483647, %v6109_v2  ;;  %v6114_v26 = vadd.f32 %v5032_v20, %v1042_v23 }
 0x1db   : > { %v5176_v50 = vpop.f32.mrf.mxu1 }
 0x1dc   : > { %5428 = vpow2.f32 %v1097_v11  ;;  %v1095_v10 = vmul.f32 1.442695, %v1087_v57  ;;  %v1090_v22 = vsub.f32 0.0, %v1082_v15  ;;  %v1081_v58 = vand.u32 2147483647, %v6114_v26  ;;  %v6143_v15 = vpop.f32.mrf.mxu0 }
 0x1dd   : > { %v6119_v27 = vadd.f32 %v5176_v50, %v5032_v20  ;;  %5285 = vset.pattern.permute.xlu1 %v5632_v17  ;;  %5283 = vset.pattern.permute.xlu0 %v5630_v29  ;;  %v1052_v59 = vpop.f32.mrf.mxu1 }
 0x1de   : > { %5430 = vpow2.f32 %v1095_v10  ;;  %1470 = vperm.xlu1 %5285, %v6116_v30   ;;  %1295 = vperm.xlu0 %5283, %v6116_v30   ;;  %v1101_v8 = vmul.f32 1.442695, %v1090_v22  ;;  %v1089_v35 = vsub.f32 0.0, %v1081_v58  ;;  %v6126_v51 = vadd.f32 %v5032_v20, %v1052_v59 }
 0x1df   : > { %v1084_v38 = vand.u32 2147483647, %v6119_v27  ;;  %v8073_v10 = vmov 4  }
 0x1e0   : > { %v1099_v49 = vmul.f32 1.442695, %v1089_v35  ;;  %v1083_v39 = vand.u32 2147483647, %v6126_v51  ;;  %5432 = vpow2.f32 %v1101_v8  ;;  %v1264_v8 = vld [vmem:[%s467_s28] sm:$0xff] }
 0x1e1   : > { %v1092_v21 = vsub.f32 0.0, %v1084_v38 }
 0x1e2   : > { %v5179_v4 = vpop.f32.mrf.mxu1  ;;  %5288 = vset.pattern.permute.xlu1 %v8052_v46  ;;  %5284 = vset.pattern.permute.xlu0 %v8064_v28  ;;  %v1091_v9 = vsub.f32 0.0, %v1083_v39  ;;  %5434 = vpow2.f32 %v1099_v49  ;;  %v1695_v49 = vsub.s32 5, %v5766_v31  ;;  %v1779_v39 = vsub.s32 6, %v5766_v31 }
 0x1e3   : > { %v6131_v33 = vadd.f32 %v5179_v4, %v5032_v20  ;;  %1722 = vperm.xlu1 %5288, %v6116_v30   ;;  %1386 = vperm.xlu0 %5284, %v6116_v30   ;;  %v1105_v5 = vmul.f32 1.442695, %v1092_v21  ;;  %v1611_v21 = vsub.s32 4, %v5766_v31 }
 0x1e4   : > { %v1062_v44 = vpop.f32.mrf.mxu1  ;;  %v1103_v18 = vmul.f32 1.442695, %v1091_v9 }
 0x1e5   : > { %v1086_v47 = vand.u32 2147483647, %v6131_v33  ;;  %v6136_v6 = vadd.f32 %v5032_v20, %v1062_v44  ;;  %5436 = vpow2.f32 %v1105_v5  ;;  %v6166_v5 = vrot.slane %v1264_v8, %v638_v36 }
 0x1e6   : > { %5438 = vpow2.f32 %v1103_v18  ;;  %v6174_v18 = vrot.slane %v1264_v8, %v768_v43  ;;  %v1072_v36 = vmax.f32 %v6099_v61, 0.0 }
 0x1e7   : > { %v1094_v24 = vsub.f32 0.0, %v1086_v47  ;;  %v1085_v25 = vand.u32 2147483647, %v6136_v6  ;;  %5289 = vset.pattern.permute.xlu1 %v8068_v0  ;;  %5286 = vset.pattern.permute.xlu0 %v8062_v54  ;;  %v6170_v47 = vrot.slane %v1264_v8, %v699_v37  ;;  %v6184_v37 = vrot.slane %v1264_v8, %v1695_v49 }
 0x1e8   : > { %1806 = vperm.xlu1 %5289, %v6116_v30   ;;  %1554 = vperm.xlu0 %5286, %v6116_v30  }
 0x1e9   : > { %v5429_v55 = vpop.eup %5428  ;;  %v1109_v63 = vmul.f32 1.442695, %v1094_v24  ;;  %v1093_v20 = vsub.f32 0.0, %v1085_v25  ;;  %v1863_v24 = vsub.s32 7, %v5766_v31 }
 0x1ea   : > { %v1112_v7 = vadd.f32 1.0, %v5429_v55 }
 0x1eb   : > { %v5431_v11 = vpop.eup %5430  ;;  %5440 = vpow2.f32 %v1109_v63  ;;  %v1107_v57 = vmul.f32 1.442695, %v1093_v20  ;;  %v6179_v63 = vrot.slane %v1264_v8, %v837_v48  ;;  %v6194_v61 = vrot.slane %v1264_v8, %v1863_v24 }
 0x1ec   : > { %5442 = vlog2.f32 %v1112_v7  ;;  %v1111_v23 = vadd.f32 1.0, %v5431_v11  ;;  %5290 = vset.pattern.permute.xlu1 %v5630_v29  ;;  %5287 = vset.pattern.permute.xlu0 %v8073_v10  ;;  %v6182_v11 = vrot.slane %v1264_v8, %v1611_v21 }
 0x1ed   : > { %5444 = vpow2.f32 %v1107_v57  ;;  %1638 = vperm.xlu0 %5287, %v6116_v30   ;;  %1310 = vperm.xlu1 %5290, %v6143_v15   ;;  %v5433_v50 = vpop.eup %5432  ;;  %v6186_v57 = vrot.slane %v1264_v8, %v1779_v39 }
 0x1ee   : > { %5446 = vlog2.f32 %v1111_v23  ;;  %v1114_v58 = vadd.f32 1.0, %v5433_v50  ;;  %v8058_v23 = vmov 8   ;;  %v1071_v50 = vmax.f32 %v6104_v60, 0.0 }
 0x1ef   : > { %v5435_v22 = vpop.eup %5434 }
 0x1f0   : > { %v1113_v38 = vadd.f32 1.0, %v5435_v22  ;;  %5448 = vlog2.f32 %v1114_v58 }
 0x1f1   : > { %5291 = vset.pattern.permute.xlu0 %v8064_v28  ;;  %5292 = vset.pattern.permute.xlu1 %v5632_v17 }
 0x1f2   : > { %1398 = vperm.xlu0 %5291, %v6143_v15   ;;  %1482 = vperm.xlu1 %5292, %v6143_v15   ;;  %v5437_v59 = vpop.eup %5436  ;;  %5450 = vlog2.f32 %v1113_v38 }
 0x1f3   : > { %v5439_v35 = vpop.eup %5438  ;;  %v1116_v9 = vadd.f32 1.0, %v5437_v59 }
 0x1f4   : > { %v1115_v25 = vadd.f32 1.0, %v5439_v35 }
 0x1f5   : > { %5452 = vlog2.f32 %v1116_v9 }
 0x1f6   : > { %5293 = vset.pattern.permute.xlu0 %v8062_v54  ;;  %5294 = vset.pattern.permute.xlu1 %v8073_v10  ;;  %5454 = vlog2.f32 %v1115_v25 }
 0x1f7   : > { %1566 = vperm.xlu0 %5293, %v6143_v15   ;;  %1650 = vperm.xlu1 %5294, %v6143_v15  }
 0x1f8   : > { %v5441_v4 = vpop.eup %5440 }
 0x1f9   : > { %v5443_v44 = vpop.eup %5442  ;;  %v1118_v43 = vadd.f32 1.0, %v5441_v4 }
 0x1fa   : > { %v5445_v55 = vpop.eup %5444  ;;  %v1122_v20 = vmul.f32 0.6931472, %v5443_v44  ;;  %v6213_v44 = vpop.f32.mrf.mxu0 }
 0x1fb   : > { %v5447_v7 = vpop.eup %5446  ;;  %5298 = vset.pattern.permute.xlu0 %v8058_v23  ;;  %5295 = vset.pattern.permute.xlu1 %v8052_v46  ;;  %v1117_v22 = vadd.f32 1.0, %v5445_v55  ;;  %5456 = vlog2.f32 %v1118_v43 }
 0x1fc   : > { %v6190_v31 = vadd.f32 %v1122_v20, %v1072_v36  ;;  %v1120_v48 = vmul.f32 0.6931472, %v5447_v7  ;;  %3562 = vperm.xlu0 %5298, %v6143_v15   ;;  %1734 = vperm.xlu1 %5295, %v6143_v15  }
 0x1fd   : > { %5458 = vlog2.f32 %v1117_v22  ;;  %v5449_v43 = vpop.eup %5448 }
 0x1fe   : > { %v1270_v58 = vmul.f32 %v6170_v47, %v6190_v31  ;;  %v1362_v59 = vmul.f32 %v6174_v18, %v6190_v31  ;;  %v1446_v35 = vmul.f32 %v6179_v63, %v6190_v31  ;;  %v1530_v38 = vmul.f32 %v6166_v5, %v6190_v31 }
 0x1ff   : > { %v1614_v8 = vmul.f32 %v6182_v11, %v6190_v31  ;;  %v1698_v60 = vmul.f32 %v6184_v37, %v6190_v31  ;;  %v1782_v21 = vmul.f32 %v6186_v57, %v6190_v31  ;;  %v6211_v9 = vadd.f32 %v1120_v48, %v1071_v50 }
 0x200   : > { %v1279_v49 = vmul.f32 1.442695, %v1270_v58  ;;  %v1371_v39 = vmul.f32 1.442695, %v1362_v59  ;;  %v1455_v4 = vmul.f32 1.442695, %v1446_v35  ;;  %5307 = vset.pattern.permute.xlu0 %v8052_v46  ;;  %5296 = vset.pattern.permute.xlu1 %v8068_v0  ;;  %v1866_v25 = vmul.f32 %v6194_v61, %v6190_v31 }
 0x201   : > { %v1539_v24 = vmul.f32 1.442695, %v1530_v38  ;;  %1818 = vperm.xlu1 %5296, %v6143_v15   ;;  %1730 = vperm.xlu0 %5307, %v6213_v44   ;;  %v1623_v55 = vmul.f32 1.442695, %v1614_v8  ;;  %v1269_v36 = vmul.f32 %v6170_v47, %v6211_v9  ;;  %v1707_v20 = vmul.f32 1.442695, %v1698_v60 }
 0x202   : > { %5460 = vpow2.f32 %v1279_v49  ;;  %v1361_v7 = vmul.f32 %v6174_v18, %v6211_v9  ;;  %v1791_v48 = vmul.f32 1.442695, %v1782_v21  ;;  %v1445_v50 = vmul.f32 %v6179_v63, %v6211_v9  ;;  %v5451_v21 = vpop.eup %5450 }
 0x203   : > { %5462 = vpow2.f32 %v1371_v39  ;;  %v1875_v22 = vmul.f32 1.442695, %v1866_v25  ;;  %v1529_v58 = vmul.f32 %v6166_v5, %v6211_v9  ;;  %v8054_v59 = vmov 7  }
 0x204   : > { %5464 = vpow2.f32 %v1455_v4  ;;  %v8050_v35 = vmov 13   ;;  %v1277_v38 = vmul.f32 1.442695, %v1269_v36  ;;  %v1613_v8 = vmul.f32 %v6182_v11, %v6211_v9 }
 0x205   : > { %5466 = vpow2.f32 %v1539_v24  ;;  %5297 = vset.pattern.permute.xlu1 %v8054_v59  ;;  %5314 = vset.pattern.permute.xlu0 %v8050_v35  ;;  %v1074_v60 = vmax.f32 %v6109_v2, 0.0  ;;  %v1369_v49 = vmul.f32 1.442695, %v1361_v7  ;;  %v1697_v39 = vmul.f32 %v6184_v37, %v6211_v9  ;;  %v6246_v59 = vpop.f32.mrf.mxu0 }
 0x206   : > { %5468 = vpow2.f32 %v1623_v55  ;;  %1902 = vperm.xlu1 %5297, %v6143_v15   ;;  %3778 = vperm.xlu0 %5314, %v6213_v44   ;;  %v1126_v4 = vmul.f32 0.6931472, %v5449_v43  ;;  %v1453_v24 = vmul.f32 1.442695, %v1445_v50  ;;  %v1781_v25 = vmul.f32 %v6186_v57, %v6211_v9  ;;  %v5453_v55 = vpop.eup %5452 }
 0x207   : > { %5470 = vpow2.f32 %v1707_v20  ;;  %v1537_v36 = vmul.f32 1.442695, %v1529_v58  ;;  %v1865_v2 = vmul.f32 %v6194_v61, %v6211_v9  ;;  %v6244_v46 = vpop.eup %5454  ;;  %v1621_v20 = vmul.f32 1.442695, %v1613_v8 }
 0x208   : > { %5472 = vpow2.f32 %v1791_v48  ;;  %v6242_v35 = vadd.f32 %v1126_v4, %v1074_v60  ;;  %v1124_v7 = vmul.f32 0.6931472, %v5451_v21  ;;  %v8056_v43 = vmov 9   ;;  %v6256_v58 = vpop.eup %5456 }
 0x209   : > { %5474 = vpow2.f32 %v1875_v22  ;;  %v1705_v48 = vmul.f32 1.442695, %v1697_v39  ;;  %v1073_v60 = vmax.f32 %v6114_v26, 0.0  ;;  %v1873_v21 = vmul.f32 1.442695, %v1865_v2 }
 0x20a   : > { %5476 = vpow2.f32 %v1277_v38  ;;  %5299 = vset.pattern.permute.xlu1 %v8056_v43  ;;  %5316 = vset.pattern.permute.xlu0 %v8064_v28  ;;  %v1272_v50 = vmul.f32 %v6170_v47, %v6242_v35  ;;  %v1364_v22 = vmul.f32 %v6174_v18, %v6242_v35  ;;  %v1789_v38 = vmul.f32 1.442695, %v1781_v25  ;;  %v6263_v39 = vpop.eup %5458 }
 0x20b   : > { %5478 = vpow2.f32 %v1369_v49  ;;  %3606 = vperm.xlu1 %5299, %v6143_v15   ;;  %1406 = vperm.xlu0 %5316, %v6246_v59   ;;  %v1448_v8 = vmul.f32 %v6179_v63, %v6242_v35  ;;  %v1532_v49 = vmul.f32 %v6166_v5, %v6242_v35  ;;  %v1616_v43 = vmul.f32 %v6182_v11, %v6242_v35 }
 0x20c   : > { %5480 = vpow2.f32 %v1453_v24  ;;  %v1283_v4 = vmul.f32 1.442695, %v1272_v50  ;;  %v6267_v23 = vadd.f32 %v1124_v7, %v1073_v60  ;;  %v1375_v25 = vmul.f32 1.442695, %v1364_v22 }
 0x20d   : > { %5482 = vpow2.f32 %v1537_v36  ;;  %v1700_v26 = vmul.f32 %v6184_v37, %v6242_v35  ;;  %v8060_v36 = vmov 11   ;;  %v1784_v7 = vmul.f32 %v6186_v57, %v6242_v35 }
 0x20e   : > { %5484 = vpow2.f32 %v1621_v20  ;;  %v1459_v20 = vmul.f32 1.442695, %v1448_v8  ;;  %v1543_v50 = vmul.f32 1.442695, %v1532_v49  ;;  %v1868_v22 = vmul.f32 %v6194_v61, %v6242_v35 }
 0x20f   : > { %v5461_v24 = vpop.eup %5460  ;;  %5486 = vpow2.f32 %v1705_v48  ;;  %5300 = vset.pattern.permute.xlu1 %v8060_v36  ;;  %5318 = vset.pattern.permute.xlu0 %v8062_v54  ;;  %v1271_v8 = vmul.f32 %v6170_v47, %v6267_v23  ;;  %v1711_v54 = vmul.f32 1.442695, %v1700_v26  ;;  %v1531_v26 = vmul.f32 %v6166_v5, %v6267_v23 }
 0x210   : > { %v5463_v2 = vpop.eup %5462  ;;  %1342 = vst.msk [vmem:[#allocation2 + $0x8] sm:$0xff] %vm941_vm1, %v5461_v24  ;;  %5488 = vpow2.f32 %v1789_v38  ;;  %3694 = vperm.xlu1 %5300, %v6143_v15   ;;  %1574 = vperm.xlu0 %5318, %v6246_v59   ;;  %v1627_v38 = vmul.f32 1.442695, %v1616_v43  ;;  %v1130_v24 = vmul.f32 0.6931472, %v5453_v55  ;;  %v1447_v43 = vmul.f32 %v6179_v63, %v6267_v23 }
 0x211   : > { %v5465_v48 = vpop.eup %5464  ;;  %1426 = vst.msk [vmem:[#allocation2 + $0x18] sm:$0xff] %vm941_vm1, %v5463_v2  ;;  %5490 = vpow2.f32 %v1873_v21  ;;  %v1363_v21 = vmul.f32 %v6174_v18, %v6267_v23  ;;  %v1795_v2 = vmul.f32 1.442695, %v1784_v7 }
 0x212   : > { %v5467_v60 = vpop.eup %5466  ;;  %1510 = vst.msk [vmem:[#allocation2 + $0x28] sm:$0xff] %vm941_vm1, %v5465_v48  ;;  %5492 = vpow2.f32 %v1283_v4  ;;  %v1076_v4 = vmax.f32 %v6119_v27, 0.0  ;;  %v8071_v48 = vmov 12   ;;  %v1281_v27 = vmul.f32 1.442695, %v1271_v8 }
 0x213   : > { %v5469_v36 = vpop.eup %5468  ;;  %1594 = vst.msk [vmem:[#allocation2 + $0x38] sm:$0xff] %vm941_vm1, %v5467_v60  ;;  %5494 = vpow2.f32 %v1375_v25  ;;  %v1879_v25 = vmul.f32 1.442695, %v1868_v22  ;;  %v1699_v22 = vmul.f32 %v6184_v37, %v6267_v23 }
 0x214   : > { %v5471_v49 = vpop.eup %5470  ;;  %1678 = vst.msk [vmem:[#allocation2 + $0x48] sm:$0xff] %vm941_vm1, %v5469_v36  ;;  %5496 = vpow2.f32 %v1459_v20  ;;  %5301 = vset.pattern.permute.xlu1 %v8071_v48  ;;  %5319 = vset.pattern.permute.xlu0 %v8073_v10  ;;  %v1615_v20 = vmul.f32 %v6182_v11, %v6267_v23  ;;  %v6301_v7 = vadd.f32 %v1130_v24, %v1076_v4  ;;  %v1541_v24 = vmul.f32 1.442695, %v1531_v26 }
 0x215   : > { %v5473_v55 = vpop.eup %5472  ;;  %1762 = vst.msk [vmem:[#allocation2 + $0x58] sm:$0xff] %vm941_vm1, %v5471_v49  ;;  %5498 = vpow2.f32 %v1543_v50  ;;  %3738 = vperm.xlu1 %5301, %v6143_v15   ;;  %1658 = vperm.xlu0 %5319, %v6246_v59   ;;  %v1373_v50 = vmul.f32 1.442695, %v1363_v21  ;;  %v1128_v4 = vmul.f32 0.6931472, %v6244_v46 }
 0x216   : > { %v5475_v36 = vpop.eup %5474  ;;  %1846 = vst.msk [vmem:[#allocation2 + $0x68] sm:$0xff] %vm941_vm1, %v5473_v55  ;;  %5500 = vpow2.f32 %v1627_v38  ;;  %v1457_v55 = vmul.f32 1.442695, %v1447_v43  ;;  %v1783_v38 = vmul.f32 %v6186_v57, %v6267_v23  ;;  %v1274_v43 = vmul.f32 %v6170_v47, %v6301_v7 }
 0x217   : > { %v5477_v60 = vpop.eup %5476  ;;  %1930 = vst.msk [vmem:[#allocation2 + $0x78] sm:$0xff] %vm941_vm1, %v5475_v36  ;;  %5502 = vpow2.f32 %v1711_v54  ;;  %v1867_v54 = vmul.f32 %v6194_v61, %v6267_v23  ;;  %v1709_v26 = vmul.f32 1.442695, %v1699_v22  ;;  %v1366_v36 = vmul.f32 %v6174_v18, %v6301_v7 }
 0x218   : > { %v5479_v49 = vpop.eup %5478  ;;  %1341 = vst.msk [vmem:[#allocation2] sm:$0xff] %vm941_vm1, %v5477_v60  ;;  %5504 = vpow2.f32 %v1795_v2  ;;  %v1625_v2 = vmul.f32 1.442695, %v1615_v20  ;;  %v1450_v46 = vmul.f32 %v6179_v63, %v6301_v7  ;;  %v1075_v20 = vmax.f32 %v6126_v51, 0.0 }
 0x219   : > { %v5481_v8 = vpop.eup %5480  ;;  %1425 = vst.msk [vmem:[#allocation2 + $0x10] sm:$0xff] %vm941_vm1, %v5479_v49  ;;  %5506 = vpow2.f32 %v1879_v25  ;;  %5302 = vset.pattern.permute.xlu1 %v5630_v29  ;;  %5321 = vset.pattern.permute.xlu0 %v8068_v0 }
 0x21a   : > { %v5483_v21 = vpop.eup %5482  ;;  %1509 = vst.msk [vmem:[#allocation2 + $0x20] sm:$0xff] %vm941_vm1, %v5481_v8  ;;  %5508 = vpow2.f32 %v1281_v27  ;;  %1305 = vperm.xlu1 %5302, %v6213_v44   ;;  %1826 = vperm.xlu0 %5321, %v6246_v59   ;;  %v1793_v27 = vmul.f32 1.442695, %v1783_v38  ;;  %v1877_v8 = vmul.f32 1.442695, %v1867_v54  ;;  %v6333_v38 = vadd.f32 %v1128_v4, %v1075_v20 }
 0x21b   : > { %v5485_v25 = vpop.eup %5484  ;;  %1593 = vst.msk [vmem:[#allocation2 + $0x30] sm:$0xff] %vm941_vm1, %v5483_v21  ;;  %5510 = vpow2.f32 %v1373_v50  ;;  %v1534_v50 = vmul.f32 %v6166_v5, %v6301_v7  ;;  %v1287_v21 = vmul.f32 1.442695, %v1274_v43  ;;  %v1702_v54 = vmul.f32 %v6184_v37, %v6301_v7 }
 0x21c   : > { %v5487_v60 = vpop.eup %5486  ;;  %1677 = vst.msk [vmem:[#allocation2 + $0x40] sm:$0xff] %vm941_vm1, %v5485_v25  ;;  %5512 = vpow2.f32 %v1457_v55  ;;  %v1618_v55 = vmul.f32 %v6182_v11, %v6301_v7  ;;  %v6335_v25 = vpop.f32.mrf.mxu0  ;;  %v1463_v43 = vmul.f32 1.442695, %v1450_v46  ;;  %v1786_v4 = vmul.f32 %v6186_v57, %v6301_v7 }
 0x21d   : > { %v5489_v49 = vpop.eup %5488  ;;  %1761 = vst.msk [vmem:[#allocation2 + $0x50] sm:$0xff] %vm941_vm1, %v5487_v60  ;;  %5514 = vpow2.f32 %v1541_v24  ;;  %v1379_v24 = vmul.f32 1.442695, %v1366_v36  ;;  %v1870_v36 = vmul.f32 %v6194_v61, %v6301_v7  ;;  %v1134_v46 = vmul.f32 0.6931472, %v6256_v58 }
 0x21e   : > { %v5491_v22 = vpop.eup %5490  ;;  %1845 = vst.msk [vmem:[#allocation2 + $0x60] sm:$0xff] %vm941_vm1, %v5489_v49  ;;  %5516 = vpow2.f32 %v1625_v2  ;;  %5303 = vset.pattern.permute.xlu1 %v8064_v28  ;;  %5325 = vset.pattern.permute.xlu0 %v5630_v29  ;;  %v1631_v49 = vmul.f32 1.442695, %v1618_v55  ;;  %v1449_v58 = vmul.f32 %v6179_v63, %v6333_v38  ;;  %v1078_v55 = vmax.f32 %v6131_v33, 0.0 }
 0x21f   : > { %v5493_v51 = vpop.eup %5492  ;;  %1929 = vst.msk [vmem:[#allocation2 + $0x70] sm:$0xff] %vm941_vm1, %v5491_v22  ;;  %5518 = vpow2.f32 %v1709_v26  ;;  %1394 = vperm.xlu1 %5303, %v6213_v44   ;;  %1315 = vperm.xlu0 %5325, %v6335_v25   ;;  %v1547_v26 = vmul.f32 1.442695, %v1534_v50  ;;  %v1617_v33 = vmul.f32 %v6182_v11, %v6333_v38 }
 0x220   : > { %v5495_v2 = vpop.eup %5494  ;;  %1346 = vst.msk [vmem:[#allocation2 + $0x88] sm:$0xff] %vm941_vm1, %v5493_v51  ;;  %5520 = vpow2.f32 %v1793_v27  ;;  %v1273_v27 = vmul.f32 %v6170_v47, %v6333_v38  ;;  %v1715_v51 = vmul.f32 1.442695, %v1702_v54  ;;  %v1883_v54 = vmul.f32 1.442695, %v1870_v36 }
 0x221   : > { %v5497_v60 = vpop.eup %5496  ;;  %1430 = vst.msk [vmem:[#allocation2 + $0x98] sm:$0xff] %vm941_vm1, %v5495_v2  ;;  %5522 = vpow2.f32 %v1877_v8  ;;  %v1365_v8 = vmul.f32 %v6174_v18, %v6333_v38  ;;  %v1533_v2 = vmul.f32 %v6166_v5, %v6333_v38 }
 0x222   : > { %v5499_v20 = vpop.eup %5498  ;;  %1514 = vst.msk [vmem:[#allocation2 + $0xa8] sm:$0xff] %vm941_vm1, %v5497_v60  ;;  %5524 = vpow2.f32 %v1287_v21  ;;  %v1799_v21 = vmul.f32 1.442695, %v1786_v4  ;;  %v6371_v4 = vadd.f32 %v1134_v46, %v1078_v55  ;;  %v8128_v46 = vmov 3  }
 0x223   : > { %v5501_v22 = vpop.eup %5500  ;;  %1598 = vst.msk [vmem:[#allocation2 + $0xb8] sm:$0xff] %vm941_vm1, %v5499_v20  ;;  %5526 = vpow2.f32 %v1379_v24  ;;  %5304 = vset.pattern.permute.xlu1 %v5632_v17  ;;  %5327 = vset.pattern.permute.xlu0 %v5632_v17 }
 0x224   : > { %v5503_v50 = vpop.eup %5502  ;;  %1682 = vst.msk [vmem:[#allocation2 + $0xc8] sm:$0xff] %vm941_vm1, %v5501_v22  ;;  %5528 = vpow2.f32 %v1463_v43  ;;  %1478 = vperm.xlu1 %5304, %v6213_v44   ;;  %1486 = vperm.xlu0 %5327, %v6335_v25   ;;  %v1285_v43 = vmul.f32 1.442695, %v1273_v27  ;;  %v1377_v22 = vmul.f32 1.442695, %v1365_v8  ;;  %v6379_v27 = vpop.f32.mrf.mxu0  ;;  %v1869_v8 = vmul.f32 %v6194_v61, %v6333_v38 }
 0x225   : > { %v5505_v24 = vpop.eup %5504  ;;  %1766 = vst.msk [vmem:[#allocation2 + $0xd8] sm:$0xff] %vm941_vm1, %v5503_v50  ;;  %5530 = vpow2.f32 %v1547_v26  ;;  %v1701_v26 = vmul.f32 %v6184_v37, %v6333_v38  ;;  %v1461_v50 = vmul.f32 1.442695, %v1449_v58  ;;  %v1629_v58 = vmul.f32 1.442695, %v1617_v33 }
 0x226   : > { %v5507_v60 = vpop.eup %5506  ;;  %1850 = vst.msk [vmem:[#allocation2 + $0xe8] sm:$0xff] %vm941_vm1, %v5505_v24  ;;  %5532 = vpow2.f32 %v1631_v49  ;;  %v1785_v49 = vmul.f32 %v6186_v57, %v6333_v38  ;;  %v1276_v24 = vmul.f32 %v6170_v47, %v6371_v4  ;;  %v1077_v33 = vmax.f32 %v6136_v6, 0.0 }
 0x227   : > { %v5509_v20 = vpop.eup %5508  ;;  %1934 = vst.msk [vmem:[#allocation2 + $0xf8] sm:$0xff] %vm941_vm1, %v5507_v60  ;;  %5534 = vpow2.f32 %v1715_v51  ;;  %v1545_v51 = vmul.f32 1.442695, %v1533_v2  ;;  %v1132_v60 = vmul.f32 0.6931472, %v6263_v39  ;;  %v1368_v2 = vmul.f32 %v6174_v18, %v6371_v4 }
 0x228   : > { %v5511_v36 = vpop.eup %5510  ;;  %1345 = vst.msk [vmem:[#allocation2 + $0x80] sm:$0xff] %vm941_vm1, %v5509_v20  ;;  %5536 = vpow2.f32 %v1799_v21  ;;  %5305 = vset.pattern.permute.xlu1 %v8128_v46  ;;  %5335 = vset.pattern.permute.xlu0 %v8064_v28  ;;  %v1881_v39 = vmul.f32 1.442695, %v1869_v8  ;;  %v1620_v6 = vmul.f32 %v6182_v11, %v6371_v4 }
 0x229   : > { %v5513_v55 = vpop.eup %5512  ;;  %1429 = vst.msk [vmem:[#allocation2 + $0x90] sm:$0xff] %vm941_vm1, %v5511_v36  ;;  %5538 = vpow2.f32 %v1883_v54  ;;  %1562 = vperm.xlu1 %5305, %v6213_v44   ;;  %1414 = vperm.xlu0 %5335, %v6379_v27   ;;  %v1713_v54 = vmul.f32 1.442695, %v1701_v26  ;;  %v6402_v26 = vpop.f32.mrf.mxu0  ;;  %v1383_v8 = vmul.f32 1.442695, %v1368_v2 }
 0x22a   : > { %v5515_v21 = vpop.eup %5514  ;;  %1513 = vst.msk [vmem:[#allocation2 + $0xa0] sm:$0xff] %vm941_vm1, %v5513_v55  ;;  %5540 = vpow2.f32 %v1285_v43  ;;  %v1797_v55 = vmul.f32 1.442695, %v1785_v49  ;;  %v1452_v43 = vmul.f32 %v6179_v63, %v6371_v4  ;;  %v1291_v49 = vmul.f32 1.442695, %v1276_v24 }
 0x22b   : > { %v5517_v20 = vpop.eup %5516  ;;  %1597 = vst.msk [vmem:[#allocation2 + $0xb0] sm:$0xff] %vm941_vm1, %v5515_v21  ;;  %5542 = vpow2.f32 %v1377_v22  ;;  %v1536_v22 = vmul.f32 %v6166_v5, %v6371_v4  ;;  %v6409_v21 = vadd.f32 %v1132_v60, %v1077_v33  ;;  %v1788_v24 = vmul.f32 %v6186_v57, %v6371_v4 }
 0x22c   : > { %v5519_v36 = vpop.eup %5518  ;;  %1681 = vst.msk [vmem:[#allocation2 + $0xc0] sm:$0xff] %vm941_vm1, %v5517_v20  ;;  %5544 = vpow2.f32 %v1461_v50  ;;  %v1704_v20 = vmul.f32 %v6184_v37, %v6371_v4  ;;  %v1635_v33 = vmul.f32 1.442695, %v1620_v6 }
 0x22d   : > { %v5521_v28 = vpop.eup %5520  ;;  %1765 = vst.msk [vmem:[#allocation2 + $0xd0] sm:$0xff] %vm941_vm1, %v5519_v36  ;;  %5546 = vpow2.f32 %v1545_v51  ;;  %5306 = vset.pattern.permute.xlu1 %v8073_v10  ;;  %5341 = vset.pattern.permute.xlu0 %v5630_v29  ;;  %v1551_v36 = vmul.f32 1.442695, %v1536_v22  ;;  %v1367_v22 = vmul.f32 %v6174_v18, %v6409_v21  ;;  %v1535_v18 = vmul.f32 %v6166_v5, %v6409_v21 }
 0x22e   : > { %v5523_v50 = vpop.eup %5522  ;;  %1849 = vst.msk [vmem:[#allocation2 + $0xe0] sm:$0xff] %vm941_vm1, %v5521_v28  ;;  %5548 = vpow2.f32 %v1629_v58  ;;  %1646 = vperm.xlu1 %5306, %v6213_v44   ;;  %1325 = vperm.xlu0 %5341, %v6402_v26   ;;  %v1467_v58 = vmul.f32 1.442695, %v1452_v43 }
 0x22f   : > { %v5525_v51 = vpop.eup %5524  ;;  %1933 = vst.msk [vmem:[#allocation2 + $0xf0] sm:$0xff] %vm941_vm1, %v5523_v50  ;;  %5550 = vpow2.f32 %v1713_v54  ;;  %v1872_v54 = vmul.f32 %v6194_v61, %v6371_v4 }
 0x230   : > { %v5527_v28 = vpop.eup %5526  ;;  %1350 = vst.msk [vmem:[#allocation2 + $0x108] sm:$0xff] %vm941_vm1, %v5525_v51  ;;  %5552 = vpow2.f32 %v1797_v55  ;;  %v1275_v55 = vmul.f32 %v6170_v47, %v6409_v21  ;;  %v1803_v47 = vmul.f32 1.442695, %v1788_v24  ;;  %v1703_v24 = vmul.f32 %v6184_v37, %v6409_v21 }
 0x231   : > { %v5529_v60 = vpop.eup %5528  ;;  %1434 = vst.msk [vmem:[#allocation2 + $0x118] sm:$0xff] %vm941_vm1, %v5527_v28  ;;  %5554 = vpow2.f32 %v1881_v39  ;;  %v1719_v39 = vmul.f32 1.442695, %v1704_v20  ;;  %v1887_v51 = vmul.f32 1.442695, %v1872_v54  ;;  %v1619_v28 = vmul.f32 %v6182_v11, %v6409_v21 }
 0x232   : > { %v5531_v2 = vpop.eup %5530  ;;  %1518 = vst.msk [vmem:[#allocation2 + $0x128] sm:$0xff] %vm941_vm1, %v5529_v60  ;;  %5556 = vpow2.f32 %v1291_v49  ;;  %5308 = vset.pattern.permute.xlu1 %v8068_v0  ;;  %5343 = vset.pattern.permute.xlu0 %v5632_v17  ;;  %v1451_v49 = vmul.f32 %v6179_v63, %v6409_v21  ;;  %v1289_v20 = vmul.f32 1.442695, %v1275_v55  ;;  %v1381_v63 = vmul.f32 1.442695, %v1367_v22 }
 0x233   : > { %v5533_v43 = vpop.eup %5532  ;;  %1602 = vst.msk [vmem:[#allocation2 + $0x138] sm:$0xff] %vm941_vm1, %v5531_v2  ;;  %5558 = vpow2.f32 %v1383_v8  ;;  %1814 = vperm.xlu1 %5308, %v6213_v44   ;;  %1494 = vperm.xlu0 %5343, %v6402_v26   ;;  %v8129_v60 = vmov 8   ;;  %v1787_v11 = vmul.f32 %v6186_v57, %v6409_v21  ;;  %v1549_v37 = vmul.f32 1.442695, %v1535_v18 }
 0x234   : > { %v5535_v50 = vpop.eup %5534  ;;  %1686 = vst.msk [vmem:[#allocation2 + $0x148] sm:$0xff] %vm941_vm1, %v5533_v43  ;;  %5560 = vpow2.f32 %v1467_v58  ;;  %v1871_v2 = vmul.f32 %v6194_v61, %v6409_v21  ;;  %v1633_v55 = vmul.f32 1.442695, %v1619_v28  ;;  %v1717_v57 = vmul.f32 1.442695, %v1703_v24 }
 0x235   : > { %v5537_v6 = vpop.eup %5536  ;;  %1770 = vst.msk [vmem:[#allocation2 + $0x158] sm:$0xff] %vm941_vm1, %v5535_v50  ;;  %5562 = vpow2.f32 %v1551_v36  ;;  %v1465_v36 = vmul.f32 1.442695, %v1451_v49  ;;  %v1801_v22 = vmul.f32 1.442695, %v1787_v11  ;;  %v8130_v50 = vmov 9  }
 0x236   : > { %v5539_v8 = vpop.eup %5538  ;;  %1854 = vst.msk [vmem:[#allocation2 + $0x168] sm:$0xff] %vm941_vm1, %v5537_v6  ;;  %5564 = vpow2.f32 %v1635_v33 }
 0x237   : > { %v5541_v58 = vpop.eup %5540  ;;  %1938 = vst.msk [vmem:[#allocation2 + $0x178] sm:$0xff] %vm941_vm1, %v5539_v8  ;;  %5566 = vpow2.f32 %v1719_v39  ;;  %5309 = vset.pattern.permute.xlu1 %v8129_v60  ;;  %5344 = vset.pattern.permute.xlu0 %v8128_v46  ;;  %v8066_v8 = vmov 10  }
 0x238   : > { %v5543_v5 = vpop.eup %5542  ;;  %1349 = vst.msk [vmem:[#allocation2 + $0x100] sm:$0xff] %vm941_vm1, %v5541_v58  ;;  %5568 = vpow2.f32 %v1803_v47  ;;  %3558 = vperm.xlu1 %5309, %v6213_v44   ;;  %1578 = vperm.xlu0 %5344, %v6402_v26   ;;  %v1885_v47 = vmul.f32 1.442695, %v1871_v2 }
 0x239   : > { %v5545_v54 = vpop.eup %5544  ;;  %1433 = vst.msk [vmem:[#allocation2 + $0x110] sm:$0xff] %vm941_vm1, %v5543_v5  ;;  %5570 = vpow2.f32 %v1887_v51  ;;  %v8131_v5 = vmov 11  }
 0x23a   : > { %v5547_v33 = vpop.eup %5546  ;;  %1517 = vst.msk [vmem:[#allocation2 + $0x120] sm:$0xff] %vm941_vm1, %v5545_v54  ;;  %5572 = vpow2.f32 %v1289_v20 }
 0x23b   : > { %v5549_v43 = vpop.eup %5548  ;;  %1601 = vst.msk [vmem:[#allocation2 + $0x130] sm:$0xff] %vm941_vm1, %v5547_v33  ;;  %5574 = vpow2.f32 %v1381_v63 }
 0x23c   : > { %v5551_v39 = vpop.eup %5550  ;;  %1685 = vst.msk [vmem:[#allocation2 + $0x140] sm:$0xff] %vm941_vm1, %v5549_v43  ;;  %5576 = vpow2.f32 %v1465_v36  ;;  %5310 = vset.pattern.permute.xlu1 %v8130_v50  ;;  %5345 = vset.pattern.permute.xlu0 %v8073_v10  ;;  %v8132_v36 = vmov 7  }
 0x23d   : > { %v5553_v61 = vpop.eup %5552  ;;  %1769 = vst.msk [vmem:[#allocation2 + $0x150] sm:$0xff] %vm941_vm1, %v5551_v39  ;;  %5578 = vpow2.f32 %v1549_v37  ;;  %3602 = vperm.xlu1 %5310, %v6213_v44   ;;  %1662 = vperm.xlu0 %5345, %v6402_v26   ;;  %v6492_v39 = vmul.f32 %v6190_v31, %v6048_v19  ;;  %v8134_v31 = vmov 5  }
 0x23e   : > { %v5555_v49 = vpop.eup %5554  ;;  %1853 = vst.msk [vmem:[#allocation2 + $0x160] sm:$0xff] %vm941_vm1, %v5553_v61  ;;  %5580 = vpow2.f32 %v1633_v55 }
 0x23f   : > { %v5557_v6 = vpop.eup %5556  ;;  %1937 = vst.msk [vmem:[#allocation2 + $0x170] sm:$0xff] %vm941_vm1, %v5555_v49  ;;  %5582 = vpow2.f32 %v1717_v57  ;;  %8133 = vst [vmem:[#allocation17_spill] sm:$0xff] %v6492_v39 }
 0x240   : > { %v5559_v51 = vpop.eup %5558  ;;  %1354 = vst.msk [vmem:[#allocation2 + $0x188] sm:$0xff] %vm941_vm1, %v5557_v6  ;;  %5584 = vpow2.f32 %v1801_v22 }
 0x241   : > { %v5561_v18 = vpop.eup %5560  ;;  %1438 = vst.msk [vmem:[#allocation2 + $0x198] sm:$0xff] %vm941_vm1, %v5559_v51  ;;  %5586 = vpow2.f32 %v1885_v47  ;;  %5311 = vset.pattern.permute.xlu1 %v8066_v8  ;;  %5351 = vset.pattern.permute.xlu0 %v8129_v60 }
 0x242   : > { %v5563_v20 = vpop.eup %5562  ;;  %1522 = vst.msk [vmem:[#allocation2 + $0x1a8] sm:$0xff] %vm941_vm1, %v5561_v18  ;;  %3646 = vperm.xlu1 %5311, %v6213_v44   ;;  %4266 = vperm.xlu0 %5351, %v6379_v27  }
 0x243   : > { %v5565_v28 = vpop.eup %5564  ;;  %1606 = vst.msk [vmem:[#allocation2 + $0x1b8] sm:$0xff] %vm941_vm1, %v5563_v20 }
 0x244   : > { %v5567_v58 = vpop.eup %5566  ;;  %1690 = vst.msk [vmem:[#allocation2 + $0x1c8] sm:$0xff] %vm941_vm1, %v5565_v28  ;;  %v6513_v28 = vmul.f32 %v6211_v9, %v6041_v14 }
 0x245   : > { %v5569_v63 = vpop.eup %5568  ;;  %1774 = vst.msk [vmem:[#allocation2 + $0x1d8] sm:$0xff] %vm941_vm1, %v5567_v58 }
 0x246   : > { %v5571_v24 = vpop.eup %5570  ;;  %1858 = vst.msk [vmem:[#allocation2 + $0x1e8] sm:$0xff] %vm941_vm1, %v5569_v63  ;;  %5312 = vset.pattern.permute.xlu1 %v8131_v5  ;;  %5352 = vset.pattern.permute.xlu0 %v8132_v36 }
 0x247   : > { %v5573_v11 = vpop.eup %5572  ;;  %1942 = vst.msk [vmem:[#allocation2 + $0x1f8] sm:$0xff] %vm941_vm1, %v5571_v24  ;;  %3690 = vperm.xlu1 %5312, %v6213_v44   ;;  %1898 = vperm.xlu0 %5352, %v6213_v44  }
 0x248   : > { %v5575_v54 = vpop.eup %5574  ;;  %1353 = vst.msk [vmem:[#allocation2 + $0x180] sm:$0xff] %vm941_vm1, %v5573_v11 }
 0x249   : > { %v5577_v37 = vpop.eup %5576  ;;  %1437 = vst.msk [vmem:[#allocation2 + $0x190] sm:$0xff] %vm941_vm1, %v5575_v54 }
 0x24a   : > { %v5579_v2 = vpop.eup %5578  ;;  %1521 = vst.msk [vmem:[#allocation2 + $0x1a0] sm:$0xff] %vm941_vm1, %v5577_v37 }
 0x24b   : > { %v5581_v33 = vpop.eup %5580  ;;  %1605 = vst.msk [vmem:[#allocation2 + $0x1b0] sm:$0xff] %vm941_vm1, %v5579_v2  ;;  %5313 = vset.pattern.permute.xlu1 %v8071_v48  ;;  %1890 = vperm.xlu0 %5352, %v6116_v30  }
 0x24c   : > { %v5583_v55 = vpop.eup %5582  ;;  %1689 = vst.msk [vmem:[#allocation2 + $0x1c0] sm:$0xff] %vm941_vm1, %v5581_v33  ;;  %3734 = vperm.xlu1 %5313, %v6213_v44  }
 0x24d   : > { %v5585_v43 = vpop.eup %5584  ;;  %1773 = vst.msk [vmem:[#allocation2 + $0x1d0] sm:$0xff] %vm941_vm1, %v5583_v55 }
 0x24e   : > { %v5587_v57 = vpop.eup %5586  ;;  %1857 = vst.msk [vmem:[#allocation2 + $0x1e0] sm:$0xff] %vm941_vm1, %v5585_v43 }
 0x24f   : > { %1941 = vst.msk [vmem:[#allocation2 + $0x1f0] sm:$0xff] %vm941_vm1, %v5587_v57  ;;  %v1391_v22 = vpop.permute.xlu1 %1390  ;;  %v1301_v61 = vpop.permute.xlu0 %1300  ;;  %1914 = vperm.xlu0 %5352, %v6402_v26  }
 0x250   : > { %v1418_v47 = vmul.f32 %v1391_v22, %v6492_v39  ;;  %v1334_v49 = vmul.f32 %v1301_v61, %v6492_v39  ;;  %5315 = vset.pattern.permute.xlu1 %v5630_v29  ;;  %v1146_v22 = vmul.f32 %v6242_v35, %v6062_v42 }
 0x251   : > { %1320 = vperm.xlu1 %5315, %v6246_v59  }
 0x252   : > { %1428 = vst.msk [vmem:[#allocation3 + $0x18] sm:$0xff] %vm941_vm1, %v1418_v47  ;;  %1344 = vst.msk [vmem:[#allocation3 + $0x8] sm:$0xff] %vm941_vm1, %v1334_v49 }
 0x253   : > { %5353 = vset.pattern.permute.xlu0 %v8134_v31 }
 0x254   : > { %v1559_v6 = vpop.permute.xlu1 %1558  ;;  %v1475_v51 = vpop.permute.xlu0 %1474  ;;  %1750 = vperm.xlu0 %5353, %v6379_v27  }
 0x255   : > { %v1586_v18 = vmul.f32 %v1559_v6, %v6492_v39  ;;  %v1502_v20 = vmul.f32 %v1475_v51, %v6492_v39  ;;  %5317 = vset.pattern.permute.xlu1 %v5632_v17  ;;  %v8074_v51 = vmov 14  }
 0x256   : > { %1490 = vperm.xlu1 %5317, %v6246_v59  }
 0x257   : > { %1596 = vst.msk [vmem:[#allocation3 + $0x38] sm:$0xff] %vm941_vm1, %v1586_v18  ;;  %1512 = vst.msk [vmem:[#allocation3 + $0x28] sm:$0xff] %vm941_vm1, %v1502_v20  ;;  %v5052_v20 = vmul.f32 -1.442695, %v5788_v45 }
 0x258   : > { %1726 = vperm.xlu0 %5353, %v6097_v52  }
 0x259   : > { %v1471_v58 = vpop.permute.xlu1 %1470  ;;  %v1296_v63 = vpop.permute.xlu0 %1295  ;;  %5588 = vpow2.f32 %v5052_v20 }
 0x25a   : > { %v1501_v24 = vmul.f32 %v1471_v58, %v6513_v28  ;;  %v1333_v11 = vmul.f32 %v1296_v63, %v6513_v28  ;;  %5320 = vset.pattern.permute.xlu1 %v8134_v31 }
 0x25b   : > { %1742 = vperm.xlu1 %5320, %v6246_v59  }
 0x25c   : > { %1511 = vst.msk [vmem:[#allocation3 + $0x20] sm:$0xff] %vm941_vm1, %v1501_v24  ;;  %1343 = vst.msk [vmem:[#allocation3] sm:$0xff] %vm941_vm1, %v1333_v11  ;;  %5357 = vset.pattern.permute.xlu0 %v8066_v8  ;;  %v8135_v24 = vmov 1   ;;  %v5054_v11 = vmul.f32 -1.442695, %v5816_v56 }
 0x25d   : > { %3650 = vperm.xlu0 %5357, %v6143_v15  }
 0x25e   : > { %v1723_v9 = vpop.permute.xlu1 %1722  ;;  %v1387_v54 = vpop.permute.xlu0 %1386  ;;  %5590 = vpow2.f32 %v5054_v11 }
 0x25f   : > { %v1753_v37 = vmul.f32 %v1723_v9, %v6513_v28  ;;  %v1417_v2 = vmul.f32 %v1387_v54, %v6513_v28  ;;  %5322 = vset.pattern.permute.xlu1 %v8132_v36 }
 0x260   : > { %1910 = vperm.xlu1 %5322, %v6246_v59  }
 0x261   : > { %1763 = vst.msk [vmem:[#allocation3 + $0x50] sm:$0xff] %vm941_vm1, %v1753_v37  ;;  %1427 = vst.msk [vmem:[#allocation3 + $0x10] sm:$0xff] %vm941_vm1, %v1417_v2  ;;  %3998 = vperm.xlu0 %5357, %v6335_v25  }
 0x263   : > { %v1807_v33 = vpop.permute.xlu1 %1806  ;;  %v1555_v55 = vpop.permute.xlu0 %1554 }
 0x264   : > { %v1837_v43 = vmul.f32 %v1807_v33, %v6513_v28  ;;  %v1585_v57 = vmul.f32 %v1555_v55, %v6513_v28  ;;  %5323 = vset.pattern.permute.xlu1 %v8129_v60  ;;  %v5056_v33 = vmul.f32 -1.442695, %v5859_v12 }
 0x265   : > { %3914 = vperm.xlu1 %5323, %v6246_v59   ;;  %4354 = vperm.xlu0 %5357, %v6379_v27  }
 0x266   : > { %1847 = vst.msk [vmem:[#allocation3 + $0x60] sm:$0xff] %vm941_vm1, %v1837_v43  ;;  %1595 = vst.msk [vmem:[#allocation3 + $0x30] sm:$0xff] %vm941_vm1, %v1585_v57  ;;  %5592 = vpow2.f32 %v5056_v33  ;;  %v5589_v20 = vpop.eup %5588 }
 0x268   : > { %v1639_v61 = vpop.permute.xlu0 %1638  ;;  %v1311_v47 = vpop.permute.xlu1 %1310 }
 0x269   : > { %v1669_v49 = vmul.f32 %v1639_v61, %v6513_v28  ;;  %v1336_v6 = vmul.f32 %v1311_v47, %v1146_v22  ;;  %5324 = vset.pattern.permute.xlu1 %v8066_v8  ;;  %5366 = vset.pattern.permute.xlu0 %v8074_v51  ;;  %v8069_v61 = vmov 15   ;;  %v6569_v47 = vmul.f32 %v6267_v23, %v6055_v1  ;;  %v2182_v8 = vld [vmem:[#allocation2 + $0x83] ss:$16 sm:$0x3] }
 0x26a   : > { %4002 = vperm.xlu1 %5324, %v6246_v59   ;;  %4174 = vperm.xlu0 %5366, %v6335_v25  }
 0x26b   : > { %1679 = vst.msk [vmem:[#allocation3 + $0x40] sm:$0xff] %vm941_vm1, %v1669_v49  ;;  %1348 = vst.msk [vmem:[#allocation3 + $0x88] sm:$0xff] %vm941_vm1, %v1336_v6 }
 0x26d   : > { %v1399_v18 = vpop.permute.xlu0 %1398  ;;  %v1483_v35 = vpop.permute.xlu1 %1482 }
 0x26e   : > { %v1420_v58 = vmul.f32 %v1399_v18, %v1146_v22  ;;  %v1504_v63 = vmul.f32 %v1483_v35, %v1146_v22  ;;  %5326 = vset.pattern.permute.xlu1 %v8135_v24  ;;  %5367 = vset.pattern.permute.xlu0 %v8071_v48 }
 0x26f   : > { %1402 = vperm.xlu1 %5326, %v6335_v25   ;;  %4086 = vperm.xlu0 %5367, %v6335_v25  }
 0x270   : > { %1432 = vst.msk [vmem:[#allocation3 + $0x98] sm:$0xff] %vm941_vm1, %v1420_v58  ;;  %1516 = vst.msk [vmem:[#allocation3 + $0xa8] sm:$0xff] %vm941_vm1, %v1504_v63  ;;  %v4630_v63 = vadd.f32 1.0, %v5589_v20 }
 0x272   : > { %v1567_v9 = vpop.permute.xlu0 %1566  ;;  %v1651_v54 = vpop.permute.xlu1 %1650  ;;  %5594 = vrcp.f32 %v4630_v63 }
 0x273   : > { %v1588_v37 = vmul.f32 %v1567_v9, %v1146_v22  ;;  %v1672_v2 = vmul.f32 %v1651_v54, %v1146_v22  ;;  %5328 = vset.pattern.permute.xlu1 %v8128_v46  ;;  %4442 = vperm.xlu0 %5367, %v6379_v27   ;;  %v5591_v9 = vpop.eup %5590  ;;  %v6586_v54 = vmul.f32 %v6301_v7, %v6075_v41  ;;  %v6719_v41 = vld [vmem:[#allocation2 + $0x84] ss:$16 sm:$0xc] }
 0x274   : > { %1570 = vperm.xlu1 %5328, %v6335_v25   ;;  %v5593_v33 = vpop.eup %5592 }
 0x275   : > { %1600 = vst.msk [vmem:[#allocation3 + $0xb8] sm:$0xff] %vm941_vm1, %v1588_v37  ;;  %1684 = vst.msk [vmem:[#allocation3 + $0xc8] sm:$0xff] %vm941_vm1, %v1672_v2  ;;  %v4632_v37 = vadd.f32 1.0, %v5591_v9 }
 0x277   : > { %v6560_v55 = vpop.permute.xlu0 %3562  ;;  %v1735_v43 = vpop.permute.xlu1 %1734  ;;  %5369 = vset.pattern.permute.xlu0 %v8069_v61  ;;  %5596 = vrcp.f32 %v4632_v37 }
 0x278   : > { %8136 = vst [vmem:[#allocation18_spill] sm:$0xff] %v6560_v55  ;;  %v1756_v57 = vmul.f32 %v1735_v43, %v1146_v22  ;;  %5329 = vset.pattern.permute.xlu1 %v8073_v10  ;;  %3870 = vperm.xlu0 %5369, %v6143_v15  }
 0x279   : > { %1654 = vperm.xlu1 %5329, %v6335_v25  }
 0x27a   : > { %1768 = vst.msk [vmem:[#allocation3 + $0xd8] sm:$0xff] %vm941_vm1, %v1756_v57  ;;  %v4634_v57 = vadd.f32 1.0, %v5593_v33 }
 0x27c   : > { %v1819_v49 = vpop.permute.xlu1 %1818  ;;  %v1731_v6 = vpop.permute.xlu0 %1730  ;;  %4222 = vperm.xlu0 %5369, %v6246_v59   ;;  %5598 = vrcp.f32 %v4634_v57 }
 0x27d   : > { %v1840_v18 = vmul.f32 %v1819_v49, %v1146_v22  ;;  %v1755_v35 = vmul.f32 %v1731_v6, %v6569_v47  ;;  %5330 = vset.pattern.permute.xlu1 %v8134_v31 }
 0x27e   : > { %1738 = vperm.xlu1 %5330, %v6335_v25  }
 0x27f   : > { %1852 = vst.msk [vmem:[#allocation3 + $0xe8] sm:$0xff] %vm941_vm1, %v1840_v18  ;;  %1767 = vst.msk [vmem:[#allocation3 + $0xd0] sm:$0xff] %vm941_vm1, %v1755_v35 }
 0x280   : > { %5371 = vset.pattern.permute.xlu0 %v8130_v50 }
 0x281   : > { %v1903_v23 = vpop.permute.xlu1 %1902  ;;  %v6578_v58 = vpop.permute.xlu0 %3778  ;;  %3954 = vperm.xlu0 %5371, %v6335_v25  }
 0x282   : > { %8137 = vst [vmem:[#allocation19_spill] sm:$0xff] %v6578_v58  ;;  %v1924_v11 = vmul.f32 %v1903_v23, %v1146_v22  ;;  %5331 = vset.pattern.permute.xlu1 %v8068_v0  ;;  %v5595_v23 = vpop.eup %5594  ;;  %v1979_v58 = vld [vmem:[#allocation3] ss:$16 sm:$0x30] }
 0x283   : > { %1822 = vperm.xlu1 %5331, %v6335_v25  }
 0x284   : > { %1936 = vst.msk [vmem:[#allocation3 + $0xf8] sm:$0xff] %vm941_vm1, %v1924_v11  ;;  %v5597_v33 = vpop.eup %5596 }
 0x285   : > { %3958 = vperm.xlu0 %5371, %v6246_v59   ;;  %v4656_v57 = vmul.f32 %v5597_v33, %v5816_v56 }
 0x286   : > { %v6589_v2 = vpop.permute.xlu1 %3606  ;;  %v1407_v22 = vpop.permute.xlu0 %1406 }
 0x287   : > { %8138 = vst [vmem:[#allocation20_spill] sm:$0xff] %v6589_v2  ;;  %v1422_v43 = vmul.f32 %v1407_v22, %v6586_v54  ;;  %5332 = vset.pattern.permute.xlu1 %v8132_v36  ;;  %v4654_v22 = vmul.f32 %v5595_v23, %v5788_v45  ;;  %v6750_v2 = vld [vmem:[#allocation2 + $0x3] ss:$16 sm:$0xc] }
 0x288   : > { %1906 = vperm.xlu1 %5332, %v6335_v25  }
 0x289   : > { %1436 = vst.msk [vmem:[#allocation3 + $0x118] sm:$0xff] %vm941_vm1, %v1422_v43  ;;  %4306 = vperm.xlu0 %5371, %v6402_v26  }
 0x28b   : > { %v6596_v7 = vpop.permute.xlu1 %3694  ;;  %v1575_v49 = vpop.permute.xlu0 %1574 }
 0x28c   : > { %8139 = vst [vmem:[#allocation21_spill] sm:$0xff] %v6596_v7  ;;  %v1590_v6 = vmul.f32 %v1575_v49, %v6586_v54  ;;  %5333 = vset.pattern.permute.xlu1 %v8129_v60  ;;  %v2053_v7 = vld [vmem:[#allocation3 + $0x1] ss:$16 sm:$0xc] }
 0x28d   : > { %3910 = vperm.xlu1 %5333, %v6335_v25   ;;  %5375 = vset.pattern.permute.xlu0 %v8131_v5 }
 0x28e   : > { %1604 = vst.msk [vmem:[#allocation3 + $0x138] sm:$0xff] %vm941_vm1, %v1590_v6  ;;  %4394 = vperm.xlu0 %5375, %v6402_v26  }
 0x290   : > { %v6604_v18 = vpop.permute.xlu1 %3738  ;;  %v1659_v35 = vpop.permute.xlu0 %1658 }
 0x291   : > { %8140 = vst [vmem:[#allocation22_spill] sm:$0xff] %v6604_v18  ;;  %v1674_v20 = vmul.f32 %v1659_v35, %v6586_v54  ;;  %5334 = vset.pattern.permute.xlu1 %v5630_v29  ;;  %v6622_v29 = vmul.f32 %v6333_v38, %v6069_v13  ;;  %v6741_v18 = vld [vmem:[#allocation2 + $0x85] ss:$16 sm:$0xc] }
 0x292   : > { %1330 = vperm.xlu1 %5334, %v6379_v27   ;;  %5376 = vset.pattern.permute.xlu0 %v8074_v51 }
 0x293   : > { %1688 = vst.msk [vmem:[#allocation3 + $0x148] sm:$0xff] %vm941_vm1, %v1674_v20  ;;  %4530 = vperm.xlu0 %5376, %v6379_v27  }
 0x295   : > { %v1306_v63 = vpop.permute.xlu1 %1305  ;;  %v1827_v11 = vpop.permute.xlu0 %1826 }
 0x296   : > { %v1335_v9 = vmul.f32 %v1306_v63, %v6569_v47  ;;  %v1842_v37 = vmul.f32 %v1827_v11, %v6586_v54  ;;  %5336 = vset.pattern.permute.xlu1 %v5632_v17  ;;  %v5599_v17 = vpop.eup %5598 }
 0x297   : > { %1498 = vperm.xlu1 %5336, %v6379_v27   ;;  %4672 = vrot.lane.b32.xlu0 %v4654_v22, %s5645_s29  ;;  %v4658_v38 = vmul.f32 %v5599_v17, %v5859_v12 }
 0x298   : > { %1347 = vst.msk [vmem:[#allocation3 + $0x80] sm:$0xff] %vm941_vm1, %v1335_v9  ;;  %1856 = vst.msk [vmem:[#allocation3 + $0x168] sm:$0xff] %vm941_vm1, %v1842_v37  ;;  %5382 = vset.pattern.permute.xlu0 %v8129_v60 }
 0x29a   : > { %v1395_v43 = vpop.permute.xlu1 %1394  ;;  %v1316_v45 = vpop.permute.xlu0 %1315 }
 0x29b   : > { %v1419_v49 = vmul.f32 %v1395_v43, %v6569_v47  ;;  %v1337_v6 = vmul.f32 %v1316_v45, %v6622_v29  ;;  %5337 = vset.pattern.permute.xlu1 %v8128_v46  ;;  %4676 = vrot.lane.b32.xlu0 %v4656_v57, %s5645_s29  ;;  %v6643_v46 = vmul.f32 %v6371_v4, %v6087_v62 }
 0x29c   : > { %1582 = vperm.xlu1 %5337, %v6379_v27   ;;  %v6655_v4 = vmul.f32 %v6409_v21, %v6081_v16 }
 0x29d   : > { %1431 = vst.msk [vmem:[#allocation3 + $0x90] sm:$0xff] %vm941_vm1, %v1419_v49  ;;  %1351 = vst.msk [vmem:[#allocation3 + $0x100] sm:$0xff] %vm941_vm1, %v1337_v6 }
 0x29e   : > { %8141 = vst [vmem:[#allocation23_spill] sm:$0xff] %v6655_v4 }
 0x29f   : > { %v1479_v35 = vpop.permute.xlu1 %1478  ;;  %v1487_v20 = vpop.permute.xlu0 %1486  ;;  %4680 = vrot.lane.b32.xlu0 %v4658_v38, %s5645_s29 }
 0x2a0   : > { %v1503_v56 = vmul.f32 %v1479_v35, %v6569_v47  ;;  %v1505_v23 = vmul.f32 %v1487_v20, %v6622_v29  ;;  %5338 = vset.pattern.permute.xlu1 %v8073_v10  ;;  %v1946_v35 = vld [vmem:[#allocation2] ss:$16 sm:$0xc]  ;;  %v2020_v10 = vld [vmem:[#allocation2 + $0x1] ss:$16 sm:$0x3] }
 0x2a1   : > { %1666 = vperm.xlu1 %5338, %v6379_v27  }
 0x2a2   : > { %1515 = vst.msk [vmem:[#allocation3 + $0xa0] sm:$0xff] %vm941_vm1, %v1503_v56  ;;  %1519 = vst.msk [vmem:[#allocation3 + $0x120] sm:$0xff] %vm941_vm1, %v1505_v23  ;;  %v1953_v23 = vld [vmem:[#allocation2 + $0x80] ss:$16 sm:$0x3] }
 0x2a3   : > { %3206 = vperm.xlu0 %5382, %v6116_v30  }
 0x2a4   : > { %v1563_v12 = vpop.permute.xlu1 %1562  ;;  %v1415_v63 = vpop.permute.xlu0 %1414  ;;  %v1984_v42 = vld [vmem:[#allocation3 + $0x80] ss:$16 sm:$0x3] }
 0x2a5   : > { %v1587_v11 = vmul.f32 %v1563_v12, %v6569_v47  ;;  %v1424_v9 = vmul.f32 %v1415_v63, %v6643_v46  ;;  %5339 = vset.pattern.permute.xlu1 %v8068_v0  ;;  %v1954_v12 = vld [vmem:[#allocation2 + $0x80] ss:$16 sm:$0xc] }
 0x2a6   : > { %1834 = vperm.xlu1 %5339, %v6379_v27  }
 0x2a7   : > { %1599 = vst.msk [vmem:[#allocation3 + $0xb0] sm:$0xff] %vm941_vm1, %v1587_v11  ;;  %1440 = vst.msk [vmem:[#allocation3 + $0x198] sm:$0xff] %vm941_vm1, %v1424_v9  ;;  %5385 = vset.pattern.permute.xlu0 %v8130_v50 }
 0x2a8   : > { %3254 = vperm.xlu0 %5385, %v6097_v52  }
 0x2a9   : > { %v1647_v37 = vpop.permute.xlu1 %1646  ;;  %v1326_v22 = vpop.permute.xlu0 %1325 }
 0x2aa   : > { %v1671_v33 = vmul.f32 %v1647_v37, %v6569_v47  ;;  %v1339_v43 = vmul.f32 %v1326_v22, %v6655_v4  ;;  %5340 = vset.pattern.permute.xlu1 %v8132_v36  ;;  %v1956_v22 = vld [vmem:[#allocation2 + $0x80] ss:$16 sm:$0x30] }
 0x2ab   : > { %1918 = vperm.xlu1 %5340, %v6379_v27  }
 0x2ac   : > { %1683 = vst.msk [vmem:[#allocation3 + $0xc0] sm:$0xff] %vm941_vm1, %v1671_v33  ;;  %1355 = vst.msk [vmem:[#allocation3 + $0x180] sm:$0xff] %vm941_vm1, %v1339_v43  ;;  %5387 = vset.pattern.permute.xlu0 %v8131_v5  ;;  %v1948_v33 = vld [vmem:[#allocation2] ss:$16 sm:$0x30] }
 0x2ad   : > { %3338 = vperm.xlu0 %5387, %v6116_v30   ;;  %v6695_v43 = vmul.f32 -1.442695, %v5768_v32  ;;  %v6735_v32 = vld [vmem:[#allocation2 + $0x82] ss:$16 sm:$0xc0] }
 0x2ae   : > { %v1815_v21 = vpop.permute.xlu1 %1814  ;;  %v1495_v45 = vpop.permute.xlu0 %1494  ;;  %v2138_v55 = vld [vmem:[#allocation3 + $0x82] ss:$16 sm:$0xc] }
 0x2af   : > { %v1839_v57 = vmul.f32 %v1815_v21, %v6569_v47  ;;  %v1507_v17 = vmul.f32 %v1495_v45, %v6655_v4  ;;  %5342 = vset.pattern.permute.xlu1 %v8135_v24  ;;  %v1945_v24 = vld [vmem:[#allocation2] ss:$16 sm:$0x3] }
 0x2b0   : > { %1410 = vperm.xlu1 %5342, %v6402_v26   ;;  %v1947_v11 = vor.u32 %v1946_v35, %v1945_v24  ;;  %v1950_v24 = vld [vmem:[#allocation2] ss:$16 sm:$0xc0] }
 0x2b1   : > { %1851 = vst.msk [vmem:[#allocation3 + $0xe0] sm:$0xff] %vm941_vm1, %v1839_v57  ;;  %1523 = vst.msk [vmem:[#allocation3 + $0x1a0] sm:$0xff] %vm941_vm1, %v1507_v17  ;;  %5390 = vset.pattern.permute.xlu0 %v8071_v48  ;;  %v6699_v57 = vmul.f32 -1.442695, %v5774_v34  ;;  %v6702_v17 = vmul.f32 -1.442695, %v5780_v40 }
 0x2b2   : > { %3386 = vperm.xlu0 %5390, %v6097_v52   ;;  %v1949_v45 = vor.u32 %v1948_v33, %v1947_v11  ;;  %v2106_v11 = vld [vmem:[#allocation2 + $0x82] ss:$16 sm:$0xc]  ;;  %v6713_v48 = vmul.f32 -1.442695, %v5839_v3 }
 0x2b3   : > { %v6674_v49 = vpop.permute.xlu1 %3558  ;;  %v1579_v6 = vpop.permute.xlu0 %1578  ;;  %v6782_v34 = vld [vmem:[#allocation2 + $0x86] ss:$16 sm:$0x3]  ;;  %5600 = vpow2.f32 %v6699_v57  ;;  %v3061_v57 = vld [vmem:[#allocation3 + $0x8e] ss:$16 sm:$0x3] }
 0x2b4   : > { %8142 = vst [vmem:[#allocation24_spill] sm:$0xff] %v6674_v49  ;;  %v1591_v38 = vmul.f32 %v1579_v6, %v6655_v4  ;;  %5346 = vset.pattern.permute.xlu1 %v8134_v31  ;;  %v1955_v31 = vor.u32 %v1954_v12, %v1953_v23  ;;  %v6705_v6 = vmul.f32 -1.442695, %v5809_v53  ;;  %v2105_v23 = vld [vmem:[#allocation2 + $0x82] ss:$16 sm:$0x3]  ;;  %v1951_v33 = vor.u32 %v1950_v24, %v1949_v45 }
 0x2b5   : > { %1746 = vperm.xlu1 %5346, %v6402_v26   ;;  %v2108_v45 = vld [vmem:[#allocation2 + $0x82] ss:$16 sm:$0x30]  ;;  %v6748_v49 = vld [vmem:[#allocation2 + $0x3] ss:$16 sm:$0x3]  ;;  %5602 = vpow2.f32 %v6702_v17 }
 0x2b6   : > { %1607 = vst.msk [vmem:[#allocation3 + $0x1b0] sm:$0xff] %vm941_vm1, %v1591_v38  ;;  %5392 = vset.pattern.permute.xlu0 %v8074_v51  ;;  %v1957_v21 = vor.u32 %v1956_v22, %v1955_v31  ;;  %v2028_v38 = vld [vmem:[#allocation2 + $0x81] ss:$16 sm:$0x3]  ;;  %v6721_v16 = vmul.f32 0.0, %v1951_v33  ;;  %5604 = vpow2.f32 %v6705_v6 }
 0x2b7   : > { %3470 = vperm.xlu0 %5392, %v6116_v30   ;;  %v2029_v31 = vld [vmem:[#allocation2 + $0x81] ss:$16 sm:$0xc]  ;;  %v1985_v51 = vld [vmem:[#allocation3 + $0x80] ss:$16 sm:$0xc]  ;;  %5606 = vpow2.f32 %v6713_v48 }
 0x2b8   : > { %v6682_v20 = vpop.permute.xlu1 %3602  ;;  %v1663_v56 = vpop.permute.xlu0 %1662  ;;  %v2030_v19 = vor.u32 %v2029_v31, %v2028_v38  ;;  %v2185_v38 = vld [vmem:[#allocation2 + $0x83] ss:$16 sm:$0x30]  ;;  %v6726_v31 = vld [vmem:[#allocation2 + $0x2] ss:$16 sm:$0x3]  ;;  %5608 = vpow2.f32 %v6695_v43 }
 0x2b9   : > { %8143 = vst [vmem:[#allocation25_spill] sm:$0xff] %v6682_v20  ;;  %v1675_v63 = vmul.f32 %v1663_v56, %v6655_v4  ;;  %5347 = vset.pattern.permute.xlu1 %v8068_v0  ;;  %v1958_v56 = vld [vmem:[#allocation2 + $0x80] ss:$16 sm:$0xc0] }
 0x2ba   : > { %1830 = vperm.xlu1 %5347, %v6402_v26   ;;  %v2183_v0 = vld [vmem:[#allocation2 + $0x83] ss:$16 sm:$0xc]  ;;  %v3143_v48 = vld [vmem:[#allocation3 + $0x8f] ss:$16 sm:$0xc0] }
 0x2bb   : > { %1691 = vst.msk [vmem:[#allocation3 + $0x1c0] sm:$0xff] %vm941_vm1, %v1675_v63  ;;  %5395 = vset.pattern.permute.xlu0 %v8069_v61  ;;  %v1959_v63 = vor.u32 %v1958_v56, %v1957_v21  ;;  %v8147_v61 = vmov 13   ;;  %v2107_v21 = vor.u32 %v2106_v11, %v2105_v23  ;;  %v2021_v56 = vld [vmem:[#allocation2 + $0x1] ss:$16 sm:$0xc]  ;;  %v2184_v24 = vor.u32 %v2183_v0, %v2182_v8 }
 0x2bc   : > { %3518 = vperm.xlu0 %5395, %v6097_v52   ;;  %v1986_v23 = vor.u32 %v1985_v51, %v1984_v42  ;;  %v1976_v0 = vld [vmem:[#allocation3] ss:$16 sm:$0x3]  ;;  %v2061_v11 = vld [vmem:[#allocation3 + $0x81] ss:$16 sm:$0xc] }
 0x2bd   : > { %v6690_v9 = vpop.permute.xlu1 %3646  ;;  %v6692_v37 = vpop.permute.xlu0 %4266  ;;  %v2008_v62 = vmul.f32 0.0, %v1959_v63  ;;  %v6728_v63 = vld [vmem:[#allocation2 + $0x2] ss:$16 sm:$0xc]  ;;  %v6732_v1 = vor.u32 %v2108_v45, %v2107_v21 }
 0x2be   : > { %8144 = vst [vmem:[#allocation26_spill] sm:$0xff] %v6690_v9  ;;  %8145 = vst [vmem:[#allocation27_spill] sm:$0xff] %v6692_v37  ;;  %5348 = vset.pattern.permute.xlu1 %v8131_v5  ;;  %v1987_v37 = vld [vmem:[#allocation3 + $0x80] ss:$16 sm:$0x30] }
 0x2bf   : > { %4042 = vperm.xlu1 %5348, %v6335_v25   ;;  %v1977_v8 = vld [vmem:[#allocation3] ss:$16 sm:$0xc]  ;;  %v2060_v42 = vld [vmem:[#allocation3 + $0x81] ss:$16 sm:$0x3]  ;;  %v1988_v51 = vor.u32 %v1987_v37, %v1986_v23 }
 0x2c0   : > { %v2023_v9 = vld [vmem:[#allocation2 + $0x1] ss:$16 sm:$0x30]  ;;  %v1978_v23 = vor.u32 %v1977_v8, %v1976_v0  ;;  %v2099_v0 = vor.u32 %v6728_v63, %v6726_v31 }
 0x2c1   : > { %v2063_v21 = vld [vmem:[#allocation3 + $0x81] ss:$16 sm:$0x30] }
 0x2c2   : > { %v6708_v35 = vpop.permute.xlu1 %3690  ;;  %v1899_v12 = vpop.permute.xlu0 %1898  ;;  %v2052_v45 = vld [vmem:[#allocation3 + $0x1] ss:$16 sm:$0x3]  ;;  %v1980_v8 = vor.u32 %v1979_v58, %v1978_v23  ;;  %v2129_v23 = vld [vmem:[#allocation3 + $0x2] ss:$16 sm:$0x3] }
 0x2c3   : > { %8146 = vst [vmem:[#allocation28_spill] sm:$0xff] %v6708_v35  ;;  %v1923_v22 = vmul.f32 %v1899_v12, %v6569_v47  ;;  %5349 = vset.pattern.permute.xlu1 %v8147_v61  ;;  %v2031_v47 = vld [vmem:[#allocation2 + $0x81] ss:$16 sm:$0x30]  ;;  %v6737_v35 = vor.u32 %v2185_v38, %v2184_v24  ;;  %v2062_v24 = vor.u32 %v2061_v11, %v2060_v42 }
 0x2c4   : > { %3782 = vperm.xlu1 %5349, %v6143_v15   ;;  %v6717_v12 = vld [vmem:[#allocation2 + $0x84] ss:$16 sm:$0x3]  ;;  %v2032_v33 = vor.u32 %v2031_v47, %v2030_v19  ;;  %v2055_v11 = vld [vmem:[#allocation3 + $0x1] ss:$16 sm:$0x30] }
 0x2c5   : > { %1935 = vst.msk [vmem:[#allocation3 + $0xf0] sm:$0xff] %vm941_vm1, %v1923_v22  ;;  %v2262_v38 = vld [vmem:[#allocation2 + $0x84] ss:$16 sm:$0x30] }
 0x2c6   : > { %v1891_v14 = vpop.permute.xlu0 %1890  ;;  %v2137_v42 = vld [vmem:[#allocation3 + $0x82] ss:$16 sm:$0x3] }
 0x2c7   : > { %v1921_v22 = vmul.f32 %v1891_v14, %v6513_v28  ;;  %v6724_v13 = vpop.permute.xlu1 %3734  ;;  %v2022_v14 = vor.u32 %v2021_v56, %v2020_v10  ;;  %v6744_v10 = vld [vmem:[#allocation2 + $0x83] ss:$16 sm:$0xc0]  ;;  %v2261_v56 = vor.u32 %v6719_v41, %v6717_v12 }
 0x2c8   : > { %8148 = vst [vmem:[#allocation29_spill] sm:$0xff] %v6724_v13  ;;  %5350 = vset.pattern.permute.xlu1 %v8131_v5  ;;  %v2033_v13 = vld [vmem:[#allocation2 + $0x81] ss:$16 sm:$0xc0] }
 0x2c9   : > { %1931 = vst.msk [vmem:[#allocation3 + $0x70] sm:$0xff] %vm941_vm1, %v1921_v22  ;;  %4046 = vperm.xlu1 %5350, %v6246_v59   ;;  %v6739_v22 = vld [vmem:[#allocation2 + $0x85] ss:$16 sm:$0x3]  ;;  %v2034_v30 = vor.u32 %v2033_v13, %v2032_v33  ;;  %v6765_v31 = vor.u32 %v2262_v38, %v2261_v56 }
 0x2ca   : > { %v1915_v28 = vpop.permute.xlu0 %1914  ;;  %v2025_v13 = vld [vmem:[#allocation2 + $0x1] ss:$16 sm:$0xc0]  ;;  %v2100_v33 = vld [vmem:[#allocation2 + $0x2] ss:$16 sm:$0x30]  ;;  %v2338_v58 = vor.u32 %v6741_v18, %v6739_v22 }
 0x2cb   : > { %v1927_v19 = vmul.f32 %v1915_v28, %v6655_v4  ;;  %v6756_v4 = vor.u32 %v2023_v9, %v2022_v14  ;;  %v2054_v14 = vor.u32 %v2053_v7, %v2052_v45  ;;  %v6773_v7 = vld [vmem:[#allocation2 + $0x4] ss:$16 sm:$0xc]  ;;  %v6776_v22 = vor.u32 %v2100_v33, %v2099_v0 }
 0x2cc   : > { %v1989_v47 = vld [vmem:[#allocation3 + $0x80] ss:$16 sm:$0xc0]  ;;  %v1321_v37 = vpop.permute.xlu1 %1320  ;;  %v2065_v12 = vld [vmem:[#allocation3 + $0x81] ss:$16 sm:$0xc0] }
 0x2cd   : > { %v1990_v20 = vor.u32 %v1989_v47, %v1988_v51  ;;  %1943 = vst.msk [vmem:[#allocation3 + $0x1f0] sm:$0xff] %vm941_vm1, %v1927_v19  ;;  %v1338_v28 = vmul.f32 %v1321_v37, %v6586_v54  ;;  %5354 = vset.pattern.permute.xlu1 %v8130_v50  ;;  %v2064_v51 = vor.u32 %v2063_v21, %v2062_v24  ;;  %v2140_v37 = vld [vmem:[#allocation3 + $0x82] ss:$16 sm:$0x30] }
 0x2ce   : > { %4310 = vperm.xlu1 %5354, %v6379_v27   ;;  %v2130_v24 = vld [vmem:[#allocation3 + $0x2] ss:$16 sm:$0xc]  ;;  %v2339_v19 = vld [vmem:[#allocation2 + $0x85] ss:$16 sm:$0x30]  ;;  %v2026_v18 = vor.u32 %v2025_v13, %v6756_v4 }
 0x2cf   : > { %v2012_v47 = vadd.f32 %v2008_v62, %v1990_v20  ;;  %1352 = vst.msk [vmem:[#allocation3 + $0x108] sm:$0xff] %vm941_vm1, %v1338_v28  ;;  %v1751_v9 = vpop.permute.xlu0 %1750  ;;  %v2139_v62 = vor.u32 %v2138_v55, %v2137_v42  ;;  %v2215_v20 = vld [vmem:[#allocation3 + $0x83] ss:$16 sm:$0xc]  ;;  %v2066_v28 = vor.u32 %v2065_v12, %v2064_v51  ;;  %v2176_v55 = vor.u32 %v6750_v2, %v6748_v49 }
 0x2d0   : > { %v1981_v63 = vld [vmem:[#allocation3] ss:$16 sm:$0xc0]  ;;  %v1760_v21 = vmul.f32 %v1751_v9, %v6643_v46  ;;  %v6771_v50 = vld [vmem:[#allocation2 + $0x4] ss:$16 sm:$0x3]  ;;  %v2131_v49 = vor.u32 %v2130_v24, %v2129_v23  ;;  %v6788_v3 = vor.u32 %v2339_v19, %v2338_v58  ;;  %v8150_v23 = vor.u32 %v6735_v32, %v6732_v1 }
 0x2d1   : > { %2016 = vst.msk [vmem:[#allocation4 + $0x8] sm:$0xff] %vm941_vm1, %v2012_v47  ;;  %v2084_v41 = vmul.f32 %v2034_v30, %v2012_v47  ;;  %v1982_v56 = vor.u32 %v1981_v63, %v1980_v8  ;;  %v1491_v45 = vpop.permute.xlu1 %1490  ;;  %v2142_v38 = vld [vmem:[#allocation3 + $0x82] ss:$16 sm:$0xc0]  ;;  %v2056_v30 = vor.u32 %v2055_v11, %v2054_v14  ;;  %v2141_v9 = vor.u32 %v2140_v37, %v2139_v62 }
 0x2d2   : > { %v2057_v42 = vld [vmem:[#allocation3 + $0x1] ss:$16 sm:$0xc0]  ;;  %1776 = vst.msk [vmem:[#allocation3 + $0x1d8] sm:$0xff] %vm941_vm1, %v1760_v21  ;;  %v1506_v12 = vmul.f32 %v1491_v45, %v6586_v54  ;;  %v8149_v13 = vmov 14  }
 0x2d3   : > { %v2132_v51 = vld [vmem:[#allocation3 + $0x2] ss:$16 sm:$0x30]  ;;  %v2214_v47 = vld [vmem:[#allocation3 + $0x83] ss:$16 sm:$0x3]  ;;  %v2088_v63 = vadd.f32 %v2084_v41, %v2066_v28  ;;  %v2011_v0 = vadd.f32 %v6721_v16, %v1982_v56  ;;  %5355 = vset.pattern.permute.xlu1 %v8149_v13  ;;  %v1727_v2 = vpop.permute.xlu0 %1726  ;;  %v2143_v16 = vor.u32 %v2142_v38, %v2141_v9  ;;  %v2253_v38 = vor.u32 %v6773_v7, %v6771_v50 }
 0x2d4   : > { %v6784_v8 = vld [vmem:[#allocation2 + $0x86] ss:$16 sm:$0xc]  ;;  %v2102_v4 = vld [vmem:[#allocation2 + $0x2] ss:$16 sm:$0xc0]  ;;  %v2216_v33 = vor.u32 %v2215_v20, %v2214_v47  ;;  %3822 = vperm.xlu1 %5355, %v6213_v44   ;;  %v1754_v14 = vmul.f32 %v1727_v2, %v6492_v39  ;;  %v2058_v20 = vor.u32 %v2057_v42, %v2056_v30  ;;  %v2133_v56 = vor.u32 %v2132_v51, %v2131_v49 }
 0x2d5   : > { %v2217_v21 = vld [vmem:[#allocation3 + $0x83] ss:$16 sm:$0x30]  ;;  %1520 = vst.msk [vmem:[#allocation3 + $0x128] sm:$0xff] %vm941_vm1, %v1506_v12  ;;  %2093 = vst.msk [vmem:[#allocation4 + $0x28] sm:$0xff] %vm941_vm1, %v2088_v63  ;;  %v2161_v24 = vmul.f32 %v8150_v23, %v2088_v63  ;;  %v2083_v28 = vmul.f32 %v2026_v18, %v2011_v0  ;;  %v2103_v12 = vor.u32 %v2102_v4, %v6776_v22 }
 0x2d6   : > { %v2177_v11 = vld [vmem:[#allocation2 + $0x3] ss:$16 sm:$0x30]  ;;  %v2292_v41 = vld [vmem:[#allocation3 + $0x84] ss:$16 sm:$0xc]  ;;  %v1743_v32 = vpop.permute.xlu1 %1742  ;;  %v2218_v2 = vor.u32 %v2217_v21, %v2216_v33  ;;  %v2415_v7 = vor.u32 %v6784_v8, %v6782_v34 }
 0x2d7   : > { %v2207_v37 = vld [vmem:[#allocation3 + $0x3] ss:$16 sm:$0xc]  ;;  %v6793_v62 = vld [vmem:[#allocation2 + $0x84] ss:$16 sm:$0xc0]  ;;  %v6805_v47 = vor.u32 %v2177_v11, %v2176_v55  ;;  %v2165_v42 = vadd.f32 %v2161_v24, %v2143_v16  ;;  %v2087_v51 = vadd.f32 %v2083_v28, %v2058_v20  ;;  %v1758_v22 = vmul.f32 %v1743_v32, %v6586_v54 }
 0x2d8   : > { %v6799_v19 = vld [vmem:[#allocation2 + $0x5] ss:$16 sm:$0x3]  ;;  %2015 = vst.msk [vmem:[#allocation4] sm:$0xff] %vm941_vm1, %v2011_v0  ;;  %1764 = vst.msk [vmem:[#allocation3 + $0x58] sm:$0xff] %vm941_vm1, %v1754_v14  ;;  %v2265_v50 = vor.u32 %v6793_v62, %v6765_v31  ;;  %v8151_v11 = vmov 4  }
 0x2d9   : > { %v6801_v58 = vld [vmem:[#allocation2 + $0x5] ss:$16 sm:$0xc]  ;;  %v2219_v45 = vld [vmem:[#allocation3 + $0x83] ss:$16 sm:$0xc0]  ;;  %5356 = vset.pattern.permute.xlu1 %v8151_v11  ;;  %v2160_v28 = vmul.f32 %v2103_v12, %v2087_v51 }
 0x2da   : > { %v2134_v9 = vld [vmem:[#allocation3 + $0x2] ss:$16 sm:$0xc0]  ;;  %v2206_v1 = vld [vmem:[#allocation3 + $0x3] ss:$16 sm:$0x3]  ;;  %1642 = vperm.xlu1 %5356, %v6097_v52  }
 0x2db   : > { %v2291_v63 = vld [vmem:[#allocation3 + $0x84] ss:$16 sm:$0x3]  ;;  %v6810_v23 = vld [vmem:[#allocation2 + $0x85] ss:$16 sm:$0xc0]  ;;  %v2208_v55 = vor.u32 %v2207_v37, %v2206_v1  ;;  %v2220_v37 = vor.u32 %v2219_v45, %v2218_v2  ;;  %v2135_v8 = vor.u32 %v2134_v9, %v2133_v56 }
 0x2dc   : > { %v2179_v18 = vld [vmem:[#allocation2 + $0x3] ss:$16 sm:$0xc0]  ;;  %v2254_v30 = vld [vmem:[#allocation2 + $0x4] ss:$16 sm:$0x30]  ;;  %v2293_v0 = vor.u32 %v2292_v41, %v2291_v63  ;;  %v8152_v41 = vor.u32 %v6744_v10, %v6737_v35  ;;  %v2330_v10 = vor.u32 %v6801_v58, %v6799_v19 }
 0x2dd   : > { %v2209_v4 = vld [vmem:[#allocation3 + $0x3] ss:$16 sm:$0x30]  ;;  %v2294_v49 = vld [vmem:[#allocation3 + $0x84] ss:$16 sm:$0x30]  ;;  %v2180_v1 = vor.u32 %v2179_v18, %v6805_v47  ;;  %v6836_v35 = vor.u32 %v2254_v30, %v2253_v38  ;;  %v2164_v32 = vadd.f32 %v2160_v28, %v2135_v8  ;;  %v1911_v47 = vpop.permute.xlu1 %1910 }
 0x2de   : > { %v2283_v33 = vld [vmem:[#allocation3 + $0x4] ss:$16 sm:$0x3]  ;;  %v2369_v14 = vld [vmem:[#allocation3 + $0x85] ss:$16 sm:$0xc]  ;;  %v2238_v31 = vmul.f32 %v8152_v41, %v2165_v42  ;;  %v2210_v56 = vor.u32 %v2209_v4, %v2208_v55  ;;  %v2295_v9 = vor.u32 %v2294_v49, %v2293_v0  ;;  %v1926_v58 = vmul.f32 %v1911_v47, %v6586_v54  ;;  %5358 = vset.pattern.permute.xlu1 %v8149_v13 }
 0x2df   : > { %v2284_v21 = vld [vmem:[#allocation3 + $0x4] ss:$16 sm:$0xc]  ;;  %v2416_v16 = vld [vmem:[#allocation2 + $0x86] ss:$16 sm:$0x30]  ;;  %3826 = vperm.xlu1 %5358, %v6143_v15  }
 0x2e0   : > { %v6818_v24 = vld [vmem:[#allocation2 + $0x87] ss:$16 sm:$0x3]  ;;  %2170 = vst.msk [vmem:[#allocation4 + $0x48] sm:$0xff] %vm941_vm1, %v2165_v42  ;;  %2092 = vst.msk [vmem:[#allocation4 + $0x20] sm:$0xff] %vm941_vm1, %v2087_v51  ;;  %v2285_v38 = vor.u32 %v2284_v21, %v2283_v33  ;;  %v6846_v19 = vor.u32 %v2416_v16, %v2415_v7  ;;  %v2237_v33 = vmul.f32 %v2180_v1, %v2164_v32 }
 0x2e1   : > { %v6820_v20 = vld [vmem:[#allocation2 + $0x87] ss:$16 sm:$0xc]  ;;  %v6826_v62 = vld [vmem:[#allocation2 + $0x6] ss:$16 sm:$0x3] }
 0x2e2   : > { %v6828_v34 = vld [vmem:[#allocation2 + $0x6] ss:$16 sm:$0xc]  ;;  %1772 = vst.msk [vmem:[#allocation3 + $0x158] sm:$0xff] %vm941_vm1, %v1758_v22  ;;  %v2242_v22 = vadd.f32 %v2238_v31, %v2220_v37  ;;  %2169 = vst.msk [vmem:[#allocation4 + $0x40] sm:$0xff] %vm941_vm1, %v2164_v32  ;;  %v2492_v7 = vor.u32 %v6820_v20, %v6818_v24 }
 0x2e3   : > { %v2296_v45 = vld [vmem:[#allocation3 + $0x84] ss:$16 sm:$0xc0]  ;;  %v2211_v63 = vld [vmem:[#allocation3 + $0x3] ss:$16 sm:$0xc0]  ;;  %v2407_v16 = vor.u32 %v6828_v34, %v6826_v62 }
 0x2e4   : > { %v6840_v2 = vld [vmem:[#allocation3 + $0x5] ss:$16 sm:$0xc]  ;;  %v6842_v42 = vld [vmem:[#allocation2 + $0x88] ss:$16 sm:$0x3]  ;;  %v2297_v37 = vor.u32 %v2296_v45, %v2295_v9  ;;  %v2315_v31 = vmul.f32 %v2265_v50, %v2242_v22  ;;  %v2212_v8 = vor.u32 %v2211_v63, %v2210_v56 }
 0x2e5   : > { %v2368_v12 = vld [vmem:[#allocation3 + $0x85] ss:$16 sm:$0x3]  ;;  %v6844_v51 = vld [vmem:[#allocation2 + $0x88] ss:$16 sm:$0xc] }
 0x2e6   : > { %v2256_v11 = vld [vmem:[#allocation2 + $0x4] ss:$16 sm:$0xc0]  ;;  %v2331_v41 = vld [vmem:[#allocation2 + $0x5] ss:$16 sm:$0x30]  ;;  %v2370_v30 = vor.u32 %v2369_v14, %v2368_v12  ;;  %v2319_v20 = vadd.f32 %v2315_v31, %v2297_v37  ;;  %v2241_v56 = vadd.f32 %v2237_v33, %v2212_v8 }
 0x2e7   : > { %v2286_v18 = vld [vmem:[#allocation3 + $0x4] ss:$16 sm:$0x30]  ;;  %v2371_v39 = vld [vmem:[#allocation3 + $0x85] ss:$16 sm:$0x30]  ;;  %v2257_v54 = vor.u32 %v2256_v11, %v6836_v35  ;;  %v6857_v14 = vor.u32 %v2331_v41, %v2330_v10 }
 0x2e8   : > { %v2360_v55 = vld [vmem:[#allocation3 + $0x5] ss:$16 sm:$0x3]  ;;  %v2446_v0 = vld [vmem:[#allocation3 + $0x86] ss:$16 sm:$0xc]  ;;  %v2287_v50 = vor.u32 %v2286_v18, %v2285_v38  ;;  %v2372_v45 = vor.u32 %v2371_v39, %v2370_v30  ;;  %v2569_v39 = vor.u32 %v6844_v51, %v6842_v42 }
 0x2e9   : > { %v2363_v4 = vld [vmem:[#allocation3 + $0x5] ss:$16 sm:$0x30]  ;;  %v6849_v49 = vld [vmem:[#allocation2 + $0x86] ss:$16 sm:$0xc0]  ;;  %v2362_v62 = vor.u32 %v6840_v2, %v2360_v55  ;;  %v8154_v2 = vor.u32 %v6810_v23, %v6788_v3 }
 0x2ea   : > { %2247 = vst.msk [vmem:[#allocation4 + $0x68] sm:$0xff] %vm941_vm1, %v2242_v22  ;;  %v2373_v21 = vld [vmem:[#allocation3 + $0x85] ss:$16 sm:$0xc0]  ;;  %1940 = vst.msk [vmem:[#allocation3 + $0x178] sm:$0xff] %vm941_vm1, %v1926_v58  ;;  %v2419_v15 = vor.u32 %v6849_v49, %v6846_v19  ;;  %v6874_v22 = vpop.permute.xlu1 %3914  ;;  %v2314_v19 = vmul.f32 %v2257_v54, %v2241_v56  ;;  %v8155_v31 = vmov 12  }
 0x2eb   : > { %v2288_v28 = vld [vmem:[#allocation3 + $0x4] ss:$16 sm:$0xc0]  ;;  %v2445_v32 = vld [vmem:[#allocation3 + $0x86] ss:$16 sm:$0x3]  ;;  %v2374_v18 = vor.u32 %v2373_v21, %v2372_v45  ;;  %v2392_v30 = vmul.f32 %v8154_v2, %v2319_v20  ;;  %v2364_v55 = vor.u32 %v2363_v4, %v2362_v62  ;;  %5359 = vset.pattern.permute.xlu1 %v8155_v31 }
 0x2ec   : > { %v2493_v1 = vld [vmem:[#allocation2 + $0x87] ss:$16 sm:$0x30]  ;;  %v6863_v63 = vld [vmem:[#allocation2 + $0x89] ss:$16 sm:$0x3]  ;;  %v2447_v34 = vor.u32 %v2446_v0, %v2445_v32  ;;  %v2289_v58 = vor.u32 %v2288_v28, %v2287_v50  ;;  %4090 = vperm.xlu1 %5359, %v6246_v59  }
 0x2ed   : > { %v6865_v24 = vld [vmem:[#allocation2 + $0x89] ss:$16 sm:$0xc]  ;;  %v2333_v35 = vld [vmem:[#allocation2 + $0x5] ss:$16 sm:$0xc0]  ;;  %v2494_v0 = vor.u32 %v2493_v1, %v2492_v7  ;;  %v2396_v3 = vadd.f32 %v2392_v30, %v2374_v18 }
 0x2ee   : > { %v2408_v10 = vld [vmem:[#allocation2 + $0x6] ss:$16 sm:$0x30]  ;;  %v6867_v12 = vld [vmem:[#allocation2 + $0x7] ss:$16 sm:$0x3]  ;;  %v2334_v51 = vor.u32 %v2333_v35, %v6857_v14 }
 0x2ef   : > { %v2448_v9 = vld [vmem:[#allocation3 + $0x86] ss:$16 sm:$0x30]  ;;  %8153 = vst [vmem:[#allocation30_spill] sm:$0xff] %v6874_v22  ;;  %2324 = vst.msk [vmem:[#allocation4 + $0x88] sm:$0xff] %vm941_vm1, %v2319_v20  ;;  %v2409_v49 = vor.u32 %v2408_v10, %v2407_v16  ;;  %v2318_v20 = vadd.f32 %v2314_v19, %v2289_v58  ;;  %v2646_v16 = vor.u32 %v6865_v24, %v6863_v63 }
 0x2f0   : > { %v2483_v11 = vld [vmem:[#allocation2 + $0x7] ss:$16 sm:$0xc]  ;;  %v2437_v41 = vld [vmem:[#allocation3 + $0x6] ss:$16 sm:$0x3]  ;;  %v2449_v21 = vor.u32 %v2448_v9, %v2447_v34  ;;  %v2469_v62 = vmul.f32 %v2419_v15, %v2396_v3  ;;  %v6893_v9 = vpop.permute.xlu1 %4002 }
 0x2f1   : > { %v2438_v47 = vld [vmem:[#allocation3 + $0x6] ss:$16 sm:$0xc]  ;;  %v2523_v38 = vld [vmem:[#allocation3 + $0x87] ss:$16 sm:$0xc]  ;;  %v2484_v4 = vor.u32 %v2483_v11, %v6867_v12  ;;  %v2391_v34 = vmul.f32 %v2334_v51, %v2318_v20 }
 0x2f2   : > { %2246 = vst.msk [vmem:[#allocation4 + $0x60] sm:$0xff] %vm941_vm1, %v2241_v56  ;;  %v2450_v42 = vld [vmem:[#allocation3 + $0x86] ss:$16 sm:$0xc0]  ;;  %v2439_v7 = vor.u32 %v2438_v47, %v2437_v41  ;;  %2401 = vst.msk [vmem:[#allocation4 + $0xa8] sm:$0xff] %vm941_vm1, %v2396_v3  ;;  %v8157_v15 = vmov 15  }
 0x2f3   : > { %v2365_v37 = vld [vmem:[#allocation3 + $0x5] ss:$16 sm:$0xc0]  ;;  %v2440_v8 = vld [vmem:[#allocation3 + $0x6] ss:$16 sm:$0x30]  ;;  %v2451_v56 = vor.u32 %v2450_v42, %v2449_v21  ;;  %5360 = vset.pattern.permute.xlu1 %v8157_v15 }
 0x2f4   : > { %v2522_v33 = vld [vmem:[#allocation3 + $0x87] ss:$16 sm:$0x3]  ;;  %v2570_v45 = vld [vmem:[#allocation2 + $0x88] ss:$16 sm:$0x30]  ;;  %v2366_v12 = vor.u32 %v2365_v37, %v2364_v55  ;;  %v2441_v41 = vor.u32 %v2440_v8, %v2439_v7  ;;  %3866 = vperm.xlu1 %5360, %v6213_v44  }
 0x2f5   : > { %v2495_v32 = vld [vmem:[#allocation2 + $0x87] ss:$16 sm:$0xc0]  ;;  %v2410_v23 = vld [vmem:[#allocation2 + $0x6] ss:$16 sm:$0xc0]  ;;  %v2524_v28 = vor.u32 %v2523_v38, %v2522_v33  ;;  %v2571_v63 = vor.u32 %v2570_v45, %v2569_v39  ;;  %v2473_v33 = vadd.f32 %v2469_v62, %v2451_v56 }
 0x2f6   : > { %v2515_v54 = vld [vmem:[#allocation3 + $0x7] ss:$16 sm:$0xc]  ;;  %v2600_v1 = vld [vmem:[#allocation3 + $0x88] ss:$16 sm:$0xc]  ;;  %v2496_v47 = vor.u32 %v2495_v32, %v2494_v0  ;;  %v2411_v38 = vor.u32 %v2410_v23, %v2409_v49  ;;  %v2395_v42 = vadd.f32 %v2391_v34, %v2366_v12 }
 0x2f7   : > { %v2525_v14 = vld [vmem:[#allocation3 + $0x87] ss:$16 sm:$0x30]  ;;  %v6887_v35 = vld [vmem:[#allocation2 + $0x8a] ss:$16 sm:$0x3] }
 0x2f8   : > { %v2514_v50 = vld [vmem:[#allocation3 + $0x7] ss:$16 sm:$0x3]  ;;  %v6889_v10 = vld [vmem:[#allocation2 + $0x8a] ss:$16 sm:$0xc]  ;;  %v2526_v58 = vor.u32 %v2525_v14, %v2524_v28  ;;  %v2546_v49 = vmul.f32 %v2496_v47, %v2473_v33  ;;  %v2468_v45 = vmul.f32 %v2411_v38, %v2395_v42  ;;  %v1403_v28 = vpop.permute.xlu1 %1402  ;;  %5361 = vset.pattern.permute.xlu1 %v8147_v61 }
 0x2f9   : > { %2323 = vst.msk [vmem:[#allocation4 + $0x80] sm:$0xff] %vm941_vm1, %v2318_v20  ;;  %8156 = vst [vmem:[#allocation31_spill] sm:$0xff] %v6893_v9  ;;  %v2485_v11 = vld [vmem:[#allocation2 + $0x7] ss:$16 sm:$0x30]  ;;  %v2516_v55 = vor.u32 %v2515_v54, %v2514_v50  ;;  %v1421_v47 = vmul.f32 %v1403_v28, %v6622_v29  ;;  %4130 = vperm.xlu1 %5361, %v6335_v25  }
 0x2fa   : > { %v2527_v24 = vld [vmem:[#allocation3 + $0x87] ss:$16 sm:$0xc0]  ;;  %v2442_v18 = vld [vmem:[#allocation3 + $0x6] ss:$16 sm:$0xc0]  ;;  %v2486_v21 = vor.u32 %v2485_v11, %v2484_v4  ;;  %v2723_v4 = vor.u32 %v6889_v10, %v6887_v35 }
 0x2fb   : > { %v2517_v2 = vld [vmem:[#allocation3 + $0x7] ss:$16 sm:$0x30]  ;;  %v2599_v30 = vld [vmem:[#allocation3 + $0x88] ss:$16 sm:$0x3]  ;;  %v2528_v8 = vor.u32 %v2527_v24, %v2526_v58  ;;  %v2443_v32 = vor.u32 %v2442_v18, %v2441_v41 }
 0x2fc   : > { %v2572_v19 = vld [vmem:[#allocation2 + $0x88] ss:$16 sm:$0xc0]  ;;  %v2601_v51 = vor.u32 %v2600_v1, %v2599_v30  ;;  %v2647_v3 = vld [vmem:[#allocation2 + $0x89] ss:$16 sm:$0x30]  ;;  %v2518_v23 = vor.u32 %v2517_v2, %v2516_v55 }
 0x2fd   : > { %v2602_v37 = vld [vmem:[#allocation3 + $0x88] ss:$16 sm:$0x30]  ;;  %v2677_v0 = vld [vmem:[#allocation3 + $0x89] ss:$16 sm:$0xc]  ;;  %v2573_v20 = vor.u32 %v2572_v19, %v2571_v63  ;;  %v2648_v7 = vor.u32 %v2647_v3, %v2646_v16  ;;  %v2550_v1 = vadd.f32 %v2546_v49, %v2528_v8  ;;  %v2472_v56 = vadd.f32 %v2468_v45, %v2443_v32 }
 0x2fe   : > { %v2604_v39 = vld [vmem:[#allocation3 + $0x88] ss:$16 sm:$0xc0]  ;;  %2478 = vst.msk [vmem:[#allocation4 + $0xc8] sm:$0xff] %vm941_vm1, %v2473_v33  ;;  %2400 = vst.msk [vmem:[#allocation4 + $0xa0] sm:$0xff] %vm941_vm1, %v2395_v42  ;;  %v2603_v50 = vor.u32 %v2602_v37, %v2601_v51  ;;  %v1571_v51 = vpop.permute.xlu1 %1570 }
 0x2ff   : > { %v2519_v54 = vld [vmem:[#allocation3 + $0x7] ss:$16 sm:$0xc0]  ;;  %v2676_v44 = vld [vmem:[#allocation3 + $0x89] ss:$16 sm:$0x3]  ;;  %v2623_v35 = vmul.f32 %v2573_v20, %v2550_v1 }
 0x300   : > { %v2487_v14 = vld [vmem:[#allocation2 + $0x7] ss:$16 sm:$0xc0]  ;;  %v2798_v62 = vld [vmem:[#allocation2 + $0x8b] ss:$16 sm:$0x3]  ;;  %v2678_v34 = vor.u32 %v2677_v0, %v2676_v44  ;;  %v2605_v16 = vor.u32 %v2604_v39, %v2603_v50  ;;  %v2520_v10 = vor.u32 %v2519_v54, %v2518_v23  ;;  %v1589_v39 = vmul.f32 %v1571_v51, %v6622_v29 }
 0x301   : > { %v2488_v12 = vor.u32 %v2487_v14, %v2486_v21  ;;  %v2679_v11 = vld [vmem:[#allocation3 + $0x89] ss:$16 sm:$0x30]  ;;  %v2799_v41 = vld [vmem:[#allocation2 + $0x8b] ss:$16 sm:$0xc] }
 0x302   : > { %v2649_v63 = vld [vmem:[#allocation2 + $0x89] ss:$16 sm:$0xc0]  ;;  %v2724_v24 = vld [vmem:[#allocation2 + $0x8a] ss:$16 sm:$0x30]  ;;  %v2680_v19 = vor.u32 %v2679_v11, %v2678_v34  ;;  %v2627_v33 = vadd.f32 %v2623_v35, %v2605_v16  ;;  %v2800_v42 = vor.u32 %v2799_v41, %v2798_v62  ;;  %v1655_v34 = vpop.permute.xlu1 %1654 }
 0x303   : > { %2555 = vst.msk [vmem:[#allocation4 + $0xe8] sm:$0xff] %vm941_vm1, %v2550_v1  ;;  %2477 = vst.msk [vmem:[#allocation4 + $0xc0] sm:$0xff] %vm941_vm1, %v2472_v56  ;;  %v2545_v38 = vmul.f32 %v2488_v12, %v2472_v56  ;;  %v2754_v18 = vld [vmem:[#allocation3 + $0x8a] ss:$16 sm:$0xc]  ;;  %v2650_v30 = vor.u32 %v2649_v63, %v2648_v7  ;;  %v2725_v58 = vor.u32 %v2724_v24, %v2723_v4  ;;  %v8159_v20 = vmov 6  }
 0x304   : > { %v2681_v2 = vld [vmem:[#allocation3 + $0x89] ss:$16 sm:$0xc0]  ;;  %1435 = vst.msk [vmem:[#allocation3 + $0x110] sm:$0xff] %vm941_vm1, %v1421_v47  ;;  %2632 = vst.msk [vmem:[#allocation4 + $0x108] sm:$0xff] %vm941_vm1, %v2627_v33  ;;  %5362 = vset.pattern.permute.xlu1 %v8159_v20  ;;  %v1673_v24 = vmul.f32 %v1655_v34, %v6622_v29 }
 0x305   : > { %v2875_v21 = vld [vmem:[#allocation2 + $0x8c] ss:$16 sm:$0x3]  ;;  %v6907_v37 = vadd.f32 %v2545_v38, %v2520_v10  ;;  %v2753_v3 = vld [vmem:[#allocation3 + $0x8a] ss:$16 sm:$0x3]  ;;  %v2682_v49 = vor.u32 %v2681_v2, %v2680_v19  ;;  %v2700_v45 = vmul.f32 %v2650_v30, %v2627_v33  ;;  %1810 = vperm.xlu1 %5362, %v6097_v52  }
 0x306   : > { %v2876_v55 = vld [vmem:[#allocation2 + $0x8c] ss:$16 sm:$0xc]  ;;  %v2756_v0 = vld [vmem:[#allocation3 + $0x8a] ss:$16 sm:$0x30]  ;;  %v2755_v8 = vor.u32 %v2754_v18, %v2753_v3 }
 0x307   : > { %8158 = vst [vmem:[#allocation32_spill] sm:$0xff] %v6907_v37  ;;  %v2726_v32 = vld [vmem:[#allocation2 + $0x8a] ss:$16 sm:$0xc0]  ;;  %2554 = vst.msk [vmem:[#allocation4 + $0xe0] sm:$0xff] %vm941_vm1, %v6907_v37  ;;  %v2704_v14 = vadd.f32 %v2700_v45, %v2682_v49  ;;  %v2877_v50 = vor.u32 %v2876_v55, %v2875_v21 }
 0x308   : > { %v2801_v23 = vld [vmem:[#allocation2 + $0x8b] ss:$16 sm:$0x30]  ;;  %v2758_v4 = vld [vmem:[#allocation3 + $0x8a] ss:$16 sm:$0xc0]  ;;  %v2727_v54 = vor.u32 %v2726_v32, %v2725_v58  ;;  %v2757_v28 = vor.u32 %v2756_v0, %v2755_v8  ;;  %v1739_v32 = vpop.permute.xlu1 %1738 }
 0x309   : > { %v2831_v7 = vld [vmem:[#allocation3 + $0x8b] ss:$16 sm:$0xc]  ;;  %1603 = vst.msk [vmem:[#allocation3 + $0x130] sm:$0xff] %vm941_vm1, %v1589_v39  ;;  %v2802_v44 = vor.u32 %v2801_v23, %v2800_v42  ;;  %2709 = vst.msk [vmem:[#allocation4 + $0x128] sm:$0xff] %vm941_vm1, %v2704_v14  ;;  %5363 = vset.pattern.permute.xlu1 %v8132_v36 }
 0x30a   : > { %v2952_v1 = vld [vmem:[#allocation2 + $0x8d] ss:$16 sm:$0x3]  ;;  %v2830_v62 = vld [vmem:[#allocation3 + $0x8b] ss:$16 sm:$0x3]  ;;  %v2759_v41 = vor.u32 %v2758_v4, %v2757_v28  ;;  %v2777_v47 = vmul.f32 %v2727_v54, %v2704_v14  ;;  %1894 = vperm.xlu1 %5363, %v6097_v52  }
 0x30b   : > { %v2953_v56 = vld [vmem:[#allocation2 + $0x8d] ss:$16 sm:$0xc]  ;;  %v2833_v12 = vld [vmem:[#allocation3 + $0x8b] ss:$16 sm:$0x30]  ;;  %v2832_v11 = vor.u32 %v2831_v7, %v2830_v62 }
 0x30c   : > { %v2803_v16 = vld [vmem:[#allocation2 + $0x8b] ss:$16 sm:$0xc0]  ;;  %v2878_v63 = vld [vmem:[#allocation2 + $0x8c] ss:$16 sm:$0x30]  ;;  %v2954_v38 = vor.u32 %v2953_v56, %v2952_v1  ;;  %v2781_v2 = vadd.f32 %v2777_v47, %v2759_v41 }
 0x30d   : > { %v2908_v35 = vld [vmem:[#allocation3 + $0x8c] ss:$16 sm:$0xc]  ;;  %v2835_v10 = vld [vmem:[#allocation3 + $0x8b] ss:$16 sm:$0xc0]  ;;  %v2834_v18 = vor.u32 %v2833_v12, %v2832_v11  ;;  %v2804_v30 = vor.u32 %v2803_v16, %v2802_v44  ;;  %v2879_v58 = vor.u32 %v2878_v63, %v2877_v50  ;;  %v1757_v44 = vmul.f32 %v1739_v32, %v6622_v29 }
 0x30e   : > { %v3029_v19 = vld [vmem:[#allocation2 + $0x8e] ss:$16 sm:$0x3]  ;;  %1687 = vst.msk [vmem:[#allocation3 + $0x140] sm:$0xff] %vm941_vm1, %v1673_v24  ;;  %2786 = vst.msk [vmem:[#allocation4 + $0x148] sm:$0xff] %vm941_vm1, %v2781_v2  ;;  %5364 = vset.pattern.permute.xlu1 %v8147_v61 }
 0x30f   : > { %v3030_v33 = vld [vmem:[#allocation2 + $0x8e] ss:$16 sm:$0xc]  ;;  %v2907_v42 = vld [vmem:[#allocation3 + $0x8c] ss:$16 sm:$0x3]  ;;  %v2836_v51 = vor.u32 %v2835_v10, %v2834_v18  ;;  %v2854_v3 = vmul.f32 %v2804_v30, %v2781_v2  ;;  %4134 = vperm.xlu1 %5364, %v6246_v59  }
 0x310   : > { %v2910_v21 = vld [vmem:[#allocation3 + $0x8c] ss:$16 sm:$0x30]  ;;  %v2909_v55 = vor.u32 %v2908_v35, %v2907_v42  ;;  %v2955_v39 = vld [vmem:[#allocation2 + $0x8d] ss:$16 sm:$0x30]  ;;  %v3031_v7 = vor.u32 %v3030_v33, %v3029_v19  ;;  %v1823_v35 = vpop.permute.xlu1 %1822 }
 0x311   : > { %v2880_v0 = vld [vmem:[#allocation2 + $0x8c] ss:$16 sm:$0xc0]  ;;  %v2985_v36 = vld [vmem:[#allocation3 + $0x8d] ss:$16 sm:$0xc]  ;;  %v2956_v49 = vor.u32 %v2955_v39, %v2954_v38  ;;  %v2858_v23 = vadd.f32 %v2854_v3, %v2836_v51  ;;  %v1841_v38 = vmul.f32 %v1823_v35, %v6622_v29 }
 0x312   : > { %v2912_v8 = vld [vmem:[#allocation3 + $0x8c] ss:$16 sm:$0xc0]  ;;  %v2911_v45 = vor.u32 %v2910_v21, %v2909_v55  ;;  %v2881_v20 = vor.u32 %v2880_v0, %v2879_v58  ;;  %v3106_v4 = vld [vmem:[#allocation2 + $0x8f] ss:$16 sm:$0x3] }
 0x313   : > { %v3107_v54 = vld [vmem:[#allocation2 + $0x8f] ss:$16 sm:$0xc]  ;;  %v2984_v28 = vld [vmem:[#allocation3 + $0x8d] ss:$16 sm:$0x3]  ;;  %5365 = vset.pattern.permute.xlu1 %v8131_v5 }
 0x314   : > { %v2987_v14 = vld [vmem:[#allocation3 + $0x8d] ss:$16 sm:$0x30]  ;;  %v2986_v50 = vor.u32 %v2985_v36, %v2984_v28  ;;  %v2913_v1 = vor.u32 %v2912_v8, %v2911_v45  ;;  %2863 = vst.msk [vmem:[#allocation4 + $0x168] sm:$0xff] %vm941_vm1, %v2858_v23  ;;  %v2931_v56 = vmul.f32 %v2881_v20, %v2858_v23  ;;  %1771 = vst.msk [vmem:[#allocation3 + $0x150] sm:$0xff] %vm941_vm1, %v1757_v44  ;;  %4398 = vperm.xlu1 %5365, %v6379_v27   ;;  %v1907_v0 = vpop.permute.xlu1 %1906 }
 0x315   : > { %v2957_v62 = vld [vmem:[#allocation2 + $0x8d] ss:$16 sm:$0xc0]  ;;  %v3032_v12 = vld [vmem:[#allocation2 + $0x8e] ss:$16 sm:$0x30]  ;;  %v3108_v24 = vor.u32 %v3107_v54, %v3106_v4 }
 0x316   : > { %v3062_v34 = vld [vmem:[#allocation3 + $0x8e] ss:$16 sm:$0xc]  ;;  %v2989_v11 = vld [vmem:[#allocation3 + $0x8d] ss:$16 sm:$0xc0]  ;;  %v2958_v41 = vor.u32 %v2957_v62, %v2956_v49  ;;  %v2988_v47 = vor.u32 %v2987_v14, %v2986_v50  ;;  %v2935_v16 = vadd.f32 %v2931_v56, %v2913_v1  ;;  %v3033_v63 = vor.u32 %v3032_v12, %v3031_v7  ;;  %v5601_v14 = vpop.eup %5600 }
 0x317   : > { %v3064_v10 = vld [vmem:[#allocation3 + $0x8e] ss:$16 sm:$0x30]  ;;  %v3063_v18 = vor.u32 %v3062_v34, %v3061_v57  ;;  %v3109_v58 = vld [vmem:[#allocation2 + $0x8f] ss:$16 sm:$0x30]  ;;  %v1925_v49 = vmul.f32 %v1907_v0, %v6622_v29  ;;  %v5603_v44 = vpop.eup %5602 }
 0x318   : > { %v2990_v17 = vor.u32 %v2989_v11, %v2988_v47  ;;  %2940 = vst.msk [vmem:[#allocation4 + $0x188] sm:$0xff] %vm941_vm1, %v2935_v16  ;;  %v3008_v2 = vmul.f32 %v2958_v41, %v2935_v16  ;;  %v3034_v30 = vld [vmem:[#allocation2 + $0x8e] ss:$16 sm:$0xc0]  ;;  %1855 = vst.msk [vmem:[#allocation3 + $0x160] sm:$0xff] %vm941_vm1, %v1841_v38  ;;  %v3110_v55 = vor.u32 %v3109_v58, %v3108_v24  ;;  %5368 = vset.pattern.permute.xlu1 %v8149_v13  ;;  %v6943_v29 = vpop.permute.xlu1 %3910  ;;  %v5605_v43 = vpop.eup %5604 }
 0x319   : > { %v3139_v19 = vld [vmem:[#allocation3 + $0x8f] ss:$16 sm:$0xc]  ;;  %v3066_v33 = vld [vmem:[#allocation3 + $0x8e] ss:$16 sm:$0xc0]  ;;  %v3065_v6 = vor.u32 %v3064_v10, %v3063_v18  ;;  %v3035_v21 = vor.u32 %v3034_v30, %v3033_v63  ;;  %4178 = vperm.xlu1 %5368, %v6246_v59   ;;  %v5607_v62 = vpop.eup %5606 }
 0x31a   : > { %v3012_v42 = vadd.f32 %v3008_v2, %v2990_v17  ;;  %v3138_v51 = vld [vmem:[#allocation3 + $0x8f] ss:$16 sm:$0x3]  ;;  %1939 = vst.msk [vmem:[#allocation3 + $0x170] sm:$0xff] %vm941_vm1, %v1925_v49  ;;  %8160 = vst [vmem:[#allocation33_spill] sm:$0xff] %v6943_v29  ;;  %v4631_v12 = vadd.f32 1.0, %v5603_v44  ;;  %v5609_v10 = vpop.eup %5608 }
 0x31b   : > { %v3141_v3 = vld [vmem:[#allocation3 + $0x8f] ss:$16 sm:$0x30]  ;;  %v3140_v39 = vor.u32 %v3139_v19, %v3138_v51  ;;  %v3067_v36 = vor.u32 %v3066_v33, %v3065_v6  ;;  %v1961_v7 = vld [vmem:[#allocation2 + $0x100] ss:$16 sm:$0x3] }
 0x31c   : > { %3017 = vst.msk [vmem:[#allocation4 + $0x1a8] sm:$0xff] %vm941_vm1, %v3012_v42  ;;  %v3085_v8 = vmul.f32 %v3035_v21, %v3012_v42  ;;  %v3111_v32 = vld [vmem:[#allocation2 + $0x8f] ss:$16 sm:$0xc0]  ;;  %v1331_v56 = vpop.permute.xlu1 %1330  ;;  %v4628_v41 = vadd.f32 1.0, %v5601_v14  ;;  %v4633_v47 = vadd.f32 1.0, %v5605_v43  ;;  %5610 = vrcp.f32 %v4631_v12 }
 0x31d   : > { %v3142_v45 = vor.u32 %v3141_v3, %v3140_v39  ;;  %v3112_v20 = vor.u32 %v3111_v32, %v3110_v55  ;;  %v1962_v4 = vld [vmem:[#allocation2 + $0x100] ss:$16 sm:$0xc]  ;;  %5370 = vset.pattern.permute.xlu1 %v8157_v15  ;;  %v1340_v11 = vmul.f32 %v1331_v56, %v6643_v46  ;;  %v2036_v16 = vld [vmem:[#allocation2 + $0x101] ss:$16 sm:$0x3] }
 0x31e   : > { %v3089_v23 = vadd.f32 %v3085_v8, %v3067_v36  ;;  %v1963_v50 = vor.u32 %v1962_v4, %v1961_v7  ;;  %4218 = vperm.xlu1 %5370, %v6335_v25   ;;  %v1964_v1 = vld [vmem:[#allocation2 + $0x100] ss:$16 sm:$0x30]  ;;  %v2037_v63 = vld [vmem:[#allocation2 + $0x101] ss:$16 sm:$0xc]  ;;  %5612 = vrcp.f32 %v4633_v47 }
 0x31f   : > { %v3144_v54 = vor.u32 %v3143_v48, %v3142_v45  ;;  %1356 = vst.msk [vmem:[#allocation3 + $0x188] sm:$0xff] %vm941_vm1, %v1340_v11  ;;  %v4635_v25 = vadd.f32 1.0, %v5607_v62  ;;  %v1966_v24 = vld [vmem:[#allocation2 + $0x100] ss:$16 sm:$0xc0]  ;;  %v2038_v18 = vor.u32 %v2037_v63, %v2036_v16  ;;  %5614 = vrcp.f32 %v4628_v41 }
 0x320   : > { %3094 = vst.msk [vmem:[#allocation4 + $0x1c8] sm:$0xff] %vm941_vm1, %v3089_v23  ;;  %v3162_v28 = vmul.f32 %v3112_v20, %v3089_v23  ;;  %v1965_v34 = vor.u32 %v1964_v1, %v1963_v50  ;;  %v1499_v57 = vpop.permute.xlu1 %1498  ;;  %v1993_v38 = vld [vmem:[#allocation3 + $0x100] ss:$16 sm:$0xc]  ;;  %v6956_v33 = vadd.f32 1.0, %v5609_v10  ;;  %v8161_v23 = vmov 10  }
 0x321   : > { %v1508_v17 = vmul.f32 %v1499_v57, %v6643_v46  ;;  %v2113_v2 = vld [vmem:[#allocation2 + $0x102] ss:$16 sm:$0x3]  ;;  %5616 = vrcp.f32 %v4635_v25  ;;  %v1992_v58 = vld [vmem:[#allocation3 + $0x100] ss:$16 sm:$0x3] }
 0x322   : > { %v3166_v59 = vadd.f32 %v3162_v28, %v3144_v54  ;;  %5372 = vset.pattern.permute.xlu1 %v8147_v61  ;;  %v1967_v35 = vor.u32 %v1966_v24, %v1965_v34  ;;  %v2114_v30 = vld [vmem:[#allocation2 + $0x102] ss:$16 sm:$0xc]  ;;  %v1995_v19 = vld [vmem:[#allocation3 + $0x100] ss:$16 sm:$0x30]  ;;  %v1994_v6 = vor.u32 %v1993_v38, %v1992_v58  ;;  %5618 = vrcp.f32 %v6956_v33 }
 0x323   : > { %4486 = vperm.xlu1 %5372, %v6379_v27   ;;  %1524 = vst.msk [vmem:[#allocation3 + $0x1a8] sm:$0xff] %vm941_vm1, %v1508_v17  ;;  %v2039_v21 = vld [vmem:[#allocation2 + $0x101] ss:$16 sm:$0x30]  ;;  %v2115_v3 = vor.u32 %v2114_v30, %v2113_v2 }
 0x324   : > { %3171 = vst.msk [vmem:[#allocation4 + $0x1e8] sm:$0xff] %vm941_vm1, %v3166_v59  ;;  %v2009_v42 = vmul.f32 0.0, %v1967_v35  ;;  %v2069_v55 = vld [vmem:[#allocation3 + $0x101] ss:$16 sm:$0xc]  ;;  %v2040_v51 = vor.u32 %v2039_v21, %v2038_v18  ;;  %v1583_v36 = vpop.permute.xlu1 %1582  ;;  %v1996_v48 = vor.u32 %v1995_v19, %v1994_v6 }
 0x325   : > { %v2190_v0 = vld [vmem:[#allocation2 + $0x103] ss:$16 sm:$0x3]  ;;  %v1969_v8 = vld [vmem:[#allocation2 + $0x180] ss:$16 sm:$0x3]  ;;  %v1592_v54 = vmul.f32 %v1583_v36, %v6643_v46 }
 0x326   : > { %v2191_v39 = vld [vmem:[#allocation2 + $0x103] ss:$16 sm:$0xc]  ;;  %v2068_v49 = vld [vmem:[#allocation3 + $0x101] ss:$16 sm:$0x3] }
 0x327   : > { %5373 = vset.pattern.permute.xlu1 %v8129_v60  ;;  %v2041_v32 = vld [vmem:[#allocation2 + $0x101] ss:$16 sm:$0xc0]  ;;  %v2116_v45 = vld [vmem:[#allocation2 + $0x102] ss:$16 sm:$0x30]  ;;  %v2070_v28 = vor.u32 %v2069_v55, %v2068_v49  ;;  %v2192_v34 = vor.u32 %v2191_v39, %v2190_v0 }
 0x328   : > { %4262 = vperm.xlu1 %5373, %v6402_v26   ;;  %v1970_v20 = vld [vmem:[#allocation2 + $0x180] ss:$16 sm:$0xc]  ;;  %v2071_v7 = vld [vmem:[#allocation3 + $0x101] ss:$16 sm:$0x30]  ;;  %v2042_v43 = vor.u32 %v2041_v32, %v2040_v51  ;;  %v2117_v1 = vor.u32 %v2116_v45, %v2115_v3  ;;  %v1667_v47 = vpop.permute.xlu1 %1666 }
 0x329   : > { %v1997_v4 = vld [vmem:[#allocation3 + $0x100] ss:$16 sm:$0xc0]  ;;  %v2267_v14 = vld [vmem:[#allocation2 + $0x104] ss:$16 sm:$0x3]  ;;  %v2072_v62 = vor.u32 %v2071_v7, %v2070_v28  ;;  %v1971_v16 = vor.u32 %v1970_v20, %v1969_v8  ;;  %v1676_v57 = vmul.f32 %v1667_v47, %v6643_v46  ;;  %v5611_v58 = vpop.eup %5610 }
 0x32a   : > { %v2268_v44 = vld [vmem:[#allocation2 + $0x104] ss:$16 sm:$0xc]  ;;  %v1998_v59 = vor.u32 %v1997_v4, %v1996_v48  ;;  %v2146_v50 = vld [vmem:[#allocation3 + $0x102] ss:$16 sm:$0xc] }
 0x32b   : > { %v2073_v56 = vld [vmem:[#allocation3 + $0x101] ss:$16 sm:$0xc0]  ;;  %1608 = vst.msk [vmem:[#allocation3 + $0x1b8] sm:$0xff] %vm941_vm1, %v1592_v54  ;;  %v2269_v35 = vor.u32 %v2268_v44, %v2267_v14  ;;  %1692 = vst.msk [vmem:[#allocation3 + $0x1c8] sm:$0xff] %vm941_vm1, %v1676_v57  ;;  %v5613_v21 = vpop.eup %5612 }
 0x32c   : > { %5374 = vset.pattern.permute.xlu1 %v8161_v23  ;;  %v2118_v12 = vld [vmem:[#allocation2 + $0x102] ss:$16 sm:$0xc0]  ;;  %v6962_v11 = vld [vmem:[#allocation2 + $0x105] ss:$16 sm:$0x3]  ;;  %v2013_v41 = vadd.f32 %v2009_v42, %v1998_v59  ;;  %v2074_v17 = vor.u32 %v2073_v56, %v2072_v62  ;;  %v5615_v8 = vpop.eup %5614  ;;  %v1835_v20 = vpop.permute.xlu1 %1834 }
 0x32d   : > { %4350 = vperm.xlu1 %5374, %v6402_v26   ;;  %v2145_v63 = vld [vmem:[#allocation3 + $0x102] ss:$16 sm:$0x3]  ;;  %v2193_v24 = vld [vmem:[#allocation2 + $0x103] ss:$16 sm:$0x30]  ;;  %v2119_v6 = vor.u32 %v2118_v12, %v2117_v1  ;;  %v1844_v62 = vmul.f32 %v1835_v20, %v6643_v46 }
 0x32e   : > { %v2148_v25 = vld [vmem:[#allocation3 + $0x102] ss:$16 sm:$0x30]  ;;  %v2147_v10 = vor.u32 %v2146_v50, %v2145_v63  ;;  %v2270_v38 = vld [vmem:[#allocation2 + $0x104] ss:$16 sm:$0x30]  ;;  %v2085_v2 = vmul.f32 %v2042_v43, %v2013_v41  ;;  %v2194_v51 = vor.u32 %v2193_v24, %v2192_v34  ;;  %v5617_v7 = vpop.eup %5616  ;;  %v7005_v63 = vmul.f32 %v5611_v58, %v5780_v40 }
 0x32f   : > { %v6966_v18 = vld [vmem:[#allocation2 + $0x105] ss:$16 sm:$0xc]  ;;  %2017 = vst.msk [vmem:[#allocation4 + $0x10] sm:$0xff] %vm941_vm1, %v2013_v41  ;;  %v6977_v32 = vor.u32 %v2270_v38, %v2269_v35  ;;  %1860 = vst.msk [vmem:[#allocation3 + $0x1e8] sm:$0xff] %vm941_vm1, %v1844_v62 }
 0x330   : > { %v1972_v30 = vld [vmem:[#allocation2 + $0x180] ss:$16 sm:$0x30]  ;;  %v2223_v19 = vld [vmem:[#allocation3 + $0x103] ss:$16 sm:$0xc]  ;;  %v2149_v55 = vor.u32 %v2148_v25, %v2147_v10  ;;  %v2089_v39 = vadd.f32 %v2085_v2, %v2074_v17  ;;  %v2346_v45 = vor.u32 %v6966_v18, %v6962_v11  ;;  %v7008_v25 = vmul.f32 %v5613_v21, %v5809_v53 }
 0x331   : > { %5377 = vset.pattern.permute.xlu1 %v8157_v15  ;;  %v2150_v42 = vld [vmem:[#allocation3 + $0x102] ss:$16 sm:$0xc0]  ;;  %v6971_v3 = vld [vmem:[#allocation2 + $0x106] ss:$16 sm:$0x3]  ;;  %v6975_v36 = vor.u32 %v1972_v30, %v1971_v16 }
 0x332   : > { %4574 = vperm.xlu1 %5377, %v6379_v27   ;;  %v6973_v0 = vld [vmem:[#allocation2 + $0x106] ss:$16 sm:$0xc]  ;;  %v2222_v49 = vld [vmem:[#allocation3 + $0x103] ss:$16 sm:$0x3]  ;;  %v2151_v28 = vor.u32 %v2150_v42, %v2149_v55  ;;  %v2162_v14 = vmul.f32 %v2119_v6, %v2089_v39 }
 0x333   : > { %v2225_v27 = vld [vmem:[#allocation3 + $0x103] ss:$16 sm:$0x30]  ;;  %v2224_v4 = vor.u32 %v2223_v19, %v2222_v49  ;;  %v6981_v54 = vld [vmem:[#allocation2 + $0x104] ss:$16 sm:$0xc0]  ;;  %v2423_v19 = vor.u32 %v6973_v0, %v6971_v3 }
 0x334   : > { %v2195_v48 = vld [vmem:[#allocation2 + $0x103] ss:$16 sm:$0xc0]  ;;  %2094 = vst.msk [vmem:[#allocation4 + $0x30] sm:$0xff] %vm941_vm1, %v2089_v39  ;;  %v2166_v57 = vadd.f32 %v2162_v14, %v2151_v28  ;;  %v2273_v58 = vor.u32 %v6981_v54, %v6977_v32  ;;  %v8163_v21 = vld [vmem:[#allocation6_spill] sm:$0xff] }
 0x335   : > { %v6984_v44 = vld [vmem:[#allocation2 + $0x107] ss:$16 sm:$0x3]  ;;  %v6988_v50 = vld [vmem:[#allocation2 + $0x108] ss:$16 sm:$0x3]  ;;  %v2226_v24 = vor.u32 %v2225_v27, %v2224_v4  ;;  %v2196_v35 = vor.u32 %v2195_v48, %v2194_v51  ;;  %v7032_v55 = vmul.f32 %v5615_v8, %v8163_v21  ;;  %v1919_v48 = vpop.permute.xlu1 %1918 }
 0x336   : > { %v6986_v59 = vld [vmem:[#allocation2 + $0x107] ss:$16 sm:$0xc]  ;;  %v6990_v43 = vld [vmem:[#allocation2 + $0x108] ss:$16 sm:$0xc]  ;;  %5378 = vset.pattern.permute.xlu1 %v8155_v31  ;;  %v1928_v4 = vmul.f32 %v1919_v48, %v6643_v46 }
 0x337   : > { %v6992_v1 = vld [vmem:[#allocation2 + $0x109] ss:$16 sm:$0x3]  ;;  %v1974_v12 = vld [vmem:[#allocation2 + $0x180] ss:$16 sm:$0xc0]  ;;  %4438 = vperm.xlu1 %5378, %v6402_v26   ;;  %v2239_v27 = vmul.f32 %v2196_v35, %v2166_v57  ;;  %v2577_v8 = vor.u32 %v6990_v43, %v6988_v50 }
 0x338   : > { %v6994_v56 = vld [vmem:[#allocation2 + $0x109] ss:$16 sm:$0xc]  ;;  %v2300_v34 = vld [vmem:[#allocation3 + $0x104] ss:$16 sm:$0xc]  ;;  %v1975_v33 = vor.u32 %v1974_v12, %v6975_v36 }
 0x339   : > { %v2347_v11 = vld [vmem:[#allocation2 + $0x105] ss:$16 sm:$0x30]  ;;  %v2227_v41 = vld [vmem:[#allocation3 + $0x103] ss:$16 sm:$0xc0] }
 0x33a   : > { %v6999_v47 = vld [vmem:[#allocation2 + $0x10a] ss:$16 sm:$0x3]  ;;  %v7012_v10 = vld [vmem:[#allocation2 + $0x181] ss:$16 sm:$0x3]  ;;  %v7034_v39 = vor.u32 %v2347_v11, %v2346_v45  ;;  %v2228_v49 = vor.u32 %v2227_v41, %v2226_v24  ;;  %v2654_v45 = vor.u32 %v6994_v56, %v6992_v1 }
 0x33b   : > { %v7001_v16 = vld [vmem:[#allocation2 + $0x10a] ss:$16 sm:$0xc]  ;;  %v7014_v38 = vld [vmem:[#allocation2 + $0x181] ss:$16 sm:$0xc]  ;;  %5379 = vset.pattern.permute.xlu1 %v8147_v61 }
 0x33c   : > { %v7016_v18 = vld [vmem:[#allocation2 + $0x182] ss:$16 sm:$0x3]  ;;  %v7020_v40 = vld [vmem:[#allocation2 + $0x183] ss:$16 sm:$0x3]  ;;  %v2243_v14 = vadd.f32 %v2239_v27, %v2228_v49  ;;  %v2731_v11 = vor.u32 %v7001_v16, %v6999_v47  ;;  %4482 = vperm.xlu1 %5379, %v6402_v26   ;;  %v2046_v1 = vor.u32 %v7014_v38, %v7012_v10 }
 0x33d   : > { %v7018_v17 = vld [vmem:[#allocation2 + $0x182] ss:$16 sm:$0xc]  ;;  %v7022_v2 = vld [vmem:[#allocation2 + $0x183] ss:$16 sm:$0xc] }
 0x33e   : > { %v2299_v53 = vld [vmem:[#allocation3 + $0x104] ss:$16 sm:$0x3]  ;;  %v2424_v36 = vld [vmem:[#allocation2 + $0x106] ss:$16 sm:$0x30]  ;;  %v2123_v56 = vor.u32 %v7018_v17, %v7016_v18  ;;  %v2200_v41 = vor.u32 %v7022_v2, %v7020_v40  ;;  %v2316_v35 = vmul.f32 %v2273_v58, %v2243_v14  ;;  %v1411_v58 = vpop.permute.xlu1 %1410 }
 0x33f   : > { %v2302_v30 = vld [vmem:[#allocation3 + $0x104] ss:$16 sm:$0x30]  ;;  %v2301_v51 = vor.u32 %v2300_v34, %v2299_v53  ;;  %2171 = vst.msk [vmem:[#allocation4 + $0x50] sm:$0xff] %vm941_vm1, %v2166_v57  ;;  %v7054_v43 = vor.u32 %v2424_v36, %v2423_v19  ;;  %1944 = vst.msk [vmem:[#allocation3 + $0x1f8] sm:$0xff] %vm941_vm1, %v1928_v4 }
 0x340   : > { %v8162_v6 = vld [vmem:[#allocation7_spill] sm:$0xff]  ;;  %v2578_v12 = vld [vmem:[#allocation2 + $0x108] ss:$16 sm:$0x30]  ;;  %2248 = vst.msk [vmem:[#allocation4 + $0x70] sm:$0xff] %vm941_vm1, %v2243_v14  ;;  %5380 = vset.pattern.permute.xlu1 %v8149_v13 }
 0x341   : > { %v7029_v42 = vmul.f32 %v5617_v7, %v8162_v6  ;;  %8164 = vst [vmem:[#allocation7_spill] sm:$0xff] %v7032_v55  ;;  %v7037_v20 = vld [vmem:[#allocation2 + $0x184] ss:$16 sm:$0x3]  ;;  %v2500_v7 = vor.u32 %v6986_v59, %v6984_v44  ;;  %v2303_v54 = vor.u32 %v2302_v30, %v2301_v51  ;;  %v7052_v44 = vmul.f32 0.0, %v1975_v33  ;;  %4526 = vperm.xlu1 %5380, %v6402_v26  }
 0x342   : > { %v7039_v32 = vld [vmem:[#allocation2 + $0x184] ss:$16 sm:$0xc]  ;;  %v2377_v3 = vld [vmem:[#allocation3 + $0x105] ss:$16 sm:$0xc]  ;;  %v7075_v19 = vor.u32 %v2578_v12, %v2577_v8 }
 0x343   : > { %v2304_v0 = vld [vmem:[#allocation3 + $0x104] ss:$16 sm:$0xc0]  ;;  %v2349_v28 = vld [vmem:[#allocation2 + $0x105] ss:$16 sm:$0xc0]  ;;  %v2277_v30 = vor.u32 %v7039_v32, %v7037_v20 }
 0x344   : > { %v2501_v62 = vld [vmem:[#allocation2 + $0x107] ss:$16 sm:$0x30]  ;;  %v2655_v34 = vld [vmem:[#allocation2 + $0x109] ss:$16 sm:$0x30]  ;;  %v2305_v24 = vor.u32 %v2304_v0, %v2303_v54  ;;  %v2350_v17 = vor.u32 %v2349_v28, %v7034_v39 }
 0x345   : > { %v2376_v59 = vld [vmem:[#allocation3 + $0x105] ss:$16 sm:$0x3]  ;;  %v2732_v46 = vld [vmem:[#allocation2 + $0x10a] ss:$16 sm:$0x30]  ;;  %v7073_v2 = vor.u32 %v2501_v62, %v2500_v7  ;;  %v7077_v6 = vor.u32 %v2655_v34, %v2654_v45  ;;  %5381 = vset.pattern.permute.xlu1 %v8157_v15 }
 0x346   : > { %v2379_v50 = vld [vmem:[#allocation3 + $0x105] ss:$16 sm:$0x30]  ;;  %v2378_v47 = vor.u32 %v2377_v3, %v2376_v59  ;;  %v7063_v16 = vld [vmem:[#allocation2 + $0x106] ss:$16 sm:$0xc0]  ;;  %v2320_v36 = vadd.f32 %v2316_v35, %v2305_v24  ;;  %v7085_v20 = vor.u32 %v2732_v46, %v2731_v11  ;;  %4570 = vperm.xlu1 %5381, %v6402_v26  }
 0x347   : > { %v2047_v57 = vld [vmem:[#allocation2 + $0x181] ss:$16 sm:$0x30]  ;;  %v2124_v33 = vld [vmem:[#allocation2 + $0x182] ss:$16 sm:$0x30]  ;;  %v2427_v45 = vor.u32 %v7063_v16, %v7054_v43 }
 0x348   : > { %v2201_v53 = vld [vmem:[#allocation2 + $0x183] ss:$16 sm:$0x30]  ;;  %v7068_v10 = vld [vmem:[#allocation2 + $0x185] ss:$16 sm:$0x3]  ;;  %v2380_v51 = vor.u32 %v2379_v50, %v2378_v47  ;;  %v7098_v54 = vor.u32 %v2047_v57, %v2046_v1  ;;  %v7100_v28 = vor.u32 %v2124_v33, %v2123_v56  ;;  %v2393_v34 = vmul.f32 %v2350_v17, %v2320_v36 }
 0x349   : > { %v7070_v38 = vld [vmem:[#allocation2 + $0x185] ss:$16 sm:$0xc]  ;;  %v2454_v18 = vld [vmem:[#allocation3 + $0x106] ss:$16 sm:$0xc]  ;;  %v7102_v14 = vor.u32 %v2201_v53, %v2200_v41 }
 0x34a   : > { %v2381_v40 = vld [vmem:[#allocation3 + $0x105] ss:$16 sm:$0xc0]  ;;  %v2278_v21 = vld [vmem:[#allocation2 + $0x184] ss:$16 sm:$0x30]  ;;  %4674 = vrot.lane.b32.xlu1 %v7005_v63, %s5645_s29 }
 0x34b   : > { %v7079_v49 = vld [vmem:[#allocation2 + $0x107] ss:$16 sm:$0xc0]  ;;  %v7081_v27 = vld [vmem:[#allocation2 + $0x108] ss:$16 sm:$0xc0]  ;;  %v2382_v12 = vor.u32 %v2381_v40, %v2380_v51  ;;  %v7112_v43 = vor.u32 %v2278_v21, %v2277_v30 }
 0x34c   : > { %v7083_v48 = vld [vmem:[#allocation2 + $0x109] ss:$16 sm:$0xc0]  ;;  %v8165_v39 = vld [vmem:[#allocation23_spill] sm:$0xff]  ;;  %8166 = vst [vmem:[#allocation6_spill] sm:$0xff] %v7102_v14  ;;  %2325 = vst.msk [vmem:[#allocation4 + $0x90] sm:$0xff] %vm941_vm1, %v2320_v36 }
 0x34d   : > { %v1423_v32 = vmul.f32 %v1411_v58, %v8165_v39  ;;  %v7089_v3 = vld [vmem:[#allocation2 + $0x186] ss:$16 sm:$0x3]  ;;  %v7095_v4 = vld [vmem:[#allocation2 + $0x10a] ss:$16 sm:$0xc0]  ;;  %v7140_v58 = vpop.eup %5618  ;;  %v2397_v51 = vadd.f32 %v2393_v34, %v2382_v12 }
 0x34e   : > { %v7091_v0 = vld [vmem:[#allocation2 + $0x186] ss:$16 sm:$0xc]  ;;  %v7106_v11 = vld [vmem:[#allocation2 + $0x181] ss:$16 sm:$0xc0]  ;;  %4678 = vrot.lane.b32.xlu1 %v7008_v25, %s5645_s29 }
 0x34f   : > { %v2453_v7 = vld [vmem:[#allocation3 + $0x106] ss:$16 sm:$0x3]  ;;  %1439 = vst.msk [vmem:[#allocation3 + $0x190] sm:$0xff] %vm941_vm1, %v1423_v32  ;;  %8167 = vst [vmem:[#allocation23_spill] sm:$0xff] %v7112_v43  ;;  %v1747_v32 = vpop.permute.xlu1 %1746  ;;  %v2431_v53 = vor.u32 %v7091_v0, %v7089_v3  ;;  %v2470_v55 = vmul.f32 %v2427_v45, %v2397_v51  ;;  %v8177_v63 = vmov 9  }
 0x350   : > { %v2456_v8 = vld [vmem:[#allocation3 + $0x106] ss:$16 sm:$0x30]  ;;  %v2455_v62 = vor.u32 %v2454_v18, %v2453_v7  ;;  %v7108_v59 = vld [vmem:[#allocation2 + $0x182] ss:$16 sm:$0xc0]  ;;  %v2354_v18 = vor.u32 %v7070_v38, %v7068_v10  ;;  %v1759_v34 = vmul.f32 %v1747_v32, %v8165_v39  ;;  %5383 = vset.pattern.permute.xlu1 %v8177_v63  ;;  %v8183_v63 = vor.u32 %v7081_v27, %v7075_v19 }
 0x351   : > { %v7110_v50 = vld [vmem:[#allocation2 + $0x183] ss:$16 sm:$0xc0]  ;;  %v7114_v46 = vld [vmem:[#allocation2 + $0x187] ss:$16 sm:$0x3] }
 0x352   : > { %v7116_v1 = vld [vmem:[#allocation2 + $0x187] ss:$16 sm:$0xc]  ;;  %v7118_v56 = vld [vmem:[#allocation2 + $0x188] ss:$16 sm:$0x3]  ;;  %v2457_v21 = vor.u32 %v2456_v8, %v2455_v62  ;;  %4682 = vrot.lane.b32.xlu1 %v7029_v42, %s5645_s29 }
 0x353   : > { %v7120_v41 = vld [vmem:[#allocation2 + $0x188] ss:$16 sm:$0xc]  ;;  %v7122_v47 = vld [vmem:[#allocation2 + $0x189] ss:$16 sm:$0x3]  ;;  %v2508_v45 = vor.u32 %v7116_v1, %v7114_v46 }
 0x354   : > { %v7124_v16 = vld [vmem:[#allocation2 + $0x189] ss:$16 sm:$0xc]  ;;  %v2531_v24 = vld [vmem:[#allocation3 + $0x107] ss:$16 sm:$0xc] }
 0x355   : > { %v2458_v35 = vld [vmem:[#allocation3 + $0x106] ss:$16 sm:$0xc0]  ;;  %v7132_v30 = vld [vmem:[#allocation2 + $0x184] ss:$16 sm:$0xc0]  ;;  %v2662_v26 = vor.u32 %v7124_v16, %v7122_v47 }
 0x356   : > { %8168 = vst [vmem:[#allocation34_spill] sm:$0xff] %v7132_v30  ;;  %v7136_v17 = vld [vmem:[#allocation2 + $0x10b] ss:$16 sm:$0x3]  ;;  %8169 = vst [vmem:[#allocation35_spill] sm:$0xff] %v7140_v58  ;;  %v2459_v22 = vor.u32 %v2458_v35, %v2457_v21 }
 0x357   : > { %v7138_v40 = vld [vmem:[#allocation2 + $0x10b] ss:$16 sm:$0xc]  ;;  %v2355_v7 = vld [vmem:[#allocation2 + $0x185] ss:$16 sm:$0x30] }
 0x358   : > { %v7146_v33 = vld [vmem:[#allocation2 + $0x10c] ss:$16 sm:$0x3]  ;;  %v7150_v10 = vld [vmem:[#allocation2 + $0x10d] ss:$16 sm:$0x3]  ;;  %v7175_v36 = vor.u32 %v2355_v7, %v2354_v18  ;;  %v2474_v21 = vadd.f32 %v2470_v55, %v2459_v22  ;;  %v2808_v46 = vor.u32 %v7138_v40, %v7136_v17  ;;  %v8173_v17 = vor.u32 %v7079_v49, %v7073_v2 }
 0x359   : > { %v7148_v57 = vld [vmem:[#allocation2 + $0x10c] ss:$16 sm:$0xc]  ;;  %v7152_v38 = vld [vmem:[#allocation2 + $0x10d] ss:$16 sm:$0xc] }
 0x35a   : > { %v7154_v37 = vld [vmem:[#allocation2 + $0x10e] ss:$16 sm:$0x3]  ;;  %v2530_v62 = vld [vmem:[#allocation3 + $0x107] ss:$16 sm:$0x3]  ;;  %v2885_v22 = vor.u32 %v7148_v57, %v7146_v33  ;;  %v2547_v40 = vmul.f32 %v8173_v17, %v2474_v21 }
 0x35b   : > { %v7156_v8 = vld [vmem:[#allocation2 + $0x10e] ss:$16 sm:$0xc]  ;;  %v2533_v12 = vld [vmem:[#allocation3 + $0x107] ss:$16 sm:$0x30]  ;;  %v2532_v9 = vor.u32 %v2531_v24, %v2530_v62  ;;  %v2585_v24 = vor.u32 %v7120_v41, %v7118_v56  ;;  %v1831_v41 = vpop.permute.xlu1 %1830 }
 0x35c   : > { %v2432_v29 = vld [vmem:[#allocation2 + $0x186] ss:$16 sm:$0x30]  ;;  %2402 = vst.msk [vmem:[#allocation4 + $0xb0] sm:$0xff] %vm941_vm1, %v2397_v51  ;;  %1775 = vst.msk [vmem:[#allocation3 + $0x1d0] sm:$0xff] %vm941_vm1, %v1759_v34 }
 0x35d   : > { %v7170_v58 = vld [vmem:[#allocation2 + $0x10f] ss:$16 sm:$0x3]  ;;  %v2608_v15 = vld [vmem:[#allocation3 + $0x108] ss:$16 sm:$0xc]  ;;  %v2534_v35 = vor.u32 %v2533_v12, %v2532_v9  ;;  %v7185_v62 = vor.u32 %v2432_v29, %v2431_v53  ;;  %v2962_v9 = vor.u32 %v7152_v38, %v7150_v10  ;;  %v3039_v29 = vor.u32 %v7156_v8, %v7154_v37 }
 0x35e   : > { %v7172_v3 = vld [vmem:[#allocation2 + $0x10f] ss:$16 sm:$0xc]  ;;  %v2535_v0 = vld [vmem:[#allocation3 + $0x107] ss:$16 sm:$0xc0]  ;;  %v1843_v12 = vmul.f32 %v1831_v41, %v8165_v39 }
 0x35f   : > { %8170 = vst [vmem:[#allocation36_spill] sm:$0xff] %v7175_v36  ;;  %v7183_v51 = vld [vmem:[#allocation2 + $0x185] ss:$16 sm:$0xc0]  ;;  %8172 = vst [vmem:[#allocation38_spill] sm:$0xff] %v7185_v62  ;;  %v3116_v55 = vor.u32 %v7172_v3, %v7170_v58  ;;  %v2536_v53 = vor.u32 %v2535_v0, %v2534_v35 }
 0x360   : > { %8171 = vst [vmem:[#allocation37_spill] sm:$0xff] %v7183_v51  ;;  %v2509_v32 = vld [vmem:[#allocation2 + $0x187] ss:$16 sm:$0x30]  ;;  %2479 = vst.msk [vmem:[#allocation4 + $0xd0] sm:$0xff] %vm941_vm1, %v2474_v21 }
 0x361   : > { %v2586_v13 = vld [vmem:[#allocation2 + $0x188] ss:$16 sm:$0x30]  ;;  %v2663_v34 = vld [vmem:[#allocation2 + $0x189] ss:$16 sm:$0x30]  ;;  %v7214_v2 = vor.u32 %v2509_v32, %v2508_v45  ;;  %v2551_v35 = vadd.f32 %v2547_v40, %v2536_v53 }
 0x362   : > { %v7187_v18 = vld [vmem:[#allocation2 + $0x18a] ss:$16 sm:$0x3]  ;;  %v2607_v1 = vld [vmem:[#allocation3 + $0x108] ss:$16 sm:$0x3]  ;;  %v7216_v49 = vor.u32 %v2586_v13, %v2585_v24  ;;  %v7218_v39 = vor.u32 %v2663_v34, %v2662_v26 }
 0x363   : > { %v7189_v7 = vld [vmem:[#allocation2 + $0x18a] ss:$16 sm:$0xc]  ;;  %v2610_v56 = vld [vmem:[#allocation3 + $0x108] ss:$16 sm:$0x30]  ;;  %v2609_v16 = vor.u32 %v2608_v15, %v2607_v1  ;;  %v2624_v3 = vmul.f32 %v8183_v63, %v2551_v35 }
 0x364   : > { %v2809_v47 = vld [vmem:[#allocation2 + $0x10b] ss:$16 sm:$0x30]  ;;  %v2886_v57 = vld [vmem:[#allocation2 + $0x10c] ss:$16 sm:$0x30]  ;;  %v2739_v32 = vor.u32 %v7189_v7, %v7187_v18 }
 0x365   : > { %v2963_v33 = vld [vmem:[#allocation2 + $0x10d] ss:$16 sm:$0x30]  ;;  %v3040_v10 = vld [vmem:[#allocation2 + $0x10e] ss:$16 sm:$0x30]  ;;  %v2611_v0 = vor.u32 %v2610_v56, %v2609_v16  ;;  %v7230_v45 = vor.u32 %v2809_v47, %v2808_v46  ;;  %v7238_v53 = vor.u32 %v2886_v57, %v2885_v22  ;;  %v7256_v22 = vpop.permute.xlu1 %4042 }
 0x366   : > { %v3117_v37 = vld [vmem:[#allocation2 + $0x10f] ss:$16 sm:$0x30]  ;;  %v7208_v38 = vld [vmem:[#allocation2 + $0x18b] ss:$16 sm:$0x3]  ;;  %v7240_v17 = vor.u32 %v2963_v33, %v2962_v9  ;;  %v7242_v40 = vor.u32 %v3040_v10, %v3039_v29 }
 0x367   : > { %v7210_v58 = vld [vmem:[#allocation2 + $0x18b] ss:$16 sm:$0xc]  ;;  %v2685_v15 = vld [vmem:[#allocation3 + $0x109] ss:$16 sm:$0xc] }
 0x368   : > { %v2612_v8 = vld [vmem:[#allocation3 + $0x108] ss:$16 sm:$0xc0]  ;;  %8174 = vst [vmem:[#allocation39_spill] sm:$0xff] %v7214_v2  ;;  %8175 = vst [vmem:[#allocation40_spill] sm:$0xff] %v7216_v49  ;;  %v2816_v33 = vor.u32 %v7210_v58, %v7208_v38 }
 0x369   : > { %8176 = vst [vmem:[#allocation41_spill] sm:$0xff] %v7218_v39  ;;  %1859 = vst.msk [vmem:[#allocation3 + $0x1e0] sm:$0xff] %vm941_vm1, %v1843_v12  ;;  %v7222_v21 = vld [vmem:[#allocation2 + $0x186] ss:$16 sm:$0xc0]  ;;  %v7244_v12 = vor.u32 %v3117_v37, %v3116_v55  ;;  %v2613_v47 = vor.u32 %v2612_v8, %v2611_v0 }
 0x36a   : > { %8178 = vst [vmem:[#allocation42_spill] sm:$0xff] %v7222_v21  ;;  %v7224_v1 = vld [vmem:[#allocation2 + $0x187] ss:$16 sm:$0xc0]  ;;  %2556 = vst.msk [vmem:[#allocation4 + $0xf0] sm:$0xff] %vm941_vm1, %v2551_v35 }
 0x36b   : > { %8179 = vst [vmem:[#allocation43_spill] sm:$0xff] %v7224_v1  ;;  %v7226_v41 = vld [vmem:[#allocation2 + $0x188] ss:$16 sm:$0xc0]  ;;  %8182 = vst [vmem:[#allocation46_spill] sm:$0xff] %v7244_v12  ;;  %v2628_v37 = vadd.f32 %v2624_v3, %v2613_v47 }
 0x36c   : > { %8180 = vst [vmem:[#allocation44_spill] sm:$0xff] %v7226_v41  ;;  %v7232_v13 = vld [vmem:[#allocation2 + $0x18c] ss:$16 sm:$0x3]  ;;  %8184 = vst [vmem:[#allocation47_spill] sm:$0xff] %v7256_v22 }
 0x36d   : > { %v7234_v24 = vld [vmem:[#allocation2 + $0x18c] ss:$16 sm:$0xc]  ;;  %v2684_v26 = vld [vmem:[#allocation3 + $0x109] ss:$16 sm:$0x3] }
 0x36e   : > { %v2687_v34 = vld [vmem:[#allocation3 + $0x109] ss:$16 sm:$0x30]  ;;  %v2740_v16 = vld [vmem:[#allocation2 + $0x18a] ss:$16 sm:$0x30]  ;;  %v2686_v46 = vor.u32 %v2685_v15, %v2684_v26  ;;  %v2893_v38 = vor.u32 %v7234_v24, %v7232_v13 }
 0x36f   : > { %v7236_v56 = vld [vmem:[#allocation2 + $0x189] ss:$16 sm:$0xc0]  ;;  %v7246_v18 = vld [vmem:[#allocation4 + $0x8] ss:$32 sm:$0x2]  ;;  %v7286_v2 = vor.u32 %v2740_v16, %v2739_v32 }
 0x370   : > { %8181 = vst [vmem:[#allocation45_spill] sm:$0xff] %v7236_v56  ;;  %v7248_v7 = vld [vmem:[#allocation4 + $0x9] ss:$32 sm:$0x2]  ;;  %v2688_v51 = vor.u32 %v2687_v34, %v2686_v46  ;;  %2633 = vst.msk [vmem:[#allocation4 + $0x110] sm:$0xff] %vm941_vm1, %v2628_v37  ;;  %v8187_v34 = vor.u32 %v7083_v48, %v7077_v6  ;;  %v7324_v48 = vpop.permute.xlu1 %3782 }
 0x371   : > { %v7258_v9 = vld [vmem:[#allocation2 + $0x10b] ss:$16 sm:$0xc0]  ;;  %v7260_v29 = vld [vmem:[#allocation2 + $0x10c] ss:$16 sm:$0xc0] }
 0x372   : > { %v7262_v55 = vld [vmem:[#allocation2 + $0x10d] ss:$16 sm:$0xc0]  ;;  %v7264_v57 = vld [vmem:[#allocation2 + $0x10e] ss:$16 sm:$0xc0]  ;;  %v2701_v3 = vmul.f32 %v8187_v34, %v2628_v37 }
 0x373   : > { %v7268_v10 = vld [vmem:[#allocation4 + $0xa] ss:$32 sm:$0x2]  ;;  %v7270_v19 = vld [vmem:[#allocation4 + $0xb] ss:$32 sm:$0x2] }
 0x374   : > { %v7272_v27 = vld [vmem:[#allocation4 + $0xc] ss:$32 sm:$0x2]  ;;  %v2689_v25 = vld [vmem:[#allocation3 + $0x109] ss:$16 sm:$0xc0] }
 0x375   : > { %v7280_v0 = vld [vmem:[#allocation2 + $0x10f] ss:$16 sm:$0xc0]  ;;  %v2817_v35 = vld [vmem:[#allocation2 + $0x18b] ss:$16 sm:$0x30]  ;;  %v2690_v39 = vor.u32 %v2689_v25, %v2688_v51 }
 0x376   : > { %v3526_v58 = vld [vmem:[#allocation4 + $0x8] ss:$32 sm:$0x1]  ;;  %v3570_v63 = vld [vmem:[#allocation4 + $0x9] ss:$32 sm:$0x1]  ;;  %v7314_v32 = vor.u32 %v2817_v35, %v2816_v33 }
 0x377   : > { %v3529_v26 = vld [vmem:[#allocation4 + $0x8] ss:$32 sm:$0x4]  ;;  %v3573_v22 = vld [vmem:[#allocation4 + $0x9] ss:$32 sm:$0x4]  ;;  %v3528_v56 = vor.u32 %v7246_v18, %v3526_v58  ;;  %v3572_v30 = vor.u32 %v7248_v7, %v3570_v63  ;;  %v2705_v16 = vadd.f32 %v2701_v3, %v2690_v39 }
 0x378   : > { %v2761_v61 = vld [vmem:[#allocation3 + $0x10a] ss:$16 sm:$0x3]  ;;  %8185 = vst [vmem:[#allocation48_spill] sm:$0xff] %v7286_v2  ;;  %8188 = vst [vmem:[#allocation50_spill] sm:$0xff] %v7314_v32 }
 0x379   : > { %v2762_v36 = vld [vmem:[#allocation3 + $0x10a] ss:$16 sm:$0xc]  ;;  %v2894_v8 = vld [vmem:[#allocation2 + $0x18c] ss:$16 sm:$0x30]  ;;  %v3574_v32 = vor.u32 %v3573_v22, %v3572_v30  ;;  %v8191_v30 = vor.u32 %v7095_v4, %v7085_v20 }
 0x37a   : > { %v7288_v49 = vld [vmem:[#allocation2 + $0x18d] ss:$16 sm:$0x3]  ;;  %v3614_v1 = vld [vmem:[#allocation4 + $0xa] ss:$32 sm:$0x1]  ;;  %v2763_v6 = vor.u32 %v2762_v36, %v2761_v61  ;;  %v7326_v42 = vor.u32 %v2894_v8, %v2893_v38  ;;  %v3530_v61 = vor.u32 %v3529_v26, %v3528_v56 }
 0x37b   : > { %8186 = vst [vmem:[#allocation49_spill] sm:$0xff] %v7288_v49  ;;  %v7290_v41 = vld [vmem:[#allocation2 + $0x18d] ss:$16 sm:$0xc]  ;;  %8189 = vst [vmem:[#allocation51_spill] sm:$0xff] %v7324_v48  ;;  %v3616_v37 = vor.u32 %v7268_v10, %v3614_v1  ;;  %v2778_v56 = vmul.f32 %v8191_v30, %v2705_v16  ;;  %v7363_v10 = vpop.permute.xlu1 %4046 }
 0x37c   : > { %v3617_v13 = vld [vmem:[#allocation4 + $0xa] ss:$32 sm:$0x4]  ;;  %v3658_v24 = vld [vmem:[#allocation4 + $0xb] ss:$32 sm:$0x1] }
 0x37d   : > { %v3661_v62 = vld [vmem:[#allocation4 + $0xb] ss:$32 sm:$0x4]  ;;  %v3702_v21 = vld [vmem:[#allocation4 + $0xc] ss:$32 sm:$0x1]  ;;  %v3660_v33 = vor.u32 %v7270_v19, %v3658_v24 }
 0x37e   : > { %v3705_v43 = vld [vmem:[#allocation4 + $0xc] ss:$32 sm:$0x4]  ;;  %v7300_v46 = vld [vmem:[#allocation4 + $0x8] ss:$32 sm:$0x8]  ;;  %v3704_v18 = vor.u32 %v7272_v27, %v3702_v21  ;;  %v3618_v21 = vor.u32 %v3617_v13, %v3616_v37 }
 0x37f   : > { %v7302_v47 = vld [vmem:[#allocation3 + $0x10b] ss:$16 sm:$0xc]  ;;  %v7304_v15 = vld [vmem:[#allocation3 + $0x10c] ss:$16 sm:$0xc]  ;;  %v3662_v27 = vor.u32 %v3661_v62, %v3660_v33  ;;  %v3532_v26 = vor.u32 %v7300_v46, %v3530_v61 }
 0x380   : > { %v2764_v2 = vld [vmem:[#allocation3 + $0x10a] ss:$16 sm:$0x30]  ;;  %v3575_v31 = vld [vmem:[#allocation4 + $0x9] ss:$32 sm:$0x8] }
 0x381   : > { %v7318_v51 = vld [vmem:[#allocation4 + $0xa] ss:$32 sm:$0x8]  ;;  %v7320_v25 = vld [vmem:[#allocation4 + $0xb] ss:$32 sm:$0x8]  ;;  %v2765_v1 = vor.u32 %v2764_v2, %v2763_v6 }
 0x382   : > { %v7322_v14 = vld [vmem:[#allocation4 + $0xc] ss:$32 sm:$0x8]  ;;  %8190 = vst [vmem:[#allocation52_spill] sm:$0xff] %v7326_v42  ;;  %v3706_v42 = vor.u32 %v3705_v43, %v3704_v18  ;;  %2710 = vst.msk [vmem:[#allocation4 + $0x130] sm:$0xff] %vm941_vm1, %v2705_v16  ;;  %v8192_v2 = vld [vmem:[#allocation16_spill] sm:$0xff]  ;;  %v3576_v16 = vor.u32 %v3575_v31, %v3574_v32  ;;  %v3620_v33 = vor.u32 %v7318_v51, %v3618_v21 }
 0x383   : > { %v2838_v35 = vld [vmem:[#allocation3 + $0x10b] ss:$16 sm:$0x3]  ;;  %v7331_v7 = vld [vmem:[#allocation3 + $0x10c] ss:$16 sm:$0x3]  ;;  %3250 = vperm.xlu1 %5383, %v8192_v2   ;;  %v3664_v18 = vor.u32 %v7320_v25, %v3662_v27 }
 0x384   : > { %v7333_v58 = vld [vmem:[#allocation3 + $0x10d] ss:$16 sm:$0xc]  ;;  %v7335_v63 = vld [vmem:[#allocation3 + $0x10e] ss:$16 sm:$0xc]  ;;  %v2840_v6 = vor.u32 %v7302_v47, %v2838_v35  ;;  %v2917_v20 = vor.u32 %v7304_v15, %v7331_v7  ;;  %v3708_v46 = vor.u32 %v7322_v14, %v3706_v42 }
 0x385   : > { %v2766_v34 = vld [vmem:[#allocation3 + $0x10a] ss:$16 sm:$0xc0]  ;;  %v3533_v36 = vld [vmem:[#allocation4 + $0x8] ss:$32 sm:$0x10] }
 0x386   : > { %v3577_v8 = vld [vmem:[#allocation4 + $0x9] ss:$32 sm:$0x10]  ;;  %v7337_v38 = vld [vmem:[#allocation3 + $0x10f] ss:$16 sm:$0xc]  ;;  %v2767_v4 = vor.u32 %v2766_v34, %v2765_v1  ;;  %v7371_v7 = vor.u32 %v3533_v36, %v3532_v26  ;;  %v8194_v26 = vor.u32 %v7258_v9, %v7230_v45 }
 0x387   : > { %v3621_v19 = vld [vmem:[#allocation4 + $0xa] ss:$32 sm:$0x10]  ;;  %v3665_v24 = vld [vmem:[#allocation4 + $0xb] ss:$32 sm:$0x10]  ;;  %v7373_v25 = vor.u32 %v3577_v8, %v3576_v16  ;;  %5384 = vset.pattern.permute.xlu1 %v8129_v60 }
 0x388   : > { %v7341_v48 = vld [vmem:[#allocation3 + $0x10d] ss:$16 sm:$0x3]  ;;  %v7343_v12 = vld [vmem:[#allocation3 + $0x10e] ss:$16 sm:$0x3]  ;;  %v2782_v51 = vadd.f32 %v2778_v56, %v2767_v4  ;;  %3210 = vperm.xlu1 %5384, %v6097_v52  }
 0x389   : > { %v2841_v39 = vld [vmem:[#allocation3 + $0x10b] ss:$16 sm:$0x30]  ;;  %v2001_v22 = vld [vmem:[#allocation3 + $0x180] ss:$16 sm:$0xc]  ;;  %v2994_v47 = vor.u32 %v7333_v58, %v7341_v48  ;;  %v3071_v15 = vor.u32 %v7335_v63, %v7343_v12  ;;  %v7378_v12 = vor.u32 %v3621_v19, %v3620_v33  ;;  %v7380_v58 = vor.u32 %v3665_v24, %v3664_v18 }
 0x38a   : > { %v7351_v13 = vld [vmem:[#allocation4 + $0x8] ss:$32 sm:$0x20]  ;;  %v7353_v62 = vld [vmem:[#allocation4 + $0x9] ss:$32 sm:$0x20]  ;;  %v2842_v35 = vor.u32 %v2841_v39, %v2840_v6  ;;  %v2855_v6 = vmul.f32 %v8194_v26, %v2782_v51  ;;  %v7399_v26 = vpop.permute.xlu1 %4310 }
 0x38b   : > { %v3709_v43 = vld [vmem:[#allocation4 + $0xc] ss:$32 sm:$0x10]  ;;  %v7355_v3 = vld [vmem:[#allocation3 + $0x10f] ss:$16 sm:$0x3] }
 0x38c   : > { %v2000_v37 = vld [vmem:[#allocation3 + $0x180] ss:$16 sm:$0x3]  ;;  %v2918_v61 = vld [vmem:[#allocation3 + $0x10c] ss:$16 sm:$0x30]  ;;  %v7393_v24 = vor.u32 %v3709_v43, %v3708_v46  ;;  %5386 = vset.pattern.permute.xlu1 %v8161_v23 }
 0x38d   : > { %v2843_v30 = vld [vmem:[#allocation3 + $0x10b] ss:$16 sm:$0xc0]  ;;  %8193 = vst [vmem:[#allocation16_spill] sm:$0xff] %v7363_v10  ;;  %v2002_v27 = vor.u32 %v2001_v22, %v2000_v37  ;;  %2787 = vst.msk [vmem:[#allocation4 + $0x150] sm:$0xff] %vm941_vm1, %v2782_v51  ;;  %v2919_v33 = vor.u32 %v2918_v61, %v2917_v20  ;;  %3294 = vperm.xlu1 %5386, %v8192_v2  }
 0x38e   : > { %v7365_v49 = vld [vmem:[#allocation4 + $0xa] ss:$32 sm:$0x20]  ;;  %v2995_v31 = vld [vmem:[#allocation3 + $0x10d] ss:$16 sm:$0x30]  ;;  %v2844_v8 = vor.u32 %v2843_v30, %v2842_v35 }
 0x38f   : > { %v2003_v32 = vld [vmem:[#allocation3 + $0x180] ss:$16 sm:$0x30]  ;;  %v3542_v42 = vld [vmem:[#allocation4 + $0x108] ss:$32 sm:$0x1]  ;;  %v7403_v43 = vor.u32 %v2995_v31, %v2994_v47  ;;  %v8196_v47 = vor.u32 %v7260_v29, %v7238_v53 }
 0x390   : > { %v3543_v34 = vld [vmem:[#allocation4 + $0x108] ss:$32 sm:$0x2]  ;;  %v3586_v1 = vld [vmem:[#allocation4 + $0x109] ss:$32 sm:$0x1]  ;;  %v2004_v16 = vor.u32 %v2003_v32, %v2002_v27  ;;  %v2859_v51 = vadd.f32 %v2855_v6, %v2844_v8 }
 0x391   : > { %v3587_v21 = vld [vmem:[#allocation4 + $0x109] ss:$32 sm:$0x2]  ;;  %v2077_v48 = vld [vmem:[#allocation3 + $0x181] ss:$16 sm:$0xc]  ;;  %v3544_v18 = vor.u32 %v3543_v34, %v3542_v42  ;;  %3298 = vperm.xlu1 %5386, %v6097_v52  }
 0x392   : > { %v7382_v63 = vld [vmem:[#allocation4 + $0xb] ss:$32 sm:$0x20]  ;;  %v3072_v36 = vld [vmem:[#allocation3 + $0x10e] ss:$16 sm:$0x30]  ;;  %v3588_v30 = vor.u32 %v3587_v21, %v3586_v1  ;;  %v2932_v31 = vmul.f32 %v8196_v47, %v2859_v51 }
 0x393   : > { %v2920_v39 = vld [vmem:[#allocation3 + $0x10c] ss:$16 sm:$0xc0]  ;;  %v2076_v56 = vld [vmem:[#allocation3 + $0x181] ss:$16 sm:$0x3] }
 0x394   : > { %v3545_v22 = vld [vmem:[#allocation4 + $0x108] ss:$32 sm:$0x4]  ;;  %v3589_v4 = vld [vmem:[#allocation4 + $0x109] ss:$32 sm:$0x4]  ;;  %v2078_v10 = vor.u32 %v2077_v48, %v2076_v56  ;;  %v2921_v27 = vor.u32 %v2920_v39, %v2919_v33  ;;  %v7412_v56 = vor.u32 %v3072_v36, %v3071_v15  ;;  %v7414_v39 = vpop.permute.xlu0 %3650 }
 0x395   : > { %v7395_v37 = vld [vmem:[#allocation3 + $0x10d] ss:$16 sm:$0xc0]  ;;  %v7397_v45 = vld [vmem:[#allocation4 + $0x10a] ss:$32 sm:$0x2]  ;;  %v3546_v42 = vor.u32 %v3545_v22, %v3544_v18  ;;  %v3590_v34 = vor.u32 %v3589_v4, %v3588_v30  ;;  %5388 = vset.pattern.permute.xlu1 %v8131_v5 }
 0x396   : > { %v2079_v9 = vld [vmem:[#allocation3 + $0x181] ss:$16 sm:$0x30]  ;;  %v2005_v35 = vld [vmem:[#allocation3 + $0x180] ss:$16 sm:$0xc0]  ;;  %v2998_v23 = vor.u32 %v7395_v37, %v7403_v43  ;;  %v2936_v15 = vadd.f32 %v2932_v31, %v2921_v27  ;;  %3342 = vperm.xlu1 %5388, %v6097_v52  }
 0x397   : > { %8195 = vst [vmem:[#allocation53_spill] sm:$0xff] %v7399_v26  ;;  %v3547_v46 = vld [vmem:[#allocation4 + $0x108] ss:$32 sm:$0x8]  ;;  %v2006_v32 = vor.u32 %v2005_v35, %v2004_v16  ;;  %2864 = vst.msk [vmem:[#allocation4 + $0x170] sm:$0xff] %vm941_vm1, %v2859_v51  ;;  %v2080_v33 = vor.u32 %v2079_v9, %v2078_v10 }
 0x398   : > { %v3591_v60 = vld [vmem:[#allocation4 + $0x109] ss:$32 sm:$0x8]  ;;  %v3675_v14 = vld [vmem:[#allocation4 + $0x10b] ss:$32 sm:$0x2]  ;;  %v3548_v53 = vor.u32 %v3547_v46, %v3546_v42 }
 0x399   : > { %v2154_v20 = vld [vmem:[#allocation3 + $0x182] ss:$16 sm:$0xc]  ;;  %v3149_v61 = vld [vmem:[#allocation3 + $0x10f] ss:$16 sm:$0x30]  ;;  %v2014_v30 = vadd.f32 %v7052_v44, %v2006_v32  ;;  %v3592_v29 = vor.u32 %v3591_v60, %v3590_v34  ;;  %v8197_v44 = vor.u32 %v7106_v11, %v7098_v54  ;;  %v7425_v60 = vpop.permute.xlu1 %3822  ;;  %v8199_v54 = vor.u32 %v7337_v38, %v7355_v3 }
 0x39a   : > { %v3630_v1 = vld [vmem:[#allocation4 + $0x10a] ss:$32 sm:$0x1]  ;;  %v2153_v8 = vld [vmem:[#allocation3 + $0x182] ss:$16 sm:$0x3] }
 0x39b   : > { %v3633_v21 = vld [vmem:[#allocation4 + $0x10a] ss:$32 sm:$0x4]  ;;  %v2081_v6 = vld [vmem:[#allocation3 + $0x181] ss:$16 sm:$0xc0]  ;;  %v3632_v48 = vor.u32 %v7397_v45, %v3630_v1  ;;  %v2155_v26 = vor.u32 %v2154_v20, %v2153_v8  ;;  %v2086_v9 = vmul.f32 %v8197_v44, %v2014_v30  ;;  %v8198_v20 = vor.u32 %v7262_v55, %v7240_v17 }
 0x39c   : > { %v3549_v22 = vld [vmem:[#allocation4 + $0x108] ss:$32 sm:$0x10]  ;;  %v3593_v4 = vld [vmem:[#allocation4 + $0x109] ss:$32 sm:$0x10]  ;;  %v2082_v10 = vor.u32 %v2081_v6, %v2080_v33  ;;  %v7436_v11 = vor.u32 %v3149_v61, %v8199_v54  ;;  %v7445_v61 = vpop.permute.xlu0 %3998 }
 0x39d   : > { %v3674_v16 = vld [vmem:[#allocation4 + $0x10b] ss:$32 sm:$0x1]  ;;  %v3635_v35 = vld [vmem:[#allocation4 + $0x10a] ss:$32 sm:$0x8]  ;;  %v3550_v32 = vor.u32 %v3549_v22, %v3548_v53  ;;  %v3594_v37 = vor.u32 %v3593_v4, %v3592_v29  ;;  %v3009_v1 = vmul.f32 %v8198_v20, %v2936_v15  ;;  %v3634_v31 = vor.u32 %v3633_v21, %v3632_v48 }
 0x39e   : > { %v3677_v18 = vld [vmem:[#allocation4 + $0x10b] ss:$32 sm:$0x4]  ;;  %v2156_v51 = vld [vmem:[#allocation3 + $0x182] ss:$16 sm:$0x30]  ;;  %v3676_v42 = vor.u32 %v3675_v14, %v3674_v16  ;;  %v2090_v14 = vadd.f32 %v2086_v9, %v2082_v10  ;;  %v8200_v48 = vor.u32 %v7108_v59, %v7100_v28 }
 0x39f   : > { %v3551_v36 = vld [vmem:[#allocation4 + $0x108] ss:$32 sm:$0x20]  ;;  %v3595_v47 = vld [vmem:[#allocation4 + $0x109] ss:$32 sm:$0x20]  ;;  %v2157_v22 = vor.u32 %v2156_v51, %v2155_v26  ;;  %v3013_v29 = vadd.f32 %v3009_v1, %v2998_v23  ;;  %v3636_v38 = vor.u32 %v3635_v35, %v3634_v31  ;;  %v8201_v35 = vor.u32 %v7264_v57, %v7242_v40 }
 0x3a0   : > { %v3074_v19 = vld [vmem:[#allocation3 + $0x10e] ss:$16 sm:$0xc0]  ;;  %2018 = vst.msk [vmem:[#allocation4 + $0x18] sm:$0xff] %vm941_vm1, %v2014_v30  ;;  %2941 = vst.msk [vmem:[#allocation4 + $0x190] sm:$0xff] %vm941_vm1, %v2936_v15  ;;  %v3552_v4 = vor.u32 %v3551_v36, %v3550_v32  ;;  %v3596_v16 = vor.u32 %v3595_v47, %v3594_v37  ;;  %v3678_v30 = vor.u32 %v3677_v18, %v3676_v42  ;;  %v8202_v40 = vld [vmem:[#allocation17_spill] sm:$0xff] }
 0x3a1   : > { %v2231_v46 = vld [vmem:[#allocation3 + $0x183] ss:$16 sm:$0xc]  ;;  %v3637_v43 = vld [vmem:[#allocation4 + $0x10a] ss:$32 sm:$0x10]  ;;  %v2163_v18 = vmul.f32 %v8200_v48, %v2090_v14  ;;  %v3075_v47 = vor.u32 %v3074_v19, %v7412_v56  ;;  %v3086_v9 = vmul.f32 %v8201_v35, %v3013_v29 }
 0x3a2   : > { %v7427_v34 = vld [vmem:[#allocation4 + $0x10b] ss:$32 sm:$0x8]  ;;  %v2230_v27 = vld [vmem:[#allocation3 + $0x183] ss:$16 sm:$0x3]  ;;  %v3638_v32 = vor.u32 %v3637_v43, %v3636_v38 }
 0x3a3   : > { %v2158_v45 = vld [vmem:[#allocation3 + $0x182] ss:$16 sm:$0xc0]  ;;  %v3553_v8 = vld [vmem:[#allocation4 + $0x108] ss:$32 sm:$0x40]  ;;  %v2232_v26 = vor.u32 %v2231_v46, %v2230_v27  ;;  %v1643_v46 = vpop.permute.xlu1 %1642  ;;  %v3680_v42 = vor.u32 %v7427_v34, %v3678_v30  ;;  %v3090_v54 = vadd.f32 %v3086_v9, %v3075_v47 }
 0x3a4   : > { %v3597_v6 = vld [vmem:[#allocation4 + $0x109] ss:$32 sm:$0x40]  ;;  %v3639_v33 = vld [vmem:[#allocation4 + $0x10a] ss:$32 sm:$0x20]  ;;  %v2159_v21 = vor.u32 %v2158_v45, %v2157_v22  ;;  %v3554_v23 = vor.u32 %v3553_v8, %v3552_v4  ;;  %v1670_v57 = vmul.f32 %v1643_v46, %v8202_v40 }
 0x3a5   : > { %v2233_v53 = vld [vmem:[#allocation3 + $0x183] ss:$16 sm:$0x30]  ;;  %v3537_v17 = vld [vmem:[#allocation4 + $0x8] ss:$32 sm:$0x40]  ;;  %v3598_v36 = vor.u32 %v3597_v6, %v3596_v16  ;;  %v3640_v43 = vor.u32 %v3639_v33, %v3638_v32 }
 0x3a6   : > { %v7439_v55 = vld [vmem:[#allocation4 + $0x108] ss:$32 sm:$0x80]  ;;  %v7441_v15 = vld [vmem:[#allocation4 + $0x109] ss:$32 sm:$0x80]  ;;  %v2234_v59 = vor.u32 %v2233_v53, %v2232_v26  ;;  %v2167_v27 = vadd.f32 %v2163_v18, %v2159_v21  ;;  %v8205_v53 = vor.u32 %v7351_v13, %v7371_v7 }
 0x3a7   : > { %v7443_v3 = vld [vmem:[#allocation3 + $0x10f] ss:$16 sm:$0xc0]  ;;  %2095 = vst.msk [vmem:[#allocation4 + $0x38] sm:$0xff] %vm941_vm1, %v2090_v14  ;;  %3018 = vst.msk [vmem:[#allocation4 + $0x1b0] sm:$0xff] %vm941_vm1, %v3013_v29  ;;  %v3556_v19 = vor.u32 %v7439_v55, %v3554_v23  ;;  %v3600_v56 = vor.u32 %v7441_v15, %v3598_v36  ;;  %v7488_v47 = vpop.permute.xlu1 %3826 }
 0x3a8   : > { %v2308_v51 = vld [vmem:[#allocation3 + $0x184] ss:$16 sm:$0xc]  ;;  %v2235_v44 = vld [vmem:[#allocation3 + $0x183] ss:$16 sm:$0xc0]  ;;  %v7471_v29 = vor.u32 %v3537_v17, %v8205_v53  ;;  %v3152_v15 = vor.u32 %v7443_v3, %v7436_v11 }
 0x3a9   : > { %v2307_v10 = vld [vmem:[#allocation3 + $0x184] ss:$16 sm:$0x3]  ;;  %v3641_v37 = vld [vmem:[#allocation4 + $0x10a] ss:$32 sm:$0x40]  ;;  %v2236_v5 = vor.u32 %v2235_v44, %v2234_v59 }
 0x3aa   : > { %v3681_v28 = vld [vmem:[#allocation4 + $0x10b] ss:$32 sm:$0x10]  ;;  %v3581_v45 = vld [vmem:[#allocation4 + $0x9] ss:$32 sm:$0x40]  ;;  %v2309_v6 = vor.u32 %v2308_v51, %v2307_v10  ;;  %v7484_v13 = vor.u32 %v3641_v37, %v3640_v43  ;;  %v7486_v51 = vpop.permute.xlu0 %4354 }
 0x3ab   : > { %v2310_v20 = vld [vmem:[#allocation3 + $0x184] ss:$16 sm:$0x30]  ;;  %v3719_v1 = vld [vmem:[#allocation4 + $0x10c] ss:$32 sm:$0x2]  ;;  %v3682_v7 = vor.u32 %v3681_v28, %v3680_v42  ;;  %v8212_v42 = vor.u32 %v7353_v62, %v7373_v25 }
 0x3ac   : > { %v7462_v8 = vld [vmem:[#allocation4 + $0x10a] ss:$32 sm:$0x80]  ;;  %v3683_v34 = vld [vmem:[#allocation4 + $0x10b] ss:$32 sm:$0x20]  ;;  %v2311_v23 = vor.u32 %v2310_v20, %v2309_v6 }
 0x3ad   : > { %2172 = vst.msk [vmem:[#allocation4 + $0x58] sm:$0xff] %vm941_vm1, %v2167_v27  ;;  %v8203_v31 = vld [vmem:[#allocation6_spill] sm:$0xff]  ;;  %v2385_v30 = vld [vmem:[#allocation3 + $0x185] ss:$16 sm:$0xc]  ;;  %3095 = vst.msk [vmem:[#allocation4 + $0x1d0] sm:$0xff] %vm941_vm1, %v3090_v54  ;;  %v3582_v28 = vor.u32 %v3581_v45, %v8212_v42  ;;  %v3684_v62 = vor.u32 %v3683_v34, %v3682_v7  ;;  %v7511_v7 = vpop.permute.xlu1 %4090 }
 0x3ae   : > { %v8204_v22 = vor.u32 %v7110_v50, %v8203_v31  ;;  %v3718_v4 = vld [vmem:[#allocation4 + $0x10c] ss:$32 sm:$0x1]  ;;  %v7473_v33 = vld [vmem:[#allocation4 + $0x8] ss:$32 sm:$0x80] }
 0x3af   : > { %v3721_v16 = vld [vmem:[#allocation4 + $0x10c] ss:$32 sm:$0x4]  ;;  %v7475_v55 = vld [vmem:[#allocation4 + $0x9] ss:$32 sm:$0x80]  ;;  %v3720_v21 = vor.u32 %v3719_v1, %v3718_v4 }
 0x3b0   : > { %v2240_v14 = vmul.f32 %v8204_v22, %v2167_v27  ;;  %v2384_v38 = vld [vmem:[#allocation3 + $0x185] ss:$16 sm:$0x3]  ;;  %v2312_v26 = vld [vmem:[#allocation3 + $0x184] ss:$16 sm:$0xc0]  ;;  %v3644_v22 = vor.u32 %v7462_v8, %v7484_v13 }
 0x3b1   : > { %v8206_v50 = vld [vmem:[#allocation46_spill] sm:$0xff]  ;;  %1680 = vst.msk [vmem:[#allocation3 + $0x48] sm:$0xff] %vm941_vm1, %v1670_v57  ;;  %8208 = vst [vmem:[#allocation17_spill] sm:$0xff] %v7486_v51  ;;  %v2387_v36 = vld [vmem:[#allocation3 + $0x185] ss:$16 sm:$0x30]  ;;  %v3722_v46 = vor.u32 %v3721_v16, %v3720_v21  ;;  %v2386_v1 = vor.u32 %v2385_v30, %v2384_v38  ;;  %v3540_v16 = vor.u32 %v7473_v33, %v7471_v29  ;;  %v7518_v33 = vpop.permute.xlu0 %4174 }
 0x3b2   : > { %v8207_v48 = vor.u32 %v7280_v0, %v8206_v50  ;;  %v3685_v17 = vld [vmem:[#allocation4 + $0x10b] ss:$32 sm:$0x40]  ;;  %v2244_v11 = vadd.f32 %v2240_v14, %v2236_v5  ;;  %v3723_v3 = vld [vmem:[#allocation4 + $0x10c] ss:$32 sm:$0x8]  ;;  %v3584_v30 = vor.u32 %v7475_v55, %v3582_v28 }
 0x3b3   : > { %v3625_v10 = vld [vmem:[#allocation4 + $0xa] ss:$32 sm:$0x40]  ;;  %v8210_v9 = vld [vmem:[#allocation20_spill] sm:$0xff]  ;;  %v8211_v27 = vmov 12   ;;  %v3724_v14 = vor.u32 %v3723_v3, %v3722_v46  ;;  %v2388_v53 = vor.u32 %v2387_v36, %v2386_v1  ;;  %v3686_v8 = vor.u32 %v3685_v17, %v3684_v62  ;;  %v8217_v17 = vld [vmem:[#allocation37_spill] sm:$0xff] }
 0x3b4   : > { %v3163_v18 = vmul.f32 %v8207_v48, %v3090_v54  ;;  %v8209_v44 = vld [vmem:[#allocation18_spill] sm:$0xff]  ;;  %v3610_v0 = vmul.f32 %v8210_v9, %v3600_v56  ;;  %5389 = vset.pattern.permute.xlu1 %v8211_v27  ;;  %2249 = vst.msk [vmem:[#allocation4 + $0x78] sm:$0xff] %vm941_vm1, %v2244_v11  ;;  %v2313_v54 = vor.u32 %v2312_v26, %v2311_v23  ;;  %v2462_v31 = vld [vmem:[#allocation3 + $0x186] ss:$16 sm:$0xc] }
 0x3b5   : > { %v3566_v35 = vmul.f32 %v8209_v44, %v3556_v19  ;;  %v3725_v32 = vld [vmem:[#allocation4 + $0x10c] ss:$32 sm:$0x10]  ;;  %v3763_v59 = vld [vmem:[#allocation4 + $0x10d] ss:$32 sm:$0x2]  ;;  %3382 = vperm.xlu1 %5389, %v8192_v2   ;;  %v8216_v23 = vor.u32 %v7365_v49, %v7378_v12 }
 0x3b6   : > { %v3167_v37 = vadd.f32 %v3163_v18, %v3152_v15  ;;  %v7496_v20 = vld [vmem:[#allocation4 + $0x10b] ss:$32 sm:$0x80]  ;;  %v8214_v19 = vld [vmem:[#allocation23_spill] sm:$0xff]  ;;  %v3726_v18 = vor.u32 %v3725_v32, %v3724_v14  ;;  %v8218_v44 = vld [vmem:[#allocation36_spill] sm:$0xff]  ;;  %v8220_v32 = vmov 13  }
 0x3b7   : > { %v8213_v57 = vld [vmem:[#allocation34_spill] sm:$0xff]  ;;  %v2461_v25 = vld [vmem:[#allocation3 + $0x186] ss:$16 sm:$0x3]  ;;  %v3612_v50 = vadd.f32 %v3610_v0, %v3566_v35  ;;  %v7516_v29 = vor.u32 %v3625_v10, %v8216_v23  ;;  %v8219_v35 = vor.u32 %v8217_v17, %v8218_v44  ;;  %v3688_v10 = vor.u32 %v7496_v20, %v3686_v8 }
 0x3b8   : > { %v8215_v43 = vor.u32 %v8213_v57, %v8214_v19  ;;  %v3762_v6 = vld [vmem:[#allocation4 + $0x10d] ss:$32 sm:$0x1]  ;;  %v2389_v45 = vld [vmem:[#allocation3 + $0x185] ss:$16 sm:$0xc0]  ;;  %v8227_v17 = vor.u32 %v7382_v63, %v7380_v58 }
 0x3b9   : > { %v3765_v5 = vld [vmem:[#allocation4 + $0x10d] ss:$32 sm:$0x4]  ;;  %v3764_v4 = vor.u32 %v3763_v59, %v3762_v6  ;;  %3172 = vst.msk [vmem:[#allocation4 + $0x1f0] sm:$0xff] %vm941_vm1, %v3167_v37  ;;  %v2390_v3 = vor.u32 %v2389_v45, %v2388_v53  ;;  %5391 = vset.pattern.permute.xlu1 %v8220_v32  ;;  %v3654_v37 = vmul.f32 %v7414_v39, %v3644_v22  ;;  %v8222_v19 = vld [vmem:[#allocation25_spill] sm:$0xff] }
 0x3ba   : > { %v2317_v56 = vmul.f32 %v8215_v43, %v2244_v11  ;;  %v3727_v38 = vld [vmem:[#allocation4 + $0x10c] ss:$32 sm:$0x20]  ;;  %v3767_v26 = vld [vmem:[#allocation4 + $0x10d] ss:$32 sm:$0x8]  ;;  %v2463_v11 = vor.u32 %v2462_v31, %v2461_v25  ;;  %3426 = vperm.xlu1 %5391, %v8192_v2   ;;  %v3609_v43 = vmul.f32 %v8222_v19, %v3584_v30 }
 0x3bb   : > { %v7509_v21 = vld [vmem:[#allocation4 + $0xa] ss:$32 sm:$0x80]  ;;  %v3851_v34 = vld [vmem:[#allocation4 + $0x10f] ss:$32 sm:$0x2]  ;;  %v3766_v13 = vor.u32 %v3765_v5, %v3764_v4  ;;  %v3728_v28 = vor.u32 %v3727_v38, %v3726_v18  ;;  %v3656_v25 = vadd.f32 %v3654_v37, %v3612_v50 }
 0x3bc   : > { %v2321_v15 = vadd.f32 %v2317_v56, %v2313_v54  ;;  %v2464_v48 = vld [vmem:[#allocation3 + $0x186] ss:$16 sm:$0x30]  ;;  %v3850_v55 = vld [vmem:[#allocation4 + $0x10f] ss:$32 sm:$0x1]  ;;  %v3628_v14 = vor.u32 %v7509_v21, %v7516_v29 }
 0x3bd   : > { %v3853_v36 = vld [vmem:[#allocation4 + $0x10f] ss:$32 sm:$0x4]  ;;  %v3729_v0 = vld [vmem:[#allocation4 + $0x10c] ss:$32 sm:$0x40]  ;;  %v3768_v1 = vor.u32 %v3767_v26, %v3766_v13  ;;  %v2465_v56 = vor.u32 %v2464_v48, %v2463_v11  ;;  %v3852_v20 = vor.u32 %v3851_v34, %v3850_v55  ;;  %v7540_v48 = vpop.permute.xlu1 %3866 }
 0x3be   : > { %2326 = vst.msk [vmem:[#allocation4 + $0x98] sm:$0xff] %vm941_vm1, %v2321_v15  ;;  %v2394_v9 = vmul.f32 %v8219_v35, %v2321_v15  ;;  %v3769_v46 = vld [vmem:[#allocation4 + $0x10d] ss:$32 sm:$0x10]  ;;  %v8221_v54 = vld [vmem:[#allocation24_spill] sm:$0xff]  ;;  %v3730_v39 = vor.u32 %v3729_v0, %v3728_v28  ;;  %v8226_v34 = vld [vmem:[#allocation21_spill] sm:$0xff]  ;;  %3430 = vperm.xlu1 %5391, %v6097_v52  }
 0x3bf   : > { %v2539_v59 = vld [vmem:[#allocation3 + $0x187] ss:$16 sm:$0xc]  ;;  %v3669_v49 = vld [vmem:[#allocation4 + $0xb] ss:$32 sm:$0x40]  ;;  %v3565_v57 = vmul.f32 %v8221_v54, %v3540_v16  ;;  %v3770_v22 = vor.u32 %v3769_v46, %v3768_v1  ;;  %v3698_v18 = vmul.f32 %v8226_v34, %v3688_v10  ;;  %v3854_v13 = vor.u32 %v3853_v36, %v3852_v20 }
 0x3c0   : > { %v7525_v12 = vld [vmem:[#allocation4 + $0xc] ss:$32 sm:$0x20]  ;;  %v2538_v27 = vld [vmem:[#allocation3 + $0x187] ss:$16 sm:$0x3]  ;;  %v2398_v6 = vadd.f32 %v2394_v9, %v2390_v3  ;;  %v3670_v44 = vor.u32 %v3669_v49, %v8227_v17  ;;  %v7553_v9 = vpop.permute.xlu0 %4086 }
 0x3c1   : > { %v2466_v42 = vld [vmem:[#allocation3 + $0x186] ss:$16 sm:$0xc0]  ;;  %v3731_v5 = vld [vmem:[#allocation4 + $0x10c] ss:$32 sm:$0x80]  ;;  %v2540_v53 = vor.u32 %v2539_v59, %v2538_v27  ;;  %v3712_v35 = vor.u32 %v7525_v12, %v7393_v24  ;;  %v3611_v59 = vadd.f32 %v3609_v43, %v3565_v57  ;;  %v3700_v10 = vadd.f32 %v3698_v18, %v3656_v25 }
 0x3c2   : > { %v3771_v31 = vld [vmem:[#allocation4 + $0x10d] ss:$32 sm:$0x20]  ;;  %v7532_v62 = vld [vmem:[#allocation4 + $0xb] ss:$32 sm:$0x80]  ;;  %v2467_v15 = vor.u32 %v2466_v42, %v2465_v56  ;;  %v3732_v11 = vor.u32 %v3731_v5, %v3730_v39 }
 0x3c3   : > { %v2541_v45 = vld [vmem:[#allocation3 + $0x187] ss:$16 sm:$0x30]  ;;  %v3855_v4 = vld [vmem:[#allocation4 + $0x10f] ss:$32 sm:$0x8]  ;;  %v3772_v21 = vor.u32 %v3771_v31, %v3770_v22  ;;  %v3672_v1 = vor.u32 %v7532_v62, %v3670_v44 }
 0x3c4   : > { %v8223_v16 = vld [vmem:[#allocation42_spill] sm:$0xff]  ;;  %2403 = vst.msk [vmem:[#allocation4 + $0xb8] sm:$0xff] %vm941_vm1, %v2398_v6  ;;  %v2543_v55 = vld [vmem:[#allocation3 + $0x187] ss:$16 sm:$0xc0]  ;;  %v2542_v0 = vor.u32 %v2541_v45, %v2540_v53  ;;  %v3856_v37 = vor.u32 %v3855_v4, %v3854_v13  ;;  %v8233_v22 = vmov 14   ;;  %v7567_v4 = vpop.permute.xlu1 %4130 }
 0x3c5   : > { %v8224_v38 = vld [vmem:[#allocation38_spill] sm:$0xff]  ;;  %v8228_v49 = vld [vmem:[#allocation43_spill] sm:$0xff]  ;;  %5393 = vset.pattern.permute.xlu1 %v8233_v22  ;;  %v8236_v44 = vld [vmem:[#allocation44_spill] sm:$0xff] }
 0x3c6   : > { %v8225_v30 = vor.u32 %v8223_v16, %v8224_v38  ;;  %v3773_v8 = vld [vmem:[#allocation4 + $0x10d] ss:$32 sm:$0x40]  ;;  %v3713_v50 = vld [vmem:[#allocation4 + $0xc] ss:$32 sm:$0x40]  ;;  %v2544_v63 = vor.u32 %v2543_v55, %v2542_v0  ;;  %3474 = vperm.xlu1 %5393, %v6097_v52  }
 0x3c7   : > { %v2616_v23 = vld [vmem:[#allocation3 + $0x188] ss:$16 sm:$0xc]  ;;  %v7543_v29 = vld [vmem:[#allocation2 + $0x18e] ss:$16 sm:$0x3]  ;;  %v3774_v28 = vor.u32 %v3773_v8, %v3772_v21  ;;  %v3714_v53 = vor.u32 %v3713_v50, %v3712_v35 }
 0x3c8   : > { %v2471_v26 = vmul.f32 %v8225_v30, %v2398_v6  ;;  %v7545_v3 = vld [vmem:[#allocation2 + $0x18e] ss:$16 sm:$0xc]  ;;  %v3857_v36 = vld [vmem:[#allocation4 + $0x10f] ss:$32 sm:$0x10] }
 0x3c9   : > { %v3775_v32 = vld [vmem:[#allocation4 + $0x10d] ss:$32 sm:$0x80]  ;;  %v2615_v27 = vld [vmem:[#allocation3 + $0x188] ss:$16 sm:$0x3]  ;;  %v3858_v5 = vor.u32 %v3857_v36, %v3856_v37  ;;  %v3047_v30 = vor.u32 %v7545_v3, %v7543_v29 }
 0x3ca   : > { %v2475_v46 = vadd.f32 %v2471_v26, %v2467_v15  ;;  %v2618_v42 = vld [vmem:[#allocation3 + $0x188] ss:$16 sm:$0x30]  ;;  %v3859_v54 = vld [vmem:[#allocation4 + $0x10f] ss:$32 sm:$0x20]  ;;  %v2617_v58 = vor.u32 %v2616_v23, %v2615_v27  ;;  %v3776_v20 = vor.u32 %v3775_v32, %v3774_v28 }
 0x3cb   : > { %v8229_v19 = vld [vmem:[#allocation39_spill] sm:$0xff]  ;;  %v8231_v56 = vld [vmem:[#allocation26_spill] sm:$0xff]  ;;  %v3860_v8 = vor.u32 %v3859_v54, %v3858_v5  ;;  %v8237_v35 = vld [vmem:[#allocation40_spill] sm:$0xff]  ;;  %v8242_v5 = vmov 15  }
 0x3cc   : > { %v8230_v24 = vor.u32 %v8228_v49, %v8229_v19  ;;  %2480 = vst.msk [vmem:[#allocation4 + $0xd8] sm:$0xff] %vm941_vm1, %v2475_v46  ;;  %v3653_v6 = vmul.f32 %v8231_v56, %v3628_v14  ;;  %v2693_v57 = vld [vmem:[#allocation3 + $0x189] ss:$16 sm:$0xc]  ;;  %v2619_v38 = vor.u32 %v2618_v42, %v2617_v58  ;;  %v8234_v23 = vld [vmem:[#allocation51_spill] sm:$0xff]  ;;  %v8238_v36 = vor.u32 %v8236_v44, %v8237_v35  ;;  %v8239_v52 = vld [vmem:[#allocation49_spill] sm:$0xff] }
 0x3cd   : > { %v2620_v43 = vld [vmem:[#allocation3 + $0x188] ss:$16 sm:$0xc0]  ;;  %v2971_v45 = vld [vmem:[#allocation2 + $0x18d] ss:$16 sm:$0x30]  ;;  %v3786_v55 = vmul.f32 %v8234_v23, %v3776_v20  ;;  %v8240_v29 = vor.u32 %v7290_v41, %v8239_v52  ;;  %5394 = vset.pattern.permute.xlu1 %v8242_v5 }
 0x3ce   : > { %v2548_v12 = vmul.f32 %v8230_v24, %v2475_v46  ;;  %v8232_v31 = vld [vmem:[#allocation22_spill] sm:$0xff]  ;;  %v3655_v26 = vadd.f32 %v3653_v6, %v3611_v59  ;;  %v2621_v17 = vor.u32 %v2620_v43, %v2619_v38  ;;  %v8241_v32 = vld [vmem:[#allocation28_spill] sm:$0xff]  ;;  %3514 = vperm.xlu1 %5394, %v8192_v2   ;;  %v3939_v5 = vld [vmem:[#allocation4 + $0x111] ss:$32 sm:$0x2] }
 0x3cf   : > { %v3742_v25 = vmul.f32 %v8232_v31, %v3732_v11  ;;  %v7562_v39 = vld [vmem:[#allocation2 + $0x18f] ss:$16 sm:$0x3]  ;;  %v3715_v15 = vld [vmem:[#allocation4 + $0xc] ss:$32 sm:$0x80]  ;;  %v7573_v11 = vpop.permute.xlu0 %4442  ;;  %v7584_v3 = vor.u32 %v2971_v45, %v8240_v29  ;;  %v3697_v59 = vmul.f32 %v8241_v32, %v3672_v1 }
 0x3d0   : > { %v7564_v62 = vld [vmem:[#allocation2 + $0x18f] ss:$16 sm:$0xc]  ;;  %v2552_v14 = vadd.f32 %v2548_v12, %v2544_v63  ;;  %v2692_v34 = vld [vmem:[#allocation3 + $0x189] ss:$16 sm:$0x3] }
 0x3d1   : > { %v3861_v16 = vld [vmem:[#allocation4 + $0x10f] ss:$32 sm:$0x40]  ;;  %v2695_v18 = vld [vmem:[#allocation3 + $0x189] ss:$16 sm:$0x30]  ;;  %v3744_v13 = vadd.f32 %v3742_v25, %v3700_v10  ;;  %v2694_v50 = vor.u32 %v2693_v57, %v2692_v34  ;;  %v3716_v10 = vor.u32 %v3715_v15, %v3714_v53  ;;  %v3124_v6 = vor.u32 %v7564_v62, %v7562_v39  ;;  %v1811_v57 = vpop.permute.xlu1 %1810 }
 0x3d2   : > { %8235 = vst [vmem:[#allocation6_spill] sm:$0xff] %v7573_v11  ;;  %v7575_v21 = vld [vmem:[#allocation4 + $0x10f] ss:$32 sm:$0x80]  ;;  %v2625_v0 = vmul.f32 %v8238_v36, %v2552_v14  ;;  %2557 = vst.msk [vmem:[#allocation4 + $0xf8] sm:$0xff] %vm941_vm1, %v2552_v14  ;;  %v3862_v37 = vor.u32 %v3861_v16, %v3860_v8  ;;  %v3699_v43 = vadd.f32 %v3697_v59, %v3655_v26  ;;  %v8243_v15 = vld [vmem:[#allocation5_spill] sm:$0xff] }
 0x3d3   : > { %v3048_v46 = vld [vmem:[#allocation2 + $0x18e] ss:$16 sm:$0x30]  ;;  %v2769_v27 = vld [vmem:[#allocation3 + $0x18a] ss:$16 sm:$0x3]  ;;  %v7589_v58 = vadd.f32 %v3786_v55, %v3744_v13  ;;  %v2696_v19 = vor.u32 %v2695_v18, %v2694_v50  ;;  %v1838_v53 = vmul.f32 %v1811_v57, %v8202_v40 }
 0x3d4   : > { %v2770_v42 = vld [vmem:[#allocation3 + $0x18a] ss:$16 sm:$0xc]  ;;  %v2697_v28 = vld [vmem:[#allocation3 + $0x189] ss:$16 sm:$0xc0]  ;;  %v2629_v41 = vadd.f32 %v2625_v0, %v2621_v17  ;;  %v7601_v56 = vor.u32 %v3048_v46, %v3047_v30  ;;  %v3864_v31 = vor.u32 %v7575_v21, %v3862_v37  ;;  %v3871_v37 = vpop.permute.xlu0 %3870 }
 0x3d5   : > { %v7587_v54 = vld [vmem:[#allocation2 + $0x18a] ss:$16 sm:$0xc0]  ;;  %v7591_v63 = vld [vmem:[#allocation3 + $0x18b] ss:$16 sm:$0xc]  ;;  %v2771_v30 = vor.u32 %v2770_v42, %v2769_v27  ;;  %v2698_v8 = vor.u32 %v2697_v28, %v2696_v19 }
 0x3d6   : > { %v7593_v49 = vld [vmem:[#allocation3 + $0x18c] ss:$16 sm:$0xc]  ;;  %v7595_v24 = vld [vmem:[#allocation2 + $0x18b] ss:$16 sm:$0xc0] }
 0x3d7   : > { %v7597_v12 = vld [vmem:[#allocation2 + $0x18c] ss:$16 sm:$0xc0]  ;;  %v7599_v1 = vld [vmem:[#allocation2 + $0x18d] ss:$16 sm:$0xc0] }
 0x3d8   : > { %v7607_v25 = vld [vmem:[#allocation3 + $0x18d] ss:$16 sm:$0xc]  ;;  %v2772_v20 = vld [vmem:[#allocation3 + $0x18a] ss:$16 sm:$0x30] }
 0x3d9   : > { %v7609_v45 = vld [vmem:[#allocation2 + $0x18e] ss:$16 sm:$0xc0]  ;;  %v3125_v22 = vld [vmem:[#allocation2 + $0x18f] ss:$16 sm:$0x30] }
 0x3da   : > { %v8244_v16 = vld [vmem:[#allocation35_spill] sm:$0xff]  ;;  %v2846_v62 = vld [vmem:[#allocation3 + $0x18b] ss:$16 sm:$0x3]  ;;  %2634 = vst.msk [vmem:[#allocation4 + $0x118] sm:$0xff] %vm941_vm1, %v2629_v41  ;;  %v8245_v34 = vld [vmem:[#allocation45_spill] sm:$0xff] }
 0x3db   : > { %v7615_v38 = vmul.f32 %v8244_v16, %v8243_v15  ;;  %v7617_v39 = vld [vmem:[#allocation4 + $0x10] ss:$32 sm:$0x2]  ;;  %v7619_v14 = vld [vmem:[#allocation3 + $0x18c] ss:$16 sm:$0x3]  ;;  %v7647_v15 = vor.u32 %v3125_v22, %v3124_v6 }
 0x3dc   : > { %v7621_v26 = vld [vmem:[#allocation3 + $0x18e] ss:$16 sm:$0xc]  ;;  %v8246_v18 = vld [vmem:[#allocation41_spill] sm:$0xff]  ;;  %1848 = vst.msk [vmem:[#allocation3 + $0x68] sm:$0xff] %vm941_vm1, %v1838_v53 }
 0x3dd   : > { %v8247_v13 = vor.u32 %v8245_v34, %v8246_v18  ;;  %v8248_v2 = vld [vmem:[#allocation48_spill] sm:$0xff]  ;;  %v8249_v21 = vld [vmem:[#allocation29_spill] sm:$0xff]  ;;  %v7630_v17 = vld [vmem:[#allocation4 + $0x11] ss:$32 sm:$0x2]  ;;  %v7651_v34 = vmul.f32 %v3871_v37, %v3864_v31 }
 0x3de   : > { %v2743_v55 = vor.u32 %v7587_v54, %v8248_v2  ;;  %v3741_v50 = vmul.f32 %v8249_v21, %v3716_v10  ;;  %v7632_v44 = vld [vmem:[#allocation3 + $0x18d] ss:$16 sm:$0x3]  ;;  %v2849_v35 = vld [vmem:[#allocation3 + $0x18b] ss:$16 sm:$0x30]  ;;  %v2773_v54 = vor.u32 %v2772_v20, %v2771_v30  ;;  %v2925_v2 = vor.u32 %v7593_v49, %v7619_v14 }
 0x3df   : > { %v2702_v23 = vmul.f32 %v8247_v13, %v2629_v41  ;;  %v2774_v36 = vld [vmem:[#allocation3 + $0x18a] ss:$16 sm:$0xc0]  ;;  %v3895_v0 = vld [vmem:[#allocation4 + $0x110] ss:$32 sm:$0x2]  ;;  %v2848_v13 = vor.u32 %v7591_v63, %v2846_v62 }
 0x3e0   : > { %v8250_v52 = vld [vmem:[#allocation50_spill] sm:$0xff]  ;;  %v8251_v46 = vld [vmem:[#allocation52_spill] sm:$0xff]  ;;  %v3878_v10 = vld [vmem:[#allocation4 + $0x10] ss:$32 sm:$0x1]  ;;  %v7649_v16 = vadd.f32 %v3741_v50, %v3699_v43  ;;  %v3002_v43 = vor.u32 %v7607_v25, %v7632_v44  ;;  %v2775_v50 = vor.u32 %v2774_v36, %v2773_v54 }
 0x3e1   : > { %v3881_v27 = vld [vmem:[#allocation4 + $0x10] ss:$32 sm:$0x4]  ;;  %v7641_v42 = vld [vmem:[#allocation3 + $0x18e] ss:$16 sm:$0x3]  ;;  %v2706_v41 = vadd.f32 %v2702_v23, %v2698_v8  ;;  %v1895_v23 = vpop.permute.xlu1 %1894  ;;  %v3880_v14 = vor.u32 %v7617_v39, %v3878_v10 }
 0x3e2   : > { %v7643_v28 = vld [vmem:[#allocation3 + $0x18f] ss:$16 sm:$0xc]  ;;  %v2926_v19 = vld [vmem:[#allocation3 + $0x18c] ss:$16 sm:$0x30]  ;;  %v1922_v25 = vmul.f32 %v1895_v23, %v8202_v40 }
 0x3e3   : > { %v3922_v53 = vld [vmem:[#allocation4 + $0x11] ss:$32 sm:$0x1]  ;;  %v3894_v20 = vld [vmem:[#allocation4 + $0x110] ss:$32 sm:$0x1]  ;;  %v2779_v37 = vmul.f32 %v2743_v55, %v2706_v41  ;;  %v2850_v55 = vor.u32 %v2849_v35, %v2848_v13  ;;  %v3882_v39 = vor.u32 %v3881_v27, %v3880_v14 }
 0x3e4   : > { %v3925_v18 = vld [vmem:[#allocation4 + $0x11] ss:$32 sm:$0x4]  ;;  %v3897_v30 = vld [vmem:[#allocation4 + $0x110] ss:$32 sm:$0x4]  ;;  %v3896_v63 = vor.u32 %v3895_v0, %v3894_v20  ;;  %v3924_v36 = vor.u32 %v7630_v17, %v3922_v53  ;;  %v7677_v17 = vpop.permute.xlu0 %4222 }
 0x3e5   : > { %v8252_v8 = vld [vmem:[#allocation7_spill] sm:$0xff]  ;;  %v7658_v6 = vld [vmem:[#allocation3 + $0x18f] ss:$16 sm:$0x3]  ;;  %2711 = vst.msk [vmem:[#allocation4 + $0x138] sm:$0xff] %vm941_vm1, %v2706_v41  ;;  %v2783_v11 = vadd.f32 %v2779_v37, %v2775_v50  ;;  %1932 = vst.msk [vmem:[#allocation3 + $0x78] sm:$0xff] %vm941_vm1, %v1922_v25 }
 0x3e6   : > { %4668 = vrot.lane.b32.xlu1 %v8252_v8, %s5645_s29  ;;  %v3883_v21 = vld [vmem:[#allocation4 + $0x10] ss:$32 sm:$0x8]  ;;  %v3003_v31 = vld [vmem:[#allocation3 + $0x18d] ss:$16 sm:$0x30]  ;;  %v3079_v8 = vor.u32 %v7621_v26, %v7641_v42  ;;  %v3898_v0 = vor.u32 %v3897_v30, %v3896_v63  ;;  %v3156_v26 = vor.u32 %v7643_v28, %v7658_v6  ;;  %v7672_v42 = vor.u32 %v2926_v19, %v2925_v2 }
 0x3e7   : > { %v3080_v22 = vld [vmem:[#allocation3 + $0x18e] ss:$16 sm:$0x30]  ;;  %v3938_v49 = vld [vmem:[#allocation4 + $0x111] ss:$32 sm:$0x1]  ;;  %v3926_v53 = vor.u32 %v3925_v18, %v3924_v36  ;;  %v3884_v6 = vor.u32 %v3883_v21, %v3882_v39  ;;  %v7687_v50 = vor.u32 %v3003_v31, %v3002_v43 }
 0x3e8   : > { %v3941_v62 = vld [vmem:[#allocation4 + $0x111] ss:$32 sm:$0x4]  ;;  %v2851_v59 = vld [vmem:[#allocation3 + $0x18b] ss:$16 sm:$0xc0]  ;;  %v3940_v29 = vor.u32 %v3939_v5, %v3938_v49  ;;  %v7689_v37 = vor.u32 %v3080_v22, %v3079_v8 }
 0x3e9   : > { %v3927_v57 = vld [vmem:[#allocation4 + $0x11] ss:$32 sm:$0x8]  ;;  %v3899_v32 = vld [vmem:[#allocation4 + $0x110] ss:$32 sm:$0x8]  ;;  %v2852_v13 = vor.u32 %v2851_v59, %v2850_v55 }
 0x3ea   : > { %v3885_v44 = vld [vmem:[#allocation4 + $0x10] ss:$32 sm:$0x10]  ;;  %v3157_v54 = vld [vmem:[#allocation3 + $0x18f] ss:$16 sm:$0x30]  ;;  %v3942_v49 = vor.u32 %v3941_v62, %v3940_v29  ;;  %4670 = vrot.lane.b32.xlu1 %v7615_v38, %s5645_s29  ;;  %v3900_v28 = vor.u32 %v3899_v32, %v3898_v0  ;;  %v8254_v29 = vor.u32 %v7595_v24, %v8250_v52  ;;  %v3928_v32 = vor.u32 %v3927_v57, %v3926_v53 }
 0x3eb   : > { %v7668_v41 = vld [vmem:[#allocation3 + $0x18c] ss:$16 sm:$0xc0]  ;;  %v3943_v20 = vld [vmem:[#allocation4 + $0x111] ss:$32 sm:$0x8]  ;;  %v3886_v51 = vor.u32 %v3885_v44, %v3884_v6  ;;  %v8255_v44 = vor.u32 %v7597_v12, %v8251_v46 }
 0x3ec   : > { %v3929_v10 = vld [vmem:[#allocation4 + $0x11] ss:$32 sm:$0x10]  ;;  %v3901_v5 = vld [vmem:[#allocation4 + $0x110] ss:$32 sm:$0x10]  ;;  %v2856_v23 = vmul.f32 %v8254_v29, %v2783_v11  ;;  %v3944_v18 = vor.u32 %v3943_v20, %v3942_v49  ;;  %v2929_v52 = vor.u32 %v7668_v41, %v7672_v42  ;;  %v7711_v29 = vpop.permute.xlu0 %3954 }
 0x3ed   : > { %v3983_v40 = vld [vmem:[#allocation4 + $0x112] ss:$32 sm:$0x2]  ;;  %8253 = vst [vmem:[#allocation46_spill] sm:$0xff] %v7677_v17  ;;  %2788 = vst.msk [vmem:[#allocation4 + $0x158] sm:$0xff] %vm941_vm1, %v2783_v11  ;;  %v3902_v25 = vor.u32 %v3901_v5, %v3900_v28  ;;  %v7691_v11 = vor.u32 %v3157_v54, %v3156_v26  ;;  %v3930_v8 = vor.u32 %v3929_v10, %v3928_v32 }
 0x3ee   : > { %v3887_v35 = vld [vmem:[#allocation4 + $0x10] ss:$32 sm:$0x20]  ;;  %v7679_v27 = vld [vmem:[#allocation3 + $0x18d] ss:$16 sm:$0xc0]  ;;  %v2860_v17 = vadd.f32 %v2856_v23, %v2852_v13 }
 0x3ef   : > { %v7681_v30 = vld [vmem:[#allocation3 + $0x18e] ss:$16 sm:$0xc0]  ;;  %v3903_v19 = vld [vmem:[#allocation4 + $0x110] ss:$32 sm:$0x20]  ;;  %v3888_v41 = vor.u32 %v3887_v35, %v3886_v51  ;;  %v3006_v42 = vor.u32 %v7679_v27, %v7687_v50 }
 0x3f0   : > { %v3945_v2 = vld [vmem:[#allocation4 + $0x111] ss:$32 sm:$0x10]  ;;  %v3905_v59 = vld [vmem:[#allocation4 + $0x110] ss:$32 sm:$0x40]  ;;  %v3904_v57 = vor.u32 %v3903_v19, %v3902_v25  ;;  %v2933_v54 = vmul.f32 %v8255_v44, %v2860_v17  ;;  %v3083_v10 = vor.u32 %v7681_v30, %v7689_v37 }
 0x3f1   : > { %v3931_v38 = vld [vmem:[#allocation4 + $0x11] ss:$32 sm:$0x20]  ;;  %v3982_v63 = vld [vmem:[#allocation4 + $0x112] ss:$32 sm:$0x1]  ;;  %v3946_v43 = vor.u32 %v3945_v2, %v3944_v18 }
 0x3f2   : > { %v3985_v62 = vld [vmem:[#allocation4 + $0x112] ss:$32 sm:$0x4]  ;;  %v3889_v14 = vld [vmem:[#allocation4 + $0x10] ss:$32 sm:$0x40]  ;;  %v3984_v0 = vor.u32 %v3983_v40, %v3982_v63  ;;  %v3932_v23 = vor.u32 %v3931_v38, %v3930_v8  ;;  %v2937_v6 = vadd.f32 %v2933_v54, %v2929_v52 }
 0x3f3   : > { %v3947_v36 = vld [vmem:[#allocation4 + $0x111] ss:$32 sm:$0x20]  ;;  %v7695_v21 = vld [vmem:[#allocation4 + $0x110] ss:$32 sm:$0x80]  ;;  %v7715_v18 = vor.u32 %v3889_v14, %v3888_v41 }
 0x3f4   : > { %v3949_v55 = vld [vmem:[#allocation4 + $0x111] ss:$32 sm:$0x40]  ;;  %v3987_v31 = vld [vmem:[#allocation4 + $0x112] ss:$32 sm:$0x8]  ;;  %v3986_v5 = vor.u32 %v3985_v62, %v3984_v0  ;;  %v3948_v13 = vor.u32 %v3947_v36, %v3946_v43 }
 0x3f5   : > { %v3933_v24 = vld [vmem:[#allocation4 + $0x11] ss:$32 sm:$0x40]  ;;  %v3989_v22 = vld [vmem:[#allocation4 + $0x112] ss:$32 sm:$0x10] }
 0x3f6   : > { %v3967_v20 = vld [vmem:[#allocation4 + $0x12] ss:$32 sm:$0x2]  ;;  %v7697_v39 = vld [vmem:[#allocation4 + $0x111] ss:$32 sm:$0x80]  ;;  %v3988_v35 = vor.u32 %v3987_v31, %v3986_v5  ;;  %v3950_v63 = vor.u32 %v3949_v55, %v3948_v13  ;;  %v7717_v0 = vor.u32 %v3933_v24, %v3932_v23 }
 0x3f7   : > { %v4026_v49 = vld [vmem:[#allocation4 + $0x113] ss:$32 sm:$0x1]  ;;  %2865 = vst.msk [vmem:[#allocation4 + $0x178] sm:$0xff] %vm941_vm1, %v2860_v17  ;;  %v3906_v17 = vor.u32 %v3905_v59, %v3904_v57  ;;  %2942 = vst.msk [vmem:[#allocation4 + $0x198] sm:$0xff] %vm941_vm1, %v2937_v6  ;;  %v8256_v59 = vor.u32 %v7599_v1, %v7584_v3 }
 0x3f8   : > { %v4027_v40 = vld [vmem:[#allocation4 + $0x113] ss:$32 sm:$0x2]  ;;  %v7703_v26 = vld [vmem:[#allocation4 + $0x10] ss:$32 sm:$0x80]  ;;  %v3990_v43 = vor.u32 %v3989_v22, %v3988_v35  ;;  %v3952_v55 = vor.u32 %v7697_v39, %v3950_v63 }
 0x3f9   : > { %v7709_v53 = vld [vmem:[#allocation3 + $0x18f] ss:$16 sm:$0xc0]  ;;  %v3991_v28 = vld [vmem:[#allocation4 + $0x112] ss:$32 sm:$0x20]  ;;  %v4028_v32 = vor.u32 %v4027_v40, %v4026_v49  ;;  %v3908_v38 = vor.u32 %v7695_v21, %v3906_v17  ;;  %v3010_v52 = vmul.f32 %v8256_v59, %v2937_v6 }
 0x3fa   : > { %v4029_v19 = vld [vmem:[#allocation4 + $0x113] ss:$32 sm:$0x4]  ;;  %v3806_v2 = vld [vmem:[#allocation4 + $0x10e] ss:$32 sm:$0x1]  ;;  %v3992_v44 = vor.u32 %v3991_v28, %v3990_v43 }
 0x3fb   : > { %v7713_v12 = vld [vmem:[#allocation4 + $0x11] ss:$32 sm:$0x80]  ;;  %v3966_v51 = vld [vmem:[#allocation4 + $0x12] ss:$32 sm:$0x1]  ;;  %v4030_v57 = vor.u32 %v4029_v19, %v4028_v32  ;;  %v3014_v1 = vadd.f32 %v3010_v52, %v3006_v42 }
 0x3fc   : > { %v3969_v46 = vld [vmem:[#allocation4 + $0x12] ss:$32 sm:$0x4]  ;;  %v3807_v27 = vld [vmem:[#allocation4 + $0x10e] ss:$32 sm:$0x2]  ;;  %v3968_v14 = vor.u32 %v3967_v20, %v3966_v51 }
 0x3fd   : > { %v3809_v50 = vld [vmem:[#allocation4 + $0x10e] ss:$32 sm:$0x4]  ;;  %v3993_v62 = vld [vmem:[#allocation4 + $0x112] ss:$32 sm:$0x40]  ;;  %v3808_v36 = vor.u32 %v3807_v27, %v3806_v2  ;;  %v3959_v27 = vpop.permute.xlu0 %3958 }
 0x3fe   : > { %v4031_v25 = vld [vmem:[#allocation4 + $0x113] ss:$32 sm:$0x8]  ;;  %v3811_v31 = vld [vmem:[#allocation4 + $0x10e] ss:$32 sm:$0x8]  ;;  %v7733_v13 = vor.u32 %v3969_v46, %v3968_v14  ;;  %v3994_v42 = vor.u32 %v3993_v62, %v3992_v44  ;;  %v8258_v46 = vor.u32 %v7609_v45, %v7601_v56  ;;  %v3962_v14 = vmul.f32 %v3959_v27, %v3952_v55 }
 0x3ff   : > { %v4033_v8 = vld [vmem:[#allocation4 + $0x113] ss:$32 sm:$0x10]  ;;  %v3746_v5 = vld [vmem:[#allocation4 + $0xd] ss:$32 sm:$0x1]  ;;  %v3810_v24 = vor.u32 %v3809_v50, %v3808_v36  ;;  %v4032_v2 = vor.u32 %v4031_v25, %v4030_v57 }
 0x400   : > { %v3747_v49 = vld [vmem:[#allocation4 + $0xd] ss:$32 sm:$0x2]  ;;  %v7729_v54 = vld [vmem:[#allocation4 + $0x112] ss:$32 sm:$0x80]  ;;  %v3087_v36 = vmul.f32 %v8258_v46, %v3014_v1 }
 0x401   : > { %v3749_v40 = vld [vmem:[#allocation4 + $0xd] ss:$32 sm:$0x4]  ;;  %v4035_v3 = vld [vmem:[#allocation4 + $0x113] ss:$32 sm:$0x20]  ;;  %v3812_v35 = vor.u32 %v3811_v31, %v3810_v24  ;;  %v3748_v43 = vor.u32 %v3747_v49, %v3746_v5  ;;  %v4034_v52 = vor.u32 %v4033_v8, %v4032_v2  ;;  %v3996_v8 = vor.u32 %v7729_v54, %v3994_v42 }
 0x402   : > { %v3791_v41 = vld [vmem:[#allocation4 + $0xe] ss:$32 sm:$0x2]  ;;  %v7735_v19 = vld [vmem:[#allocation4 + $0x12] ss:$32 sm:$0x8]  ;;  %v3091_v62 = vadd.f32 %v3087_v36, %v3083_v10 }
 0x403   : > { %v3813_v20 = vld [vmem:[#allocation4 + $0x10e] ss:$32 sm:$0x10]  ;;  %v3127_v23 = vld [vmem:[#allocation2 + $0x18f] ss:$16 sm:$0xc0]  ;;  %v3750_v56 = vor.u32 %v3749_v40, %v3748_v43  ;;  %v4036_v55 = vor.u32 %v4035_v3, %v4034_v52  ;;  %v3972_v27 = vor.u32 %v7735_v19, %v7733_v13  ;;  %v8259_v13 = vor.u32 %v7709_v53, %v7691_v11 }
 0x404   : > { %v3751_v51 = vld [vmem:[#allocation4 + $0xd] ss:$32 sm:$0x8]  ;;  %v3790_v17 = vld [vmem:[#allocation4 + $0xe] ss:$32 sm:$0x1]  ;;  %v3814_v39 = vor.u32 %v3813_v20, %v3812_v35 }
 0x405   : > { %v3815_v6 = vld [vmem:[#allocation4 + $0x10e] ss:$32 sm:$0x20]  ;;  %v4070_v28 = vld [vmem:[#allocation4 + $0x114] ss:$32 sm:$0x1]  ;;  %v3792_v45 = vor.u32 %v3791_v41, %v3790_v17  ;;  %v3752_v37 = vor.u32 %v3751_v51, %v3750_v56 }
 0x406   : > { %v8257_v50 = vld [vmem:[#allocation30_spill] sm:$0xff]  ;;  %v4037_v32 = vld [vmem:[#allocation4 + $0x113] ss:$32 sm:$0x40]  ;;  %3019 = vst.msk [vmem:[#allocation4 + $0x1b8] sm:$0xff] %vm941_vm1, %v3014_v1  ;;  %v3816_v20 = vor.u32 %v3815_v6, %v3814_v39  ;;  %3096 = vst.msk [vmem:[#allocation4 + $0x1d8] sm:$0xff] %vm941_vm1, %v3091_v62 }
 0x407   : > { %v3918_v63 = vmul.f32 %v8257_v50, %v3908_v38  ;;  %v4071_v59 = vld [vmem:[#allocation4 + $0x114] ss:$32 sm:$0x2]  ;;  %v3753_v57 = vld [vmem:[#allocation4 + $0xd] ss:$32 sm:$0x10]  ;;  %v3128_v38 = vor.u32 %v3127_v23, %v7647_v15  ;;  %v4038_v54 = vor.u32 %v4037_v32, %v4036_v55 }
 0x408   : > { %v4073_v25 = vld [vmem:[#allocation4 + $0x114] ss:$32 sm:$0x4]  ;;  %v3793_v31 = vld [vmem:[#allocation4 + $0xe] ss:$32 sm:$0x4]  ;;  %v4072_v21 = vor.u32 %v4071_v59, %v4070_v28  ;;  %v3754_v46 = vor.u32 %v3753_v57, %v3752_v37 }
 0x409   : > { %v3795_v24 = vld [vmem:[#allocation4 + $0xe] ss:$32 sm:$0x8]  ;;  %v7742_v22 = vld [vmem:[#allocation4 + $0x113] ss:$32 sm:$0x80]  ;;  %v3164_v15 = vmul.f32 %v3128_v38, %v3091_v62  ;;  %v3794_v10 = vor.u32 %v3793_v31, %v3792_v45  ;;  %v3964_v3 = vadd.f32 %v3962_v14, %v3918_v63 }
 0x40a   : > { %v3817_v5 = vld [vmem:[#allocation4 + $0x10e] ss:$32 sm:$0x40]  ;;  %v4075_v49 = vld [vmem:[#allocation4 + $0x114] ss:$32 sm:$0x8]  ;;  %v4074_v28 = vor.u32 %v4073_v25, %v4072_v21  ;;  %v7755_v25 = vpop.permute.xlu0 %4306  ;;  %v4040_v63 = vor.u32 %v7742_v22, %v4038_v54 }
 0x40b   : > { %v4011_v44 = vld [vmem:[#allocation4 + $0x13] ss:$32 sm:$0x2]  ;;  %v3755_v1 = vld [vmem:[#allocation4 + $0xd] ss:$32 sm:$0x20]  ;;  %v3818_v50 = vor.u32 %v3817_v5, %v3816_v20  ;;  %v3168_v19 = vadd.f32 %v3164_v15, %v8259_v13  ;;  %v3796_v43 = vor.u32 %v3795_v24, %v3794_v10 }
 0x40c   : > { %v3797_v2 = vld [vmem:[#allocation4 + $0xe] ss:$32 sm:$0x10]  ;;  %v3973_v30 = vld [vmem:[#allocation4 + $0x12] ss:$32 sm:$0x10]  ;;  %v4076_v42 = vor.u32 %v4075_v49, %v4074_v28  ;;  %v3756_v11 = vor.u32 %v3755_v1, %v3754_v46 }
 0x40d   : > { %v3819_v35 = vld [vmem:[#allocation4 + $0x10e] ss:$32 sm:$0x80]  ;;  %v4077_v40 = vld [vmem:[#allocation4 + $0x114] ss:$32 sm:$0x10]  ;;  %v3798_v57 = vor.u32 %v3797_v2, %v3796_v43  ;;  %v3974_v49 = vor.u32 %v3973_v30, %v3972_v27 }
 0x40e   : > { %v3834_v41 = vld [vmem:[#allocation4 + $0xf] ss:$32 sm:$0x1]  ;;  %v4010_v23 = vld [vmem:[#allocation4 + $0x13] ss:$32 sm:$0x1]  ;;  %v3820_v62 = vor.u32 %v3819_v35, %v3818_v50  ;;  %v4078_v38 = vor.u32 %v4077_v40, %v4076_v42  ;;  %v7763_v46 = vpop.permute.xlu0 %4394 }
 0x40f   : > { %v4013_v17 = vld [vmem:[#allocation4 + $0x13] ss:$32 sm:$0x4]  ;;  %v3835_v39 = vld [vmem:[#allocation4 + $0xf] ss:$32 sm:$0x2]  ;;  %v4012_v45 = vor.u32 %v4011_v44, %v4010_v23 }
 0x410   : > { %v3837_v6 = vld [vmem:[#allocation4 + $0xf] ss:$32 sm:$0x4]  ;;  %v3975_v21 = vld [vmem:[#allocation4 + $0x12] ss:$32 sm:$0x20]  ;;  %v3836_v59 = vor.u32 %v3835_v39, %v3834_v41 }
 0x411   : > { %v3757_v36 = vld [vmem:[#allocation4 + $0xd] ss:$32 sm:$0x40]  ;;  %v4079_v51 = vld [vmem:[#allocation4 + $0x114] ss:$32 sm:$0x20]  ;;  %v4014_v37 = vor.u32 %v4013_v17, %v4012_v45  ;;  %v3976_v1 = vor.u32 %v3975_v21, %v3974_v49 }
 0x412   : > { %v4015_v52 = vld [vmem:[#allocation4 + $0x13] ss:$32 sm:$0x8]  ;;  %v3799_v14 = vld [vmem:[#allocation4 + $0xe] ss:$32 sm:$0x20]  ;;  %v3838_v5 = vor.u32 %v3837_v6, %v3836_v59  ;;  %v4080_v15 = vor.u32 %v4079_v51, %v4078_v38  ;;  %v3758_v10 = vor.u32 %v3757_v36, %v3756_v11  ;;  %v8264_v11 = vor.u32 %v7713_v12, %v7717_v0 }
 0x413   : > { %v8260_v31 = vld [vmem:[#allocation31_spill] sm:$0xff]  ;;  %v3839_v56 = vld [vmem:[#allocation4 + $0xf] ss:$32 sm:$0x8]  ;;  %3173 = vst.msk [vmem:[#allocation4 + $0x1f8] sm:$0xff] %vm941_vm1, %v3168_v19  ;;  %v3800_v40 = vor.u32 %v3799_v14, %v3798_v57  ;;  %v8261_v2 = vld [vmem:[#allocation16_spill] sm:$0xff]  ;;  %v4016_v39 = vor.u32 %v4015_v52, %v4014_v37 }
 0x414   : > { %v4006_v32 = vmul.f32 %v8260_v31, %v3996_v8  ;;  %v3759_v53 = vld [vmem:[#allocation4 + $0xd] ss:$32 sm:$0x80]  ;;  %v4081_v24 = vld [vmem:[#allocation4 + $0x114] ss:$32 sm:$0x40]  ;;  %v3830_v8 = vmul.f32 %v7488_v47, %v3820_v62  ;;  %v3840_v41 = vor.u32 %v3839_v56, %v3838_v5  ;;  %v4050_v50 = vmul.f32 %v8261_v2, %v4040_v63 }
 0x415   : > { %v3977_v55 = vld [vmem:[#allocation4 + $0x12] ss:$32 sm:$0x40]  ;;  %v3801_v28 = vld [vmem:[#allocation4 + $0xe] ss:$32 sm:$0x40]  ;;  %v4082_v30 = vor.u32 %v4081_v24, %v4080_v15  ;;  %v3760_v47 = vor.u32 %v3759_v53, %v3758_v10  ;;  %v3961_v53 = vmul.f32 %v7711_v29, %v8264_v11 }
 0x416   : > { %v4008_v20 = vadd.f32 %v4006_v32, %v3964_v3  ;;  %v3841_v22 = vld [vmem:[#allocation4 + $0xf] ss:$32 sm:$0x10]  ;;  %v4017_v35 = vld [vmem:[#allocation4 + $0x13] ss:$32 sm:$0x10]  ;;  %v3832_v27 = vadd.f32 %v3830_v8, %v7589_v58  ;;  %v3802_v6 = vor.u32 %v3801_v28, %v3800_v40  ;;  %v8262_v58 = vor.u32 %v7703_v26, %v7715_v18  ;;  %v7788_v40 = vpop.permute.xlu1 %4134 }
 0x417   : > { %v4083_v44 = vld [vmem:[#allocation4 + $0x114] ss:$32 sm:$0x80]  ;;  %v3979_v54 = vld [vmem:[#allocation4 + $0x12] ss:$32 sm:$0x80]  ;;  %v3842_v13 = vor.u32 %v3841_v22, %v3840_v41  ;;  %v3978_v63 = vor.u32 %v3977_v55, %v3976_v1  ;;  %v4018_v57 = vor.u32 %v4017_v35, %v4016_v39  ;;  %v7790_v41 = vpop.permute.xlu0 %4530 }
 0x418   : > { %v4055_v23 = vld [vmem:[#allocation4 + $0x14] ss:$32 sm:$0x2]  ;;  %v3803_v42 = vld [vmem:[#allocation4 + $0xe] ss:$32 sm:$0x80]  ;;  %v4052_v43 = vadd.f32 %v4050_v50, %v4008_v20  ;;  %v4084_v51 = vor.u32 %v4083_v44, %v4082_v30  ;;  %v7766_v31 = vadd.f32 %v7651_v34, %v3832_v27 }
 0x419   : > { %v3843_v3 = vld [vmem:[#allocation4 + $0xf] ss:$32 sm:$0x20]  ;;  %v4054_v17 = vld [vmem:[#allocation4 + $0x14] ss:$32 sm:$0x1]  ;;  %v3804_v62 = vor.u32 %v3803_v42, %v3802_v6  ;;  %v3980_v18 = vor.u32 %v3979_v54, %v3978_v63 }
 0x41a   : > { %v4057_v19 = vld [vmem:[#allocation4 + $0x14] ss:$32 sm:$0x4]  ;;  %v4019_v36 = vld [vmem:[#allocation4 + $0x13] ss:$32 sm:$0x20]  ;;  %v4056_v59 = vor.u32 %v4055_v23, %v4054_v17  ;;  %v3844_v38 = vor.u32 %v3843_v3, %v3842_v13  ;;  %v4094_v34 = vmul.f32 %v7511_v7, %v4084_v51 }
 0x41b   : > { %v3845_v21 = vld [vmem:[#allocation4 + $0xf] ss:$32 sm:$0x40]  ;;  %v8263_v32 = vld [vmem:[#allocation33_spill] sm:$0xff]  ;;  %v8265_v49 = vld [vmem:[#allocation19_spill] sm:$0xff]  ;;  %v3829_v55 = vmul.f32 %v7425_v60, %v3804_v62  ;;  %v4020_v0 = vor.u32 %v4019_v36, %v4018_v57  ;;  %v7800_v62 = vpop.permute.xlu1 %4398 }
 0x41c   : > { %v3917_v52 = vmul.f32 %v8263_v32, %v8262_v58  ;;  %v4021_v14 = vld [vmem:[#allocation4 + $0x13] ss:$32 sm:$0x40]  ;;  %v3847_v56 = vld [vmem:[#allocation4 + $0xf] ss:$32 sm:$0x80]  ;;  %v4058_v24 = vor.u32 %v4057_v19, %v4056_v59  ;;  %v3785_v20 = vmul.f32 %v8265_v49, %v3760_v47  ;;  %v3846_v28 = vor.u32 %v3845_v21, %v3844_v38 }
 0x41d   : > { %v4059_v45 = vld [vmem:[#allocation4 + $0x14] ss:$32 sm:$0x8]  ;;  %v4098_v26 = vld [vmem:[#allocation4 + $0x15] ss:$32 sm:$0x1]  ;;  %v7785_v7 = vadd.f32 %v4094_v34, %v4052_v43  ;;  %v4022_v23 = vor.u32 %v4021_v14, %v4020_v0 }
 0x41e   : > { %v4061_v5 = vld [vmem:[#allocation4 + $0x14] ss:$32 sm:$0x10]  ;;  %v4099_v12 = vld [vmem:[#allocation4 + $0x15] ss:$32 sm:$0x2]  ;;  %v4060_v15 = vor.u32 %v4059_v45, %v4058_v24  ;;  %v3787_v37 = vadd.f32 %v3785_v20, %v7649_v16  ;;  %v3848_v35 = vor.u32 %v3847_v56, %v3846_v28  ;;  %v3963_v44 = vadd.f32 %v3961_v53, %v3917_v52 }
 0x41f   : > { %v4101_v29 = vld [vmem:[#allocation4 + $0x15] ss:$32 sm:$0x4]  ;;  %v4023_v8 = vld [vmem:[#allocation4 + $0x13] ss:$32 sm:$0x80]  ;;  %v4100_v22 = vor.u32 %v4099_v12, %v4098_v26  ;;  %v4005_v16 = vmul.f32 %v7445_v61, %v3980_v18  ;;  %v4673_v61 = vpop.permute.xlu0 %4672 }
 0x420   : > { %v4063_v10 = vld [vmem:[#allocation4 + $0x14] ss:$32 sm:$0x20]  ;;  %v4103_v60 = vld [vmem:[#allocation4 + $0x15] ss:$32 sm:$0x8]  ;;  %v4062_v54 = vor.u32 %v4061_v5, %v4060_v15  ;;  %v3831_v50 = vadd.f32 %v3829_v55, %v3787_v37  ;;  %v3873_v42 = vmul.f32 %v7540_v48, %v3848_v35  ;;  %v4024_v3 = vor.u32 %v4023_v8, %v4022_v23  ;;  %v7804_v37 = vpop.permute.xlu1 %4178 }
 0x421   : > { %v7793_v1 = vld [vmem:[%s7783_s12] ss:$0 sm:$0xff]  ;;  %v4102_v2 = vor.u32 %v4101_v29, %v4100_v22  ;;  %v4065_v27 = vld [vmem:[#allocation4 + $0x14] ss:$32 sm:$0x40]  ;;  %v8266_v17 = vld [vmem:[#allocation10_spill] sm:$0xff]  ;;  %v4007_v21 = vadd.f32 %v4005_v16, %v3963_v44 }
 0x422   : > { %v4105_v30 = vld [vmem:[#allocation4 + $0x15] ss:$32 sm:$0x10]  ;;  %v4064_v39 = vor.u32 %v4063_v10, %v4062_v54  ;;  %v2559_v6 = vld [vmem:[#allocation2 + $0x8] ss:$16 sm:$0x3]  ;;  %v4590_v19 = vmul.f32 %v7793_v1, %v8266_v17  ;;  %v3875_v36 = vadd.f32 %v3873_v42, %v3831_v50 }
 0x423   : > { %v4104_v47 = vor.u32 %v4103_v60, %v4102_v2  ;;  %v2560_v13 = vld [vmem:[#allocation2 + $0x8] ss:$16 sm:$0xc]  ;;  %v4067_v43 = vld [vmem:[#allocation4 + $0x14] ss:$32 sm:$0x80] }
 0x424   : > { %v4107_v51 = vld [vmem:[#allocation4 + $0x15] ss:$32 sm:$0x20]  ;;  %v4066_v32 = vor.u32 %v4065_v27, %v4064_v39  ;;  %v4598_v52 = vadd.f32 %v4590_v19, %v3875_v36  ;;  %v2561_v14 = vor.u32 %v2560_v13, %v2559_v6  ;;  %v2636_v45 = vld [vmem:[#allocation2 + $0x9] ss:$16 sm:$0x3] }
 0x425   : > { %v8267_v59 = vld [vmem:[#allocation47_spill] sm:$0xff]  ;;  %v4106_v48 = vor.u32 %v4105_v30, %v4104_v47  ;;  %v2637_v11 = vld [vmem:[#allocation2 + $0x9] ss:$16 sm:$0xc] }
 0x426   : > { %v4049_v58 = vmul.f32 %v8267_v59, %v4024_v3  ;;  %v4109_v63 = vld [vmem:[#allocation4 + $0x15] ss:$32 sm:$0x40]  ;;  %v4068_v38 = vor.u32 %v4067_v43, %v4066_v32  ;;  %v4694_v53 = vmul.f32 %v4673_v61, %v4598_v52  ;;  %v2592_v34 = vld [vmem:[#allocation3 + $0x8] ss:$16 sm:$0xc]  ;;  %v2638_v55 = vor.u32 %v2637_v11, %v2636_v45 }
 0x427   : > { %v4108_v56 = vor.u32 %v4107_v51, %v4106_v48  ;;  %v4111_v57 = vld [vmem:[#allocation4 + $0x15] ss:$32 sm:$0x80]  ;;  %v2562_v26 = vld [vmem:[#allocation2 + $0x8] ss:$16 sm:$0x30]  ;;  %v7810_v48 = vpop.permute.xlu1 %4218 }
 0x428   : > { %v4051_v24 = vadd.f32 %v4049_v58, %v4007_v21  ;;  %v2591_v18 = vld [vmem:[#allocation3 + $0x8] ss:$16 sm:$0x3]  ;;  %5227 = vmatprep.mubr.msk.f32.mxu1 %vm941_vm1, %v4694_v53  ;;  %v2563_v20 = vor.u32 %v2562_v26, %v2561_v14  ;;  %v4093_v12 = vmul.f32 %v7553_v9, %v4068_v38  ;;  %v2713_v29 = vld [vmem:[#allocation2 + $0xa] ss:$16 sm:$0x3] }
 0x429   : > { %v4110_v5 = vor.u32 %v4109_v63, %v4108_v56  ;;  %v2594_v49 = vld [vmem:[#allocation3 + $0x8] ss:$16 sm:$0x30]  ;;  %v2714_v0 = vld [vmem:[#allocation2 + $0xa] ss:$16 sm:$0xc]  ;;  %v2593_v15 = vor.u32 %v2592_v34, %v2591_v18 }
 0x42a   : > { %v2668_v8 = vld [vmem:[#allocation3 + $0x9] ss:$16 sm:$0x3]  ;;  %v4095_v35 = vadd.f32 %v4093_v12, %v4051_v24  ;;  %v2564_v60 = vld [vmem:[#allocation2 + $0x8] ss:$16 sm:$0xc0]  ;;  %v2715_v42 = vor.u32 %v2714_v0, %v2713_v29 }
 0x42b   : > { %v4112_v28 = vor.u32 %v4111_v57, %v4110_v5  ;;  %v2669_v22 = vld [vmem:[#allocation3 + $0x9] ss:$16 sm:$0xc]  ;;  %v2595_v23 = vor.u32 %v2594_v49, %v2593_v15  ;;  %v2565_v2 = vor.u32 %v2564_v60, %v2563_v20  ;;  %v2790_v27 = vld [vmem:[#allocation2 + $0xb] ss:$16 sm:$0x3]  ;;  %v7814_v15 = vpop.permute.xlu1 %4486 }
 0x42c   : > { %v2639_v44 = vld [vmem:[#allocation2 + $0x9] ss:$16 sm:$0x30]  ;;  %v2670_v30 = vor.u32 %v2669_v22, %v2668_v8  ;;  %v2791_v3 = vld [vmem:[#allocation2 + $0xb] ss:$16 sm:$0xc] }
 0x42d   : > { %v4137_v10 = vmul.f32 %v7567_v4, %v4112_v28  ;;  %v2671_v54 = vld [vmem:[#allocation3 + $0x9] ss:$16 sm:$0x30]  ;;  %v2640_v50 = vor.u32 %v2639_v44, %v2638_v55  ;;  %v2596_v16 = vld [vmem:[#allocation3 + $0x8] ss:$16 sm:$0xc0]  ;;  %v2792_v58 = vor.u32 %v2791_v3, %v2790_v27 }
 0x42e   : > { %v2746_v39 = vld [vmem:[#allocation3 + $0xa] ss:$16 sm:$0xc]  ;;  %v2641_v47 = vld [vmem:[#allocation2 + $0x9] ss:$16 sm:$0xc0]  ;;  %v2597_v6 = vor.u32 %v2596_v16, %v2595_v23  ;;  %v2672_v19 = vor.u32 %v2671_v54, %v2670_v30 }
 0x42f   : > { %v7807_v9 = vadd.f32 %v4137_v10, %v4095_v35  ;;  %v8268_v13 = vld [vmem:[#allocation32_spill] sm:$0xff]  ;;  %v2642_v21 = vor.u32 %v2641_v47, %v2640_v50 }
 0x430   : > { %v2622_v17 = vmul.f32 %v2565_v2, %v8268_v13  ;;  %v2716_v4 = vld [vmem:[#allocation2 + $0xa] ss:$16 sm:$0x30]  ;;  %v2673_v36 = vld [vmem:[#allocation3 + $0x9] ss:$16 sm:$0xc0] }
 0x431   : > { %v2745_v43 = vld [vmem:[#allocation3 + $0xa] ss:$16 sm:$0x3]  ;;  %v2717_v59 = vor.u32 %v2716_v4, %v2715_v42  ;;  %v2867_v63 = vld [vmem:[#allocation2 + $0xc] ss:$16 sm:$0x3]  ;;  %v2674_v56 = vor.u32 %v2673_v36, %v2672_v19 }
 0x432   : > { %v2748_v51 = vld [vmem:[#allocation3 + $0xa] ss:$16 sm:$0x30]  ;;  %v2626_v32 = vadd.f32 %v2622_v17, %v2597_v6  ;;  %v2747_v52 = vor.u32 %v2746_v39, %v2745_v43  ;;  %v2868_v14 = vld [vmem:[#allocation2 + $0xc] ss:$16 sm:$0xc] }
 0x433   : > { %v2823_v61 = vld [vmem:[#allocation3 + $0xb] ss:$16 sm:$0xc]  ;;  %v2718_v38 = vld [vmem:[#allocation2 + $0xa] ss:$16 sm:$0xc0]  ;;  %v2869_v18 = vor.u32 %v2868_v14, %v2867_v63 }
 0x434   : > { %2631 = vst.msk [vmem:[#allocation4 + $0x100] sm:$0xff] %vm941_vm1, %v2626_v32  ;;  %v2699_v45 = vmul.f32 %v2642_v21, %v2626_v32  ;;  %v2749_v11 = vor.u32 %v2748_v51, %v2747_v52  ;;  %v2793_v53 = vld [vmem:[#allocation2 + $0xb] ss:$16 sm:$0x30]  ;;  %v2719_v5 = vor.u32 %v2718_v38, %v2717_v59  ;;  %v7817_v51 = vpop.permute.xlu1 %4262 }
 0x435   : > { %v2750_v57 = vld [vmem:[#allocation3 + $0xa] ss:$16 sm:$0xc0]  ;;  %v2822_v34 = vld [vmem:[#allocation3 + $0xb] ss:$16 sm:$0x3]  ;;  %v2794_v26 = vor.u32 %v2793_v53, %v2792_v58 }
 0x436   : > { %v2825_v24 = vld [vmem:[#allocation3 + $0xb] ss:$16 sm:$0x30]  ;;  %v2703_v49 = vadd.f32 %v2699_v45, %v2674_v56  ;;  %v2824_v20 = vor.u32 %v2823_v61, %v2822_v34  ;;  %v2944_v55 = vld [vmem:[#allocation2 + $0xd] ss:$16 sm:$0x3]  ;;  %v2751_v0 = vor.u32 %v2750_v57, %v2749_v11 }
 0x437   : > { %v2945_v28 = vld [vmem:[#allocation2 + $0xd] ss:$16 sm:$0xc]  ;;  %v2900_v12 = vld [vmem:[#allocation3 + $0xc] ss:$16 sm:$0xc] }
 0x438   : > { %v2795_v29 = vld [vmem:[#allocation2 + $0xb] ss:$16 sm:$0xc0]  ;;  %2708 = vst.msk [vmem:[#allocation4 + $0x120] sm:$0xff] %vm941_vm1, %v2703_v49  ;;  %v2776_v8 = vmul.f32 %v2719_v5, %v2703_v49  ;;  %v2826_v22 = vor.u32 %v2825_v24, %v2824_v20  ;;  %v2946_v2 = vor.u32 %v2945_v28, %v2944_v55 }
 0x439   : > { %v2870_v35 = vld [vmem:[#allocation2 + $0xc] ss:$16 sm:$0x30]  ;;  %v2827_v10 = vld [vmem:[#allocation3 + $0xb] ss:$16 sm:$0xc0]  ;;  %v2796_v23 = vor.u32 %v2795_v29, %v2794_v26 }
 0x43a   : > { %v2899_v60 = vld [vmem:[#allocation3 + $0xc] ss:$16 sm:$0x3]  ;;  %v2871_v54 = vor.u32 %v2870_v35, %v2869_v18  ;;  %v2780_v50 = vadd.f32 %v2776_v8, %v2751_v0  ;;  %v3021_v27 = vld [vmem:[#allocation2 + $0xe] ss:$16 sm:$0x3]  ;;  %v2828_v39 = vor.u32 %v2827_v10, %v2826_v22  ;;  %v7821_v18 = vpop.permute.xlu1 %4350 }
 0x43b   : > { %v2902_v44 = vld [vmem:[#allocation3 + $0xc] ss:$16 sm:$0x30]  ;;  %v2901_v42 = vor.u32 %v2900_v12, %v2899_v60  ;;  %v3022_v30 = vld [vmem:[#allocation2 + $0xe] ss:$16 sm:$0xc] }
 0x43c   : > { %v2977_v3 = vld [vmem:[#allocation3 + $0xd] ss:$16 sm:$0xc]  ;;  %v2872_v16 = vld [vmem:[#allocation2 + $0xc] ss:$16 sm:$0xc0]  ;;  %v2853_v47 = vmul.f32 %v2796_v23, %v2780_v50  ;;  %v3023_v36 = vor.u32 %v3022_v30, %v3021_v27 }
 0x43d   : > { %2785 = vst.msk [vmem:[#allocation4 + $0x140] sm:$0xff] %vm941_vm1, %v2780_v50  ;;  %v2903_v6 = vor.u32 %v2902_v44, %v2901_v42  ;;  %v2947_v13 = vld [vmem:[#allocation2 + $0xd] ss:$16 sm:$0x30]  ;;  %v2873_v19 = vor.u32 %v2872_v16, %v2871_v54 }
 0x43e   : > { %v2904_v17 = vld [vmem:[#allocation3 + $0xc] ss:$16 sm:$0xc0]  ;;  %v2948_v4 = vor.u32 %v2947_v13, %v2946_v2  ;;  %v2857_v43 = vadd.f32 %v2853_v47, %v2828_v39  ;;  %v2976_v21 = vld [vmem:[#allocation3 + $0xd] ss:$16 sm:$0x3]  ;;  %v7826_v22 = vpop.permute.xlu1 %4574 }
 0x43f   : > { %v2979_v59 = vld [vmem:[#allocation3 + $0xd] ss:$16 sm:$0x30]  ;;  %v2978_v58 = vor.u32 %v2977_v3, %v2976_v21  ;;  %v3054_v32 = vld [vmem:[#allocation3 + $0xe] ss:$16 sm:$0xc]  ;;  %v2905_v63 = vor.u32 %v2904_v17, %v2903_v6 }
 0x440   : > { %v2949_v52 = vld [vmem:[#allocation2 + $0xd] ss:$16 sm:$0xc0]  ;;  %2862 = vst.msk [vmem:[#allocation4 + $0x160] sm:$0xff] %vm941_vm1, %v2857_v43  ;;  %v2930_v14 = vmul.f32 %v2873_v19, %v2857_v43 }
 0x441   : > { %v3024_v61 = vld [vmem:[#allocation2 + $0xe] ss:$16 sm:$0x30]  ;;  %v2981_v38 = vld [vmem:[#allocation3 + $0xd] ss:$16 sm:$0xc0]  ;;  %v2980_v56 = vor.u32 %v2979_v59, %v2978_v58  ;;  %v2950_v45 = vor.u32 %v2949_v52, %v2948_v4 }
 0x442   : > { %v3025_v11 = vor.u32 %v3024_v61, %v3023_v36  ;;  %v2934_v53 = vadd.f32 %v2930_v14, %v2905_v63  ;;  %v3053_v57 = vld [vmem:[#allocation3 + $0xe] ss:$16 sm:$0x3]  ;;  %v4247_v35 = vld [vmem:[#allocation4 + $0x118] ss:$32 sm:$0x2]  ;;  %v7830_v42 = vpop.permute.xlu1 %4438 }
 0x443   : > { %v3056_v34 = vld [vmem:[#allocation3 + $0xe] ss:$16 sm:$0x30]  ;;  %v3055_v24 = vor.u32 %v3054_v32, %v3053_v57  ;;  %v2982_v5 = vor.u32 %v2981_v38, %v2980_v56  ;;  %v4246_v10 = vld [vmem:[#allocation4 + $0x118] ss:$32 sm:$0x1] }
 0x444   : > { %2939 = vst.msk [vmem:[#allocation4 + $0x180] sm:$0xff] %vm941_vm1, %v2934_v53  ;;  %v3007_v26 = vmul.f32 %v2950_v45, %v2934_v53  ;;  %v3026_v49 = vld [vmem:[#allocation2 + $0xe] ss:$16 sm:$0xc0]  ;;  %v4248_v54 = vor.u32 %v4247_v35, %v4246_v10 }
 0x445   : > { %v3058_v20 = vld [vmem:[#allocation3 + $0xe] ss:$16 sm:$0xc0]  ;;  %v3057_v55 = vor.u32 %v3056_v34, %v3055_v24  ;;  %v3027_v28 = vor.u32 %v3026_v49, %v3025_v11  ;;  %v4291_v60 = vld [vmem:[#allocation4 + $0x119] ss:$32 sm:$0x2] }
 0x446   : > { %v3011_v12 = vadd.f32 %v3007_v26, %v2982_v5  ;;  %v4249_v44 = vld [vmem:[#allocation4 + $0x118] ss:$32 sm:$0x4]  ;;  %v4290_v23 = vld [vmem:[#allocation4 + $0x119] ss:$32 sm:$0x1]  ;;  %v7832_v11 = vpop.permute.xlu1 %4482 }
 0x447   : > { %v3059_v29 = vor.u32 %v3058_v20, %v3057_v55  ;;  %v4251_v2 = vld [vmem:[#allocation4 + $0x118] ss:$32 sm:$0x8]  ;;  %v4293_v50 = vld [vmem:[#allocation4 + $0x119] ss:$32 sm:$0x4]  ;;  %v4292_v30 = vor.u32 %v4291_v60, %v4290_v23  ;;  %v4250_v16 = vor.u32 %v4249_v44, %v4248_v54 }
 0x448   : > { %v3084_v0 = vmul.f32 %v3027_v28, %v3011_v12  ;;  %3016 = vst.msk [vmem:[#allocation4 + $0x1a0] sm:$0xff] %vm941_vm1, %v3011_v12  ;;  %v4253_v27 = vld [vmem:[#allocation4 + $0x118] ss:$32 sm:$0x10] }
 0x449   : > { %v4295_v3 = vld [vmem:[#allocation4 + $0x119] ss:$32 sm:$0x8]  ;;  %v4143_v47 = vld [vmem:[#allocation4 + $0x16] ss:$32 sm:$0x2]  ;;  %v4294_v13 = vor.u32 %v4293_v50, %v4292_v30  ;;  %v4252_v4 = vor.u32 %v4251_v2, %v4250_v16 }
 0x44a   : > { %v7824_v8 = vadd.f32 %v3084_v0, %v3059_v29  ;;  %v4297_v39 = vld [vmem:[#allocation4 + $0x119] ss:$32 sm:$0x10]  ;;  %v4255_v6 = vld [vmem:[#allocation4 + $0x118] ss:$32 sm:$0x20] }
 0x44b   : > { %v4335_v17 = vld [vmem:[#allocation4 + $0x11a] ss:$32 sm:$0x2]  ;;  %v4142_v19 = vld [vmem:[#allocation4 + $0x16] ss:$32 sm:$0x1]  ;;  %v4296_v32 = vor.u32 %v4295_v3, %v4294_v13  ;;  %v4254_v61 = vor.u32 %v4253_v27, %v4252_v4 }
 0x44c   : > { %3093 = vst.msk [vmem:[#allocation4 + $0x1c0] sm:$0xff] %vm941_vm1, %v7824_v8  ;;  %v4299_v36 = vld [vmem:[#allocation4 + $0x119] ss:$32 sm:$0x20]  ;;  %v4144_v63 = vor.u32 %v4143_v47, %v4142_v19 }
 0x44d   : > { %v4334_v43 = vld [vmem:[#allocation4 + $0x11a] ss:$32 sm:$0x1]  ;;  %v4145_v21 = vld [vmem:[#allocation4 + $0x16] ss:$32 sm:$0x4]  ;;  %v4298_v57 = vor.u32 %v4297_v39, %v4296_v32  ;;  %v4256_v49 = vor.u32 %v4255_v6, %v4254_v61 }
 0x44e   : > { %v4187_v59 = vld [vmem:[#allocation4 + $0x17] ss:$32 sm:$0x2]  ;;  %v4257_v58 = vld [vmem:[#allocation4 + $0x118] ss:$32 sm:$0x40]  ;;  %v4336_v34 = vor.u32 %v4335_v17, %v4334_v43  ;;  %v4146_v5 = vor.u32 %v4145_v21, %v4144_v63 }
 0x44f   : > { %v4337_v52 = vld [vmem:[#allocation4 + $0x11a] ss:$32 sm:$0x4]  ;;  %v4147_v14 = vld [vmem:[#allocation4 + $0x16] ss:$32 sm:$0x8]  ;;  %v4300_v29 = vor.u32 %v4299_v36, %v4298_v57  ;;  %v4258_v54 = vor.u32 %v4257_v58, %v4256_v49 }
 0x450   : > { %v4301_v38 = vld [vmem:[#allocation4 + $0x119] ss:$32 sm:$0x40]  ;;  %v4186_v56 = vld [vmem:[#allocation4 + $0x17] ss:$32 sm:$0x1]  ;;  %v4338_v35 = vor.u32 %v4337_v52, %v4336_v34  ;;  %v4148_v44 = vor.u32 %v4147_v14, %v4146_v5 }
 0x451   : > { %v4189_v45 = vld [vmem:[#allocation4 + $0x17] ss:$32 sm:$0x4]  ;;  %v4259_v53 = vld [vmem:[#allocation4 + $0x118] ss:$32 sm:$0x80]  ;;  %v4188_v26 = vor.u32 %v4187_v59, %v4186_v56  ;;  %v4302_v30 = vor.u32 %v4301_v38, %v4300_v29  ;;  %v7834_v59 = vpop.permute.xlu1 %4526 }
 0x452   : > { %v4339_v24 = vld [vmem:[#allocation4 + $0x11a] ss:$32 sm:$0x8]  ;;  %v4303_v20 = vld [vmem:[#allocation4 + $0x119] ss:$32 sm:$0x80]  ;;  %v4260_v19 = vor.u32 %v4259_v53, %v4258_v54 }
 0x453   : > { %v4341_v55 = vld [vmem:[#allocation4 + $0x11a] ss:$32 sm:$0x10]  ;;  %v4149_v28 = vld [vmem:[#allocation4 + $0x16] ss:$32 sm:$0x10]  ;;  %v4190_v23 = vor.u32 %v4189_v45, %v4188_v26  ;;  %v4340_v39 = vor.u32 %v4339_v24, %v4338_v35  ;;  %v4304_v32 = vor.u32 %v4303_v20, %v4302_v30 }
 0x454   : > { %v4191_v12 = vld [vmem:[#allocation4 + $0x17] ss:$32 sm:$0x8]  ;;  %v4115_v0 = vld [vmem:[#allocation4 + $0x115] ss:$32 sm:$0x2]  ;;  %v4150_v13 = vor.u32 %v4149_v28, %v4148_v44 }
 0x455   : > { %v4378_v10 = vld [vmem:[#allocation4 + $0x11b] ss:$32 sm:$0x1]  ;;  %v4343_v2 = vld [vmem:[#allocation4 + $0x11a] ss:$32 sm:$0x20]  ;;  %v4192_v17 = vor.u32 %v4191_v12, %v4190_v23  ;;  %v4342_v52 = vor.u32 %v4341_v55, %v4340_v39 }
 0x456   : > { %v4379_v60 = vld [vmem:[#allocation4 + $0x11b] ss:$32 sm:$0x2]  ;;  %v4151_v50 = vld [vmem:[#allocation4 + $0x16] ss:$32 sm:$0x20] }
 0x457   : > { %v4193_v27 = vld [vmem:[#allocation4 + $0x17] ss:$32 sm:$0x10]  ;;  %v4114_v3 = vld [vmem:[#allocation4 + $0x115] ss:$32 sm:$0x1]  ;;  %v4380_v36 = vor.u32 %v4379_v60, %v4378_v10  ;;  %v4152_v38 = vor.u32 %v4151_v50, %v4150_v13  ;;  %v4344_v26 = vor.u32 %v4343_v2, %v4342_v52 }
 0x458   : > { %v4117_v16 = vld [vmem:[#allocation4 + $0x115] ss:$32 sm:$0x4]  ;;  %v4381_v47 = vld [vmem:[#allocation4 + $0x11b] ss:$32 sm:$0x4]  ;;  %v4194_v56 = vor.u32 %v4193_v27, %v4192_v17  ;;  %v4116_v45 = vor.u32 %v4115_v0, %v4114_v3 }
 0x459   : > { %v4383_v6 = vld [vmem:[#allocation4 + $0x11b] ss:$32 sm:$0x8]  ;;  %v4345_v4 = vld [vmem:[#allocation4 + $0x11a] ss:$32 sm:$0x40]  ;;  %v4382_v34 = vor.u32 %v4381_v47, %v4380_v36 }
 0x45a   : > { %v4153_v43 = vld [vmem:[#allocation4 + $0x16] ss:$32 sm:$0x40]  ;;  %v4195_v21 = vld [vmem:[#allocation4 + $0x17] ss:$32 sm:$0x20]  ;;  %v4118_v10 = vor.u32 %v4117_v16, %v4116_v45  ;;  %v4346_v30 = vor.u32 %v4345_v4, %v4344_v26 }
 0x45b   : > { %v4119_v58 = vld [vmem:[#allocation4 + $0x115] ss:$32 sm:$0x8]  ;;  %v4385_v63 = vld [vmem:[#allocation4 + $0x11b] ss:$32 sm:$0x10]  ;;  %v4154_v29 = vor.u32 %v4153_v43, %v4152_v38  ;;  %v4196_v20 = vor.u32 %v4195_v21, %v4194_v56  ;;  %v4384_v60 = vor.u32 %v4383_v6, %v4382_v34 }
 0x45c   : > { %v4158_v14 = vld [vmem:[#allocation4 + $0x116] ss:$32 sm:$0x1]  ;;  %v7836_v57 = vld [vmem:[#allocation4 + $0x11a] ss:$32 sm:$0x80]  ;;  %v4120_v17 = vor.u32 %v4119_v58, %v4118_v10 }
 0x45d   : > { %v4159_v61 = vld [vmem:[#allocation4 + $0x116] ss:$32 sm:$0x2]  ;;  %v4197_v53 = vld [vmem:[#allocation4 + $0x17] ss:$32 sm:$0x40]  ;;  %v4386_v36 = vor.u32 %v4385_v63, %v4384_v60 }
 0x45e   : > { %v4155_v24 = vld [vmem:[#allocation4 + $0x16] ss:$32 sm:$0x80]  ;;  %v4121_v5 = vld [vmem:[#allocation4 + $0x115] ss:$32 sm:$0x10]  ;;  %v4160_v44 = vor.u32 %v4159_v61, %v4158_v14  ;;  %v4198_v2 = vor.u32 %v4197_v53, %v4196_v20  ;;  %v4348_v14 = vor.u32 %v7836_v57, %v4346_v30 }
 0x45f   : > { %v4387_v49 = vld [vmem:[#allocation4 + $0x11b] ss:$32 sm:$0x20]  ;;  %v4161_v28 = vld [vmem:[#allocation4 + $0x116] ss:$32 sm:$0x4]  ;;  %v4156_v47 = vor.u32 %v4155_v24, %v4154_v29  ;;  %v4122_v34 = vor.u32 %v4121_v5, %v4120_v17 }
 0x460   : > { %v4163_v12 = vld [vmem:[#allocation4 + $0x116] ss:$32 sm:$0x8]  ;;  %v4199_v23 = vld [vmem:[#allocation4 + $0x17] ss:$32 sm:$0x80]  ;;  %v4162_v43 = vor.u32 %v4161_v28, %v4160_v44  ;;  %v4388_v53 = vor.u32 %v4387_v49, %v4386_v36 }
 0x461   : > { %v8269_v35 = vld [vmem:[#allocation27_spill] sm:$0xff]  ;;  %v4423_v54 = vld [vmem:[#allocation4 + $0x11c] ss:$32 sm:$0x2]  ;;  %v8270_v0 = vld [vmem:[#allocation53_spill] sm:$0xff]  ;;  %v4200_v61 = vor.u32 %v4199_v23, %v4198_v2  ;;  %v4181_v44 = vmul.f32 %v7518_v33, %v4156_v47 }
 0x462   : > { %v4270_v55 = vmul.f32 %v8269_v35, %v4260_v19  ;;  %v4314_v50 = vmul.f32 %v8270_v0, %v4304_v32  ;;  %v4123_v27 = vld [vmem:[#allocation4 + $0x115] ss:$32 sm:$0x20]  ;;  %v4389_v3 = vld [vmem:[#allocation4 + $0x11b] ss:$32 sm:$0x40]  ;;  %v7840_v19 = vpop.permute.xlu1 %4570  ;;  %v4164_v26 = vor.u32 %v4163_v12, %v4162_v43 }
 0x463   : > { %v4165_v39 = vld [vmem:[#allocation4 + $0x116] ss:$32 sm:$0x10]  ;;  %v4422_v13 = vld [vmem:[#allocation4 + $0x11c] ss:$32 sm:$0x1]  ;;  %v4124_v30 = vor.u32 %v4123_v27, %v4122_v34  ;;  %v4390_v2 = vor.u32 %v4389_v3, %v4388_v53 }
 0x464   : > { %v4425_v21 = vld [vmem:[#allocation4 + $0x11c] ss:$32 sm:$0x4]  ;;  %v8271_v16 = vld [vmem:[#allocation11_spill] sm:$0xff]  ;;  %v4424_v58 = vor.u32 %v4423_v54, %v4422_v13  ;;  %v4316_v10 = vadd.f32 %v4314_v50, %v4270_v55  ;;  %v4166_v49 = vor.u32 %v4165_v39, %v4164_v26  ;;  %v8273_v43 = vld [vmem:[#allocation17_spill] sm:$0xff]  ;;  %v4183_v55 = vadd.f32 %v4181_v44, %v7807_v9 }
 0x465   : > { %v4427_v52 = vld [vmem:[#allocation4 + $0x11c] ss:$32 sm:$0x8]  ;;  %v4591_v6 = vmul.f32 %v7793_v1, %v8271_v16  ;;  %v7845_v32 = vld [vmem:[#allocation4 + $0x11b] ss:$32 sm:$0x80]  ;;  %v4358_v16 = vmul.f32 %v8273_v43, %v4348_v14 }
 0x466   : > { %v4167_v4 = vld [vmem:[#allocation4 + $0x116] ss:$32 sm:$0x20]  ;;  %v8272_v38 = vld [vmem:[#allocation12_spill] sm:$0xff]  ;;  %v4426_v23 = vor.u32 %v4425_v21, %v4424_v58  ;;  %v4392_v21 = vor.u32 %v7845_v32, %v4390_v2  ;;  %v4675_v58 = vpop.permute.xlu1 %4674 }
 0x467   : > { %v7849_v56 = vmul.f32 %v7793_v1, %v8272_v38  ;;  %v4467_v63 = vld [vmem:[#allocation4 + $0x11d] ss:$32 sm:$0x2]  ;;  %v4231_v45 = vld [vmem:[#allocation4 + $0x18] ss:$32 sm:$0x2]  ;;  %v4599_v57 = vadd.f32 %v4591_v6, %v7766_v31  ;;  %v4225_v1 = vmul.f32 %v7810_v48, %v4200_v61  ;;  %v4168_v6 = vor.u32 %v4167_v4, %v4166_v49 }
 0x468   : > { %v4125_v24 = vld [vmem:[#allocation4 + $0x115] ss:$32 sm:$0x40]  ;;  %v4429_v28 = vld [vmem:[#allocation4 + $0x11c] ss:$32 sm:$0x10]  ;;  %v4428_v50 = vor.u32 %v4427_v52, %v4426_v23  ;;  %v4360_v9 = vadd.f32 %v4358_v16, %v4316_v10 }
 0x469   : > { %v4466_v29 = vld [vmem:[#allocation4 + $0x11d] ss:$32 sm:$0x1]  ;;  %v4230_v35 = vld [vmem:[#allocation4 + $0x18] ss:$32 sm:$0x1]  ;;  %v4227_v34 = vadd.f32 %v4225_v1, %v4183_v55  ;;  %v7859_v1 = vmul.f32 %v4675_v58, %v4599_v57 }
 0x46a   : > { %v4469_v20 = vld [vmem:[#allocation4 + $0x11d] ss:$32 sm:$0x4]  ;;  %v4169_v60 = vld [vmem:[#allocation4 + $0x116] ss:$32 sm:$0x40]  ;;  %v4232_v17 = vor.u32 %v4231_v45, %v4230_v35  ;;  %v4468_v33 = vor.u32 %v4467_v63, %v4466_v29  ;;  %v4126_v45 = vor.u32 %v4125_v24, %v4124_v30  ;;  %v4430_v53 = vor.u32 %v4429_v28, %v4428_v50 }
 0x46b   : > { %v4233_v54 = vld [vmem:[#allocation4 + $0x18] ss:$32 sm:$0x4]  ;;  %v4275_v0 = vld [vmem:[#allocation4 + $0x19] ss:$32 sm:$0x2]  ;;  %v4170_v52 = vor.u32 %v4169_v60, %v4168_v6  ;;  %v4402_v28 = vmul.f32 %v7800_v62, %v4392_v21 }
 0x46c   : > { %v4127_v5 = vld [vmem:[#allocation4 + $0x115] ss:$32 sm:$0x80]  ;;  %v4431_v12 = vld [vmem:[#allocation4 + $0x11c] ss:$32 sm:$0x20]  ;;  %v4234_v3 = vor.u32 %v4233_v54, %v4232_v17  ;;  %v4470_v14 = vor.u32 %v4469_v20, %v4468_v33 }
 0x46d   : > { %v4471_v13 = vld [vmem:[#allocation4 + $0x11d] ss:$32 sm:$0x8]  ;;  %v4235_v36 = vld [vmem:[#allocation4 + $0x18] ss:$32 sm:$0x8]  ;;  %v4128_v2 = vor.u32 %v4127_v5, %v4126_v45  ;;  %v4432_v54 = vor.u32 %v4431_v12, %v4430_v53  ;;  %v7868_v62 = vadd.f32 %v4402_v28, %v4360_v9  ;;  %v4677_v53 = vpop.permute.xlu0 %4676 }
 0x46e   : > { %v4171_v31 = vld [vmem:[#allocation4 + $0x116] ss:$32 sm:$0x80]  ;;  %v4274_v47 = vld [vmem:[#allocation4 + $0x19] ss:$32 sm:$0x1]  ;;  %v4236_v44 = vor.u32 %v4235_v36, %v4234_v3  ;;  %v4472_v49 = vor.u32 %v4471_v13, %v4470_v14  ;;  %v4600_v36 = vadd.f32 %v7849_v56, %v4227_v34 }
 0x46f   : > { %v4277_v48 = vld [vmem:[#allocation4 + $0x19] ss:$32 sm:$0x4]  ;;  %v4433_v27 = vld [vmem:[#allocation4 + $0x11c] ss:$32 sm:$0x40]  ;;  %v4276_v38 = vor.u32 %v4275_v0, %v4274_v47  ;;  %v4172_v20 = vor.u32 %v4171_v31, %v4170_v52  ;;  %v7866_v57 = vmul.f32 %v7788_v40, %v4128_v2 }
 0x470   : > { %v4473_v61 = vld [vmem:[#allocation4 + $0x11d] ss:$32 sm:$0x10]  ;;  %v4237_v39 = vld [vmem:[#allocation4 + $0x18] ss:$32 sm:$0x10]  ;;  %v7863_v55 = vor.u32 %v4433_v27, %v4432_v54 }
 0x471   : > { %v4239_v26 = vld [vmem:[#allocation4 + $0x18] ss:$32 sm:$0x20]  ;;  %v4279_v35 = vld [vmem:[#allocation4 + $0x19] ss:$32 sm:$0x8]  ;;  %v4278_v32 = vor.u32 %v4277_v48, %v4276_v38  ;;  %v4238_v60 = vor.u32 %v4237_v39, %v4236_v44  ;;  %v4474_v5 = vor.u32 %v4473_v61, %v4472_v49  ;;  %v7871_v56 = vmul.f32 %v7804_v37, %v4172_v20 }
 0x472   : > { %v7857_v63 = vld [vmem:[#allocation4 + $0x11c] ss:$32 sm:$0x80]  ;;  %v4475_v29 = vld [vmem:[#allocation4 + $0x11d] ss:$32 sm:$0x20]  ;;  %v7885_v44 = vmul.f32 %v4677_v53, %v4600_v36 }
 0x473   : > { %v4281_v4 = vld [vmem:[#allocation4 + $0x19] ss:$32 sm:$0x10]  ;;  %v4319_v23 = vld [vmem:[#allocation4 + $0x1a] ss:$32 sm:$0x2]  ;;  %v4280_v30 = vor.u32 %v4279_v35, %v4278_v32  ;;  %v4240_v31 = vor.u32 %v4239_v26, %v4238_v60  ;;  %v4436_v27 = vor.u32 %v7857_v63, %v7863_v55  ;;  %v4476_v61 = vor.u32 %v4475_v29, %v4474_v5 }
 0x474   : > { %v4241_v0 = vld [vmem:[#allocation4 + $0x18] ss:$32 sm:$0x40]  ;;  %v4283_v17 = vld [vmem:[#allocation4 + $0x19] ss:$32 sm:$0x20] }
 0x475   : > { %v4318_v24 = vld [vmem:[#allocation4 + $0x1a] ss:$32 sm:$0x1]  ;;  %v4477_v10 = vld [vmem:[#allocation4 + $0x11d] ss:$32 sm:$0x40]  ;;  %v4282_v48 = vor.u32 %v4281_v4, %v4280_v30  ;;  %v4242_v14 = vor.u32 %v4241_v0, %v4240_v31 }
 0x476   : > { %v4321_v43 = vld [vmem:[#allocation4 + $0x1a] ss:$32 sm:$0x4]  ;;  %v4243_v12 = vld [vmem:[#allocation4 + $0x18] ss:$32 sm:$0x80]  ;;  %v4320_v50 = vor.u32 %v4319_v23, %v4318_v24  ;;  %v7887_v32 = vor.u32 %v4477_v10, %v4476_v61 }
 0x477   : > { %v4323_v16 = vld [vmem:[#allocation4 + $0x1a] ss:$32 sm:$0x8]  ;;  %v4285_v13 = vld [vmem:[#allocation4 + $0x19] ss:$32 sm:$0x40]  ;;  %v4284_v26 = vor.u32 %v4283_v17, %v4282_v48  ;;  %v4244_v24 = vor.u32 %v4243_v12, %v4242_v14 }
 0x478   : > { %v4510_v33 = vld [vmem:[#allocation4 + $0x11e] ss:$32 sm:$0x1]  ;;  %v4325_v21 = vld [vmem:[#allocation4 + $0x1a] ss:$32 sm:$0x10]  ;;  %v4322_v40 = vor.u32 %v4321_v43, %v4320_v50 }
 0x479   : > { %v4511_v47 = vld [vmem:[#allocation4 + $0x11e] ss:$32 sm:$0x2]  ;;  %v4363_v3 = vld [vmem:[#allocation4 + $0x1b] ss:$32 sm:$0x2]  ;;  %v4286_v0 = vor.u32 %v4285_v13, %v4284_v26  ;;  %v7896_v13 = vmul.f32 %v7817_v51, %v4244_v24 }
 0x47a   : > { %v4513_v6 = vld [vmem:[#allocation4 + $0x11e] ss:$32 sm:$0x4]  ;;  %v7875_v39 = vld [vmem:[#allocation4 + $0x11d] ss:$32 sm:$0x80]  ;;  %v4512_v9 = vor.u32 %v4511_v47, %v4510_v33  ;;  %v4324_v4 = vor.u32 %v4323_v16, %v4322_v40 }
 0x47b   : > { %v7877_v38 = vld [vmem:[#allocation4 + $0x19] ss:$32 sm:$0x80]  ;;  %v4515_v58 = vld [vmem:[#allocation4 + $0x11e] ss:$32 sm:$0x8]  ;;  %v4480_v12 = vor.u32 %v7875_v39, %v7887_v32 }
 0x47c   : > { %v4362_v45 = vld [vmem:[#allocation4 + $0x1b] ss:$32 sm:$0x1]  ;;  %v4706_v37 = vld [vmem:[%s8041_s2 + $0x30] sm:$0xff]  ;;  %v4514_v28 = vor.u32 %v4513_v6, %v4512_v9  ;;  %v4326_v43 = vor.u32 %v4325_v21, %v4324_v4  ;;  %v4288_v33 = vor.u32 %v7877_v38, %v4286_v0  ;;  %v4704_v61 = vld [vmem:[%s8041_s2 + $0x20] sm:$0xff] }
 0x47d   : > { %v4707_v34 = vld [vmem:[%s8041_s2 + $0x38] sm:$0xff]  ;;  %v4364_v54 = vor.u32 %v4363_v3, %v4362_v45  ;;  %v4705_v3 = vld [vmem:[%s8041_s2 + $0x28] sm:$0xff] }
 0x47e   : > { %v4327_v35 = vld [vmem:[#allocation4 + $0x1a] ss:$32 sm:$0x20]  ;;  %v4365_v52 = vld [vmem:[#allocation4 + $0x1b] ss:$32 sm:$0x4]  ;;  %5236 = vmatprep.subr.mxu1 %v4707_v34  ;;  %5208 = vmatprep.subr.mxu0 %v4707_v34  ;;  %v4516_v31 = vor.u32 %v4515_v58, %v4514_v28 }
 0x47f   : > { %v4407_v29 = vld [vmem:[#allocation4 + $0x1c] ss:$32 sm:$0x2]  ;;  %v4517_v23 = vld [vmem:[#allocation4 + $0x11e] ss:$32 sm:$0x10]  ;;  %5244 = vmatpush3.msra.mxu1 %v4707_v34  ;;  %5209 = vmatpush3.msra.mxu0 %v4707_v34  ;;  %v4366_v10 = vor.u32 %v4365_v52, %v4364_v54  ;;  %v4328_v40 = vor.u32 %v4327_v35, %v4326_v43  ;;  %v7918_v43 = vpop.permute.xlu1 %4678 }
 0x480   : > { %v7889_v2 = vld [vmem:[#allocation4 + $0x11f] ss:$32 sm:$0x2]  ;;  %v4367_v49 = vld [vmem:[#allocation4 + $0x1b] ss:$32 sm:$0x8]  ;;  %5237 = vmatprep.subr.mxu1 %v4706_v37  ;;  %5210 = vmatprep.subr.mxu0 %v4706_v37  ;;  %v7905_v58 = vor.u32 %v4517_v23, %v4516_v31  ;;  %v4313_v23 = vmul.f32 %v7755_v25, %v4288_v33 }
 0x481   : > { %v4329_v17 = vld [vmem:[#allocation4 + $0x1a] ss:$32 sm:$0x40]  ;;  %v4369_v20 = vld [vmem:[#allocation4 + $0x1b] ss:$32 sm:$0x10]  ;;  %5245 = vmatpush3.msra.mxu1 %v4706_v37  ;;  %5211 = vmatpush3.msra.mxu0 %v4706_v37  ;;  %v4368_v45 = vor.u32 %v4367_v49, %v4366_v10 }
 0x482   : > { %v4406_v60 = vld [vmem:[#allocation4 + $0x1c] ss:$32 sm:$0x1]  ;;  %v7891_v36 = vld [vmem:[#allocation4 + $0x11f] ss:$32 sm:$0x1]  ;;  %5238 = vmatprep.subr.mxu1 %v4705_v3  ;;  %5212 = vmatprep.subr.mxu0 %v4705_v3 }
 0x483   : > { %v4409_v30 = vld [vmem:[#allocation4 + $0x1c] ss:$32 sm:$0x4]  ;;  %v4408_v16 = vor.u32 %v4407_v29, %v4406_v60  ;;  %v4451_v50 = vld [vmem:[#allocation4 + $0x1d] ss:$32 sm:$0x2]  ;;  %v4556_v53 = vor.u32 %v7889_v2, %v7891_v36  ;;  %5246 = vmatpush3.msra.mxu1 %v4705_v3  ;;  %5213 = vmatpush3.msra.mxu0 %v4705_v3  ;;  %v4330_v29 = vor.u32 %v4329_v17, %v4328_v40 }
 0x484   : > { %v4411_v5 = vld [vmem:[#allocation4 + $0x1c] ss:$32 sm:$0x8]  ;;  %v4331_v47 = vld [vmem:[#allocation4 + $0x1a] ss:$32 sm:$0x80]  ;;  %v4370_v37 = vor.u32 %v4369_v20, %v4368_v45  ;;  %5239 = vmatprep.subr.mxu1 %v4704_v61  ;;  %5214 = vmatprep.subr.mxu0 %v4704_v61 }
 0x485   : > { %v4371_v48 = vld [vmem:[#allocation4 + $0x1b] ss:$32 sm:$0x20]  ;;  %v4413_v21 = vld [vmem:[#allocation4 + $0x1c] ss:$32 sm:$0x10]  ;;  %v4410_v51 = vor.u32 %v4409_v30, %v4408_v16  ;;  %5247 = vmatpush3.msra.mxu1 %v4704_v61  ;;  %5215 = vmatpush3.msra.mxu0 %v4704_v61  ;;  %v4332_v25 = vor.u32 %v4331_v47, %v4330_v29 }
 0x486   : > { %v4450_v6 = vld [vmem:[#allocation4 + $0x1d] ss:$32 sm:$0x1]  ;;  %v4495_v38 = vld [vmem:[#allocation4 + $0x1e] ss:$32 sm:$0x2]  ;;  %v4372_v36 = vor.u32 %v4371_v48, %v4370_v37 }
 0x487   : > { %v4453_v34 = vld [vmem:[#allocation4 + $0x1d] ss:$32 sm:$0x4]  ;;  %v4373_v14 = vld [vmem:[#allocation4 + $0x1b] ss:$32 sm:$0x40]  ;;  %v4452_v9 = vor.u32 %v4451_v50, %v4450_v6  ;;  %v4412_v35 = vor.u32 %v4411_v5, %v4410_v51  ;;  %v4357_v45 = vmul.f32 %v7821_v18, %v4332_v25 }
 0x488   : > { %v4415_v26 = vld [vmem:[#allocation4 + $0x1c] ss:$32 sm:$0x20]  ;;  %v4455_v52 = vld [vmem:[#allocation4 + $0x1d] ss:$32 sm:$0x8]  ;;  %v4374_v51 = vor.u32 %v4373_v14, %v4372_v36 }
 0x489   : > { %v4457_v4 = vld [vmem:[#allocation4 + $0x1d] ss:$32 sm:$0x10]  ;;  %v4494_v54 = vld [vmem:[#allocation4 + $0x1e] ss:$32 sm:$0x1]  ;;  %v4454_v28 = vor.u32 %v4453_v34, %v4452_v9  ;;  %v4414_v10 = vor.u32 %v4413_v21, %v4412_v35  ;;  %v4315_v35 = vadd.f32 %v4313_v23, %v7896_v13  ;;  %v7931_v23 = vpop.permute.xlu1 %4682 }
 0x48a   : > { %v4497_v49 = vld [vmem:[#allocation4 + $0x1e] ss:$32 sm:$0x4]  ;;  %v4557_v24 = vld [vmem:[#allocation4 + $0x11f] ss:$32 sm:$0x4]  ;;  %v4496_v60 = vor.u32 %v4495_v38, %v4494_v54 }
 0x48b   : > { %v7910_v0 = vld [vmem:[#allocation4 + $0x1b] ss:$32 sm:$0x80]  ;;  %v4417_v2 = vld [vmem:[#allocation4 + $0x1c] ss:$32 sm:$0x40]  ;;  %v4456_v33 = vor.u32 %v4455_v52, %v4454_v28  ;;  %v4416_v61 = vor.u32 %v4415_v26, %v4414_v10  ;;  %v4558_v54 = vor.u32 %v4557_v24, %v4556_v53  ;;  %v4359_v24 = vadd.f32 %v4357_v45, %v4315_v35 }
 0x48c   : > { %v4499_v30 = vld [vmem:[#allocation4 + $0x1e] ss:$32 sm:$0x8]  ;;  %v4702_v20 = vld [vmem:[%s8041_s2 + $0x10] sm:$0xff]  ;;  %v4498_v6 = vor.u32 %v4497_v49, %v4496_v60  ;;  %v4376_v18 = vor.u32 %v7910_v0, %v4374_v51  ;;  %v4701_v49 = vld [vmem:[%s8041_s2 + $0x8] sm:$0xff] }
 0x48d   : > { %v4703_v17 = vld [vmem:[%s8041_s2 + $0x18] sm:$0xff]  ;;  %v4458_v38 = vor.u32 %v4457_v4, %v4456_v33  ;;  %v4418_v14 = vor.u32 %v4417_v2, %v4416_v61  ;;  %v4700_v4 = vld [vmem:[%s8041_s2] sm:$0xff]  ;;  %v4202_v28 = vld [vmem:[#allocation4 + $0x117] ss:$32 sm:$0x1] }
 0x48e   : > { %5240 = vmatprep.subr.mxu1 %v4703_v17  ;;  %v4538_v16 = vld [vmem:[#allocation4 + $0x1f] ss:$32 sm:$0x1]  ;;  %5216 = vmatprep.subr.mxu0 %v4703_v17  ;;  %v7920_v50 = vld [vmem:[#allocation4 + $0x1c] ss:$32 sm:$0x80]  ;;  %v4500_v9 = vor.u32 %v4499_v30, %v4498_v6 }
 0x48f   : > { %v4539_v5 = vld [vmem:[#allocation4 + $0x1f] ss:$32 sm:$0x2]  ;;  %v4459_v31 = vld [vmem:[#allocation4 + $0x1d] ss:$32 sm:$0x20]  ;;  %5248 = vmatpush3.msra.mxu1 %v4703_v17  ;;  %5217 = vmatpush3.msra.mxu0 %v4703_v17  ;;  %v4420_v0 = vor.u32 %v7920_v50, %v4418_v14 }
 0x490   : > { %v4540_v3 = vor.u32 %v4539_v5, %v4538_v16  ;;  %v4541_v40 = vld [vmem:[#allocation4 + $0x1f] ss:$32 sm:$0x4]  ;;  %v4461_v47 = vld [vmem:[#allocation4 + $0x1d] ss:$32 sm:$0x40]  ;;  %5241 = vmatprep.subr.mxu1 %v4702_v20  ;;  %5218 = vmatprep.subr.mxu0 %v4702_v20  ;;  %v4460_v30 = vor.u32 %v4459_v31, %v4458_v38 }
 0x491   : > { %v4501_v48 = vld [vmem:[#allocation4 + $0x1e] ss:$32 sm:$0x10]  ;;  %v4543_v21 = vld [vmem:[#allocation4 + $0x1f] ss:$32 sm:$0x8]  ;;  %5249 = vmatpush3.msra.mxu1 %v4702_v20  ;;  %5219 = vmatpush3.msra.mxu0 %v4702_v20 }
 0x492   : > { %v4559_v34 = vld [vmem:[#allocation4 + $0x11f] ss:$32 sm:$0x8]  ;;  %v4503_v29 = vld [vmem:[#allocation4 + $0x1e] ss:$32 sm:$0x20]  ;;  %v4542_v52 = vor.u32 %v4541_v40, %v4540_v3  ;;  %v4502_v17 = vor.u32 %v4501_v48, %v4500_v9  ;;  %5242 = vmatprep.subr.mxu1 %v4701_v49  ;;  %5220 = vmatprep.subr.mxu0 %v4701_v49  ;;  %v4462_v5 = vor.u32 %v4461_v47, %v4460_v30 }
 0x493   : > { %v4545_v37 = vld [vmem:[#allocation4 + $0x1f] ss:$32 sm:$0x10]  ;;  %v4463_v26 = vld [vmem:[#allocation4 + $0x1d] ss:$32 sm:$0x80]  ;;  %5250 = vmatpush3.msra.mxu1 %v4701_v49  ;;  %5221 = vmatpush3.msra.mxu0 %v4701_v49  ;;  %v4560_v3 = vor.u32 %v4559_v34, %v4558_v54  ;;  %v4401_v40 = vmul.f32 %v7763_v46, %v4376_v18  ;;  %v4445_v48 = vmul.f32 %v7830_v42, %v4420_v0 }
 0x494   : > { %v4519_v60 = vld [vmem:[#allocation4 + $0x11e] ss:$32 sm:$0x20]  ;;  %v4544_v20 = vor.u32 %v4543_v21, %v4542_v52  ;;  %v4203_v13 = vld [vmem:[#allocation4 + $0x117] ss:$32 sm:$0x2]  ;;  %v4504_v33 = vor.u32 %v4503_v29, %v4502_v17  ;;  %5243 = vmatprep.subr.mxu1 %v4700_v4  ;;  %5222 = vmatprep.subr.mxu0 %v4700_v4  ;;  %v4464_v21 = vor.u32 %v4463_v26, %v4462_v5 }
 0x495   : > { %v4205_v53 = vld [vmem:[#allocation4 + $0x117] ss:$32 sm:$0x4]  ;;  %v4505_v2 = vld [vmem:[#allocation4 + $0x1e] ss:$32 sm:$0x40]  ;;  %v4204_v36 = vor.u32 %v4203_v13, %v4202_v28  ;;  %5251 = vmatpush3.msra.mxu1 %v4700_v4  ;;  %5223 = vmatpush3.msra.mxu0 %v4700_v4  ;;  %v4520_v52 = vor.u32 %v4519_v60, %v7905_v58  ;;  %v4403_v14 = vadd.f32 %v4401_v40, %v4359_v24  ;;  %v7946_v28 = vpop.permute.xlu1 %3250 }
 0x496   : > { %v4547_v25 = vld [vmem:[#allocation4 + $0x1f] ss:$32 sm:$0x20]  ;;  %v4521_v10 = vld [vmem:[#allocation4 + $0x11e] ss:$32 sm:$0x40]  ;;  %v4546_v31 = vor.u32 %v4545_v37, %v4544_v20  ;;  %v4506_v38 = vor.u32 %v4505_v2, %v4504_v33  ;;  %5228 = vmatmul.mubr.msk.f32.vlgmr.msra.gmra.mxu1 %vm941_vm1, %v7859_v1  ;;  %v4489_v1 = vmul.f32 %v7832_v11, %v4464_v21 }
 0x497   : > { %v4561_v16 = vld [vmem:[#allocation4 + $0x11f] ss:$32 sm:$0x10]  ;;  %v4207_v6 = vld [vmem:[#allocation4 + $0x117] ss:$32 sm:$0x8]  ;;  %v4206_v50 = vor.u32 %v4205_v53, %v4204_v36  ;;  %5230 = vmatprep.mubr.msk.f32.mxu1 %vm941_vm1, %v7885_v44  ;;  %v4522_v55 = vor.u32 %v4521_v10, %v4520_v52  ;;  %v4490_v44 = vmul.f32 %v7814_v15, %v4480_v12  ;;  %v4447_v17 = vadd.f32 %v4445_v48, %v4403_v14  ;;  %v4681_v52 = vpop.permute.xlu0 %4680 }
 0x498   : > { %v4507_v51 = vld [vmem:[#allocation4 + $0x1e] ss:$32 sm:$0x80]  ;;  %v4549_v45 = vld [vmem:[#allocation4 + $0x1f] ss:$32 sm:$0x40]  ;;  %v4548_v9 = vor.u32 %v4547_v25, %v4546_v31  ;;  %v4562_v35 = vor.u32 %v4561_v16, %v4560_v3  ;;  %v4140_v16 = vadd.f32 %v7866_v57, %v7785_v7 }
 0x499   : > { %v4563_v61 = vld [vmem:[#allocation4 + $0x11f] ss:$32 sm:$0x20]  ;;  %v4209_v47 = vld [vmem:[#allocation4 + $0x117] ss:$32 sm:$0x10]  ;;  %v4208_v18 = vor.u32 %v4207_v6, %v4206_v50  ;;  %v4508_v26 = vor.u32 %v4507_v51, %v4506_v38  ;;  %v4491_v5 = vadd.f32 %v4489_v1, %v4447_v17  ;;  %v7958_v50 = vpop.permute.xlu1 %3210 }
 0x49a   : > { %v3131_v29 = vld [vmem:[#allocation3 + $0xf] ss:$16 sm:$0xc]  ;;  %v4523_v37 = vld [vmem:[#allocation4 + $0x11e] ss:$32 sm:$0x80]  ;;  %v4550_v49 = vor.u32 %v4549_v45, %v4548_v9  ;;  %v4184_v40 = vadd.f32 %v7871_v56, %v4140_v16 }
 0x49b   : > { %v8274_v46 = vld [vmem:[#allocation6_spill] sm:$0xff]  ;;  %v4551_v54 = vld [vmem:[#allocation4 + $0x1f] ss:$32 sm:$0x80]  ;;  %v4210_v60 = vor.u32 %v4209_v47, %v4208_v18  ;;  %v4533_v11 = vmul.f32 %v7834_v59, %v4508_v26  ;;  %v4524_v2 = vor.u32 %v4523_v37, %v4522_v55  ;;  %v8278_v1 = vld [vmem:[#allocation15_spill] sm:$0xff] }
 0x49c   : > { %v4446_v34 = vmul.f32 %v8274_v46, %v4436_v27  ;;  %v4565_v42 = vld [vmem:[#allocation4 + $0x11f] ss:$32 sm:$0x40]  ;;  %v4211_v4 = vld [vmem:[#allocation4 + $0x117] ss:$32 sm:$0x20]  ;;  %v4564_v27 = vor.u32 %v4563_v61, %v4562_v35  ;;  %v4552_v20 = vor.u32 %v4551_v54, %v4550_v49 }
 0x49d   : > { %v4567_v58 = vld [vmem:[#allocation4 + $0x11f] ss:$32 sm:$0x80]  ;;  %v4213_v13 = vld [vmem:[#allocation4 + $0x117] ss:$32 sm:$0x40]  ;;  %v4212_v25 = vor.u32 %v4211_v4, %v4210_v60  ;;  %v4535_v51 = vadd.f32 %v4533_v11, %v4491_v5  ;;  %v4534_v7 = vmul.f32 %v7790_v41, %v4524_v2 }
 0x49e   : > { %v4448_v63 = vadd.f32 %v4446_v34, %v7868_v62  ;;  %v3098_v30 = vld [vmem:[#allocation2 + $0xf] ss:$16 sm:$0x3]  ;;  %v4566_v62 = vor.u32 %v4565_v42, %v4564_v27  ;;  %v4577_v39 = vmul.f32 %v7840_v19, %v4552_v20  ;;  %v4215_v15 = vld [vmem:[#allocation4 + $0x117] ss:$32 sm:$0x80]  ;;  %v7971_v42 = vpop.permute.xlu1 %3294 }
 0x49f   : > { %v3099_v53 = vld [vmem:[#allocation2 + $0xf] ss:$16 sm:$0xc]  ;;  %v4214_v33 = vor.u32 %v4213_v13, %v4212_v25  ;;  %v7965_v46 = vld [vmem:[%s7783_s12] ss:$0 sm:$0xff]  ;;  %s5646_s12 = smov 32  }
 0x4a0   : > { %v3130_v24 = vld [vmem:[#allocation3 + $0xf] ss:$16 sm:$0x3]  ;;  %v3100_v36 = vor.u32 %v3099_v53, %v3098_v30  ;;  %v4492_v12 = vadd.f32 %v4490_v44, %v4448_v63  ;;  %v4568_v59 = vor.u32 %v4567_v58, %v4566_v62  ;;  %v4579_v48 = vadd.f32 %v4577_v39, %v4535_v51  ;;  %v8277_v35 = vld [vmem:[#allocation13_spill] sm:$0xff]  ;;  %v7977_v30 = vpop.permute.xlu0 %3206 }
 0x4a1   : > { %v3133_v0 = vld [vmem:[#allocation3 + $0xf] ss:$16 sm:$0x30]  ;;  %v3132_v10 = vor.u32 %v3131_v29, %v3130_v24  ;;  %v4216_v19 = vor.u32 %v4215_v15, %v4214_v33  ;;  %v4593_v41 = vmul.f32 %v7965_v46, %v8277_v35  ;;  %v4595_v26 = vmul.f32 %v7965_v46, %v8278_v1  ;;  %v3175_v49 = vld [vmem:[#allocation4] ss:$32 sm:$0x2] }
 0x4a2   : > { %v3101_v32 = vld [vmem:[#allocation2 + $0xf] ss:$16 sm:$0x30]  ;;  %v4578_v57 = vmul.f32 %v7826_v22, %v4568_v59  ;;  %v4536_v38 = vadd.f32 %v4534_v7, %v4492_v12  ;;  %v3307_v4 = vld [vmem:[#allocation4 + $0x3] ss:$32 sm:$0x2] }
 0x4a3   : > { %v3102_v31 = vor.u32 %v3101_v32, %v3100_v36  ;;  %v3134_v6 = vor.u32 %v3133_v0, %v3132_v10  ;;  %v3135_v3 = vld [vmem:[#allocation3 + $0xf] ss:$16 sm:$0xc0]  ;;  %v3177_v27 = vld [vmem:[#allocation4] ss:$32 sm:$0x4]  ;;  %v7982_v0 = vpop.permute.xlu1 %3298 }
 0x4a4   : > { %v3103_v45 = vld [vmem:[#allocation2 + $0xf] ss:$16 sm:$0xc0]  ;;  %v4580_v37 = vadd.f32 %v4578_v57, %v4536_v38  ;;  %v3306_v58 = vld [vmem:[#allocation4 + $0x3] ss:$32 sm:$0x1] }
 0x4a5   : > { %v3104_v61 = vor.u32 %v3103_v45, %v3102_v31  ;;  %v3136_v21 = vor.u32 %v3135_v3, %v3134_v6  ;;  %v8275_v9 = vld [vmem:[#allocation46_spill] sm:$0xff]  ;;  %v3309_v44 = vld [vmem:[#allocation4 + $0x3] ss:$32 sm:$0x4]  ;;  %v3308_v53 = vor.u32 %v3307_v4, %v3306_v58 }
 0x4a6   : > { %v4226_v47 = vmul.f32 %v8275_v9, %v4216_v19  ;;  %v8276_v56 = vld [vmem:[#allocation14_spill] sm:$0xff]  ;;  %v4603_v55 = vadd.f32 %v4595_v26, %v4580_v37  ;;  %v3219_v11 = vld [vmem:[#allocation4 + $0x1] ss:$32 sm:$0x2] }
 0x4a7   : > { %v3161_v29 = vmul.f32 %v3104_v61, %v7824_v8  ;;  %v4594_v34 = vmul.f32 %v7965_v46, %v8276_v56  ;;  %v3174_v8 = vld [vmem:[#allocation4] ss:$32 sm:$0x1]  ;;  %v3311_v24 = vld [vmem:[#allocation4 + $0x3] ss:$32 sm:$0x8]  ;;  %v3310_v36 = vor.u32 %v3309_v44, %v3308_v53 }
 0x4a8   : > { %v4228_v22 = vadd.f32 %v4226_v47, %v4184_v40  ;;  %v4699_v17 = vmul.f32 %v7931_v23, %v4603_v55  ;;  %v3176_v20 = vor.u32 %v3175_v49, %v3174_v8  ;;  %v3179_v13 = vld [vmem:[#allocation4] ss:$32 sm:$0x8]  ;;  %v3221_v2 = vld [vmem:[#allocation4 + $0x1] ss:$32 sm:$0x4]  ;;  %v7985_v40 = vpop.permute.xlu0 %3254  ;;  %v7987_v47 = vpop.permute.xlu1 %3342 }
 0x4a9   : > { %v3165_v54 = vadd.f32 %v3161_v29, %v3136_v21  ;;  %v4602_v18 = vadd.f32 %v4594_v34, %v4579_v48  ;;  %v3181_v25 = vld [vmem:[#allocation4] ss:$32 sm:$0x10]  ;;  %v3313_v10 = vld [vmem:[#allocation4 + $0x3] ss:$32 sm:$0x10]  ;;  %v3312_v12 = vor.u32 %v3311_v24, %v3310_v36 }
 0x4aa   : > { %v4601_v14 = vadd.f32 %v4593_v41, %v4228_v22  ;;  %v3178_v62 = vor.u32 %v3177_v27, %v3176_v20  ;;  %v3183_v5 = vld [vmem:[#allocation4] ss:$32 sm:$0x20]  ;;  %v3315_v39 = vld [vmem:[#allocation4 + $0x3] ss:$32 sm:$0x20] }
 0x4ab   : > { %3170 = vst.msk [vmem:[#allocation4 + $0x1e0] sm:$0xff] %vm941_vm1, %v3165_v54  ;;  %v4698_v60 = vmul.f32 %v4681_v52, %v4602_v18  ;;  %v3223_v23 = vld [vmem:[#allocation4 + $0x1] ss:$32 sm:$0x8]  ;;  %v3314_v48 = vor.u32 %v3313_v10, %v3312_v12 }
 0x4ac   : > { %v4697_v63 = vmul.f32 %v7918_v43, %v4601_v14  ;;  %v3218_v43 = vld [vmem:[#allocation4 + $0x1] ss:$32 sm:$0x1]  ;;  %v3180_v32 = vor.u32 %v3179_v13, %v3178_v62  ;;  %v3191_v33 = vld [vmem:[#allocation4 + $0x100] ss:$32 sm:$0x2]  ;;  %v3339_v62 = vpop.permute.xlu0 %3338 }
 0x4ad   : > { %v3220_v16 = vor.u32 %v3219_v11, %v3218_v43  ;;  %v3225_v15 = vld [vmem:[#allocation4 + $0x1] ss:$32 sm:$0x10]  ;;  %v3263_v6 = vld [vmem:[#allocation4 + $0x2] ss:$32 sm:$0x2]  ;;  %v3316_v14 = vor.u32 %v3315_v39, %v3314_v48 }
 0x4ae   : > { %5231 = vmatmul.mubr.msk.f32.gmra.mxu1 %vm941_vm1, %v4697_v63  ;;  %v3235_v31 = vld [vmem:[#allocation4 + $0x101] ss:$32 sm:$0x2]  ;;  %v3185_v3 = vld [vmem:[#allocation4] ss:$32 sm:$0x40]  ;;  %v3182_v61 = vor.u32 %v3181_v25, %v3180_v32 }
 0x4af   : > { %5233 = vmatprep.mubr.msk.f32.mxu1 %vm941_vm1, %v4698_v60  ;;  %v3222_v59 = vor.u32 %v3221_v2, %v3220_v16  ;;  %v3317_v51 = vld [vmem:[#allocation4 + $0x3] ss:$32 sm:$0x40]  ;;  %v3439_v45 = vld [vmem:[#allocation4 + $0x6] ss:$32 sm:$0x2] }
 0x4b0   : > { %v3227_v7 = vld [vmem:[#allocation4 + $0x1] ss:$32 sm:$0x20]  ;;  %v3262_v38 = vld [vmem:[#allocation4 + $0x2] ss:$32 sm:$0x1]  ;;  %v3184_v18 = vor.u32 %v3183_v5, %v3182_v61  ;;  %v3318_v11 = vor.u32 %v3317_v51, %v3316_v14  ;;  %v7989_v51 = vpop.permute.xlu1 %3382 }
 0x4b1   : > { %v3234_v57 = vld [vmem:[#allocation4 + $0x101] ss:$32 sm:$0x1]  ;;  %v3224_v21 = vor.u32 %v3223_v23, %v3222_v59  ;;  %v3265_v9 = vld [vmem:[#allocation4 + $0x2] ss:$32 sm:$0x4]  ;;  %v3264_v54 = vor.u32 %v3263_v6, %v3262_v38 }
 0x4b2   : > { %5234 = vmatmul.mubr.msk.f32.gmra.mxu1 %vm941_vm1, %v4699_v17  ;;  %v3237_v19 = vld [vmem:[#allocation4 + $0x101] ss:$32 sm:$0x4]  ;;  %v3187_v29 = vld [vmem:[#allocation4] ss:$32 sm:$0x80]  ;;  %v3236_v22 = vor.u32 %v3235_v31, %v3234_v57  ;;  %v3186_v17 = vor.u32 %v3185_v3, %v3184_v18 }
 0x4b3   : > { %v3319_v56 = vld [vmem:[#allocation4 + $0x3] ss:$32 sm:$0x80]  ;;  %v3438_v34 = vld [vmem:[#allocation4 + $0x6] ss:$32 sm:$0x1]  ;;  %v3226_v1 = vor.u32 %v3225_v15, %v3224_v21  ;;  %v3266_v60 = vor.u32 %v3265_v9, %v3264_v54 }
 0x4b4   : > { %v3441_v52 = vld [vmem:[#allocation4 + $0x6] ss:$32 sm:$0x4]  ;;  %v3229_v37 = vld [vmem:[#allocation4 + $0x1] ss:$32 sm:$0x40]  ;;  %v3238_v27 = vor.u32 %v3237_v19, %v3236_v22  ;;  %v3440_v20 = vor.u32 %v3439_v45, %v3438_v34  ;;  %v3188_v23 = vor.u32 %v3187_v29, %v3186_v17  ;;  %v3320_v15 = vor.u32 %v3319_v56, %v3318_v11 }
 0x4b5   : > { %v3190_v35 = vld [vmem:[#allocation4 + $0x100] ss:$32 sm:$0x1]  ;;  %v3239_v8 = vld [vmem:[#allocation4 + $0x101] ss:$32 sm:$0x8]  ;;  %v3228_v13 = vor.u32 %v3227_v7, %v3226_v1 }
 0x4b6   : > { %v3193_v41 = vld [vmem:[#allocation4 + $0x100] ss:$32 sm:$0x4]  ;;  %v3267_v49 = vld [vmem:[#allocation4 + $0x2] ss:$32 sm:$0x8]  ;;  %v3192_v55 = vor.u32 %v3191_v33, %v3190_v35  ;;  %v3240_v10 = vor.u32 %v3239_v8, %v3238_v27  ;;  %v3442_v32 = vor.u32 %v3441_v52, %v3440_v20  ;;  %v3213_v9 = vmul.f32 %v7977_v30, %v3188_v23 }
 0x4b7   : > { %v3195_v26 = vld [vmem:[#allocation4 + $0x100] ss:$32 sm:$0x8]  ;;  %v3443_v4 = vld [vmem:[#allocation4 + $0x6] ss:$32 sm:$0x8]  ;;  %v3268_v16 = vor.u32 %v3267_v49, %v3266_v60  ;;  %v3230_v12 = vor.u32 %v3229_v37, %v3228_v13  ;;  %v7994_v29 = vmul.f32 %v3339_v62, %v3320_v15 }
 0x4b8   : > { %v3231_v63 = vld [vmem:[#allocation4 + $0x1] ss:$32 sm:$0x80]  ;;  %v3269_v44 = vld [vmem:[#allocation4 + $0x2] ss:$32 sm:$0x10]  ;;  %v3194_v36 = vor.u32 %v3193_v41, %v3192_v55  ;;  %v3444_v56 = vor.u32 %v3443_v4, %v3442_v32 }
 0x4b9   : > { %v3241_v58 = vld [vmem:[#allocation4 + $0x101] ss:$32 sm:$0x10]  ;;  %v3197_v53 = vld [vmem:[#allocation4 + $0x100] ss:$32 sm:$0x10]  ;;  %v3270_v19 = vor.u32 %v3269_v44, %v3268_v16  ;;  %v3232_v34 = vor.u32 %v3231_v63, %v3230_v12 }
 0x4ba   : > { %v3243_v24 = vld [vmem:[#allocation4 + $0x101] ss:$32 sm:$0x20]  ;;  %v3271_v43 = vld [vmem:[#allocation4 + $0x2] ss:$32 sm:$0x20]  ;;  %v3196_v7 = vor.u32 %v3195_v26, %v3194_v36  ;;  %v3242_v57 = vor.u32 %v3241_v58, %v3240_v10  ;;  %v8003_v10 = vpop.permute.xlu1 %3426 }
 0x4bb   : > { %v3279_v2 = vld [vmem:[#allocation4 + $0x102] ss:$32 sm:$0x2]  ;;  %v3445_v25 = vld [vmem:[#allocation4 + $0x6] ss:$32 sm:$0x10]  ;;  %v3272_v14 = vor.u32 %v3271_v43, %v3270_v19  ;;  %v3257_v30 = vmul.f32 %v7946_v28, %v3232_v34 }
 0x4bc   : > { %v3278_v5 = vld [vmem:[#allocation4 + $0x102] ss:$32 sm:$0x1]  ;;  %v3199_v59 = vld [vmem:[#allocation4 + $0x100] ss:$32 sm:$0x20]  ;;  %v3198_v54 = vor.u32 %v3197_v53, %v3196_v7  ;;  %v3244_v18 = vor.u32 %v3243_v24, %v3242_v57  ;;  %v7998_v55 = vor.u32 %v3445_v25, %v3444_v56 }
 0x4bd   : > { %v3281_v39 = vld [vmem:[#allocation4 + $0x102] ss:$32 sm:$0x4]  ;;  %v3245_v33 = vld [vmem:[#allocation4 + $0x101] ss:$32 sm:$0x40]  ;;  %v3280_v61 = vor.u32 %v3279_v2, %v3278_v5 }
 0x4be   : > { %v3273_v31 = vld [vmem:[#allocation4 + $0x2] ss:$32 sm:$0x40]  ;;  %v3323_v3 = vld [vmem:[#allocation4 + $0x103] ss:$32 sm:$0x2]  ;;  %v3200_v17 = vor.u32 %v3199_v59, %v3198_v54  ;;  %v3246_v11 = vor.u32 %v3245_v33, %v3244_v18 }
 0x4bf   : > { %v3283_v6 = vld [vmem:[#allocation4 + $0x102] ss:$32 sm:$0x8]  ;;  %v7991_v45 = vld [vmem:[#allocation4 + $0x6] ss:$32 sm:$0x20]  ;;  %v3282_v1 = vor.u32 %v3281_v39, %v3280_v61  ;;  %v3274_v20 = vor.u32 %v3273_v31, %v3272_v14 }
 0x4c0   : > { %v3322_v48 = vld [vmem:[#allocation4 + $0x103] ss:$32 sm:$0x1]  ;;  %v3351_v38 = vld [vmem:[#allocation4 + $0x4] ss:$32 sm:$0x2]  ;;  %v3448_v2 = vor.u32 %v7991_v45, %v7998_v55 }
 0x4c1   : > { %v3325_v21 = vld [vmem:[#allocation4 + $0x103] ss:$32 sm:$0x4]  ;;  %v3201_v52 = vld [vmem:[#allocation4 + $0x100] ss:$32 sm:$0x40]  ;;  %v3324_v63 = vor.u32 %v3323_v3, %v3322_v48  ;;  %v3284_v13 = vor.u32 %v3283_v6, %v3282_v1 }
 0x4c2   : > { %v7996_v37 = vld [vmem:[#allocation4 + $0x101] ss:$32 sm:$0x80]  ;;  %v3275_v35 = vld [vmem:[#allocation4 + $0x2] ss:$32 sm:$0x80]  ;;  %v3202_v39 = vor.u32 %v3201_v52, %v3200_v17 }
 0x4c3   : > { %v3285_v41 = vld [vmem:[#allocation4 + $0x102] ss:$32 sm:$0x10]  ;;  %v3350_v22 = vld [vmem:[#allocation4 + $0x4] ss:$32 sm:$0x1]  ;;  %v3326_v25 = vor.u32 %v3325_v21, %v3324_v63  ;;  %v3248_v23 = vor.u32 %v7996_v37, %v3246_v11  ;;  %v3276_v15 = vor.u32 %v3275_v35, %v3274_v20 }
 0x4c4   : > { %v3327_v26 = vld [vmem:[#allocation4 + $0x103] ss:$32 sm:$0x8]  ;;  %v3353_v8 = vld [vmem:[#allocation4 + $0x4] ss:$32 sm:$0x4]  ;;  %v3352_v58 = vor.u32 %v3351_v38, %v3350_v22  ;;  %v3286_v32 = vor.u32 %v3285_v41, %v3284_v13  ;;  %v3259_v38 = vadd.f32 %v3257_v30, %v3213_v9  ;;  %v8009_v13 = vpop.permute.xlu1 %3430 }
 0x4c5   : > { %v3395_v49 = vld [vmem:[#allocation4 + $0x5] ss:$32 sm:$0x2]  ;;  %v3203_v27 = vld [vmem:[#allocation4 + $0x100] ss:$32 sm:$0x80]  ;;  %v3328_v7 = vor.u32 %v3327_v26, %v3326_v25  ;;  %v3301_v34 = vmul.f32 %v7971_v42, %v3276_v15 }
 0x4c6   : > { %v3287_v4 = vld [vmem:[#allocation4 + $0x102] ss:$32 sm:$0x20]  ;;  %v3355_v60 = vld [vmem:[#allocation4 + $0x4] ss:$32 sm:$0x8]  ;;  %v3354_v36 = vor.u32 %v3353_v8, %v3352_v58  ;;  %v3204_v56 = vor.u32 %v3203_v27, %v3202_v39  ;;  %v3258_v58 = vmul.f32 %v7985_v40, %v3248_v23 }
 0x4c7   : > { %v3394_v44 = vld [vmem:[#allocation4 + $0x5] ss:$32 sm:$0x1]  ;;  %v3329_v53 = vld [vmem:[#allocation4 + $0x103] ss:$32 sm:$0x10]  ;;  %v3288_v52 = vor.u32 %v3287_v4, %v3286_v32 }
 0x4c8   : > { %v3397_v24 = vld [vmem:[#allocation4 + $0x5] ss:$32 sm:$0x4]  ;;  %v3367_v43 = vld [vmem:[#allocation4 + $0x104] ss:$32 sm:$0x2]  ;;  %v3396_v16 = vor.u32 %v3395_v49, %v3394_v44  ;;  %v3356_v57 = vor.u32 %v3355_v60, %v3354_v36  ;;  %v3330_v18 = vor.u32 %v3329_v53, %v3328_v7  ;;  %v3214_v63 = vmul.f32 %v7958_v50, %v3204_v56 }
 0x4c9   : > { %v3289_v62 = vld [vmem:[#allocation4 + $0x102] ss:$32 sm:$0x40]  ;;  %v3357_v28 = vld [vmem:[#allocation4 + $0x4] ss:$32 sm:$0x10]  ;;  %v3303_v36 = vadd.f32 %v3301_v34, %v3259_v38 }
 0x4ca   : > { %v3399_v5 = vld [vmem:[#allocation4 + $0x5] ss:$32 sm:$0x8]  ;;  %v3331_v12 = vld [vmem:[#allocation4 + $0x103] ss:$32 sm:$0x20]  ;;  %v3398_v19 = vor.u32 %v3397_v24, %v3396_v16  ;;  %v3358_v14 = vor.u32 %v3357_v28, %v3356_v57  ;;  %v3290_v9 = vor.u32 %v3289_v62, %v3288_v52 }
 0x4cb   : > { %v3359_v59 = vld [vmem:[#allocation4 + $0x4] ss:$32 sm:$0x20]  ;;  %v3401_v33 = vld [vmem:[#allocation4 + $0x5] ss:$32 sm:$0x10]  ;;  %v3332_v17 = vor.u32 %v3331_v12, %v3330_v18 }
 0x4cc   : > { %v3366_v31 = vld [vmem:[#allocation4 + $0x104] ss:$32 sm:$0x1]  ;;  %v3291_v3 = vld [vmem:[#allocation4 + $0x102] ss:$32 sm:$0x80]  ;;  %v3400_v1 = vor.u32 %v3399_v5, %v3398_v19  ;;  %v3360_v11 = vor.u32 %v3359_v59, %v3358_v14 }
 0x4cd   : > { %v3369_v6 = vld [vmem:[#allocation4 + $0x104] ss:$32 sm:$0x4]  ;;  %v3368_v61 = vor.u32 %v3367_v43, %v3366_v31  ;;  %v3411_v21 = vld [vmem:[#allocation4 + $0x105] ss:$32 sm:$0x2]  ;;  %v3292_v50 = vor.u32 %v3291_v3, %v3290_v9 }
 0x4ce   : > { %v3371_v48 = vld [vmem:[#allocation4 + $0x104] ss:$32 sm:$0x8]  ;;  %v3333_v37 = vld [vmem:[#allocation4 + $0x103] ss:$32 sm:$0x40]  ;;  %v3402_v20 = vor.u32 %v3401_v33, %v3400_v1 }
 0x4cf   : > { %v3361_v35 = vld [vmem:[#allocation4 + $0x4] ss:$32 sm:$0x40]  ;;  %v3403_v41 = vld [vmem:[#allocation4 + $0x5] ss:$32 sm:$0x20]  ;;  %v3370_v8 = vor.u32 %v3369_v6, %v3368_v61  ;;  %v3334_v23 = vor.u32 %v3333_v37, %v3332_v17  ;;  %v3302_v31 = vmul.f32 %v7982_v0, %v3292_v50 }
 0x4d0   : > { %v3373_v22 = vld [vmem:[#allocation4 + $0x104] ss:$32 sm:$0x10]  ;;  %v3410_v54 = vld [vmem:[#allocation4 + $0x105] ss:$32 sm:$0x1]  ;;  %v3362_v15 = vor.u32 %v3361_v35, %v3360_v11  ;;  %v3404_v32 = vor.u32 %v3403_v41, %v3402_v20  ;;  %v3387_v35 = vpop.permute.xlu0 %3386  ;;  %v3347_v20 = vadd.f32 %v7994_v29, %v3303_v36 }
 0x4d1   : > { %v3413_v26 = vld [vmem:[#allocation4 + $0x105] ss:$32 sm:$0x4]  ;;  %v3455_v49 = vld [vmem:[#allocation4 + $0x106] ss:$32 sm:$0x2]  ;;  %v3412_v60 = vor.u32 %v3411_v21, %v3410_v54  ;;  %v3372_v53 = vor.u32 %v3371_v48, %v3370_v8 }
 0x4d2   : > { %v3335_v30 = vld [vmem:[#allocation4 + $0x103] ss:$32 sm:$0x80]  ;;  %v3363_v27 = vld [vmem:[#allocation4 + $0x4] ss:$32 sm:$0x80] }
 0x4d3   : > { %v3405_v42 = vld [vmem:[#allocation4 + $0x5] ss:$32 sm:$0x40]  ;;  %v3375_v4 = vld [vmem:[#allocation4 + $0x104] ss:$32 sm:$0x20]  ;;  %v3414_v62 = vor.u32 %v3413_v26, %v3412_v60  ;;  %v3374_v12 = vor.u32 %v3373_v22, %v3372_v53  ;;  %v3336_v48 = vor.u32 %v3335_v30, %v3334_v23  ;;  %v3364_v21 = vor.u32 %v3363_v27, %v3362_v15  ;;  %v3475_v30 = vpop.permute.xlu1 %3474 }
 0x4d4   : > { %v3415_v44 = vld [vmem:[#allocation4 + $0x105] ss:$32 sm:$0x8]  ;;  %v3454_v43 = vld [vmem:[#allocation4 + $0x106] ss:$32 sm:$0x1]  ;;  %v3406_v38 = vor.u32 %v3405_v42, %v3404_v32  ;;  %v3260_v22 = vadd.f32 %v3258_v58, %v3214_v63  ;;  %v3471_v29 = vpop.permute.xlu0 %3470 }
 0x4d5   : > { %v3417_v24 = vld [vmem:[#allocation4 + $0x105] ss:$32 sm:$0x10]  ;;  %v3457_v25 = vld [vmem:[#allocation4 + $0x106] ss:$32 sm:$0x4]  ;;  %v3456_v16 = vor.u32 %v3455_v49, %v3454_v43  ;;  %v3416_v7 = vor.u32 %v3415_v44, %v3414_v62  ;;  %v3376_v56 = vor.u32 %v3375_v4, %v3374_v12  ;;  %v3346_v8 = vmul.f32 %v7987_v47, %v3336_v48 }
 0x4d6   : > { %v3407_v28 = vld [vmem:[#allocation4 + $0x5] ss:$32 sm:$0x80]  ;;  %v3377_v40 = vld [vmem:[#allocation4 + $0x104] ss:$32 sm:$0x40]  ;;  %v3389_v26 = vmul.f32 %v7989_v51, %v3364_v21  ;;  %v3304_v58 = vadd.f32 %v3302_v31, %v3260_v22 }
 0x4d7   : > { %v3459_v5 = vld [vmem:[#allocation4 + $0x106] ss:$32 sm:$0x8]  ;;  %v3482_v39 = vld [vmem:[#allocation4 + $0x7] ss:$32 sm:$0x1]  ;;  %v3458_v19 = vor.u32 %v3457_v25, %v3456_v16  ;;  %v3418_v54 = vor.u32 %v3417_v24, %v3416_v7  ;;  %v3408_v49 = vor.u32 %v3407_v28, %v3406_v38  ;;  %v3378_v9 = vor.u32 %v3377_v40, %v3376_v56 }
 0x4d8   : > { %v3483_v59 = vld [vmem:[#allocation4 + $0x7] ss:$32 sm:$0x2]  ;;  %v3379_v6 = vld [vmem:[#allocation4 + $0x104] ss:$32 sm:$0x80] }
 0x4d9   : > { %v3485_v33 = vld [vmem:[#allocation4 + $0x7] ss:$32 sm:$0x4]  ;;  %v3419_v57 = vld [vmem:[#allocation4 + $0x105] ss:$32 sm:$0x20]  ;;  %v3484_v3 = vor.u32 %v3483_v59, %v3482_v39  ;;  %v3460_v18 = vor.u32 %v3459_v5, %v3458_v19  ;;  %v3433_v53 = vmul.f32 %v8003_v10, %v3408_v49  ;;  %v3380_v24 = vor.u32 %v3379_v6, %v3378_v9  ;;  %v3515_v6 = vpop.permute.xlu1 %3514 }
 0x4da   : > { %v3461_v61 = vld [vmem:[#allocation4 + $0x106] ss:$32 sm:$0x10]  ;;  %v3421_v34 = vld [vmem:[#allocation4 + $0x105] ss:$32 sm:$0x40]  ;;  %v3420_v4 = vor.u32 %v3419_v57, %v3418_v54  ;;  %v3348_v5 = vadd.f32 %v3346_v8, %v3304_v58  ;;  %v3391_v39 = vadd.f32 %v3389_v26, %v3347_v20 }
 0x4db   : > { %v3463_v52 = vld [vmem:[#allocation4 + $0x106] ss:$32 sm:$0x20]  ;;  %v3487_v37 = vld [vmem:[#allocation4 + $0x7] ss:$32 sm:$0x8]  ;;  %v3486_v14 = vor.u32 %v3485_v33, %v3484_v3  ;;  %v3462_v44 = vor.u32 %v3461_v61, %v3460_v18  ;;  %v3390_v31 = vmul.f32 %v3387_v35, %v3380_v24 }
 0x4dc   : > { %v3449_v41 = vld [vmem:[#allocation4 + $0x6] ss:$32 sm:$0x40]  ;;  %v3489_v0 = vld [vmem:[#allocation4 + $0x7] ss:$32 sm:$0x10]  ;;  %v3422_v25 = vor.u32 %v3421_v34, %v3420_v4  ;;  %v3435_v33 = vadd.f32 %v3433_v53, %v3391_v39 }
 0x4dd   : > { %v3498_v1 = vld [vmem:[#allocation4 + $0x107] ss:$32 sm:$0x1]  ;;  %v3423_v60 = vld [vmem:[#allocation4 + $0x105] ss:$32 sm:$0x80]  ;;  %v3488_v11 = vor.u32 %v3487_v37, %v3486_v14  ;;  %v3464_v50 = vor.u32 %v3463_v52, %v3462_v44  ;;  %v3450_v16 = vor.u32 %v3449_v41, %v3448_v2  ;;  %v3392_v48 = vadd.f32 %v3390_v31, %v3348_v5  ;;  %v4669_v35 = vpop.permute.xlu1 %4668 }
 0x4de   : > { %v3499_v27 = vld [vmem:[#allocation4 + $0x107] ss:$32 sm:$0x2]  ;;  %v3465_v17 = vld [vmem:[#allocation4 + $0x106] ss:$32 sm:$0x40]  ;;  %v3424_v36 = vor.u32 %v3423_v60, %v3422_v25 }
 0x4df   : > { %v3501_v42 = vld [vmem:[#allocation4 + $0x107] ss:$32 sm:$0x4]  ;;  %v3500_v63 = vor.u32 %v3499_v27, %v3498_v1  ;;  %v3451_v51 = vld [vmem:[#allocation4 + $0x6] ss:$32 sm:$0x80]  ;;  %v3490_v40 = vor.u32 %v3489_v0, %v3488_v11  ;;  %v3466_v10 = vor.u32 %v3465_v17, %v3464_v50  ;;  %v3519_v1 = vpop.permute.xlu0 %3518 }
 0x4e0   : > { %v3491_v47 = vld [vmem:[#allocation4 + $0x7] ss:$32 sm:$0x20]  ;;  %v3467_v28 = vld [vmem:[#allocation4 + $0x106] ss:$32 sm:$0x80]  ;;  %v3452_v59 = vor.u32 %v3451_v51, %v3450_v16  ;;  %v3434_v19 = vmul.f32 %v8009_v13, %v3424_v36 }
 0x4e1   : > { %v3503_v43 = vld [vmem:[#allocation4 + $0x107] ss:$32 sm:$0x8]  ;;  %v3502_v62 = vor.u32 %v3501_v42, %v3500_v63  ;;  %v3492_v32 = vor.u32 %v3491_v47, %v3490_v40  ;;  %v3468_v61 = vor.u32 %v3467_v28, %v3466_v10  ;;  %v8279_v14 = vld [vmem:[#allocation8_spill] sm:$0xff]  ;;  %v4671_v42 = vpop.permute.xlu1 %4670 }
 0x4e2   : > { %v3493_v23 = vld [vmem:[#allocation4 + $0x7] ss:$32 sm:$0x40]  ;;  %v3477_v2 = vmul.f32 %v3471_v29, %v3452_v59  ;;  %v3436_v52 = vadd.f32 %v3434_v19, %v3392_v48  ;;  %v4588_v13 = vmul.f32 %v7965_v46, %v8279_v14 }
 0x4e3   : > { %v3505_v15 = vld [vmem:[#allocation4 + $0x107] ss:$32 sm:$0x10]  ;;  %v3504_v12 = vor.u32 %v3503_v43, %v3502_v62  ;;  %v3494_v45 = vor.u32 %v3493_v23, %v3492_v32  ;;  %v3478_v21 = vmul.f32 %v3475_v30, %v3468_v61 }
 0x4e4   : > { %v3495_v7 = vld [vmem:[#allocation4 + $0x7] ss:$32 sm:$0x80]  ;;  %v3479_v37 = vadd.f32 %v3477_v2, %v3435_v33 }
 0x4e5   : > { %v3507_v57 = vld [vmem:[#allocation4 + $0x107] ss:$32 sm:$0x20]  ;;  %v3506_v55 = vor.u32 %v3505_v15, %v3504_v12  ;;  %v3496_v38 = vor.u32 %v3495_v7, %v3494_v45  ;;  %v3480_v54 = vadd.f32 %v3478_v21, %v3436_v52 }
 0x4e6   : > { %v3509_v3 = vld [vmem:[#allocation4 + $0x107] ss:$32 sm:$0x40] }
 0x4e7   : > { %v3508_v56 = vor.u32 %v3507_v57, %v3506_v55  ;;  %v3511_v34 = vld [vmem:[#allocation4 + $0x107] ss:$32 sm:$0x80]  ;;  %v3521_v41 = vmul.f32 %v3515_v6, %v3496_v38 }
 0x4e8   : > { %v8280_v9 = vld [vmem:[#allocation9_spill] sm:$0xff] }
 0x4e9   : > { %v3510_v22 = vor.u32 %v3509_v3, %v3508_v56  ;;  %v3523_v18 = vadd.f32 %v3521_v41, %v3479_v37  ;;  %v4589_v30 = vmul.f32 %v7965_v46, %v8280_v9 }
 0x4eb   : > { %v3512_v0 = vor.u32 %v3511_v34, %v3510_v22  ;;  %v4596_v8 = vadd.f32 %v4588_v13, %v3523_v18 }
 0x4ed   : > { %v3522_v26 = vmul.f32 %v3519_v1, %v3512_v0  ;;  %v4692_v49 = vmul.f32 %v4669_v35, %v4596_v8 }
 0x4ef   : > { %v3524_v27 = vadd.f32 %v3522_v26, %v3480_v54  ;;  %5224 = vmatprep.mubr.msk.f32.mxu0 %vm941_vm1, %v4692_v49 }
 0x4f1   : > { %v4597_v4 = vadd.f32 %v4589_v30, %v3524_v27 }
 0x4f3   : > { %v4693_v60 = vmul.f32 %v4671_v42, %v4597_v4 }
 0x4f5   : > { %5225 = vmatmul.mubr.msk.f32.vlgmr.msra.gmra.mxu0 %vm941_vm1, %v4693_v60 }
 0x556   : > { %v5229_v44 = vpop.f32.mrf.mxu1 }
 0x557   : > { %4841 = vrot.lane.b32.xlu1 %v5229_v44, %s5646_s12 }
 0x558   : > { %v4808_v17 = vpop.f32.mrf.mxu1 }
 0x559   : > { %4839 = vrot.lane.b32.xlu0 %v4808_v17, %s5646_s12 }
 0x56e   : > { %v5232_v11 = vpop.f32.mrf.mxu1 }
 0x56f   : > { %4849 = vrot.lane.b32.xlu1 %v5232_v11, %s5645_s29 }
 0x570   : > { %v4818_v63 = vpop.f32.mrf.mxu1 }
 0x571   : > { %4847 = vrot.lane.b32.xlu0 %v4818_v63, %s5645_s29 }
 0x572   : > { %v5235_v46 = vpop.f32.mrf.mxu1 }
 0x573   : > { %4857 = vrot.lane.b32.xlu1 %v5235_v46, %s5647_s15 }
 0x574   : > { %v4828_v58 = vpop.f32.mrf.mxu1 }
 0x575   : > { %4855 = vrot.lane.b32.xlu0 %v4828_v58, %s5647_s15 }
 0x5b5   : > { %v5226_v24 = vpop.f32.mrf.mxu0 }
 0x5b7   : > { %v4798_v25 = vpop.f32.mrf.mxu0 }
 0x5c9   : > { %v4842_v20 = vpop.permute.xlu1 %4841 }
 0x5ca   : > { %v4862_v51 = vsel %vm488_vm0, %v5226_v24, %v4842_v20 }
 0x5cb   : > { %v4840_v53 = vpop.permute.xlu0 %4839 }
 0x5cc   : > { %v4861_v40 = vsel %vm488_vm0, %v4798_v25, %v4840_v53 }
 0x5e1   : > { %v4850_v47 = vpop.permute.xlu1 %4849 }
 0x5e2   : > { %v4864_v50 = vsel %vm941_vm1, %v4862_v51, %v4850_v47 }
 0x5e3   : > { %v4848_v43 = vpop.permute.xlu0 %4847 }
 0x5e4   : > { %v4863_v16 = vsel %vm941_vm1, %v4861_v40, %v4848_v43 }
 0x5e5   : > { %v4858_v28 = vpop.permute.xlu1 %4857 }
 0x5e6   : > { %v4867_v62 = vsel %vm4865_vm2, %v4864_v50, %v4858_v28 }
 0x5e7   : > { %4869 = vst [vmem:[%s475_s19 + $0x8] sm:$0xff] %v4867_v62  ;;  %v4856_v5 = vpop.permute.xlu0 %4855 }
 0x5e8   : > { %v4866_v39 = vsel %vm4865_vm2, %v4863_v16, %v4856_v5 }
 0x5e9   : > { %4868 = vst [vmem:[%s475_s19] sm:$0xff] %v4866_v39 }
 0x5ea PF: > { %s20_s13 = sadd.s32 1, %s5627_s13  }
 0x5eb   : > { %p17_p4 = scmp.ge.s32.totalorder %s20_s13, 4  }
 0x5ed   :  { %19 = sbr.rel (!%p17_p4) target bundleno = 1 (0x1), region = 315 }

</bundles_post_ra>
